<compile_context>
chip_gen: v7x
topology: tpu7x:2x2x1
jax: 0.10.0
libtpu: 0.0.40
codegen_flags: <defaults>
</compile_context>

<pallas_src>
import functools

import numpy as np
import jax
import jax.numpy as jnp
from jax.experimental import pallas as pl
from jax.experimental.pallas import tpu as pltpu

# ----------------------------- cfg constants (py-faster-rcnn defaults) ----------
RPN_POSITIVE_OVERLAP = 0.7
RPN_NEGATIVE_OVERLAP = 0.3
RPN_FG_FRACTION = 0.5
RPN_BATCHSIZE = 256
RPN_BBOX_INSIDE_WEIGHT = 1.0       # cfg.TRAIN.RPN_BBOX_INSIDE_WEIGHTS[0]
RPN_POSITIVE_WEIGHT = -1.0
RPN_CLOBBER_POSITIVES = False

MAX_TILE_N = 2048                  # anchor-tile lane width (multiple of 128)


# ----------------------------- generate_anchors (numpy, parameter setup) --------
def _whctrs(anchor):
    w = anchor[2] - anchor[0] + 1
    h = anchor[3] - anchor[1] + 1
    x_ctr = anchor[0] + 0.5 * (w - 1)
    y_ctr = anchor[1] + 0.5 * (h - 1)
    return w, h, x_ctr, y_ctr


def _mkanchors(ws, hs, x_ctr, y_ctr):
    ws = ws[:, np.newaxis]
    hs = hs[:, np.newaxis]
    return np.hstack((x_ctr - 0.5 * (ws - 1), y_ctr - 0.5 * (hs - 1),
                      x_ctr + 0.5 * (ws - 1), y_ctr + 0.5 * (hs - 1)))


def _ratio_enum(anchor, ratios):
    w, h, x_ctr, y_ctr = _whctrs(anchor)
    size = w * h
    size_ratios = size / ratios
    ws = np.round(np.sqrt(size_ratios))
    hs = np.round(ws * ratios)
    return _mkanchors(ws, hs, x_ctr, y_ctr)


def _scale_enum(anchor, scales):
    w, h, x_ctr, y_ctr = _whctrs(anchor)
    ws = w * scales
    hs = h * scales
    return _mkanchors(ws, hs, x_ctr, y_ctr)


def generate_anchors(base_size=16, ratios=(0.5, 1, 2), scales=2 ** np.arange(3, 6)):
    base_anchor = np.array([1, 1, base_size, base_size], dtype=np.float64) - 1
    ratio_anchors = _ratio_enum(base_anchor, np.array(ratios, dtype=np.float64))
    anchors = np.vstack([_scale_enum(ratio_anchors[i, :], np.array(scales, dtype=np.float64))
                         for i in range(ratio_anchors.shape[0])])
    return anchors


# ----------------------------- shared in-kernel IoU helper -----------------------
def _iou_tile(anchors_ref, gt_ref):
    """IoU of one anchor tile (4, TN) against the batch's gt boxes (Gp, 5)."""
    ax1 = anchors_ref[0:1, :]
    ay1 = anchors_ref[1:2, :]
    ax2 = anchors_ref[2:3, :]
    ay2 = anchors_ref[3:4, :]

    gt = gt_ref[0]                                     # (Gp, 5)
    gx1 = gt[:, 0:1]
    gy1 = gt[:, 1:2]
    gx2 = gt[:, 2:3]
    gy2 = gt[:, 3:4]

    gt_w = gx2 - gx1 + 1.0
    gt_h = gy2 - gy1 + 1.0
    a_w = ax2 - ax1 + 1.0
    a_h = ay2 - ay1 + 1.0
    gt_area = gt_w * gt_h                              # (Gp, 1)
    a_area = a_w * a_h                                 # (1, TN)

    gt_zero = jnp.logical_and(gt_w == 1.0, gt_h == 1.0)   # padded / zero-area gts
    a_zero = jnp.logical_and(a_w == 1.0, a_h == 1.0)      # zero-area anchors

    iw = jnp.maximum(jnp.minimum(ax2, gx2) - jnp.maximum(ax1, gx1) + 1.0, 0.0)
    ih = jnp.maximum(jnp.minimum(ay2, gy2) - jnp.maximum(ay1, gy1) + 1.0, 0.0)
    inter = iw * ih                                    # (Gp, TN)
    ua = a_area + gt_area - inter
    # exact reciprocal; routes the big (Gp, TN) divide off the VALU
    ov = inter * pl.reciprocal(ua)
    ov = jnp.where(gt_zero, 0.0, ov)
    ov = jnp.where(a_zero, -1.0, ov)
    return ov, (ax1, ay1, a_w, a_h)


# ----------------------------- Pallas kernel 1: per-gt max over inside anchors ---
def _gtmax_kernel(inside_ref, anchors_ref, gt_ref, gtmax_ref):
    @pl.when(pl.program_id(1) == 0)
    def _():
        gtmax_ref[...] = jnp.zeros_like(gtmax_ref)

    ins = inside_ref[...] > 0.5                        # (1, TN)
    ov, _ = _iou_tile(anchors_ref, gt_ref)             # (Gp, TN)
    ov_inside = jnp.where(ins, ov, 0.0)
    tile_max = jnp.max(ov_inside, axis=1, keepdims=True)   # (Gp, 1)
    gtmax_ref[0] = jnp.maximum(gtmax_ref[0], tile_max)


# ----------------------------- Pallas kernel 2: labels + bbox targets ------------
def _labels_targets_kernel(inside_ref, anchors_ref, gt_ref, gt4t_ref, gtmax_ref,
                           labels_ref, tgt_ref):
    Gp = gt_ref.shape[1]
    ins = inside_ref[...] > 0.5                        # (1, TN)
    ov, (ax1, ay1, a_w, a_h) = _iou_tile(anchors_ref, gt_ref)

    # per-anchor max / argmax over gts (within the tile: reduction is over Gp)
    max_ov = jnp.max(ov, axis=0, keepdims=True)        # (1, TN)
    g_iota = jax.lax.broadcasted_iota(jnp.int32, ov.shape, 0)
    argmax = jnp.min(jnp.where(ov == max_ov, g_iota, Gp), axis=0, keepdims=True)

    # per-gt max over ALL inside anchors (from the pre-pass kernel)
    gt_max = gtmax_ref[0]                              # (Gp, 1)
    gt_max = jnp.where(gt_max == 0.0, 1e-5, gt_max)
    keep = jnp.sum((ov == gt_max).astype(jnp.float32), axis=0, keepdims=True)

    # label assignment (before fg/bg subsampling)
    labels = jnp.full(max_ov.shape, -1.0, dtype=jnp.float32)
    if not RPN_CLOBBER_POSITIVES:
        labels = jnp.where(max_ov < RPN_NEGATIVE_OVERLAP, 0.0, labels)
    labels = jnp.where(keep > 0.0, 1.0, labels)
    labels = jnp.where(max_ov >= RPN_POSITIVE_OVERLAP, 1.0, labels)
    if RPN_CLOBBER_POSITIVES:
        labels = jnp.where(max_ov < RPN_NEGATIVE_OVERLAP, 0.0, labels)
    labels_ref[0] = jnp.where(ins, labels, -1.0)       # _unmap(..., fill=-1)

    # argmax-gt coordinate select as one MXU matmul (f32 operands kept exact)
    one_hot = (g_iota == argmax).astype(jnp.float32)   # (Gp, TN)
    sel = jnp.dot(gt4t_ref[0], one_hot,
                  preferred_element_type=jnp.float32)  # (4, Gp) @ (Gp, TN) -> (4, TN)
    sel_x1 = sel[0:1, :]
    sel_y1 = sel[1:2, :]
    sel_x2 = sel[2:3, :]
    sel_y2 = sel[3:4, :]

    g_w = sel_x2 - sel_x1 + 1.0
    g_h = sel_y2 - sel_y1 + 1.0
    g_cx = sel_x1 + 0.5 * g_w
    g_cy = sel_y1 + 0.5 * g_h
    a_cx = ax1 + 0.5 * a_w
    a_cy = ay1 + 0.5 * a_h
    inv_aw = pl.reciprocal(a_w)
    inv_ah = pl.reciprocal(a_h)
    dx = (g_cx - a_cx) * inv_aw
    dy = (g_cy - a_cy) * inv_ah
    dw = jnp.log(g_w * inv_aw)
    dh = jnp.log(g_h * inv_ah)

    tgt = jnp.concatenate([dx, dy, dw, dh], axis=0)    # (4, TN)
    tgt_ref[0] = jnp.where(ins, tgt, 0.0)              # single fused masked store


# ----------------------------- host-side (cached) anchor setup -------------------
@functools.lru_cache(maxsize=None)
def _anchor_setup(H, W, feat_stride, scales, ratios, im_h, im_w):
    base_anchors = generate_anchors(scales=np.array(scales),
                                    ratios=np.array(ratios)).astype(np.float32)
    A = base_anchors.shape[0]
    shift_x = np.arange(0, W) * feat_stride
    shift_y = np.arange(0, H) * feat_stride
    sx, sy = np.meshgrid(shift_x, shift_y)
    shifts = np.vstack((sx.ravel(), sy.ravel(), sx.ravel(), sy.ravel())).T.astype(np.float32)
    K = shifts.shape[0]
    all_anchors = (base_anchors[None, :, :] + shifts[:, None, :]).reshape(K * A, 4)
    total = K * A

    allowed_border = 0
    img_w = float(int(im_w))
    img_h = float(int(im_h))
    keep = ((all_anchors[:, 0] >= -allowed_border) &
            (all_anchors[:, 1] >= -allowed_border) &
            (all_anchors[:, 2] < img_w + allowed_border) &
            (all_anchors[:, 3] < img_h + allowed_border))

    np128 = int(np.ceil(total / 128.0)) * 128
    TN = min(MAX_TILE_N, np128)
    Np = int(np.ceil(total / TN)) * TN                 # multiple of TN (and of 128)

    anchors_pad = np.tile(np.array([0., 0., 15., 15.], np.float32), (Np, 1))
    anchors_pad[:total] = all_anchors
    inside_pad = np.zeros((1, Np), np.float32)
    inside_pad[0, :total] = keep.astype(np.float32)

    anchors_t = jnp.asarray(anchors_pad.T)             # (4, Np), device-resident, cached
    inside_j = jnp.asarray(inside_pad)                 # (1, Np)
    return anchors_t, inside_j, A, total, TN


# ----------------------------- fg/bg subsampling (vmapped, top_k thresholds) -----
def _subsample_one(lab, key):
    # TODO(synk): reference uses np.random.permutation; here a seeded jax.random
    # priority + top_k threshold picks a uniform random subset of the same size
    # (RNG stream differs from the reference).
    Np = lab.shape[0]
    num_fg_max = int(RPN_FG_FRACTION * RPN_BATCHSIZE)
    kf, kb = jax.random.split(key)

    fg = lab == 1.0
    sum_fg = jnp.sum(fg.astype(jnp.int32))
    prio_f = jnp.where(fg, jax.random.uniform(kf, (Np,)), -jnp.inf)
    top_f, _ = jax.lax.top_k(prio_f, num_fg_max)
    thr_f = top_f[num_fg_max - 1]
    lab = jnp.where(fg & (prio_f < thr_f) & (sum_fg > num_fg_max), -1.0, lab)

    num_bg = RPN_BATCHSIZE - jnp.sum((lab == 1.0).astype(jnp.int32))
    bg = lab == 0.0
    sum_bg = jnp.sum(bg.astype(jnp.int32))
    prio_b = jnp.where(bg, jax.random.uniform(kb, (Np,)), -jnp.inf)
    top_b, _ = jax.lax.top_k(prio_b, RPN_BATCHSIZE)
    thr_b = jnp.take(top_b, jnp.clip(num_bg - 1, 0, RPN_BATCHSIZE - 1))
    lab = jnp.where(bg & (prio_b < thr_b) & (sum_bg > num_bg), -1.0, lab)
    return lab


# ----------------------------- jittable core --------------------------------------
@functools.partial(jax.jit, static_argnames=("H", "W", "A", "total", "TN"))
def _anchor_target_core(gt_boxes, anchors_t, inside_j, key, *, H, W, A, total, TN):
    B, G = gt_boxes.shape[0], gt_boxes.shape[1]
    Np = anchors_t.shape[1]
    NT = Np // TN
    Gp = int(np.ceil(max(G, 8) / 8.0)) * 8

    gt_pad = jnp.zeros((B, Gp, 5), jnp.float32).at[:, :G, :].set(gt_boxes.astype(jnp.float32))
    gt4_t = jnp.transpose(gt_pad[:, :, 0:4], (0, 2, 1))          # (B, 4, Gp), coord-major

    # kernel 1: per-gt max overlap over all inside anchors (tile-accumulated)
    gtmax = pl.pallas_call(
        _gtmax_kernel,
        out_shape=jax.ShapeDtypeStruct((B, Gp, 1), jnp.float32),
        grid=(B, NT),
        in_specs=[pl.BlockSpec((1, TN), lambda b, t: (0, t)),
                  pl.BlockSpec((4, TN), lambda b, t: (0, t)),
                  pl.BlockSpec((1, Gp, 5), lambda b, t: (b, 0, 0))],
        out_specs=pl.BlockSpec((1, Gp, 1), lambda b, t: (b, 0, 0)),
        compiler_params=pltpu.CompilerParams(
            dimension_semantics=("parallel", "arbitrary")),
    )(inside_j, anchors_t, gt_pad)

    # kernel 2: labels + bbox targets, fully parallel over (batch, anchor tile)
    labels_pre, targets_t = pl.pallas_call(
        _labels_targets_kernel,
        out_shape=(jax.ShapeDtypeStruct((B, 1, Np), jnp.float32),
                   jax.ShapeDtypeStruct((B, 4, Np), jnp.float32)),
        grid=(B, NT),
        in_specs=[pl.BlockSpec((1, TN), lambda b, t: (0, t)),
                  pl.BlockSpec((4, TN), lambda b, t: (0, t)),
                  pl.BlockSpec((1, Gp, 5), lambda b, t: (b, 0, 0)),
                  pl.BlockSpec((1, 4, Gp), lambda b, t: (b, 0, 0)),
                  pl.BlockSpec((1, Gp, 1), lambda b, t: (b, 0, 0))],
        out_specs=(pl.BlockSpec((1, 1, TN), lambda b, t: (b, 0, t)),
                   pl.BlockSpec((1, 4, TN), lambda b, t: (b, 0, t))),
        compiler_params=pltpu.CompilerParams(
            dimension_semantics=("parallel", "parallel")),
    )(inside_j, anchors_t, gt_pad, gt4_t, gtmax)
    labels_pre = labels_pre[:, 0, :]                   # (B, Np)

    # fg/bg subsampling (vmapped over batch)
    labels_final = jax.vmap(_subsample_one)(labels_pre, jax.random.split(key, B))

    # weights in plain jnp (XLA fuses with the broadcast/reshape epilogue below)
    assert RPN_POSITIVE_WEIGHT < 0
    # reference bug reproduced: uses loop variable i == batch_size - 1
    num_examples = jnp.sum((labels_final[B - 1] >= 0).astype(jnp.float32))
    pos_w = 1.0 / num_examples
    neg_w = pos_w
    is_fg = labels_final == 1.0
    is_bg = labels_final == 0.0
    bin_w = jnp.where(is_fg, RPN_BBOX_INSIDE_WEIGHT, 0.0).astype(jnp.float32)   # (B, Np)
    bout_w = jnp.where(is_fg, pos_w, jnp.where(is_bg, neg_w, 0.0)).astype(jnp.float32)

    # final reshapes to PyTorch NCHW outputs
    labels_out = (labels_final[:, :total].reshape(B, H, W, A)
                  .transpose(0, 3, 1, 2).reshape(B, 1, A * H, W))
    tgt = jnp.transpose(targets_t, (0, 2, 1))[:, :total, :]                      # (B, total, 4)
    bbox_targets_out = tgt.reshape(B, H, W, A * 4).transpose(0, 3, 1, 2)
    biw = jnp.broadcast_to(bin_w[:, :total, None], (B, total, 4))
    bbox_inside_out = biw.reshape(B, H, W, 4 * A).transpose(0, 3, 1, 2)
    bow = jnp.broadcast_to(bout_w[:, :total, None], (B, total, 4))
    bbox_outside_out = bow.reshape(B, H, W, 4 * A).transpose(0, 3, 1, 2)
    return labels_out, bbox_targets_out, bbox_inside_out, bbox_outside_out


# ----------------------------- full forward --------------------------------------
def anchor_target_forward(rpn_cls_score, gt_boxes, im_info, num_boxes,
                          feat_stride, scales, ratios, subsample_key):
    del num_boxes  # not used by the reference forward either
    H, W = int(rpn_cls_score.shape[2]), int(rpn_cls_score.shape[3])
    # im_info is consumed host-side (like `long(im_info[0][1])` in the reference);
    # pass it as a host/numpy array to avoid a device->host sync per call.
    im_info_np = np.asarray(im_info)
    anchors_t, inside_j, A, total, TN = _anchor_setup(
        H, W, int(feat_stride),
        tuple(float(s) for s in scales), tuple(float(r) for r in ratios),
        float(im_info_np[0, 0]), float(im_info_np[0, 1]))
    outs = _anchor_target_core(gt_boxes, anchors_t, inside_j, subsample_key,
                               H=H, W=W, A=A, total=total, TN=TN)
    return list(outs)


# ----------------------------- demo ----------------------------------------------
if __name__ == "__main__":
    key = jax.random.PRNGKey(0)
    B, A, H, W = 2, 9, 16, 16
    feat_stride = 16
    scales = [8, 16, 32]
    ratios = [0.5, 1, 2]
    G, n_real = 20, 4

    k0, k1, k2, k3 = jax.random.split(key, 4)
    rpn_cls_score = jax.random.normal(k0, (B, 2 * A, H, W), jnp.float32)  # NCHW

    ctr = jax.random.uniform(k1, (B, n_real, 2), minval=60.0, maxval=196.0)
    wh = jax.random.uniform(k2, (B, n_real, 2), minval=50.0, maxval=160.0)
    x1 = jnp.clip(ctr[..., 0] - wh[..., 0] / 2, 0.0, 255.0)
    y1 = jnp.clip(ctr[..., 1] - wh[..., 1] / 2, 0.0, 255.0)
    x2 = jnp.clip(ctr[..., 0] + wh[..., 0] / 2, 0.0, 255.0)
    y2 = jnp.clip(ctr[..., 1] + wh[..., 1] / 2, 0.0, 255.0)
    cls = jnp.ones((B, n_real), jnp.float32)
    gt_real = jnp.stack([x1, y1, x2, y2, cls], axis=-1)
    gt_boxes = jnp.zeros((B, G, 5), jnp.float32).at[:, :n_real, :].set(gt_real)

    im_info = np.array([[256.0, 256.0, 1.0]] * B, np.float32)   # host-side, no sync
    num_boxes = jnp.full((B,), n_real, jnp.int32)

    outs = anchor_target_forward(rpn_cls_score, gt_boxes, im_info, num_boxes,
                                 feat_stride=feat_stride, scales=scales,
                                 ratios=ratios, subsample_key=k3)
    for o in outs:
        jax.block_until_ready(o)

    assert outs[0].shape == (B, 1, A * H, W)
    assert outs[1].shape == (B, 4 * A, H, W)
    assert outs[2].shape == (B, 4 * A, H, W)
    assert outs[3].shape == (B, 4 * A, H, W)
    print("KERNEL_OK")
</pallas_src>

<mosaic_0001>
module attributes {stable_mosaic.version = 11 : i64} {
  func.func @_gtmax_kernel(%arg0: i32, %arg1: i32, %arg2: memref<1x2048xf32, #tpu.memory_space<vmem>>, %arg3: memref<4x2048xf32, #tpu.memory_space<vmem>>, %arg4: memref<1x24x5xf32, #tpu.memory_space<vmem>>, %arg5: memref<1x24x1xf32, #tpu.memory_space<vmem>>) attributes {dimension_semantics = [#tpu.dimension_semantics<parallel>, #tpu.dimension_semantics<arbitrary>], iteration_bounds = array<i64: 2, 2>, scalar_prefetch = 0 : i64, scratch_operands = 0 : i64, tpu.core_type = #tpu.core_type<tc>, window_params = [{transform_indices = @transform_0, window_bounds = array<i64: 1, 2048>}, {transform_indices = @transform_1, window_bounds = array<i64: 4, 2048>}, {transform_indices = @transform_2, window_bounds = array<i64: 1, 24, 5>}, {transform_indices = @transform_3, window_bounds = array<i64: 1, 24, 1>}]} {
    %c0_i32 = arith.constant 0 : i32
    %0 = arith.cmpi eq, %arg1, %c0_i32 : i32
    %1 = arith.extui %0 : i1 to i32
    %c0_i32_0 = arith.constant 0 : i32
    %2 = arith.cmpi ne, %1, %c0_i32_0 : i32
    scf.if %2 {
      %cst_32 = arith.constant 0.000000e+00 : f32
      %89 = vector.broadcast %cst_32 : f32 to vector<1x24x1xf32>
      %c0_33 = arith.constant 0 : index
      %c0_34 = arith.constant 0 : index
      %c0_35 = arith.constant 0 : index
      %90 = vector.load %arg5[%c0_33, %c0_34, %c0_35] : memref<1x24x1xf32, #tpu.memory_space<vmem>>, vector<1x24x1xf32>
      tpu.vector_store %arg5[%c0_33, %c0_34, %c0_35], %89 {strides = array<i32>} : memref<1x24x1xf32, #tpu.memory_space<vmem>>, vector<1x24x1xf32>,
    } else {
    }
    %c0 = arith.constant 0 : index
    %c0_1 = arith.constant 0 : index
    %3 = vector.load %arg2[%c0, %c0_1] : memref<1x2048xf32, #tpu.memory_space<vmem>>, vector<1x2048xf32>
    %cst = arith.constant 5.000000e-01 : f32
    %4 = vector.broadcast %cst : f32 to vector<1x2048xf32>
    %5 = arith.cmpf ogt, %3, %4 : vector<1x2048xf32>
    %c0_2 = arith.constant 0 : index
    %c0_3 = arith.constant 0 : index
    %6 = vector.load %arg3[%c0_2, %c0_3] : memref<4x2048xf32, #tpu.memory_space<vmem>>, vector<1x2048xf32>
    %c1 = arith.constant 1 : index
    %c0_4 = arith.constant 0 : index
    %7 = vector.load %arg3[%c1, %c0_4] : memref<4x2048xf32, #tpu.memory_space<vmem>>, vector<1x2048xf32>
    %c2 = arith.constant 2 : index
    %c0_5 = arith.constant 0 : index
    %8 = vector.load %arg3[%c2, %c0_5] : memref<4x2048xf32, #tpu.memory_space<vmem>>, vector<1x2048xf32>
    %c3 = arith.constant 3 : index
    %c0_6 = arith.constant 0 : index
    %9 = vector.load %arg3[%c3, %c0_6] : memref<4x2048xf32, #tpu.memory_space<vmem>>, vector<1x2048xf32>
    %c0_7 = arith.constant 0 : index
    %c0_8 = arith.constant 0 : index
    %c0_9 = arith.constant 0 : index
    %10 = vector.load %arg4[%c0_7, %c0_8, %c0_9] : memref<1x24x5xf32, #tpu.memory_space<vmem>>, vector<1x24x5xf32>
    %11 = vector.shape_cast %10 : vector<1x24x5xf32> to vector<24x5xf32>
    %12 = vector.extract_strided_slice %11 {offsets = [0, 0], sizes = [24, 1], strides = [1, 1]} : vector<24x5xf32> to vector<24x1xf32>
    %13 = vector.extract_strided_slice %11 {offsets = [0, 1], sizes = [24, 1], strides = [1, 1]} : vector<24x5xf32> to vector<24x1xf32>
    %14 = vector.extract_strided_slice %11 {offsets = [0, 2], sizes = [24, 1], strides = [1, 1]} : vector<24x5xf32> to vector<24x1xf32>
    %15 = vector.extract_strided_slice %11 {offsets = [0, 3], sizes = [24, 1], strides = [1, 1]} : vector<24x5xf32> to vector<24x1xf32>
    %16 = arith.subf %14, %12 : vector<24x1xf32>
    %cst_10 = arith.constant 1.000000e+00 : f32
    %17 = vector.broadcast %cst_10 : f32 to vector<24x1xf32>
    %18 = arith.addf %16, %17 : vector<24x1xf32>
    %19 = arith.subf %15, %13 : vector<24x1xf32>
    %cst_11 = arith.constant 1.000000e+00 : f32
    %20 = vector.broadcast %cst_11 : f32 to vector<24x1xf32>
    %21 = arith.addf %19, %20 : vector<24x1xf32>
    %22 = arith.subf %8, %6 : vector<1x2048xf32>
    %cst_12 = arith.constant 1.000000e+00 : f32
    %23 = vector.broadcast %cst_12 : f32 to vector<1x2048xf32>
    %24 = arith.addf %22, %23 : vector<1x2048xf32>
    %25 = arith.subf %9, %7 : vector<1x2048xf32>
    %cst_13 = arith.constant 1.000000e+00 : f32
    %26 = vector.broadcast %cst_13 : f32 to vector<1x2048xf32>
    %27 = arith.addf %25, %26 : vector<1x2048xf32>
    %28 = arith.mulf %18, %21 : vector<24x1xf32>
    %29 = arith.mulf %24, %27 : vector<1x2048xf32>
    %cst_14 = arith.constant 1.000000e+00 : f32
    %30 = vector.broadcast %cst_14 : f32 to vector<24x1xf32>
    %31 = arith.cmpf oeq, %18, %30 : vector<24x1xf32>
    %cst_15 = arith.constant 1.000000e+00 : f32
    %32 = vector.broadcast %cst_15 : f32 to vector<24x1xf32>
    %33 = arith.cmpf oeq, %21, %32 : vector<24x1xf32>
    %34 = arith.andi %31, %33 : vector<24x1xi1>
    %cst_16 = arith.constant 1.000000e+00 : f32
    %35 = vector.broadcast %cst_16 : f32 to vector<1x2048xf32>
    %36 = arith.cmpf oeq, %24, %35 : vector<1x2048xf32>
    %cst_17 = arith.constant 1.000000e+00 : f32
    %37 = vector.broadcast %cst_17 : f32 to vector<1x2048xf32>
    %38 = arith.cmpf oeq, %27, %37 : vector<1x2048xf32>
    %39 = arith.andi %36, %38 : vector<1x2048xi1>
    %40 = vector.broadcast %8 : vector<1x2048xf32> to vector<24x2048xf32>
    %41 = vector.broadcast %14 : vector<24x1xf32> to vector<24x2048xf32>
    %42 = arith.minimumf %40, %41 : vector<24x2048xf32>
    %43 = vector.broadcast %6 : vector<1x2048xf32> to vector<24x2048xf32>
    %44 = vector.broadcast %12 : vector<24x1xf32> to vector<24x2048xf32>
    %45 = arith.maximumf %43, %44 : vector<24x2048xf32>
    %46 = arith.subf %42, %45 : vector<24x2048xf32>
    %cst_18 = arith.constant 1.000000e+00 : f32
    %47 = vector.broadcast %cst_18 : f32 to vector<24x2048xf32>
    %48 = arith.addf %46, %47 : vector<24x2048xf32>
    %cst_19 = arith.constant 0.000000e+00 : f32
    %49 = vector.broadcast %cst_19 : f32 to vector<24x2048xf32>
    %50 = arith.maximumf %48, %49 : vector<24x2048xf32>
    %51 = vector.broadcast %9 : vector<1x2048xf32> to vector<24x2048xf32>
    %52 = vector.broadcast %15 : vector<24x1xf32> to vector<24x2048xf32>
    %53 = arith.minimumf %51, %52 : vector<24x2048xf32>
    %54 = vector.broadcast %7 : vector<1x2048xf32> to vector<24x2048xf32>
    %55 = vector.broadcast %13 : vector<24x1xf32> to vector<24x2048xf32>
    %56 = arith.maximumf %54, %55 : vector<24x2048xf32>
    %57 = arith.subf %53, %56 : vector<24x2048xf32>
    %cst_20 = arith.constant 1.000000e+00 : f32
    %58 = vector.broadcast %cst_20 : f32 to vector<24x2048xf32>
    %59 = arith.addf %57, %58 : vector<24x2048xf32>
    %cst_21 = arith.constant 0.000000e+00 : f32
    %60 = vector.broadcast %cst_21 : f32 to vector<24x2048xf32>
    %61 = arith.maximumf %59, %60 : vector<24x2048xf32>
    %62 = arith.mulf %50, %61 : vector<24x2048xf32>
    %63 = vector.broadcast %29 : vector<1x2048xf32> to vector<24x2048xf32>
    %64 = vector.broadcast %28 : vector<24x1xf32> to vector<24x2048xf32>
    %65 = arith.addf %63, %64 : vector<24x2048xf32>
    %66 = arith.subf %65, %62 : vector<24x2048xf32>
    %67 = tpu.reciprocal %66 : vector<24x2048xf32> -> vector<24x2048xf32>
    %68 = arith.mulf %62, %67 : vector<24x2048xf32>
    %cst_22 = arith.constant 0.000000e+00 : f32
    %69 = vector.shape_cast %34 : vector<24x1xi1> to vector<24x1xi1>
    %70 = vector.broadcast %69 : vector<24x1xi1> to vector<24x2048xi1>
    %71 = vector.broadcast %cst_22 : f32 to vector<24x2048xf32>
    %72 = arith.select %70, %71, %68 : vector<24x2048xi1>, vector<24x2048xf32>
    %cst_23 = arith.constant -1.000000e+00 : f32
    %73 = vector.shape_cast %39 : vector<1x2048xi1> to vector<1x2048xi1>
    %74 = vector.broadcast %73 : vector<1x2048xi1> to vector<24x2048xi1>
    %75 = vector.broadcast %cst_23 : f32 to vector<24x2048xf32>
    %76 = arith.select %74, %75, %72 : vector<24x2048xi1>, vector<24x2048xf32>
    %cst_24 = arith.constant 0.000000e+00 : f32
    %77 = vector.shape_cast %5 : vector<1x2048xi1> to vector<1x2048xi1>
    %78 = vector.broadcast %77 : vector<1x2048xi1> to vector<24x2048xi1>
    %79 = vector.broadcast %cst_24 : f32 to vector<24x2048xf32>
    %80 = arith.select %78, %76, %79 : vector<24x2048xi1>, vector<24x2048xf32>
    %cst_25 = arith.constant dense<0xFF800000> : vector<24xf32>
    %81 = vector.multi_reduction <maximumf>, %80, %cst_25 [1] : vector<24x2048xf32> to vector<24xf32>
    %82 = vector.shape_cast %81 : vector<24xf32> to vector<24x1xf32>
    %c0_26 = arith.constant 0 : index
    %c0_27 = arith.constant 0 : index
    %c0_28 = arith.constant 0 : index
    %83 = vector.load %arg5[%c0_26, %c0_27, %c0_28] : memref<1x24x1xf32, #tpu.memory_space<vmem>>, vector<1x24x1xf32>
    %84 = vector.shape_cast %83 : vector<1x24x1xf32> to vector<24x1xf32>
    %85 = arith.maximumf %84, %82 : vector<24x1xf32>
    %c0_29 = arith.constant 0 : index
    %c0_30 = arith.constant 0 : index
    %c0_31 = arith.constant 0 : index
    %86 = vector.load %arg5[%c0_29, %c0_30, %c0_31] : memref<1x24x1xf32, #tpu.memory_space<vmem>>, vector<1x24x1xf32>
    %87 = vector.shape_cast %86 : vector<1x24x1xf32> to vector<24x1xf32>
    %88 = vector.shape_cast %85 : vector<24x1xf32> to vector<1x24x1xf32>
    tpu.vector_store %arg5[%c0_29, %c0_30, %c0_31], %88 {strides = array<i32>} : memref<1x24x1xf32, #tpu.memory_space<vmem>>, vector<1x24x1xf32>,
    return
  }
  func.func @transform_0(%arg0: i32, %arg1: i32) -> (i32, i32) {
    %c0_i32 = arith.constant 0 : i32
    %c0_i32_0 = arith.constant 0 : i32
    return %c0_i32, %arg1 : i32, i32
  }
  func.func @transform_1(%arg0: i32, %arg1: i32) -> (i32, i32) {
    %c0_i32 = arith.constant 0 : i32
    %c0_i32_0 = arith.constant 0 : i32
    return %c0_i32, %arg1 : i32, i32
  }
  func.func @transform_2(%arg0: i32, %arg1: i32) -> (i32, i32, i32) {
    %c0_i32 = arith.constant 0 : i32
    %c0_i32_0 = arith.constant 0 : i32
    %c0_i32_1 = arith.constant 0 : i32
    return %arg0, %c0_i32, %c0_i32_0 : i32, i32, i32
  }
  func.func @transform_3(%arg0: i32, %arg1: i32) -> (i32, i32, i32) {
    %c0_i32 = arith.constant 0 : i32
    %c0_i32_0 = arith.constant 0 : i32
    %c0_i32_1 = arith.constant 0 : i32
    return %arg0, %c0_i32, %c0_i32_0 : i32, i32, i32
  }
}

module attributes {stable_mosaic.version = 11 : i64} {
  func.func @_labels_targets_kernel(%arg0: i32, %arg1: i32, %arg2: memref<1x2048xf32, #tpu.memory_space<vmem>>, %arg3: memref<4x2048xf32, #tpu.memory_space<vmem>>, %arg4: memref<1x24x5xf32, #tpu.memory_space<vmem>>, %arg5: memref<1x4x24xf32, #tpu.memory_space<vmem>>, %arg6: memref<1x24x1xf32, #tpu.memory_space<vmem>>, %arg7: memref<1x1x2048xf32, #tpu.memory_space<vmem>>, %arg8: memref<1x4x2048xf32, #tpu.memory_space<vmem>>) attributes {dimension_semantics = [#tpu.dimension_semantics<parallel>, #tpu.dimension_semantics<parallel>], iteration_bounds = array<i64: 2, 2>, scalar_prefetch = 0 : i64, scratch_operands = 0 : i64, tpu.core_type = #tpu.core_type<tc>, window_params = [{transform_indices = @transform_0, window_bounds = array<i64: 1, 2048>}, {transform_indices = @transform_1, window_bounds = array<i64: 4, 2048>}, {transform_indices = @transform_2, window_bounds = array<i64: 1, 24, 5>}, {transform_indices = @transform_3, window_bounds = array<i64: 1, 4, 24>}, {transform_indices = @transform_4, window_bounds = array<i64: 1, 24, 1>}, {transform_indices = @transform_5, window_bounds = array<i64: 1, 1, 2048>}, {transform_indices = @transform_6, window_bounds = array<i64: 1, 4, 2048>}]} {
    %c0 = arith.constant 0 : index
    %c0_0 = arith.constant 0 : index
    %0 = vector.load %arg2[%c0, %c0_0] : memref<1x2048xf32, #tpu.memory_space<vmem>>, vector<1x2048xf32>
    %cst = arith.constant 5.000000e-01 : f32
    %1 = vector.broadcast %cst : f32 to vector<1x2048xf32>
    %2 = arith.cmpf ogt, %0, %1 : vector<1x2048xf32>
    %c0_1 = arith.constant 0 : index
    %c0_2 = arith.constant 0 : index
    %3 = vector.load %arg3[%c0_1, %c0_2] : memref<4x2048xf32, #tpu.memory_space<vmem>>, vector<1x2048xf32>
    %c1 = arith.constant 1 : index
    %c0_3 = arith.constant 0 : index
    %4 = vector.load %arg3[%c1, %c0_3] : memref<4x2048xf32, #tpu.memory_space<vmem>>, vector<1x2048xf32>
    %c2 = arith.constant 2 : index
    %c0_4 = arith.constant 0 : index
    %5 = vector.load %arg3[%c2, %c0_4] : memref<4x2048xf32, #tpu.memory_space<vmem>>, vector<1x2048xf32>
    %c3 = arith.constant 3 : index
    %c0_5 = arith.constant 0 : index
    %6 = vector.load %arg3[%c3, %c0_5] : memref<4x2048xf32, #tpu.memory_space<vmem>>, vector<1x2048xf32>
    %c0_6 = arith.constant 0 : index
    %c0_7 = arith.constant 0 : index
    %c0_8 = arith.constant 0 : index
    %7 = vector.load %arg4[%c0_6, %c0_7, %c0_8] : memref<1x24x5xf32, #tpu.memory_space<vmem>>, vector<1x24x5xf32>
    %8 = vector.shape_cast %7 : vector<1x24x5xf32> to vector<24x5xf32>
    %9 = vector.extract_strided_slice %8 {offsets = [0, 0], sizes = [24, 1], strides = [1, 1]} : vector<24x5xf32> to vector<24x1xf32>
    %10 = vector.extract_strided_slice %8 {offsets = [0, 1], sizes = [24, 1], strides = [1, 1]} : vector<24x5xf32> to vector<24x1xf32>
    %11 = vector.extract_strided_slice %8 {offsets = [0, 2], sizes = [24, 1], strides = [1, 1]} : vector<24x5xf32> to vector<24x1xf32>
    %12 = vector.extract_strided_slice %8 {offsets = [0, 3], sizes = [24, 1], strides = [1, 1]} : vector<24x5xf32> to vector<24x1xf32>
    %13 = arith.subf %11, %9 : vector<24x1xf32>
    %cst_9 = arith.constant 1.000000e+00 : f32
    %14 = vector.broadcast %cst_9 : f32 to vector<24x1xf32>
    %15 = arith.addf %13, %14 : vector<24x1xf32>
    %16 = arith.subf %12, %10 : vector<24x1xf32>
    %cst_10 = arith.constant 1.000000e+00 : f32
    %17 = vector.broadcast %cst_10 : f32 to vector<24x1xf32>
    %18 = arith.addf %16, %17 : vector<24x1xf32>
    %19 = arith.subf %5, %3 : vector<1x2048xf32>
    %cst_11 = arith.constant 1.000000e+00 : f32
    %20 = vector.broadcast %cst_11 : f32 to vector<1x2048xf32>
    %21 = arith.addf %19, %20 : vector<1x2048xf32>
    %22 = arith.subf %6, %4 : vector<1x2048xf32>
    %cst_12 = arith.constant 1.000000e+00 : f32
    %23 = vector.broadcast %cst_12 : f32 to vector<1x2048xf32>
    %24 = arith.addf %22, %23 : vector<1x2048xf32>
    %25 = arith.mulf %15, %18 : vector<24x1xf32>
    %26 = arith.mulf %21, %24 : vector<1x2048xf32>
    %cst_13 = arith.constant 1.000000e+00 : f32
    %27 = vector.broadcast %cst_13 : f32 to vector<24x1xf32>
    %28 = arith.cmpf oeq, %15, %27 : vector<24x1xf32>
    %cst_14 = arith.constant 1.000000e+00 : f32
    %29 = vector.broadcast %cst_14 : f32 to vector<24x1xf32>
    %30 = arith.cmpf oeq, %18, %29 : vector<24x1xf32>
    %31 = arith.andi %28, %30 : vector<24x1xi1>
    %cst_15 = arith.constant 1.000000e+00 : f32
    %32 = vector.broadcast %cst_15 : f32 to vector<1x2048xf32>
    %33 = arith.cmpf oeq, %21, %32 : vector<1x2048xf32>
    %cst_16 = arith.constant 1.000000e+00 : f32
    %34 = vector.broadcast %cst_16 : f32 to vector<1x2048xf32>
    %35 = arith.cmpf oeq, %24, %34 : vector<1x2048xf32>
    %36 = arith.andi %33, %35 : vector<1x2048xi1>
    %37 = vector.broadcast %5 : vector<1x2048xf32> to vector<24x2048xf32>
    %38 = vector.broadcast %11 : vector<24x1xf32> to vector<24x2048xf32>
    %39 = arith.minimumf %37, %38 : vector<24x2048xf32>
    %40 = vector.broadcast %3 : vector<1x2048xf32> to vector<24x2048xf32>
    %41 = vector.broadcast %9 : vector<24x1xf32> to vector<24x2048xf32>
    %42 = arith.maximumf %40, %41 : vector<24x2048xf32>
    %43 = arith.subf %39, %42 : vector<24x2048xf32>
    %cst_17 = arith.constant 1.000000e+00 : f32
    %44 = vector.broadcast %cst_17 : f32 to vector<24x2048xf32>
    %45 = arith.addf %43, %44 : vector<24x2048xf32>
    %cst_18 = arith.constant 0.000000e+00 : f32
    %46 = vector.broadcast %cst_18 : f32 to vector<24x2048xf32>
    %47 = arith.maximumf %45, %46 : vector<24x2048xf32>
    %48 = vector.broadcast %6 : vector<1x2048xf32> to vector<24x2048xf32>
    %49 = vector.broadcast %12 : vector<24x1xf32> to vector<24x2048xf32>
    %50 = arith.minimumf %48, %49 : vector<24x2048xf32>
    %51 = vector.broadcast %4 : vector<1x2048xf32> to vector<24x2048xf32>
    %52 = vector.broadcast %10 : vector<24x1xf32> to vector<24x2048xf32>
    %53 = arith.maximumf %51, %52 : vector<24x2048xf32>
    %54 = arith.subf %50, %53 : vector<24x2048xf32>
    %cst_19 = arith.constant 1.000000e+00 : f32
    %55 = vector.broadcast %cst_19 : f32 to vector<24x2048xf32>
    %56 = arith.addf %54, %55 : vector<24x2048xf32>
    %cst_20 = arith.constant 0.000000e+00 : f32
    %57 = vector.broadcast %cst_20 : f32 to vector<24x2048xf32>
    %58 = arith.maximumf %56, %57 : vector<24x2048xf32>
    %59 = arith.mulf %47, %58 : vector<24x2048xf32>
    %60 = vector.broadcast %26 : vector<1x2048xf32> to vector<24x2048xf32>
    %61 = vector.broadcast %25 : vector<24x1xf32> to vector<24x2048xf32>
    %62 = arith.addf %60, %61 : vector<24x2048xf32>
    %63 = arith.subf %62, %59 : vector<24x2048xf32>
    %64 = tpu.reciprocal %63 : vector<24x2048xf32> -> vector<24x2048xf32>
    %65 = arith.mulf %59, %64 : vector<24x2048xf32>
    %cst_21 = arith.constant 0.000000e+00 : f32
    %66 = vector.shape_cast %31 : vector<24x1xi1> to vector<24x1xi1>
    %67 = vector.broadcast %66 : vector<24x1xi1> to vector<24x2048xi1>
    %68 = vector.broadcast %cst_21 : f32 to vector<24x2048xf32>
    %69 = arith.select %67, %68, %65 : vector<24x2048xi1>, vector<24x2048xf32>
    %cst_22 = arith.constant -1.000000e+00 : f32
    %70 = vector.shape_cast %36 : vector<1x2048xi1> to vector<1x2048xi1>
    %71 = vector.broadcast %70 : vector<1x2048xi1> to vector<24x2048xi1>
    %72 = vector.broadcast %cst_22 : f32 to vector<24x2048xf32>
    %73 = arith.select %71, %72, %69 : vector<24x2048xi1>, vector<24x2048xf32>
    %cst_23 = arith.constant dense<0xFF800000> : vector<2048xf32>
    %74 = vector.multi_reduction <maximumf>, %73, %cst_23 [0] : vector<24x2048xf32> to vector<2048xf32>
    %75 = vector.shape_cast %74 : vector<2048xf32> to vector<1x2048xf32>
    %76 = tpu.iota {dimensions = array<i32: 0>} : vector<24x2048xi32>
    %77 = vector.broadcast %75 : vector<1x2048xf32> to vector<24x2048xf32>
    %78 = arith.cmpf oeq, %73, %77 : vector<24x2048xf32>
    %c24_i32 = arith.constant 24 : i32
    %79 = vector.broadcast %c24_i32 : i32 to vector<24x2048xi32>
    %80 = arith.select %78, %76, %79 : vector<24x2048xi1>, vector<24x2048xi32>
    %cst_24 = arith.constant dense<2147483647> : vector<2048xi32>
    %81 = vector.multi_reduction <minsi>, %80, %cst_24 [0] : vector<24x2048xi32> to vector<2048xi32>
    %82 = vector.shape_cast %81 : vector<2048xi32> to vector<1x2048xi32>
    %c0_25 = arith.constant 0 : index
    %c0_26 = arith.constant 0 : index
    %c0_27 = arith.constant 0 : index
    %83 = vector.load %arg6[%c0_25, %c0_26, %c0_27] : memref<1x24x1xf32, #tpu.memory_space<vmem>>, vector<1x24x1xf32>
    %84 = vector.shape_cast %83 : vector<1x24x1xf32> to vector<24x1xf32>
    %cst_28 = arith.constant 0.000000e+00 : f32
    %85 = vector.broadcast %cst_28 : f32 to vector<24x1xf32>
    %86 = arith.cmpf oeq, %84, %85 : vector<24x1xf32>
    %cst_29 = arith.constant 9.99999974E-6 : f32
    %87 = vector.broadcast %cst_29 : f32 to vector<24x1xf32>
    %88 = arith.select %86, %87, %84 : vector<24x1xi1>, vector<24x1xf32>
    %89 = vector.broadcast %88 : vector<24x1xf32> to vector<24x2048xf32>
    %90 = arith.cmpf oeq, %73, %89 : vector<24x2048xf32>
    %91 = arith.extui %90 : vector<24x2048xi1> to vector<24x2048xi32>
    %92 = arith.sitofp %91 : vector<24x2048xi32> to vector<24x2048xf32>
    %cst_30 = arith.constant dense<0.000000e+00> : vector<2048xf32>
    %93 = vector.multi_reduction <add>, %92, %cst_30 [0] : vector<24x2048xf32> to vector<2048xf32>
    %94 = vector.shape_cast %93 : vector<2048xf32> to vector<1x2048xf32>
    %cst_31 = arith.constant -1.000000e+00 : f32
    %95 = vector.broadcast %cst_31 : f32 to vector<1x2048xf32>
    %cst_32 = arith.constant 3.000000e-01 : f32
    %96 = vector.broadcast %cst_32 : f32 to vector<1x2048xf32>
    %97 = arith.cmpf olt, %75, %96 : vector<1x2048xf32>
    %cst_33 = arith.constant 0.000000e+00 : f32
    %98 = vector.broadcast %cst_33 : f32 to vector<1x2048xf32>
    %99 = arith.select %97, %98, %95 : vector<1x2048xi1>, vector<1x2048xf32>
    %cst_34 = arith.constant 0.000000e+00 : f32
    %100 = vector.broadcast %cst_34 : f32 to vector<1x2048xf32>
    %101 = arith.cmpf ogt, %94, %100 : vector<1x2048xf32>
    %cst_35 = arith.constant 1.000000e+00 : f32
    %102 = vector.broadcast %cst_35 : f32 to vector<1x2048xf32>
    %103 = arith.select %101, %102, %99 : vector<1x2048xi1>, vector<1x2048xf32>
    %cst_36 = arith.constant 0.699999988 : f32
    %104 = vector.broadcast %cst_36 : f32 to vector<1x2048xf32>
    %105 = arith.cmpf oge, %75, %104 : vector<1x2048xf32>
    %cst_37 = arith.constant 1.000000e+00 : f32
    %106 = vector.broadcast %cst_37 : f32 to vector<1x2048xf32>
    %107 = arith.select %105, %106, %103 : vector<1x2048xi1>, vector<1x2048xf32>
    %cst_38 = arith.constant -1.000000e+00 : f32
    %108 = vector.broadcast %cst_38 : f32 to vector<1x2048xf32>
    %109 = arith.select %2, %107, %108 : vector<1x2048xi1>, vector<1x2048xf32>
    %c0_39 = arith.constant 0 : index
    %c0_40 = arith.constant 0 : index
    %c0_41 = arith.constant 0 : index
    %110 = vector.load %arg7[%c0_39, %c0_40, %c0_41] : memref<1x1x2048xf32, #tpu.memory_space<vmem>>, vector<1x1x2048xf32>
    %111 = vector.shape_cast %110 : vector<1x1x2048xf32> to vector<1x2048xf32>
    %112 = vector.shape_cast %109 : vector<1x2048xf32> to vector<1x1x2048xf32>
    tpu.vector_store %arg7[%c0_39, %c0_40, %c0_41], %112 {strides = array<i32>} : memref<1x1x2048xf32, #tpu.memory_space<vmem>>, vector<1x1x2048xf32>,
    %113 = vector.broadcast %82 : vector<1x2048xi32> to vector<24x2048xi32>
    %114 = arith.cmpi eq, %76, %113 : vector<24x2048xi32>
    %115 = arith.extui %114 : vector<24x2048xi1> to vector<24x2048xi32>
    %116 = arith.sitofp %115 : vector<24x2048xi32> to vector<24x2048xf32>
    %c0_42 = arith.constant 0 : index
    %c0_43 = arith.constant 0 : index
    %c0_44 = arith.constant 0 : index
    %117 = vector.load %arg5[%c0_42, %c0_43, %c0_44] : memref<1x4x24xf32, #tpu.memory_space<vmem>>, vector<1x4x24xf32>
    %118 = vector.shape_cast %117 : vector<1x4x24xf32> to vector<4x24xf32>
    %cst_45 = arith.constant dense<0.000000e+00> : vector<4x2048xf32>
    %119 = tpu.matmul %118, %116, %cst_45 {dimension_numbers = #tpu.dot_dimension_numbers<[1], [0], [0], [1], [0, 0, 1, 1], [], []>} : vector<4x24xf32>, vector<24x2048xf32>, vector<4x2048xf32> -> vector<4x2048xf32>
    %120 = vector.extract_strided_slice %119 {offsets = [0, 0], sizes = [1, 2048], strides = [1, 1]} : vector<4x2048xf32> to vector<1x2048xf32>
    %121 = vector.extract_strided_slice %119 {offsets = [1, 0], sizes = [1, 2048], strides = [1, 1]} : vector<4x2048xf32> to vector<1x2048xf32>
    %122 = vector.extract_strided_slice %119 {offsets = [2, 0], sizes = [1, 2048], strides = [1, 1]} : vector<4x2048xf32> to vector<1x2048xf32>
    %123 = vector.extract_strided_slice %119 {offsets = [3, 0], sizes = [1, 2048], strides = [1, 1]} : vector<4x2048xf32> to vector<1x2048xf32>
    %124 = arith.subf %122, %120 : vector<1x2048xf32>
    %cst_46 = arith.constant 1.000000e+00 : f32
    %125 = vector.broadcast %cst_46 : f32 to vector<1x2048xf32>
    %126 = arith.addf %124, %125 : vector<1x2048xf32>
    %127 = arith.subf %123, %121 : vector<1x2048xf32>
    %cst_47 = arith.constant 1.000000e+00 : f32
    %128 = vector.broadcast %cst_47 : f32 to vector<1x2048xf32>
    %129 = arith.addf %127, %128 : vector<1x2048xf32>
    %cst_48 = arith.constant 5.000000e-01 : f32
    %130 = vector.broadcast %cst_48 : f32 to vector<1x2048xf32>
    %131 = arith.mulf %130, %126 : vector<1x2048xf32>
    %132 = arith.addf %120, %131 : vector<1x2048xf32>
    %cst_49 = arith.constant 5.000000e-01 : f32
    %133 = vector.broadcast %cst_49 : f32 to vector<1x2048xf32>
    %134 = arith.mulf %133, %129 : vector<1x2048xf32>
    %135 = arith.addf %121, %134 : vector<1x2048xf32>
    %cst_50 = arith.constant 5.000000e-01 : f32
    %136 = vector.broadcast %cst_50 : f32 to vector<1x2048xf32>
    %137 = arith.mulf %136, %21 : vector<1x2048xf32>
    %138 = arith.addf %3, %137 : vector<1x2048xf32>
    %cst_51 = arith.constant 5.000000e-01 : f32
    %139 = vector.broadcast %cst_51 : f32 to vector<1x2048xf32>
    %140 = arith.mulf %139, %24 : vector<1x2048xf32>
    %141 = arith.addf %4, %140 : vector<1x2048xf32>
    %142 = tpu.reciprocal %21 : vector<1x2048xf32> -> vector<1x2048xf32>
    %143 = tpu.reciprocal %24 : vector<1x2048xf32> -> vector<1x2048xf32>
    %144 = arith.subf %132, %138 : vector<1x2048xf32>
    %145 = arith.mulf %144, %142 : vector<1x2048xf32>
    %146 = arith.subf %135, %141 : vector<1x2048xf32>
    %147 = arith.mulf %146, %143 : vector<1x2048xf32>
    %148 = arith.mulf %126, %142 : vector<1x2048xf32>
    %149 = math.log %148 : vector<1x2048xf32>
    %150 = arith.mulf %129, %143 : vector<1x2048xf32>
    %151 = math.log %150 : vector<1x2048xf32>
    %152 = tpu.concatenate %145, %147, %149, %151 in 0 : vector<1x2048xf32>, vector<1x2048xf32>, vector<1x2048xf32>, vector<1x2048xf32> -> vector<4x2048xf32>
    %cst_52 = arith.constant 0.000000e+00 : f32
    %153 = vector.shape_cast %2 : vector<1x2048xi1> to vector<1x2048xi1>
    %154 = vector.broadcast %153 : vector<1x2048xi1> to vector<4x2048xi1>
    %155 = vector.broadcast %cst_52 : f32 to vector<4x2048xf32>
    %156 = arith.select %154, %152, %155 : vector<4x2048xi1>, vector<4x2048xf32>
    %c0_53 = arith.constant 0 : index
    %c0_54 = arith.constant 0 : index
    %c0_55 = arith.constant 0 : index
    %157 = vector.load %arg8[%c0_53, %c0_54, %c0_55] : memref<1x4x2048xf32, #tpu.memory_space<vmem>>, vector<1x4x2048xf32>
    %158 = vector.shape_cast %157 : vector<1x4x2048xf32> to vector<4x2048xf32>
    %159 = vector.shape_cast %156 : vector<4x2048xf32> to vector<1x4x2048xf32>
    tpu.vector_store %arg8[%c0_53, %c0_54, %c0_55], %159 {strides = array<i32>} : memref<1x4x2048xf32, #tpu.memory_space<vmem>>, vector<1x4x2048xf32>,
    return
  }
  func.func @transform_0(%arg0: i32, %arg1: i32) -> (i32, i32) {
    %c0_i32 = arith.constant 0 : i32
    %c0_i32_0 = arith.constant 0 : i32
    return %c0_i32, %arg1 : i32, i32
  }
  func.func @transform_1(%arg0: i32, %arg1: i32) -> (i32, i32) {
    %c0_i32 = arith.constant 0 : i32
    %c0_i32_0 = arith.constant 0 : i32
    return %c0_i32, %arg1 : i32, i32
  }
  func.func @transform_2(%arg0: i32, %arg1: i32) -> (i32, i32, i32) {
    %c0_i32 = arith.constant 0 : i32
    %c0_i32_0 = arith.constant 0 : i32
    %c0_i32_1 = arith.constant 0 : i32
    return %arg0, %c0_i32, %c0_i32_0 : i32, i32, i32
  }
  func.func @transform_3(%arg0: i32, %arg1: i32) -> (i32, i32, i32) {
    %c0_i32 = arith.constant 0 : i32
    %c0_i32_0 = arith.constant 0 : i32
    %c0_i32_1 = arith.constant 0 : i32
    return %arg0, %c0_i32, %c0_i32_0 : i32, i32, i32
  }
  func.func @transform_4(%arg0: i32, %arg1: i32) -> (i32, i32, i32) {
    %c0_i32 = arith.constant 0 : i32
    %c0_i32_0 = arith.constant 0 : i32
    %c0_i32_1 = arith.constant 0 : i32
    return %arg0, %c0_i32, %c0_i32_0 : i32, i32, i32
  }
  func.func @transform_5(%arg0: i32, %arg1: i32) -> (i32, i32, i32) {
    %c0_i32 = arith.constant 0 : i32
    %c0_i32_0 = arith.constant 0 : i32
    return %arg0, %c0_i32, %arg1 : i32, i32, i32
  }
  func.func @transform_6(%arg0: i32, %arg1: i32) -> (i32, i32, i32) {
    %c0_i32 = arith.constant 0 : i32
    %c0_i32_0 = arith.constant 0 : i32
    return %arg0, %c0_i32, %arg1 : i32, i32, i32
  }
}

</mosaic_0001>

<bundles_post_ra>
// kernel: _anchor_target_core.6
= control target key start
LH: loop header
LB: loop body
LE: loop exit
PB: predicated region body
PF: predicated region fallthrough
CT: control target
= control target key end

     0   :  { %8 = vsyncpa [#allocation3], 0  ;;  %s4606_s0 = inlined_call_operand.hbm [shape: f32[1,4096], index: 0, kind: input, shape index: {}]   ;;  %s4607_s1 = inlined_call_operand.hbm [shape: f32[4,4096], index: 1, kind: input, shape index: {}]   ;;  %s4608_s2 = inlined_call_operand.vmem [shape: f32[2,24,5], index: 2, kind: input, shape index: {}]   ;;  %s4609_s3 = inlined_call_operand.vmem [shape: f32[2,24,1], index: 3, kind: output, shape index: {}]  }
   0x1   :  { %10 = vsyncpa [#allocation3 + $0x1], 0 }
   0x2   :  { %11 = vsyncpa [#allocation5], 0 }
   0x3   :  { %13 = vsyncpa [#allocation5 + $0x1], 0  ;;  %s2426_s12 = smov 0   ;;  %s2428_s13 = smov 0  }
   0x4   :  { %s2430_s14 = smov 0   ;;  %s2432_s15 = smov 0  }
   0x5   :  { %s2434_s16 = smov 0   ;;  %s2436_s17 = smov 0  }
   0x6   :  { %s2438_s18 = smov 0   ;;  %s2440_s19 = smov 0  }
   0x7 LB: > { %s2048_s20 = sadd.s32 4294967295, %s2395_s19   ;;  %s28_s21 = sadd.s32 1, %s2387_s17  ;;  %s2395_s19 = sphi %s2440_s19, %s19_s19   ;;  %s2391_s18 = sphi %s2438_s18, %s5674_s18   ;;  %s2387_s17 = sphi %s2436_s17, %s5673_s17   ;;  %s2383_s16 = sphi %s2434_s16, %s5672_s16   ;;  %s2379_s15 = sphi %s2432_s15, %s5671_s15   ;;  %s2375_s14 = sphi %s2430_s14, %s5670_s14   ;;  %s2371_s13 = sphi %s2428_s13, %s5669_s13   ;;  %s2367_s12 = sphi %s2426_s12, %s5668_s12  }
   0x8   : > { %p29_p0 = scmp.ge.s32.totalorder %s28_s21, 2  ;;  %s31_s22 = sadd.s32 1, %s2391_s18 }
   0x9   : > { %s38_s23 = sadd.s32 1, %s2375_s14  ;;  %p45_p1 = scmp.ne.s32.totalorder %s2375_s14, %s2371_s13 }
   0xa   : > { %s5676_s21 = smov (%p29_p0, %s28_s21), 0  ;;  %s5678_s22 = smov (!%p29_p0, %s31_s22), %s2391_s18 }
   0xb   : > { %s35_s24 = ssub.s32 %s2387_s17, %s5676_s21  ;;  %p46_p2 = scmp.eq.s32.totalorder %s2395_s19, 0 }
   0xc   : > { %p33_p3 = scmp.ge.s32.totalorder %s5678_s22, 2  ;;  %p36_p4 = scmp.eq.s32.totalorder %s35_s24, 0 }
   0xd   : > { %p2476_p5 = por %p46_p2, %p45_p1  ;;  %p51_p6 = scmp.ne.s32.totalorder %s2371_s13, %s2367_s12 }
   0xe   : > { %s5680_s22 = smov (%p33_p3, %s5678_s22), 0  ;;  %p52_p7 = scmp.eq.s32.totalorder %s2048_s20, 0 }
   0xf   : > { %s2484_s26 = scalar_select %p36_p4, %s2375_s14, %s38_s23  }
  0x10   : > { %p2087_p8 = scmp.lt.s32.totalorder %s2395_s19, 4  ;;  %s2488_s27 = sand.u32 1, %s2375_s14  }
  0x11   : > { %p2490_p9 = por %p52_p7, %p51_p6  ;;  %s2052_s29 = sshll.u32 %s2488_s27, 4 }
  0x12   : > { %s2073_s30 = sshll.u32 %s2387_s17, 8  ;;  %s157_s7 = scalar_lea.vmem [#allocation2], %s2052_s29 }
  0x13   : > { %s4922_s28 = scalar_select %p2490_p9, 1, 0 }
  0x14   : > { %s2499_s6 = scalar_lea.hbm %s4606_s0, %s2073_s30  ;;  %s165_s8 = sshll.u32 %s157_s7, 4  ;;  %s2507_s8 = int_to_ptr.vmem [resolvable:$true] %s165_s8 }
  0x15   : > { %p2503_p10 = pnand %p2087_p8, %p2476_p5  ;;  %s154_s10 = scalar_lea.sflag [#allocation3], %s2488_s27 }
  0x16   : > { %s2265_s11 = scalar_lea.hbm %s2499_s6, 256  ;;  %s2270_s23 = scalar_lea.hbm %s4606_s0, 512 }
  0x17   : > { %p2266_p13 = scmp.ne.s32.totalorder %s2499_s6, %s2265_s11  ;;  %p2267_p0 = pneg %p2503_p10 }
  0x18   : > { %p2271_p3 = scmp.lt.u32.totalorder %s2499_s6, %s4606_s0  ;;  %p2272_p4 = scmp.lt.u32.totalorder %s2270_s23, %s2265_s11 }
  0x19   : > { %p2268_p1 = pnand %p2267_p0, %p2266_p13  ;;  %p2274_p6 = scmp.lt.u32.totalorder %s2265_s11, %s2499_s6 }
  0x1a   : > { %p2273_p5 = por %p2272_p4, %p2271_p3 }
  0x1b   : > { %p2269_p2 = pneg %p2268_p1 }
  0x1c   : > { %p2275_p7 = por %p2274_p6, %p2273_p5 }
  0x1e   : > { %p2276_p8 = pnand %p2275_p7, %p2269_p2 }
  0x20   : > { %2279 = shalt.err (!%p2276_p8)
}
  0x21   : > { %s2280_s29 = scalar_lea.vmem %s2507_s8, 256  ;;  %s2397_s30 = smov [#allocation2]  }
  0x22   : > { %p2281_p13 = scmp.ne.s32.totalorder %s2507_s8, %s2280_s29  ;;  %s2285_s4 = sshll.u32 %s2397_s30, 4  ;;  %s2286_s4 = int_to_ptr.vmem [resolvable:$false] %s2285_s4 }
  0x23   : > { %s2287_s5 = scalar_lea.vmem %s2286_s4, 512  ;;  %p2288_p12 = scmp.lt.s32.totalorder %s2507_s8, %s2286_s4 }
  0x24   : > { %p2283_p1 = pnand %p2281_p13, %p2267_p0  ;;  %p2289_p3 = scmp.lt.s32.totalorder %s2287_s5, %s2280_s29 }
  0x26   : > { %p2284_p11 = pneg %p2283_p1  ;;  %p2290_p4 = por %p2289_p3, %p2288_p12 }
  0x28   : > { %p2291_p5 = pnand %p2290_p4, %p2284_p11 }
  0x2a   : > { %2294 = shalt.err (!%p2291_p5)
}
  0x2b   : > { %2083 = dma.hbm_to_vmem [thread:$0]  (!%p2503_p10), %s2499_s6, 256, %s2507_s8, %s154_s10  }
  0x2c   : > { %p4924_p2 = scmp.lt.s32.totalorder %s2395_s19, 5  ;;  %p4925_p6 = scmp.ge.s32.totalorder %s2395_s19, 1 }
  0x2d   : > { %s2055_s11 = sshll.u32 %s2488_s27, 6  ;;  %s2074_s12 = sshll.u32 %s2387_s17, 10 }
  0x2e   : > { %p2541_p7 = pnand %p4925_p6, %p4924_p2  ;;  %s2550_s24 = scalar_lea.hbm %s4607_s1, %s2074_s12 }
  0x2f   : > { %s176_s25 = scalar_lea.vmem [#allocation4], %s2055_s11  ;;  %s173_s6 = scalar_lea.sflag [#allocation5], %s2488_s27 }
  0x30   : > { %s4926_s7 = scalar_select %p2541_p7, 1, 0 }
  0x31   : > { %s184_s29 = sshll.u32 %s176_s25, 4  ;;  %s2295_s8 = scalar_lea.hbm %s2550_s24, 1024  ;;  %s185_s29 = int_to_ptr.vmem [resolvable:$true] %s184_s29 }
  0x32   : > { %p2296_p11 = scmp.ne.s32.totalorder %s2550_s24, %s2295_s8  ;;  %s2300_s4 = scalar_lea.hbm %s4607_s1, 2048 }
  0x33   : > { %p2301_p13 = scmp.lt.u32.totalorder %s2550_s24, %s4607_s1  ;;  %p2302_p1 = scmp.lt.u32.totalorder %s2300_s4, %s2295_s8 }
  0x34   : > { %p2298_p12 = pnand %p2296_p11, %p2267_p0  ;;  %p2304_p4 = scmp.lt.u32.totalorder %s2295_s8, %s2550_s24 }
  0x35   : > { %p2303_p3 = por %p2302_p1, %p2301_p13 }
  0x36   : > { %p2299_p8 = pneg %p2298_p12 }
  0x37   : > { %p2305_p5 = por %p2304_p4, %p2303_p3 }
  0x39   : > { %p2306_p2 = pnand %p2305_p5, %p2299_p8 }
  0x3b   : > { %2309 = shalt.err (!%p2306_p2)
}
  0x3c   : > { %s2310_s27 = scalar_lea.vmem %s185_s29, 1024  ;;  %s2398_s11 = smov [#allocation4]  }
  0x3d   : > { %p2311_p6 = scmp.ne.s32.totalorder %s185_s29, %s2310_s27  ;;  %s2315_s20 = sshll.u32 %s2398_s11, 4  ;;  %s2316_s20 = int_to_ptr.vmem [resolvable:$false] %s2315_s20 }
  0x3e   : > { %s2317_s23 = scalar_lea.vmem %s2316_s20, 2048  ;;  %p2318_p9 = scmp.lt.s32.totalorder %s185_s29, %s2316_s20 }
  0x3f   : > { %p2313_p11 = pnand %p2311_p6, %p2267_p0  ;;  %p2319_p7 = scmp.lt.s32.totalorder %s2317_s23, %s2310_s27 }
  0x41   : > { %p2314_p12 = pneg %p2313_p11  ;;  %p2320_p1 = por %p2319_p7, %p2318_p9 }
  0x43   : > { %p2321_p13 = pnand %p2320_p1, %p2314_p12 }
  0x45   : > { %2324 = shalt.err (!%p2321_p13)
}
  0x46   : > { %2086 = dma.hbm_to_vmem [thread:$0]  (!%p2503_p10), %s2550_s24, 1024, %s185_s29, %s173_s6  }
  0x47   : > { %p4927_p8 = scmp.ne.s32.totalorder %s4926_s7, 0 }
  0x49   : > { %201 = sbr.rel (%p4927_p8) target bundleno = 802 (0x322), region = 32 }
  0x50   : > { %s203_s25 = sand.u32 1, %s2371_s13   ;;  %p4928_p0 = scmp.ne.s32.totalorder %s4922_s28, 0 }
  0x51   : > { %s2059_s8 = sshll.u32 %s203_s25, 4  ;;  %s204_s10 = scalar_lea.sflag [#allocation3], %s203_s25 }
  0x52   : > { %s2575_s30 = scalar_lea.vmem [#allocation2], %s2059_s8 }
  0x53   : > { %2358 = dma.done.wait (%p4928_p0), %s204_s10, 256  }
  0x54   : > { %2360 = vsyncadd (%p4928_p0), %s204_s10, 4294967040  ;;  %s2060_s4 = sshll.u32 %s203_s25, 6  ;;  %s213_s9 = scalar_lea.sflag [#allocation5], %s203_s25 }
  0x55   : > { %s2581_s5 = scalar_lea.vmem [#allocation4], %s2060_s4 }
  0x56   : > { %2362 = dma.done.wait (%p4928_p0), %s213_s9, 1024  }
  0x57   : > { %2364 = vsyncadd (%p4928_p0), %s213_s9, 4294966272  ;;  %p251_p9 = scmp.lt.s32.totalorder %s2383_s16, 1  ;;  %p2063_p10 = scmp.ne.s32.totalorder %s2379_s15, 0 }
  0x58   : > { %vm265_vm0 = vcmask (!%p2063_p10), 7168   ;;  %v2399_v0 = vmov (!%p2063_p10), 0.0  }
  0x59   : > { %s5682_s16 = smov (!%p251_p9, %s2383_s16), 1  ;;  %264 = sbr.rel (%p2063_p10) target bundleno = 96 (0x60), region = 44 }
  0x5a   : > { %s2075_s7 = smul.u32 24, %s5682_s16 }
  0x5c   : > { %s255_s6 = scalar_lea.vmem %s4608_s2, %s2075_s7  ;;  %s2595_s11 = scalar_lea.vmem %s4609_s3, %s2075_s7 }
  0x5d   : > { %266 = vst.msk [vmem:[%s2595_s11] sm:$0xff] (!%p2063_p10), %vm265_vm0, %v2399_v0  ;;  %267 = vst.msk [vmem:[%s2595_s11 + $0x8] sm:$0xff] (!%p2063_p10), %vm265_vm0, %v2399_v0 }
  0x5e   : > { %268 = vst.msk [vmem:[%s2595_s11 + $0x10] sm:$0xff] (!%p2063_p10), %vm265_vm0, %v2399_v0 }
  0x60 PF: > { %v288_v1 = vld [vmem:[%s255_s6] sm:$0xff]  ;;  %v290_v2 = vld [vmem:[%s255_s6 + $0x10] sm:$0xff]  ;;  %s2400_s16 = smov 2   ;;  %v289_v3 = vld [vmem:[%s255_s6 + $0x8] sm:$0xff]  ;;  %v2401_v4 = vmov 2   ;;  %s2402_s15 = smov 127   ;;  %v360_v26 = vlaneseq }
  0x61   : > { %294 = vrot.lane.b32.xlu0 %v288_v1, %s2400_s16  ;;  %298 = vrot.lane.b32.xlu1 %v290_v2, %s2400_s16  ;;  %v4611_v14 = vmov 0   ;;  %v2404_v18 = vmov 3   ;;  %v2405_v19 = vmov 1   ;;  %v273_v35 = vld [vmem:[%s2581_s5] ss:$4 sm:$0xff] }
  0x62   : > { %2159 = vset.pattern.permute.xlu1 %v2401_v4  ;;  %2160 = vset.pattern.permute.xlu0 %v2401_v4  ;;  %v361_v30 = vshrl.u32 %v360_v26, 7  ;;  %v2067_v39 = vld [vmem:[%s2581_s5 + $0x2] ss:$4 sm:$0xff]  ;;  %v2064_v54 = vld [vmem:[%s2581_s5 + $0x20] ss:$4 sm:$0xff] }
  0x63   : > { %v2068_v40 = vld [vmem:[%s2581_s5 + $0x22] ss:$4 sm:$0xff] }
  0x64   : > { %v2615_v34 = vsub.s32 0, %v361_v30  ;;  %v2618_v36 = vsub.s32 1, %v361_v30  ;;  %v2620_v37 = vsub.s32 2, %v361_v30  ;;  %v2622_v38 = vsub.s32 3, %v361_v30 }
  0x65   : > { %296 = vrot.lane.b32.xlu0 %v289_v3, %s2400_s16  ;;  %v2626_v41 = vsub.s32 4, %v361_v30  ;;  %v2628_v42 = vsub.s32 5, %v361_v30  ;;  %v2630_v43 = vsub.s32 6, %v361_v30  ;;  %v2632_v44 = vsub.s32 7, %v361_v30 }
  0x66   : > { %4929 = vst [vmem:[#allocation8_spill] sm:$0xff] %v2615_v34  ;;  %4930 = vst [vmem:[#allocation9_spill] sm:$0xff] %v2618_v36  ;;  %v2635_v45 = vrot.slane %v273_v35, %v2615_v34  ;;  %v2638_v46 = vrot.slane %v2067_v39, %v2615_v34  ;;  %v2641_v47 = vrot.slane %v273_v35, %v2618_v36 }
  0x67   : > { %4931 = vst [vmem:[#allocation10_spill] sm:$0xff] %v2620_v37  ;;  %4932 = vst [vmem:[#allocation11_spill] sm:$0xff] %v2622_v38  ;;  %v2644_v48 = vrot.slane %v273_v35, %v2620_v37  ;;  %v2647_v49 = vrot.slane %v273_v35, %v2622_v38  ;;  %v2650_v50 = vrot.slane %v2067_v39, %v2618_v36 }
  0x68   : > { %4933 = vst [vmem:[#allocation12_spill] sm:$0xff] %v2626_v41  ;;  %4934 = vst [vmem:[#allocation13_spill] sm:$0xff] %v2628_v42  ;;  %v2653_v51 = vrot.slane %v2067_v39, %v2620_v37  ;;  %v2656_v52 = vrot.slane %v2067_v39, %v2622_v38  ;;  %v2659_v53 = vrot.slane %v2068_v40, %v2615_v34 }
  0x69   : > { %4935 = vst [vmem:[#allocation14_spill] sm:$0xff] %v2630_v43  ;;  %4936 = vst [vmem:[#allocation15_spill] sm:$0xff] %v2632_v44  ;;  %v2663_v55 = vrot.slane %v2067_v39, %v2626_v41  ;;  %v2666_v56 = vrot.slane %v2068_v40, %v2618_v36  ;;  %v2669_v57 = vrot.slane %v2068_v40, %v2620_v37 }
  0x6a   : > { %4937 = vst [vmem:[#allocation16_spill] sm:$0xff] %v2635_v45  ;;  %4938 = vst [vmem:[#allocation17_spill] sm:$0xff] %v2638_v46  ;;  %v2672_v58 = vrot.slane %v2068_v40, %v2622_v38  ;;  %v2675_v59 = vrot.slane %v2067_v39, %v2628_v42  ;;  %v2678_v60 = vrot.slane %v2067_v39, %v2630_v43 }
  0x6b   : > { %4939 = vst [vmem:[#allocation18_spill] sm:$0xff] %v2641_v47  ;;  %4940 = vst [vmem:[#allocation19_spill] sm:$0xff] %v2644_v48  ;;  %v2681_v61 = vrot.slane %v2067_v39, %v2632_v44  ;;  %v2684_v62 = vrot.slane %v2068_v40, %v2626_v41  ;;  %v2687_v63 = vrot.slane %v2068_v40, %v2628_v42 }
  0x6c   : > { %4941 = vst [vmem:[#allocation20_spill] sm:$0xff] %v2647_v49  ;;  %4942 = vst [vmem:[#allocation21_spill] sm:$0xff] %v2650_v50  ;;  %v2690_v0 = vrot.slane %v2068_v40, %v2630_v43 }
  0x6d   : > { %4943 = vst [vmem:[#allocation22_spill] sm:$0xff] %v2653_v51  ;;  %4944 = vst [vmem:[#allocation23_spill] sm:$0xff] %v2656_v52 }
  0x6e   : > { %4945 = vst [vmem:[#allocation24_spill] sm:$0xff] %v2659_v53  ;;  %4946 = vst [vmem:[#allocation25_spill] sm:$0xff] %v2663_v55 }
  0x6f   : > { %4947 = vst [vmem:[#allocation26_spill] sm:$0xff] %v2666_v56  ;;  %4948 = vst [vmem:[#allocation27_spill] sm:$0xff] %v2669_v57 }
  0x70   : > { %4949 = vst [vmem:[#allocation28_spill] sm:$0xff] %v2672_v58  ;;  %4950 = vst [vmem:[#allocation29_spill] sm:$0xff] %v2675_v59 }
  0x71   : > { %4951 = vst [vmem:[#allocation30_spill] sm:$0xff] %v2678_v60  ;;  %4952 = vst [vmem:[#allocation31_spill] sm:$0xff] %v2681_v61 }
  0x72   : > { %4953 = vst [vmem:[#allocation32_spill] sm:$0xff] %v2684_v62  ;;  %4954 = vst [vmem:[#allocation33_spill] sm:$0xff] %v2687_v63 }
  0x73   : > { %4955 = vst [vmem:[#allocation34_spill] sm:$0xff] %v2690_v0 }
  0xd3   : > { %v295_v5 = vpop.permute.xlu0 %294  ;;  %v299_v6 = vpop.permute.xlu1 %298 }
  0xd4   : > { %v303_v7 = vsub.f32 %v288_v1, %v295_v5  ;;  %v305_v8 = vsub.f32 %v290_v2, %v299_v6  ;;  %v2701_v5 = vrot.slane %v273_v35, %v2628_v42  ;;  %v2704_v6 = vrot.slane %v273_v35, %v2630_v43 }
  0xd6   : > { %v306_v9 = vadd.f32 1.0, %v303_v7  ;;  %v308_v11 = vadd.f32 1.0, %v305_v8  ;;  %4958 = vst [vmem:[#allocation37_spill] sm:$0xff] %v2701_v5  ;;  %4959 = vst [vmem:[#allocation38_spill] sm:$0xff] %v2704_v6  ;;  %v2707_v7 = vrot.slane %v273_v35, %v2632_v44  ;;  %v2710_v8 = vrot.slane %v2064_v54, %v2615_v34 }
  0xd7   : > { %v297_v10 = vpop.permute.xlu0 %296 }
  0xd8   : > { %v304_v12 = vsub.f32 %v289_v3, %v297_v10  ;;  %320 = vrot.lane.b32.xlu1 %v306_v9, %s2402_s15  ;;  %vm334_vm1 = vcmp.eq.f32.partialorder %v306_v9, 1.0  ;;  %vm336_vm3 = vcmp.eq.f32.partialorder %v308_v11, 1.0  ;;  %4960 = vst [vmem:[#allocation39_spill] sm:$0xff] %v2707_v7  ;;  %4961 = vst [vmem:[#allocation40_spill] sm:$0xff] %v2710_v8 }
  0xd9   : > { %v337_v15 = vsel %vm334_vm1, 1, %v4611_v14  ;;  %v339_v17 = vsel %vm336_vm3, 1, %v4611_v14 }
  0xda   : > { %v307_v13 = vadd.f32 1.0, %v304_v12  ;;  %v2716_v12 = vrot.slane %v2064_v54, %v2620_v37 }
  0xdc   : > { %324 = vrot.lane.b32.xlu1 %v308_v11, %s2402_s15  ;;  %322 = vrot.lane.b32.xlu0 %v307_v13, %s2402_s15  ;;  %vm335_vm2 = vcmp.eq.f32.partialorder %v307_v13, 1.0  ;;  %4963 = vst [vmem:[#allocation42_spill] sm:$0xff] %v2716_v12 }
  0xdd   : > { %v338_v16 = vsel %vm335_vm2, 1, %v4611_v14 }
  0xe0   : > { %340 = vrot.lane.b32.xlu0 %v337_v15, %s2402_s15  ;;  %342 = vrot.lane.b32.xlu1 %v338_v16, %s2402_s15  ;;  %v2070_v15 = vld [vmem:[%s2581_s5 + $0x23] ss:$4 sm:$0xff]  ;;  %v2721_v16 = vrot.slane %v2064_v54, %v2622_v38 }
  0xe2   : > { %4964 = vst [vmem:[#allocation43_spill] sm:$0xff] %v2721_v16 }
  0xe4   : > { %344 = vrot.lane.b32.xlu0 %v339_v17, %s2402_s15  ;;  %441 = vperm.xlu1 %2159, %v288_v1   ;;  %v2724_v17 = vrot.slane %v2064_v54, %v2626_v41 }
  0xe6   : > { %4965 = vst [vmem:[#allocation44_spill] sm:$0xff] %v2724_v17 }
  0xe8   : > { %449 = vperm.xlu1 %2159, %v290_v2   ;;  %445 = vperm.xlu0 %2160, %v289_v3  }
  0xec   : > { %2161 = vset.pattern.permute.xlu1 %v4611_v14  ;;  %2162 = vset.pattern.permute.xlu0 %v4611_v14 }
  0xed   : > { %583 = vperm.xlu1 %2161, %v288_v1   ;;  %587 = vperm.xlu0 %2162, %v289_v3  }
  0xf1   : > { %591 = vperm.xlu1 %2161, %v290_v2   ;;  %2164 = vset.pattern.permute.xlu0 %v2404_v18 }
  0xf2   : > { %873 = vperm.xlu0 %2164, %v289_v3  }
  0xf5   : > { %2163 = vset.pattern.permute.xlu1 %v2404_v18  ;;  %v2727_v18 = vrot.slane %v2064_v54, %v2628_v42 }
  0xf6   : > { %869 = vperm.xlu1 %2163, %v288_v1   ;;  %2166 = vset.pattern.permute.xlu0 %v2405_v19 }
  0xf7   : > { %1015 = vperm.xlu0 %2166, %v289_v3   ;;  %v2065_v3 = vld [vmem:[%s2581_s5 + $0x1] ss:$4 sm:$0xff]  ;;  %4966 = vst [vmem:[#allocation45_spill] sm:$0xff] %v2727_v18 }
  0xfa   : > { %877 = vperm.xlu1 %2163, %v290_v2  }
  0xfb   : > { %2168 = vset.pattern.permute.xlu0 %v2401_v4 }
  0xfe   : > { %2165 = vset.pattern.permute.xlu1 %v2405_v19  ;;  %v2730_v19 = vrot.slane %v2064_v54, %v2630_v43 }
  0xff   : > { %1011 = vperm.xlu1 %2165, %v288_v1   ;;  %v2693_v1 = vrot.slane %v2068_v40, %v2632_v44 }
 0x100   : > { %4967 = vst [vmem:[#allocation46_spill] sm:$0xff] %v2730_v19 }
 0x101   : > { %4956 = vst [vmem:[#allocation35_spill] sm:$0xff] %v2693_v1 }
 0x103   : > { %1019 = vperm.xlu1 %2165, %v290_v2   ;;  %v2696_v2 = vrot.slane %v273_v35, %v2626_v41 }
 0x105   : > { %4957 = vst [vmem:[#allocation36_spill] sm:$0xff] %v2696_v2 }
 0x107   : > { %2167 = vset.pattern.permute.xlu1 %v2401_v4  ;;  %v2069_v4 = vld [vmem:[%s2581_s5 + $0x3] ss:$4 sm:$0xff] }
 0x108   : > { %v313_v10 = vsub.f32 %v2069_v4, %v2065_v3  ;;  %v2745_v26 = vrot.slane %v2069_v4, %v2622_v38  ;;  %v2755_v30 = vrot.slane %v2069_v4, %v2628_v42 }
 0x10a   : > { %4972 = vst [vmem:[#allocation51_spill] sm:$0xff] %v2745_v26  ;;  %4976 = vst [vmem:[#allocation55_spill] sm:$0xff] %v2755_v30 }
 0x14a   : > { %v321_v20 = vpop.permute.xlu1 %320 }
 0x14b   : > { %v329_v21 = vmul.f32 %v321_v20, %v306_v9  ;;  %v309_v9 = vsub.f32 %v2067_v39, %v273_v35  ;;  %v310_v20 = vsub.f32 %v2068_v40, %v2064_v54  ;;  %v2767_v35 = vrot.slane %v2070_v15, %v2618_v36 }
 0x14c   : > { %v2770_v39 = vrot.slane %v2070_v15, %v2620_v37 }
 0x14d   : > { %1346 = vperm.xlu1 %2167, %v329_v21   ;;  %4980 = vst [vmem:[#allocation59_spill] sm:$0xff] %v2767_v35  ;;  %v2772_v40 = vadd.f32 1.0, %v310_v20  ;;  %v2788_v35 = vrot.slane %v2070_v15, %v2630_v43  ;;  %v2794_v20 = vrot.slane %v2065_v3, %v2615_v34 }
 0x14e   : > { %v325_v22 = vpop.permute.xlu1 %324  ;;  %v323_v23 = vpop.permute.xlu0 %322  ;;  %4981 = vst [vmem:[#allocation60_spill] sm:$0xff] %v2770_v39  ;;  %v2791_v39 = vrot.slane %v2070_v15, %v2632_v44 }
 0x14f   : > { %v331_v24 = vmul.f32 %v325_v22, %v308_v11  ;;  %v330_v25 = vmul.f32 %v323_v23, %v307_v13  ;;  %v2713_v11 = vrot.slane %v2064_v54, %v2618_v36  ;;  %v2066_v13 = vld [vmem:[%s2581_s5 + $0x21] ss:$4 sm:$0xff]  ;;  %v2733_v22 = vrot.slane %v2064_v54, %v2632_v44  ;;  %4982 = vst [vmem:[#allocation61_spill] sm:$0xff] %v2772_v40 }
 0x150   : > { %v314_v21 = vsub.f32 %v2070_v15, %v2066_v13  ;;  %v2736_v23 = vrot.slane %v2069_v4, %v2615_v34  ;;  %4987 = vst [vmem:[#allocation66_spill] sm:$0xff] %v2788_v35  ;;  %4988 = vst [vmem:[#allocation67_spill] sm:$0xff] %v2791_v39  ;;  %v2808_v35 = vrot.slane %v2065_v3, %v2626_v41 }
 0x151   : > { %1351 = vperm.xlu0 %2168, %v330_v25   ;;  %1356 = vperm.xlu1 %2167, %v331_v24   ;;  %4962 = vst [vmem:[#allocation41_spill] sm:$0xff] %v2713_v11  ;;  %4968 = vst [vmem:[#allocation47_spill] sm:$0xff] %v2733_v22  ;;  %v2739_v24 = vrot.slane %v2069_v4, %v2618_v36  ;;  %v2742_v25 = vrot.slane %v2069_v4, %v2620_v37 }
 0x152   : > { %v341_v27 = vpop.permute.xlu0 %340  ;;  %v343_v28 = vpop.permute.xlu1 %342  ;;  %4969 = vst [vmem:[#allocation48_spill] sm:$0xff] %v2736_v23  ;;  %v2774_v54 = vadd.f32 1.0, %v314_v21  ;;  %4989 = vst [vmem:[#allocation68_spill] sm:$0xff] %v2794_v20  ;;  %v2814_v20 = vrot.slane %v2065_v3, %v2630_v43 }
 0x153   : > { %vm346_vm4 = vcmp.ne.s32.totalorder %v341_v27, 0  ;;  %vm347_vm5 = vcmp.ne.s32.totalorder %v343_v28, 0  ;;  %4970 = vst [vmem:[#allocation49_spill] sm:$0xff] %v2739_v24  ;;  %4971 = vst [vmem:[#allocation50_spill] sm:$0xff] %v2742_v25  ;;  %v2748_v27 = vrot.slane %v2069_v4, %v2626_v41  ;;  %v2750_v28 = vadd.f32 1.0, %v309_v9 }
 0x154   : > { %vm349_vm6 = vmand %vm334_vm1, %vm346_vm4  ;;  %4983 = vst [vmem:[#allocation62_spill] sm:$0xff] %v2774_v54  ;;  %v2777_v9 = vrot.slane %v2070_v15, %v2622_v38 }
 0x155   : > { %vm350_vm7 = vmand %vm335_vm2, %vm347_vm5  ;;  %v1551_v29 = vsel %vm349_vm6, 1, %v4611_v14  ;;  %4973 = vst [vmem:[#allocation52_spill] sm:$0xff] %v2748_v27 }
 0x156   : > { %v345_v31 = vpop.permute.xlu0 %344  ;;  %1555 = vperm.xlu1 %2167, %v1551_v29   ;;  %v1552_v32 = vsel %vm350_vm7, 1, %v4611_v14  ;;  %4974 = vst [vmem:[#allocation53_spill] sm:$0xff] %v2750_v28  ;;  %v2752_v29 = vadd.f32 1.0, %v313_v10  ;;  %4984 = vst [vmem:[#allocation63_spill] sm:$0xff] %v2777_v9  ;;  %v2780_v10 = vrot.slane %v2070_v15, %v2626_v41  ;;  %v2799_v9 = vrot.slane %v2065_v3, %v2618_v36 }
 0x157   : > { %vm348_vm8 = vcmp.ne.s32.totalorder %v345_v31, 0  ;;  %1558 = vperm.xlu0 %2168, %v1552_v32   ;;  %v2758_v31 = vrot.slane %v2069_v4, %v2630_v43  ;;  %v2761_v32 = vrot.slane %v2069_v4, %v2632_v44  ;;  %4993 = vst [vmem:[#allocation72_spill] sm:$0xff] %v2808_v35  ;;  %4995 = vst [vmem:[#allocation74_spill] sm:$0xff] %v2814_v20 }
 0x158   : > { %vm351_vm9 = vmand %vm336_vm3, %vm348_vm8  ;;  %4975 = vst [vmem:[#allocation54_spill] sm:$0xff] %v2752_v29  ;;  %v332_v21 = vmul.f32 %v2752_v29, %v2750_v28  ;;  %v2817_v29 = vrot.slane %v2065_v3, %v2632_v44  ;;  %v333_v28 = vmul.f32 %v2774_v54, %v2772_v40  ;;  %v2828_v35 = vrot.slane %v2066_v13, %v2620_v37 }
 0x159   : > { %v1553_v33 = vsel %vm351_vm9, 1, %v4611_v14  ;;  %4977 = vst [vmem:[#allocation56_spill] sm:$0xff] %v2758_v31  ;;  %4978 = vst [vmem:[#allocation57_spill] sm:$0xff] %v2761_v32  ;;  %v2785_v14 = vrot.slane %v2070_v15, %v2628_v42  ;;  %v2834_v20 = vrot.slane %v2066_v13, %v2626_v41  ;;  %v2840_v54 = vrot.slane %v2066_v13, %v2630_v43 }
 0x15a   : > { %1561 = vperm.xlu1 %2167, %v1553_v33   ;;  %v2764_v33 = vrot.slane %v2070_v15, %v2615_v34  ;;  %4985 = vst [vmem:[#allocation64_spill] sm:$0xff] %v2780_v10  ;;  %4990 = vst [vmem:[#allocation69_spill] sm:$0xff] %v2799_v9  ;;  %v2802_v10 = vrot.slane %v2065_v3, %v2620_v37  ;;  %v2811_v15 = vrot.slane %v2065_v3, %v2628_v42 }
 0x15b   : > { %4986 = vst [vmem:[#allocation65_spill] sm:$0xff] %v2785_v14  ;;  %v2805_v14 = vrot.slane %v2065_v3, %v2622_v38  ;;  %4996 = vst [vmem:[#allocation75_spill] sm:$0xff] %v2817_v29  ;;  %v2837_v3 = vrot.slane %v2066_v13, %v2628_v42  ;;  %v2843_v40 = vrot.slane %v2066_v13, %v2632_v44 }
 0x15c   : > { %4979 = vst [vmem:[#allocation58_spill] sm:$0xff] %v2764_v33  ;;  %4991 = vst [vmem:[#allocation70_spill] sm:$0xff] %v2802_v10  ;;  %v2822_v10 = vrot.slane %v2066_v13, %v2615_v34 }
 0x15d   : > { %4992 = vst [vmem:[#allocation71_spill] sm:$0xff] %v2805_v14  ;;  %4994 = vst [vmem:[#allocation73_spill] sm:$0xff] %v2811_v15  ;;  %v2825_v14 = vrot.slane %v2066_v13, %v2618_v36  ;;  %v2831_v15 = vrot.slane %v2066_v13, %v2622_v38  ;;  %v2863_v13 = vrot.slane %v332_v21, %v2628_v42 }
 0x15e   : > { %4997 = vst [vmem:[#allocation76_spill] sm:$0xff] %v2822_v10  ;;  %4999 = vst [vmem:[#allocation78_spill] sm:$0xff] %v2828_v35  ;;  %v2849_v35 = vrot.slane %v332_v21, %v2618_v36 }
 0x15f   : > { %4998 = vst [vmem:[#allocation77_spill] sm:$0xff] %v2825_v14  ;;  %5000 = vst [vmem:[#allocation79_spill] sm:$0xff] %v2831_v15  ;;  %v2846_v14 = vrot.slane %v332_v21, %v2615_v34  ;;  %v2852_v15 = vrot.slane %v332_v21, %v2620_v37 }
 0x160   : > { %5001 = vst [vmem:[#allocation80_spill] sm:$0xff] %v2834_v20  ;;  %5002 = vst [vmem:[#allocation81_spill] sm:$0xff] %v2837_v3  ;;  %v2857_v20 = vrot.slane %v332_v21, %v2622_v38  ;;  %v2860_v3 = vrot.slane %v332_v21, %v2626_v41 }
 0x161   : > { %5003 = vst [vmem:[#allocation82_spill] sm:$0xff] %v2840_v54  ;;  %5004 = vst [vmem:[#allocation83_spill] sm:$0xff] %v2843_v40  ;;  %v2866_v40 = vrot.slane %v332_v21, %v2630_v43 }
 0x162   : > { %5005 = vst [vmem:[#allocation84_spill] sm:$0xff] %v2846_v14  ;;  %5006 = vst [vmem:[#allocation85_spill] sm:$0xff] %v2849_v35  ;;  %v2869_v14 = vrot.slane %v332_v21, %v2632_v44  ;;  %v2872_v35 = vrot.slane %v333_v28, %v2615_v34  ;;  %v2890_v21 = vrot.slane %v333_v28, %v2630_v43 }
 0x163   : > { %v2782_v4 = vpop.permute.xlu1 %441  ;;  %5007 = vst [vmem:[#allocation86_spill] sm:$0xff] %v2852_v15  ;;  %5009 = vst [vmem:[#allocation88_spill] sm:$0xff] %v2857_v20  ;;  %v2878_v20 = vrot.slane %v333_v28, %v2620_v37 }
 0x164   : > { %5010 = vst [vmem:[#allocation89_spill] sm:$0xff] %v2860_v3  ;;  %5011 = vst [vmem:[#allocation90_spill] sm:$0xff] %v2863_v13  ;;  %v2881_v3 = vrot.slane %v333_v28, %v2622_v38  ;;  %v2884_v13 = vrot.slane %v333_v28, %v2626_v41  ;;  %v459_v15 = vmin.f32 %v2681_v61, %v2782_v4 }
 0x165   : > { %5012 = vst [vmem:[#allocation91_spill] sm:$0xff] %v2866_v40  ;;  %5013 = vst [vmem:[#allocation92_spill] sm:$0xff] %v2869_v14  ;;  %v2887_v40 = vrot.slane %v333_v28, %v2628_v42  ;;  %v458_v14 = vmin.f32 %v2678_v60, %v2782_v4  ;;  %v460_v43 = vmin.f32 %v2659_v53, %v2782_v4 }
 0x166   : > { %5014 = vst [vmem:[#allocation93_spill] sm:$0xff] %v2872_v35  ;;  %5016 = vst [vmem:[#allocation95_spill] sm:$0xff] %v2878_v20  ;;  %v452_v35 = vmin.f32 %v2638_v46, %v2782_v4  ;;  %v454_v20 = vmin.f32 %v2653_v51, %v2782_v4  ;;  %v463_v41 = vmin.f32 %v2672_v58, %v2782_v4 }
 0x167   : > { %v2854_v10 = vpop.permute.xlu1 %449  ;;  %5017 = vst [vmem:[#allocation96_spill] sm:$0xff] %v2881_v3  ;;  %5018 = vst [vmem:[#allocation97_spill] sm:$0xff] %v2884_v13  ;;  %v2899_v3 = vrot.slane %v333_v28, %v2632_v44  ;;  %v455_v13 = vmin.f32 %v2656_v52, %v2782_v4  ;;  %v2917_v42 = vpop.permute.xlu0 %445  ;;  %v464_v38 = vmin.f32 %v2684_v62, %v2782_v4 }
 0x168   : > { %5008 = vst [vmem:[#allocation87_spill] sm:$0xff] %v2854_v10  ;;  %v2875_v10 = vrot.slane %v333_v28, %v2618_v36  ;;  %5019 = vst [vmem:[#allocation98_spill] sm:$0xff] %v2887_v40  ;;  %v456_v40 = vmin.f32 %v2663_v55, %v2782_v4  ;;  %v461_v28 = vmin.f32 %v2666_v56, %v2782_v4 }
 0x169   : > { %5020 = vst [vmem:[#allocation99_spill] sm:$0xff] %v2890_v21  ;;  %5021 = vst [vmem:[#allocation100_spill] sm:$0xff] %v2899_v3  ;;  %v457_v21 = vmin.f32 %v2675_v59, %v2782_v4  ;;  %v462_v3 = vmin.f32 %v2669_v57, %v2782_v4  ;;  %v465_v37 = vmin.f32 %v2687_v63, %v2782_v4 }
 0x16a   : > { %5015 = vst [vmem:[#allocation94_spill] sm:$0xff] %v2875_v10  ;;  %v453_v10 = vmin.f32 %v2650_v50, %v2782_v4  ;;  %5022 = vst [vmem:[#allocation101_spill] sm:$0xff] %v2917_v42  ;;  %v466_v36 = vmin.f32 %v2690_v0, %v2782_v4  ;;  %v467_v34 = vmin.f32 %v2693_v1, %v2782_v4 }
 0x16c   : > { %v584_v44 = vpop.permute.xlu1 %583 }
 0x16d   : > { %v594_v29 = vmax.f32 %v2635_v45, %v584_v44  ;;  %v595_v53 = vmax.f32 %v2641_v47, %v584_v44  ;;  %v596_v9 = vmax.f32 %v2644_v48, %v584_v44  ;;  %v597_v33 = vmax.f32 %v2647_v49, %v584_v44  ;;  %v3082_v47 = vld [vmem:[%s2575_s30] sm:$0xff] }
 0x16e   : > { %v598_v32 = vmax.f32 %v2696_v2, %v584_v44  ;;  %v599_v4 = vmax.f32 %v2701_v5, %v584_v44  ;;  %v600_v63 = vmax.f32 %v2704_v6, %v584_v44  ;;  %v601_v54 = vmax.f32 %v2707_v7, %v584_v44 }
 0x16f   : > { %v602_v0 = vmax.f32 %v2710_v8, %v584_v44  ;;  %v603_v62 = vmax.f32 %v2713_v11, %v584_v44  ;;  %v604_v58 = vmax.f32 %v2716_v12, %v584_v44  ;;  %v605_v39 = vmax.f32 %v2721_v16, %v584_v44 }
 0x170   : > { %v2964_v57 = vpop.permute.xlu1 %591  ;;  %v607_v1 = vmax.f32 %v2727_v18, %v584_v44  ;;  %v608_v56 = vmax.f32 %v2730_v19, %v584_v44  ;;  %v609_v61 = vmax.f32 %v2733_v22, %v584_v44  ;;  %v642_v60 = vsub.f32 %v452_v35, %v594_v29 }
 0x171   : > { %5023 = vst [vmem:[#allocation102_spill] sm:$0xff] %v2964_v57  ;;  %v606_v57 = vmax.f32 %v2724_v17, %v584_v44  ;;  %v643_v59 = vsub.f32 %v453_v10, %v595_v53  ;;  %v644_v55 = vsub.f32 %v454_v20, %v596_v9  ;;  %v645_v52 = vsub.f32 %v455_v13, %v597_v33  ;;  %v5029_v10 = vld [vmem:[#allocation58_spill] sm:$0xff]  ;;  %v5031_v13 = vld [vmem:[#allocation60_spill] sm:$0xff] }
 0x172   : > { %v646_v51 = vsub.f32 %v456_v40, %v598_v32  ;;  %v647_v50 = vsub.f32 %v457_v21, %v599_v4  ;;  %v648_v42 = vsub.f32 %v458_v14, %v600_v63  ;;  %v649_v46 = vsub.f32 %v459_v15, %v601_v54  ;;  %v5028_v54 = vld [vmem:[#allocation57_spill] sm:$0xff]  ;;  %v5030_v15 = vld [vmem:[#allocation59_spill] sm:$0xff] }
 0x173   : > { %v650_v11 = vsub.f32 %v460_v43, %v602_v0  ;;  %v651_v12 = vsub.f32 %v461_v28, %v603_v62  ;;  %v652_v8 = vsub.f32 %v462_v3, %v604_v58  ;;  %v653_v17 = vsub.f32 %v463_v41, %v605_v39  ;;  %v5032_v4 = vld [vmem:[#allocation63_spill] sm:$0xff] }
 0x174   : > { %v654_v7 = vsub.f32 %v464_v38, %v606_v57  ;;  %v655_v18 = vsub.f32 %v465_v37, %v607_v1  ;;  %v656_v6 = vsub.f32 %v466_v36, %v608_v56  ;;  %v657_v19 = vsub.f32 %v467_v34, %v609_v61  ;;  %v5036_v0 = vld [vmem:[#allocation67_spill] sm:$0xff]  ;;  %v5037_v61 = vld [vmem:[#allocation68_spill] sm:$0xff] }
 0x175   : > { %v2979_v16 = vpop.permute.xlu1 %869  ;;  %v2981_v5 = vadd.f32 1.0, %v642_v60  ;;  %v2983_v44 = vadd.f32 1.0, %v643_v59  ;;  %v2985_v53 = vadd.f32 1.0, %v644_v55  ;;  %v2987_v29 = vadd.f32 1.0, %v645_v52  ;;  %v5038_v59 = vld [vmem:[#allocation69_spill] sm:$0xff]  ;;  %v5039_v55 = vld [vmem:[#allocation70_spill] sm:$0xff] }
 0x176   : > { %v2989_v14 = vadd.f32 1.0, %v646_v51  ;;  %v2991_v43 = vadd.f32 1.0, %v647_v50  ;;  %v2993_v58 = vadd.f32 1.0, %v648_v42  ;;  %v2995_v62 = vadd.f32 1.0, %v649_v46  ;;  %v5040_v42 = vld [vmem:[#allocation71_spill] sm:$0xff] }
 0x177   : > { %v2997_v38 = vadd.f32 1.0, %v650_v11  ;;  %v2999_v36 = vadd.f32 1.0, %v651_v12  ;;  %v3001_v34 = vadd.f32 1.0, %v652_v8  ;;  %v3003_v37 = vadd.f32 1.0, %v653_v17  ;;  %v5033_v12 = vld [vmem:[#allocation64_spill] sm:$0xff]  ;;  %v5034_v8 = vld [vmem:[#allocation65_spill] sm:$0xff] }
 0x178   : > { %v3005_v41 = vadd.f32 1.0, %v654_v7  ;;  %v3007_v52 = vadd.f32 1.0, %v655_v18  ;;  %v3009_v51 = vadd.f32 1.0, %v656_v6  ;;  %v3011_v50 = vadd.f32 1.0, %v657_v19  ;;  %v5035_v6 = vld [vmem:[#allocation66_spill] sm:$0xff] }
 0x179   : > { %v3016_v56 = vpop.permute.xlu1 %877  ;;  %v880_v18 = vmin.f32 %v2736_v23, %v2979_v16  ;;  %v881_v19 = vmin.f32 %v2739_v24, %v2979_v16  ;;  %v882_v32 = vmin.f32 %v2742_v25, %v2979_v16  ;;  %v883_v33 = vmin.f32 %v2745_v26, %v2979_v16 }
 0x17a   : > { %5024 = vst [vmem:[#allocation103_spill] sm:$0xff] %v3007_v52  ;;  %5025 = vst [vmem:[#allocation104_spill] sm:$0xff] %v3009_v51  ;;  %v884_v35 = vmin.f32 %v2748_v27, %v2979_v16  ;;  %v885_v39 = vmin.f32 %v2755_v30, %v2979_v16  ;;  %v886_v40 = vmin.f32 %v2758_v31, %v2979_v16  ;;  %v5046_v27 = vld [vmem:[#allocation77_spill] sm:$0xff]  ;;  %vm271_vm14 = vcmp.gt.f32.partialorder %v3082_v47, 0.5 }
 0x17b   : > { %5026 = vst [vmem:[#allocation105_spill] sm:$0xff] %v3011_v50  ;;  %5027 = vst [vmem:[#allocation106_spill] sm:$0xff] %v3016_v56  ;;  %v887_v9 = vmin.f32 %v5028_v54, %v2979_v16  ;;  %v888_v20 = vmin.f32 %v5029_v10, %v2979_v16  ;;  %v889_v3 = vmin.f32 %v5030_v15, %v2979_v16  ;;  %v5043_v10 = vld [vmem:[#allocation74_spill] sm:$0xff]  ;;  %v5044_v54 = vld [vmem:[#allocation75_spill] sm:$0xff] }
 0x17c   : > { %v890_v21 = vmin.f32 %v5031_v13, %v2979_v16  ;;  %v891_v17 = vmin.f32 %v5032_v4, %v2979_v16  ;;  %v892_v11 = vmin.f32 %v5033_v12, %v2979_v16  ;;  %v893_v7 = vmin.f32 %v5034_v8, %v2979_v16  ;;  %v5041_v4 = vld [vmem:[#allocation72_spill] sm:$0xff]  ;;  %v5042_v12 = vld [vmem:[#allocation73_spill] sm:$0xff] }
 0x17d   : > { %v894_v1 = vmin.f32 %v5035_v6, %v2979_v16  ;;  %v895_v63 = vmin.f32 %v5036_v0, %v2979_v16  ;;  %v5045_v6 = vld [vmem:[#allocation76_spill] sm:$0xff]  ;;  %v5047_v0 = vld [vmem:[#allocation78_spill] sm:$0xff]  ;;  %v3087_v52 = vld [vmem:[%s2575_s30 + $0x8] sm:$0xff] }
 0x17e   : > { %v1012_v28 = vpop.permute.xlu1 %1011  ;;  %vm272_vm15 = vcmp.gt.f32.partialorder %v3087_v52, 0.5  ;;  %v5110_v52 = vld [vmem:[#allocation42_spill] sm:$0xff]  ;;  %v5177_v47 = vld [vmem:[#allocation69_spill] sm:$0xff] }
 0x17f   : > { %v1022_v60 = vmax.f32 %v5037_v61, %v1012_v28  ;;  %v1023_v57 = vmax.f32 %v5038_v59, %v1012_v28  ;;  %v1024_v46 = vmax.f32 %v5039_v55, %v1012_v28  ;;  %v1025_v56 = vmax.f32 %v5040_v42, %v1012_v28  ;;  %v5048_v59 = vld [vmem:[#allocation79_spill] sm:$0xff]  ;;  %v5049_v55 = vld [vmem:[#allocation80_spill] sm:$0xff]  ;;  %v5050_v42 = vld [vmem:[#allocation81_spill] sm:$0xff] }
 0x180   : > { %v1026_v13 = vmax.f32 %v5041_v4, %v1012_v28  ;;  %v1027_v15 = vmax.f32 %v5042_v12, %v1012_v28  ;;  %v1028_v8 = vmax.f32 %v5043_v10, %v1012_v28  ;;  %v1029_v31 = vmax.f32 %v5044_v54, %v1012_v28  ;;  %v5051_v4 = vld [vmem:[#allocation82_spill] sm:$0xff]  ;;  %v5052_v12 = vld [vmem:[#allocation53_spill] sm:$0xff]  ;;  %v5054_v54 = vld [vmem:[#allocation83_spill] sm:$0xff] }
 0x181   : > { %v1030_v30 = vmax.f32 %v5045_v6, %v1012_v28  ;;  %v1031_v16 = vmax.f32 %v5046_v27, %v1012_v28  ;;  %v1032_v61 = vmax.f32 %v5047_v0, %v1012_v28  ;;  %v1033_v26 = vmax.f32 %v5048_v59, %v1012_v28  ;;  %v5053_v10 = vld [vmem:[#allocation54_spill] sm:$0xff] }
 0x182   : > { %v1034_v25 = vmax.f32 %v5049_v55, %v1012_v28  ;;  %v1035_v24 = vmax.f32 %v5050_v42, %v1012_v28  ;;  %v1036_v23 = vmax.f32 %v5051_v4, %v1012_v28  ;;  %vm352_vm10 = vcmp.eq.f32.partialorder %v5052_v12, 1.0  ;;  %v5055_v55 = vld [vmem:[#allocation61_spill] sm:$0xff]  ;;  %v5056_v42 = vld [vmem:[#allocation62_spill] sm:$0xff] }
 0x183   : > { %vm354_vm11 = vcmp.eq.f32.partialorder %v5053_v10, 1.0  ;;  %v1037_v6 = vmax.f32 %v5054_v54, %v1012_v28  ;;  %v1070_v22 = vsub.f32 %v880_v18, %v1022_v60  ;;  %v1071_v27 = vsub.f32 %v881_v19, %v1023_v57 }
 0x184   : > { %v1072_v2 = vsub.f32 %v882_v32, %v1024_v46  ;;  %v1073_v49 = vsub.f32 %v883_v33, %v1025_v56  ;;  %v1074_v0 = vsub.f32 %v884_v35, %v1026_v13  ;;  %v1075_v48 = vsub.f32 %v885_v39, %v1027_v15  ;;  %vm3095_vm0 = vmand %vm352_vm10, %vm354_vm11 }
 0x185   : > { %v1076_v59 = vsub.f32 %v886_v40, %v1028_v8  ;;  %vm353_vm12 = vcmp.eq.f32.partialorder %v5055_v55, 1.0  ;;  %vm355_vm13 = vcmp.eq.f32.partialorder %v5056_v42, 1.0  ;;  %v1077_v4 = vsub.f32 %v887_v9, %v1029_v31 }
 0x186   : > { %v1078_v45 = vsub.f32 %v888_v20, %v1030_v30  ;;  %v1079_v50 = vsub.f32 %v889_v3, %v1031_v16  ;;  %v1080_v51 = vsub.f32 %v890_v21, %v1032_v61  ;;  %v1081_v28 = vsub.f32 %v891_v17, %v1033_v26  ;;  %vm357_vm1 = vmand %vm353_vm12, %vm355_vm13 }
 0x187   : > { %v1082_v60 = vsub.f32 %v892_v11, %v1034_v25  ;;  %v1083_v57 = vsub.f32 %v893_v7, %v1035_v24  ;;  %v1084_v46 = vsub.f32 %v894_v1, %v1036_v23  ;;  %v1085_v56 = vsub.f32 %v895_v63, %v1037_v6 }
 0x188   : > { %v1118_v18 = vadd.f32 1.0, %v1070_v22  ;;  %v1119_v19 = vadd.f32 1.0, %v1071_v27  ;;  %v1120_v8 = vadd.f32 1.0, %v1072_v2  ;;  %v1121_v32 = vadd.f32 1.0, %v1073_v49 }
 0x189   : > { %v1122_v33 = vadd.f32 1.0, %v1074_v0  ;;  %v1123_v35 = vadd.f32 1.0, %v1075_v48  ;;  %v1124_v39 = vadd.f32 1.0, %v1076_v59  ;;  %v1125_v30 = vadd.f32 1.0, %v1077_v4 }
 0x18a   : > { %v1126_v31 = vadd.f32 1.0, %v1078_v45  ;;  %v1127_v61 = vadd.f32 1.0, %v1079_v50  ;;  %v1128_v40 = vadd.f32 1.0, %v1080_v51  ;;  %v1129_v26 = vadd.f32 1.0, %v1081_v28 }
 0x18b   : > { %v1130_v25 = vadd.f32 1.0, %v1082_v60  ;;  %v1131_v24 = vadd.f32 1.0, %v1083_v57  ;;  %v1132_v23 = vadd.f32 1.0, %v1084_v46  ;;  %v1133_v63 = vadd.f32 1.0, %v1085_v56 }
 0x18c   : > { %v1166_v22 = vmax.f32 %v1118_v18, 0.0  ;;  %v1167_v27 = vmax.f32 %v1119_v19, 0.0  ;;  %v1168_v2 = vmax.f32 %v1120_v8, 0.0  ;;  %v1169_v1 = vmax.f32 %v1121_v32, 0.0 }
 0x18d   : > { %v1170_v6 = vmax.f32 %v1122_v33, 0.0  ;;  %v1171_v49 = vmax.f32 %v1123_v35, 0.0  ;;  %v1172_v0 = vmax.f32 %v1124_v39, 0.0  ;;  %v1173_v48 = vmax.f32 %v1125_v30, 0.0  ;;  %v5083_v39 = vld [vmem:[#allocation104_spill] sm:$0xff] }
 0x18e   : > { %v1174_v59 = vmax.f32 %v1126_v31, 0.0  ;;  %v1175_v7 = vmax.f32 %v1127_v61, 0.0  ;;  %v1176_v11 = vmax.f32 %v1128_v40, 0.0  ;;  %v1177_v51 = vmax.f32 %v1129_v26, 0.0  ;;  %v5086_v61 = vld [vmem:[#allocation105_spill] sm:$0xff] }
 0x18f   : > { %v1178_v50 = vmax.f32 %v1130_v25, 0.0  ;;  %v1179_v17 = vmax.f32 %v1131_v24, 0.0  ;;  %v1180_v9 = vmax.f32 %v1132_v23, 0.0  ;;  %v1181_v20 = vmax.f32 %v1133_v63, 0.0  ;;  %v5116_v23 = vld [vmem:[#allocation17_spill] sm:$0xff]  ;;  %v5179_v24 = vld [vmem:[#allocation71_spill] sm:$0xff] }
 0x190   : > { %v5059_v15 = vmax.f32 %v2981_v5, 0.0  ;;  %v5060_v13 = vmax.f32 %v2983_v44, 0.0  ;;  %v5061_v10 = vmax.f32 %v2985_v53, 0.0  ;;  %v5062_v4 = vmax.f32 %v2987_v29, 0.0  ;;  %v5117_v25 = vld [vmem:[#allocation101_spill] sm:$0xff] }
 0x191   : > { %v5063_v5 = vmax.f32 %v2989_v14, 0.0  ;;  %v5064_v44 = vmax.f32 %v2991_v43, 0.0  ;;  %v5065_v53 = vmax.f32 %v2993_v58, 0.0  ;;  %v5066_v42 = vmax.f32 %v2995_v62, 0.0 }
 0x192   : > { %v3101_v3 = vmul.f32 %v1166_v22, %v5059_v15  ;;  %v3105_v21 = vmul.f32 %v1167_v27, %v5060_v13  ;;  %v3109_v12 = vmul.f32 %v1168_v2, %v5061_v10  ;;  %v3117_v16 = vmul.f32 %v1169_v1, %v5062_v4  ;;  %v5101_v15 = vld [vmem:[#allocation18_spill] sm:$0xff]  ;;  %v5115_v1 = vld [vmem:[#allocation47_spill] sm:$0xff] }
 0x193   : > { %v3121_v28 = vmul.f32 %v1170_v6, %v5063_v5  ;;  %v3125_v60 = vmul.f32 %v1171_v49, %v5064_v44  ;;  %v3129_v57 = vmul.f32 %v1172_v0, %v5065_v53  ;;  %v3133_v55 = vmul.f32 %v1173_v48, %v5066_v42  ;;  %v5109_v53 = vld [vmem:[#allocation41_spill] sm:$0xff]  ;;  %v5111_v5 = vld [vmem:[#allocation43_spill] sm:$0xff]  ;;  %v5114_v0 = vld [vmem:[#allocation46_spill] sm:$0xff] }
 0x194   : > { %v5068_v29 = vmax.f32 %v2997_v38, 0.0  ;;  %v5070_v14 = vmax.f32 %v2999_v36, 0.0  ;;  %v5072_v18 = vmov 0   ;;  %v5074_v58 = vmax.f32 %v3001_v34, 0.0  ;;  %v5080_v36 = vld [vmem:[#allocation103_spill] sm:$0xff]  ;;  %v5176_v49 = vld [vmem:[#allocation68_spill] sm:$0xff] }
 0x195   : > { %5067 = vst [vmem:[#allocation53_spill] sm:$0xff] %v3133_v55  ;;  %v3146_v43 = vsel %vm3095_vm0, 1, %v5072_v18  ;;  %v5076_v62 = vmax.f32 %v3003_v37, 0.0  ;;  %v5078_v38 = vmax.f32 %v3005_v41, 0.0  ;;  %v5081_v33 = vmax.f32 %v5080_v36, 0.0  ;;  %v5105_v36 = vld [vmem:[#allocation37_spill] sm:$0xff] }
 0x196   : > { %v3137_v46 = vmul.f32 %v1174_v59, %v5068_v29  ;;  %v3141_v56 = vmul.f32 %v1175_v7, %v5070_v14  ;;  %5073 = vst [vmem:[#allocation62_spill] sm:$0xff] %v3146_v43  ;;  %v3150_v19 = vmul.f32 %v1176_v11, %v5074_v58  ;;  %v5084_v30 = vmax.f32 %v5083_v39, 0.0  ;;  %v5102_v58 = vld [vmem:[#allocation19_spill] sm:$0xff]  ;;  %v5108_v39 = vld [vmem:[#allocation40_spill] sm:$0xff]  ;;  %v5113_v59 = vld [vmem:[#allocation45_spill] sm:$0xff] }
 0x197   : > { %v3154_v8 = vmul.f32 %v1177_v51, %v5076_v62  ;;  %v3158_v32 = vmul.f32 %v1178_v50, %v5078_v38  ;;  %v3162_v35 = vmul.f32 %v1179_v17, %v5081_v33  ;;  %v5087_v34 = vmax.f32 %v5086_v61, 0.0  ;;  %v588_v62 = vpop.permute.xlu0 %587  ;;  %v5100_v61 = vld [vmem:[#allocation16_spill] sm:$0xff]  ;;  %v5106_v51 = vld [vmem:[#allocation38_spill] sm:$0xff]  ;;  %v5107_v29 = vld [vmem:[#allocation39_spill] sm:$0xff] }
 0x198   : > { %5069 = vst [vmem:[#allocation54_spill] sm:$0xff] %v3137_v46  ;;  %5071 = vst [vmem:[#allocation61_spill] sm:$0xff] %v3141_v56  ;;  %v3166_v31 = vmul.f32 %v1180_v9, %v5084_v30  ;;  %v3173_v37 = vsel %vm357_vm1, 1, %v5072_v18  ;;  %v3178_v41 = vsel %vm271_vm14, 1, %v5072_v18  ;;  %v3189_v27 = vsel %vm272_vm15, 1, %v5072_v18  ;;  %v5103_v17 = vld [vmem:[#allocation20_spill] sm:$0xff] }
 0x199   : > { %5075 = vst [vmem:[#allocation107_spill] sm:$0xff] %v3150_v19  ;;  %5077 = vst [vmem:[#allocation108_spill] sm:$0xff] %v3154_v8  ;;  %v3170_v40 = vmul.f32 %v1181_v20, %v5087_v34  ;;  %v610_v34 = vmax.f32 %v5100_v61, %v588_v62  ;;  %v611_v20 = vmax.f32 %v5101_v15, %v588_v62  ;;  %v5104_v18 = vld [vmem:[#allocation36_spill] sm:$0xff]  ;;  %v5182_v43 = vld [vmem:[#allocation74_spill] sm:$0xff] }
 0x19a   : > { %5079 = vst [vmem:[#allocation109_spill] sm:$0xff] %v3158_v32  ;;  %5082 = vst [vmem:[#allocation103_spill] sm:$0xff] %v3162_v35  ;;  %v612_v9 = vmax.f32 %v5102_v58, %v588_v62  ;;  %v613_v38 = vmax.f32 %v5103_v17, %v588_v62  ;;  %v614_v50 = vmax.f32 %v5104_v18, %v588_v62  ;;  %v5112_v11 = vld [vmem:[#allocation44_spill] sm:$0xff]  ;;  %v5121_v18 = vld [vmem:[#allocation22_spill] sm:$0xff] }
 0x19b   : > { %5085 = vst [vmem:[#allocation104_spill] sm:$0xff] %v3166_v31  ;;  %5088 = vst [vmem:[#allocation105_spill] sm:$0xff] %v3170_v40  ;;  %v615_v14 = vmax.f32 %v5105_v36, %v588_v62  ;;  %v616_v33 = vmax.f32 %v5106_v51, %v588_v62  ;;  %v617_v42 = vmax.f32 %v5107_v29, %v588_v62  ;;  %v5119_v36 = vld [vmem:[#allocation21_spill] sm:$0xff]  ;;  %v5123_v17 = vld [vmem:[#allocation23_spill] sm:$0xff] }
 0x19c   : > { %5089 = vst [vmem:[#allocation110_spill] sm:$0xff] %v3173_v37  ;;  %5090 = vst [vmem:[#allocation111_spill] sm:$0xff] %v3178_v41  ;;  %v618_v45 = vmax.f32 %v5108_v39, %v588_v62  ;;  %v619_v30 = vmax.f32 %v5109_v53, %v588_v62  ;;  %v620_v44 = vmax.f32 %v5110_v52, %v588_v62  ;;  %v5125_v58 = vld [vmem:[#allocation25_spill] sm:$0xff]  ;;  %v5187_v32 = vld [vmem:[#allocation79_spill] sm:$0xff] }
 0x19d   : > { %5094 = vst [vmem:[#allocation112_spill] sm:$0xff] %v3189_v27  ;;  %v621_v10 = vmax.f32 %v5111_v5, %v588_v62  ;;  %v622_v4 = vmax.f32 %v5112_v11, %v588_v62  ;;  %v623_v13 = vmax.f32 %v5113_v59, %v588_v62  ;;  %v624_v6 = vmax.f32 %v5114_v0, %v588_v62  ;;  %v5185_v35 = vld [vmem:[#allocation77_spill] sm:$0xff]  ;;  %v5188_v8 = vld [vmem:[#allocation80_spill] sm:$0xff] }
 0x19e   : > { %v625_v22 = vmax.f32 %v5115_v1, %v588_v62  ;;  %v5118_v51 = vmin.f32 %v5116_v23, %v5117_v25  ;;  %v5120_v39 = vmin.f32 %v5119_v36, %v5117_v25  ;;  %v5122_v52 = vmin.f32 %v5121_v18, %v5117_v25  ;;  %v5127_v1 = vld [vmem:[#allocation29_spill] sm:$0xff] }
 0x19f   : > { %v5124_v11 = vmin.f32 %v5123_v17, %v5117_v25  ;;  %v5126_v0 = vmin.f32 %v5125_v58, %v5117_v25  ;;  %v5128_v15 = vmin.f32 %v5127_v1, %v5117_v25 }
 0x1a0   : > { %v658_v29 = vsub.f32 %v5118_v51, %v610_v34  ;;  %v659_v53 = vsub.f32 %v5120_v39, %v611_v20  ;;  %v660_v5 = vsub.f32 %v5122_v52, %v612_v9  ;;  %v5129_v34 = vld [vmem:[#allocation30_spill] sm:$0xff]  ;;  %v5131_v39 = vld [vmem:[#allocation31_spill] sm:$0xff]  ;;  %v5133_v9 = vld [vmem:[#allocation24_spill] sm:$0xff] }
 0x1a1   : > { %v661_v59 = vsub.f32 %v5124_v11, %v613_v38  ;;  %v662_v62 = vsub.f32 %v5126_v0, %v614_v50  ;;  %v663_v51 = vsub.f32 %v5128_v15, %v615_v14  ;;  %v5130_v61 = vmin.f32 %v5129_v34, %v5117_v25  ;;  %v5135_v38 = vld [vmem:[#allocation26_spill] sm:$0xff]  ;;  %v5137_v50 = vld [vmem:[#allocation27_spill] sm:$0xff]  ;;  %v5139_v14 = vld [vmem:[#allocation28_spill] sm:$0xff] }
 0x1a2   : > { %v5132_v18 = vmin.f32 %v5131_v39, %v5117_v25  ;;  %v5134_v17 = vmin.f32 %v5133_v9, %v5117_v25  ;;  %v5136_v58 = vmin.f32 %v5135_v38, %v5117_v25  ;;  %v5138_v1 = vmin.f32 %v5137_v50, %v5117_v25 }
 0x1a3   : > { %v664_v20 = vsub.f32 %v5130_v61, %v616_v33  ;;  %v5140_v34 = vmin.f32 %v5139_v14, %v5117_v25  ;;  %v5141_v61 = vld [vmem:[#allocation32_spill] sm:$0xff]  ;;  %v3315_v14 = vadd.f32 1.0, %v659_v53  ;;  %v3335_v53 = vpop.permute.xlu0 %873 }
 0x1a4   : > { %v665_v52 = vsub.f32 %v5132_v18, %v617_v42  ;;  %v666_v11 = vsub.f32 %v5134_v17, %v618_v45  ;;  %v667_v0 = vsub.f32 %v5136_v58, %v619_v30  ;;  %v668_v15 = vsub.f32 %v5138_v1, %v620_v44  ;;  %v5143_v18 = vld [vmem:[#allocation33_spill] sm:$0xff]  ;;  %v5145_v17 = vld [vmem:[#allocation34_spill] sm:$0xff]  ;;  %v5147_v30 = vld [vmem:[#allocation35_spill] sm:$0xff] }
 0x1a5   : > { %v669_v33 = vsub.f32 %v5140_v34, %v621_v10  ;;  %v5142_v39 = vmin.f32 %v5141_v61, %v5117_v25  ;;  %v5144_v9 = vmin.f32 %v5143_v18, %v5117_v25  ;;  %v5146_v38 = vmin.f32 %v5145_v17, %v5117_v25 }
 0x1a6   : > { %v5148_v50 = vmin.f32 %v5147_v30, %v5117_v25  ;;  %v3313_v44 = vadd.f32 1.0, %v658_v29  ;;  %v3317_v10 = vadd.f32 1.0, %v660_v5  ;;  %v3319_v34 = vadd.f32 1.0, %v661_v59 }
 0x1a7   : > { %v670_v42 = vsub.f32 %v5142_v39, %v622_v4  ;;  %v671_v45 = vsub.f32 %v5144_v9, %v623_v13  ;;  %v672_v58 = vsub.f32 %v5146_v38, %v624_v6  ;;  %v3321_v4 = vadd.f32 1.0, %v662_v62 }
 0x1a8   : > { %v673_v1 = vsub.f32 %v5148_v50, %v625_v22  ;;  %v3323_v39 = vadd.f32 1.0, %v663_v51  ;;  %v3325_v13 = vadd.f32 1.0, %v664_v20  ;;  %v3327_v9 = vadd.f32 1.0, %v665_v52  ;;  %v5166_v50 = vld [vmem:[#allocation56_spill] sm:$0xff] }
 0x1a9   : > { %v3329_v6 = vadd.f32 1.0, %v666_v11  ;;  %v3331_v25 = vadd.f32 1.0, %v667_v0  ;;  %v3333_v22 = vadd.f32 1.0, %v668_v15  ;;  %v3337_v5 = vadd.f32 1.0, %v669_v33  ;;  %v5160_v15 = vld [vmem:[#allocation48_spill] sm:$0xff]  ;;  %v5161_v33 = vld [vmem:[#allocation49_spill] sm:$0xff] }
 0x1aa   : > { %5149 = vst [vmem:[#allocation101_spill] sm:$0xff] %v3323_v39  ;;  %5150 = vst [vmem:[#allocation113_spill] sm:$0xff] %v3325_v13  ;;  %v3339_v59 = vadd.f32 1.0, %v670_v42  ;;  %v3341_v29 = vadd.f32 1.0, %v671_v45  ;;  %v3343_v62 = vadd.f32 1.0, %v672_v58  ;;  %v3345_v51 = vadd.f32 1.0, %v673_v1  ;;  %v1016_v58 = vpop.permute.xlu0 %1015 }
 0x1ab   : > { %5151 = vst [vmem:[#allocation114_spill] sm:$0xff] %v3327_v9  ;;  %5152 = vst [vmem:[#allocation115_spill] sm:$0xff] %v3329_v6  ;;  %v896_v52 = vmin.f32 %v5160_v15, %v3335_v53  ;;  %v897_v42 = vmin.f32 %v5161_v33, %v3335_v53  ;;  %v5162_v45 = vld [vmem:[#allocation50_spill] sm:$0xff]  ;;  %v5163_v1 = vld [vmem:[#allocation51_spill] sm:$0xff]  ;;  %v902_v18 = vmin.f32 %v5166_v50, %v3335_v53 }
 0x1ac   : > { %5153 = vst [vmem:[#allocation116_spill] sm:$0xff] %v3331_v25  ;;  %5154 = vst [vmem:[#allocation117_spill] sm:$0xff] %v3333_v22  ;;  %v898_v20 = vmin.f32 %v5162_v45, %v3335_v53  ;;  %v899_v30 = vmin.f32 %v5163_v1, %v3335_v53  ;;  %v5164_v11 = vld [vmem:[#allocation52_spill] sm:$0xff]  ;;  %v5165_v0 = vld [vmem:[#allocation55_spill] sm:$0xff]  ;;  %v1039_v2 = vmax.f32 %v5177_v47, %v1016_v58 }
 0x1ad   : > { %5155 = vst [vmem:[#allocation118_spill] sm:$0xff] %v3337_v5  ;;  %5156 = vst [vmem:[#allocation119_spill] sm:$0xff] %v3339_v59  ;;  %v900_v38 = vmin.f32 %v5164_v11, %v3335_v53  ;;  %v901_v17 = vmin.f32 %v5165_v0, %v3335_v53  ;;  %v5167_v15 = vld [vmem:[#allocation57_spill] sm:$0xff]  ;;  %v5168_v33 = vld [vmem:[#allocation58_spill] sm:$0xff]  ;;  %v1049_v47 = vmax.f32 %v5187_v32, %v1016_v58  ;;  %v3411_v32 = vpop.permute.xlu1 %1019 }
 0x1ae   : > { %5157 = vst [vmem:[#allocation120_spill] sm:$0xff] %v3341_v29  ;;  %5158 = vst [vmem:[#allocation121_spill] sm:$0xff] %v3343_v62  ;;  %v903_v61 = vmin.f32 %v5167_v15, %v3335_v53  ;;  %v904_v36 = vmin.f32 %v5168_v33, %v3335_v53  ;;  %v5169_v45 = vld [vmem:[#allocation59_spill] sm:$0xff]  ;;  %v5170_v1 = vld [vmem:[#allocation60_spill] sm:$0xff] }
 0x1af   : > { %5159 = vst [vmem:[#allocation122_spill] sm:$0xff] %v3345_v51  ;;  %v905_v23 = vmin.f32 %v5169_v45, %v3335_v53  ;;  %v906_v51 = vmin.f32 %v5170_v1, %v3335_v53  ;;  %v5171_v11 = vld [vmem:[#allocation63_spill] sm:$0xff]  ;;  %v5172_v0 = vld [vmem:[#allocation64_spill] sm:$0xff]  ;;  %v5173_v50 = vld [vmem:[#allocation65_spill] sm:$0xff]  ;;  %v1038_v45 = vmax.f32 %v5176_v49, %v1016_v58 }
 0x1b0   : > { %v907_v27 = vmin.f32 %v5171_v11, %v3335_v53  ;;  %v908_v37 = vmin.f32 %v5172_v0, %v3335_v53  ;;  %v909_v7 = vmin.f32 %v5173_v50, %v3335_v53  ;;  %v5174_v15 = vld [vmem:[#allocation66_spill] sm:$0xff]  ;;  %v5175_v33 = vld [vmem:[#allocation67_spill] sm:$0xff]  ;;  %v1041_v11 = vmax.f32 %v5179_v24, %v1016_v58  ;;  %v5180_v62 = vld [vmem:[#allocation72_spill] sm:$0xff]  ;;  %5191 = vst [vmem:[#allocation123_spill] sm:$0xff] %v3411_v32 }
 0x1b1   : > { %v910_v48 = vmin.f32 %v5174_v15, %v3335_v53  ;;  %v911_v41 = vmin.f32 %v5175_v33, %v3335_v53  ;;  %v5178_v1 = vld [vmem:[#allocation70_spill] sm:$0xff]  ;;  %v1042_v29 = vmax.f32 %v5180_v62, %v1016_v58  ;;  %v5181_v0 = vld [vmem:[#allocation73_spill] sm:$0xff]  ;;  %v1044_v50 = vmax.f32 %v5182_v43, %v1016_v58  ;;  %v5183_v59 = vld [vmem:[#allocation75_spill] sm:$0xff] }
 0x1b2   : > { %v1040_v63 = vmax.f32 %v5178_v1, %v1016_v58  ;;  %v1043_v26 = vmax.f32 %v5181_v0, %v1016_v58  ;;  %v1045_v40 = vmax.f32 %v5183_v59, %v1016_v58  ;;  %v5184_v15 = vld [vmem:[#allocation76_spill] sm:$0xff]  ;;  %v1047_v53 = vmax.f32 %v5185_v35, %v1016_v58  ;;  %v5186_v33 = vld [vmem:[#allocation78_spill] sm:$0xff]  ;;  %v5189_v5 = vld [vmem:[#allocation81_spill] sm:$0xff] }
 0x1b3   : > { %v1046_v31 = vmax.f32 %v5184_v15, %v1016_v58  ;;  %v1048_v49 = vmax.f32 %v5186_v33, %v1016_v58  ;;  %v1050_v1 = vmax.f32 %v5188_v8, %v1016_v58  ;;  %v1051_v24 = vmax.f32 %v5189_v5, %v1016_v58  ;;  %v5190_v22 = vld [vmem:[#allocation82_spill] sm:$0xff] }
 0x1b4   : > { %v1052_v62 = vmax.f32 %v5190_v22, %v1016_v58  ;;  %v1053_v0 = vmax.f32 %v5054_v54, %v1016_v58  ;;  %v1086_v25 = vsub.f32 %v896_v52, %v1038_v45  ;;  %v1087_v43 = vsub.f32 %v897_v42, %v1039_v2  ;;  %v5228_v54 = vld [vmem:[#allocation115_spill] sm:$0xff] }
 0x1b5   : > { %v1088_v6 = vsub.f32 %v898_v20, %v1040_v63  ;;  %v1089_v59 = vsub.f32 %v899_v30, %v1041_v11  ;;  %v1090_v9 = vsub.f32 %v900_v38, %v1042_v29  ;;  %v1091_v15 = vsub.f32 %v901_v17, %v1043_v26  ;;  %v5198_v11 = vld [vmem:[#allocation90_spill] sm:$0xff] }
 0x1b6   : > { %v1092_v19 = vsub.f32 %v902_v18, %v1044_v50  ;;  %v1093_v35 = vsub.f32 %v903_v61, %v1045_v40  ;;  %v1094_v56 = vsub.f32 %v904_v36, %v1046_v31  ;;  %v1095_v33 = vsub.f32 %v905_v23, %v1047_v53  ;;  %v5195_v18 = vld [vmem:[#allocation86_spill] sm:$0xff] }
 0x1b7   : > { %v1096_v46 = vsub.f32 %v906_v51, %v1048_v49  ;;  %v1097_v8 = vsub.f32 %v907_v27, %v1049_v47  ;;  %v1098_v13 = vsub.f32 %v908_v37, %v1050_v1  ;;  %v1099_v5 = vsub.f32 %v909_v7, %v1051_v24  ;;  %v5192_v47 = vld [vmem:[#allocation84_spill] sm:$0xff]  ;;  %v5223_v1 = vld [vmem:[#allocation61_spill] sm:$0xff] }
 0x1b8   : > { %v1100_v55 = vsub.f32 %v910_v48, %v1052_v62  ;;  %v1101_v22 = vsub.f32 %v911_v41, %v1053_v0  ;;  %v1134_v39 = vadd.f32 1.0, %v1086_v25  ;;  %v1135_v58 = vadd.f32 1.0, %v1087_v43  ;;  %v5194_v48 = vld [vmem:[#allocation85_spill] sm:$0xff] }
 0x1b9   : > { %v1136_v52 = vadd.f32 1.0, %v1088_v6  ;;  %v1137_v2 = vadd.f32 1.0, %v1089_v59  ;;  %v1138_v63 = vadd.f32 1.0, %v1090_v9  ;;  %v1139_v30 = vadd.f32 1.0, %v1091_v15  ;;  %v5196_v6 = vld [vmem:[#allocation88_spill] sm:$0xff] }
 0x1ba   : > { %v1140_v29 = vadd.f32 1.0, %v1092_v19  ;;  %v3413_v26 = vadd.f32 1.0, %v1093_v35  ;;  %v3415_v40 = vadd.f32 1.0, %v1094_v56  ;;  %v3417_v31 = vadd.f32 1.0, %v1095_v33  ;;  %v5199_v33 = vld [vmem:[#allocation91_spill] sm:$0xff] }
 0x1bb   : > { %v3419_v23 = vadd.f32 1.0, %v1096_v46  ;;  %v3421_v37 = vadd.f32 1.0, %v1097_v8  ;;  %v3423_v24 = vadd.f32 1.0, %v1098_v13  ;;  %v3425_v41 = vadd.f32 1.0, %v1099_v5  ;;  %v5197_v5 = vld [vmem:[#allocation89_spill] sm:$0xff] }
 0x1bc   : > { %v3427_v43 = vadd.f32 1.0, %v1100_v55  ;;  %v3430_v19 = vadd.f32 1.0, %v1101_v22  ;;  %v1182_v35 = vmax.f32 %v1134_v39, 0.0  ;;  %v1183_v56 = vmax.f32 %v1135_v58, 0.0 }
 0x1bd   : > { %v1184_v36 = vmax.f32 %v1136_v52, 0.0  ;;  %v1185_v46 = vmax.f32 %v1137_v2, 0.0  ;;  %v1186_v61 = vmax.f32 %v1138_v63, 0.0  ;;  %v1187_v17 = vmax.f32 %v1139_v30, 0.0  ;;  %v5201_v52 = vld [vmem:[#allocation92_spill] sm:$0xff] }
 0x1be   : > { %5193 = vst [vmem:[#allocation124_spill] sm:$0xff] %v3430_v19  ;;  %v1188_v13 = vmax.f32 %v1140_v29, 0.0  ;;  %v1189_v9 = vmax.f32 %v3413_v26, 0.0  ;;  %v1190_v25 = vmax.f32 %v3415_v40, 0.0  ;;  %v1191_v22 = vmax.f32 %v3417_v31, 0.0  ;;  %v5204_v31 = vld [vmem:[#allocation93_spill] sm:$0xff] }
 0x1bf   : > { %v1192_v39 = vmax.f32 %v3419_v23, 0.0  ;;  %v1193_v51 = vmax.f32 %v3421_v37, 0.0  ;;  %v1194_v20 = vmax.f32 %v3423_v24, 0.0  ;;  %v1195_v50 = vmax.f32 %v3425_v41, 0.0  ;;  %v5231_v19 = vld [vmem:[#allocation116_spill] sm:$0xff] }
 0x1c0   : > { %v1196_v15 = vmax.f32 %v3427_v43, 0.0  ;;  %v5200_v53 = vmax.f32 %v3313_v44, 0.0  ;;  %v5202_v30 = vmax.f32 %v3315_v14, 0.0  ;;  %v5203_v26 = vmax.f32 %v3317_v10, 0.0  ;;  %v5207_v43 = vld [vmem:[#allocation94_spill] sm:$0xff] }
 0x1c1   : > { %v5205_v44 = vmax.f32 %v3319_v34, 0.0  ;;  %v5208_v10 = vmax.f32 %v3321_v4, 0.0  ;;  %v5218_v4 = vld [vmem:[#allocation97_spill] sm:$0xff]  ;;  %v5229_v32 = vmax.f32 %v5228_v54, 0.0  ;;  %v5241_v54 = vld [vmem:[#allocation108_spill] sm:$0xff] }
 0x1c2   : > { %v3452_v58 = vmul.f32 %v1182_v35, %v5200_v53  ;;  %v3458_v29 = vmul.f32 %v1183_v56, %v5202_v30  ;;  %v3462_v40 = vmul.f32 %v1184_v36, %v5203_v26  ;;  %v5210_v56 = vld [vmem:[#allocation95_spill] sm:$0xff]  ;;  %v5219_v26 = vld [vmem:[#allocation98_spill] sm:$0xff] }
 0x1c3   : > { %v3468_v24 = vmul.f32 %v1185_v46, %v5205_v44  ;;  %v3476_v35 = vmul.f32 %v1186_v61, %v5208_v10  ;;  %v5220_v10 = vld [vmem:[#allocation54_spill] sm:$0xff] }
 0x1c5   : > { %5209 = vst [vmem:[#allocation126_spill] sm:$0xff] %v3476_v35 }
 0x1cc   : > { %v1347_v27 = vpop.permute.xlu1 %1346 }
 0x1cd   : > { %v1359_v49 = vadd.f32 %v1347_v27, %v5192_v47  ;;  %v1360_v7 = vadd.f32 %v1347_v27, %v5194_v48  ;;  %v1361_v8 = vadd.f32 %v1347_v27, %v5195_v18  ;;  %v1362_v55 = vadd.f32 %v1347_v27, %v5196_v6 }
 0x1ce   : > { %v1363_v59 = vadd.f32 %v1347_v27, %v5197_v5  ;;  %v1364_v38 = vadd.f32 %v1347_v27, %v5198_v11  ;;  %v1365_v42 = vadd.f32 %v1347_v27, %v5199_v33  ;;  %v1366_v2 = vadd.f32 %v1347_v27, %v5201_v52 }
 0x1cf   : > { %v1407_v62 = vsub.f32 %v1359_v49, %v3101_v3  ;;  %v1408_v0 = vsub.f32 %v1360_v7, %v3105_v21  ;;  %v1409_v45 = vsub.f32 %v1361_v8, %v3109_v12  ;;  %v1410_v63 = vsub.f32 %v1362_v55, %v3117_v16  ;;  %v5211_v8 = vld [vmem:[#allocation101_spill] sm:$0xff]  ;;  %v5213_v55 = vld [vmem:[#allocation96_spill] sm:$0xff] }
 0x1d0   : > { %v1367_v23 = vadd.f32 %v1347_v27, %v5204_v31  ;;  %v1411_v37 = vsub.f32 %v1363_v59, %v3121_v28  ;;  %v3470_v41 = vpop.permute.xlu1 %1356  ;;  %v1368_v49 = vadd.f32 %v1347_v27, %v5207_v43  ;;  %v1412_v14 = vsub.f32 %v1364_v38, %v3125_v60  ;;  %v5215_v38 = vld [vmem:[#allocation113_spill] sm:$0xff] }
 0x1d1   : > { %2169 = vrcp.f32 %v1407_v62  ;;  %5206 = vst [vmem:[#allocation125_spill] sm:$0xff] %v3470_v41  ;;  %v1369_v7 = vadd.f32 %v1347_v27, %v5210_v56  ;;  %v1413_v36 = vsub.f32 %v1365_v42, %v3129_v57  ;;  %v5212_v34 = vmax.f32 %v5211_v8, 0.0  ;;  %v5214_v62 = vld [vmem:[#allocation53_spill] sm:$0xff] }
 0x1d2   : > { %2171 = vrcp.f32 %v1408_v0  ;;  %v1370_v59 = vadd.f32 %v1347_v27, %v5213_v55  ;;  %v1414_v53 = vsub.f32 %v1366_v2, %v5214_v62  ;;  %v5216_v0 = vmax.f32 %v5215_v38, 0.0 }
 0x1d3   : > { %2173 = vrcp.f32 %v1409_v45  ;;  %v3482_v46 = vmul.f32 %v1187_v17, %v5212_v34  ;;  %v1371_v61 = vadd.f32 %v1347_v27, %v5218_v4  ;;  %v1372_v44 = vadd.f32 %v1347_v27, %v5219_v26  ;;  %v5221_v45 = vld [vmem:[#allocation99_spill] sm:$0xff]  ;;  %v5222_v17 = vld [vmem:[#allocation100_spill] sm:$0xff] }
 0x1d4   : > { %2175 = vrcp.f32 %v1410_v63  ;;  %v3488_v30 = vmul.f32 %v1188_v13, %v5216_v0  ;;  %v1415_v42 = vsub.f32 %v1367_v23, %v5220_v10  ;;  %v3494_v8 = vadd.f32 %v1347_v27, %v5221_v45  ;;  %v5224_v63 = vld [vmem:[#allocation107_spill] sm:$0xff]  ;;  %v5225_v13 = vld [vmem:[#allocation114_spill] sm:$0xff] }
 0x1d5   : > { %2177 = vrcp.f32 %v1411_v37  ;;  %v3497_v34 = vadd.f32 %v1347_v27, %v5222_v17  ;;  %v1416_v2 = vsub.f32 %v1368_v49, %v5223_v1  ;;  %v1417_v38 = vsub.f32 %v1369_v7, %v5224_v63  ;;  %v3509_v37 = vpop.permute.xlu1 %1555  ;;  %v5234_v49 = vld [vmem:[#allocation117_spill] sm:$0xff]  ;;  %v5237_v7 = vld [vmem:[#allocation118_spill] sm:$0xff] }
 0x1d6   : > { %5217 = vst [vmem:[#allocation101_spill] sm:$0xff] %v3488_v30  ;;  %2179 = vrcp.f32 %v1412_v14  ;;  %v5226_v0 = vmax.f32 %v5225_v13, 0.0  ;;  %v3507_v23 = vmul.f32 %v1190_v25, %v5229_v32  ;;  %v5232_v27 = vmax.f32 %v5231_v19, 0.0  ;;  %v5242_v25 = vld [vmem:[#allocation109_spill] sm:$0xff]  ;;  %v5244_v19 = vld [vmem:[#allocation104_spill] sm:$0xff] }
 0x1d7   : > { %2181 = vrcp.f32 %v1413_v36  ;;  %v5235_v14 = vmax.f32 %v5234_v49, 0.0  ;;  %v5238_v36 = vmax.f32 %v5237_v7, 0.0  ;;  %v1418_v32 = vsub.f32 %v1370_v59, %v5241_v54  ;;  %v5246_v49 = vld [vmem:[#allocation119_spill] sm:$0xff]  ;;  %v5249_v59 = vld [vmem:[#allocation62_spill] sm:$0xff] }
 0x1d8   : > { %v3503_v41 = vmul.f32 %v1189_v9, %v5226_v0  ;;  %5230 = vst [vmem:[#allocation113_spill] sm:$0xff] %v3507_v23  ;;  %2183 = vrcp.f32 %v1414_v53  ;;  %v3513_v17 = vmul.f32 %v1191_v22, %v5232_v27  ;;  %v3523_v9 = vpop.permute.xlu0 %1351  ;;  %v1419_v0 = vsub.f32 %v1371_v61, %v5242_v25  ;;  %v5243_v23 = vld [vmem:[#allocation103_spill] sm:$0xff]  ;;  %v5245_v27 = vld [vmem:[#allocation105_spill] sm:$0xff]  ;;  %v5250_v61 = vld [vmem:[#allocation8_spill] sm:$0xff] }
 0x1d9   : > { %v3517_v30 = vmul.f32 %v1192_v39, %v5235_v14  ;;  %v3521_v13 = vmul.f32 %v1193_v51, %v5238_v36  ;;  %5240 = vst [vmem:[#allocation114_spill] sm:$0xff] %v3523_v9  ;;  %v1420_v53 = vsub.f32 %v1372_v44, %v5243_v23  ;;  %2185 = vrcp.f32 %v1415_v42  ;;  %v5255_v42 = vld [vmem:[#allocation120_spill] sm:$0xff] }
 0x1da   : > { %5227 = vst [vmem:[#allocation53_spill] sm:$0xff] %v3503_v41  ;;  %5233 = vst [vmem:[#allocation54_spill] sm:$0xff] %v3513_v17  ;;  %v1421_v22 = vsub.f32 %v3494_v8, %v5244_v19  ;;  %v1422_v39 = vsub.f32 %v3497_v34, %v5245_v27  ;;  %2187 = vrcp.f32 %v1416_v2  ;;  %v5247_v14 = vmax.f32 %v5246_v49, 0.0  ;;  %v5258_v34 = vld [vmem:[#allocation121_spill] sm:$0xff]  ;;  %v5286_v19 = vld [vmem:[#allocation111_spill] sm:$0xff] }
 0x1db   : > { %5236 = vst [vmem:[#allocation61_spill] sm:$0xff] %v3517_v30  ;;  %5239 = vst [vmem:[#allocation107_spill] sm:$0xff] %v3521_v13  ;;  %v2170_v7 = vpop.eup %2169  ;;  %2189 = vrcp.f32 %v1417_v38  ;;  %v5251_v36 = vrot.slane %v5249_v59, %v5250_v61  ;;  %v5252_v44 = vmov 0  ;;  %v5256_v8 = vmax.f32 %v5255_v42, 0.0 }
 0x1dc   : > { %v3534_v51 = vmul.f32 %v1194_v20, %v5247_v14  ;;  %v5259_v2 = vmax.f32 %v5258_v34, 0.0  ;;  %v2172_v20 = vpop.eup %2171  ;;  %v5261_v14 = vld [vmem:[#allocation9_spill] sm:$0xff]  ;;  %v5263_v38 = vmov 0  ;;  %v5268_v17 = vmov 0 }
 0x1dd   : > { %vm3540_vm3 = vcmp.eq.s32.totalorder %v5251_v36, 1  ;;  %v3546_v13 = vmul.f32 %v1195_v50, %v5256_v8  ;;  %v5266_v36 = vld [vmem:[#allocation10_spill] sm:$0xff]  ;;  %v3568_v50 = vadd.f32 %v3523_v9, %v5192_v47  ;;  %v3580_v42 = vadd.f32 %v3523_v9, %v5196_v6  ;;  %v5271_v8 = vld [vmem:[#allocation11_spill] sm:$0xff] }
 0x1de   : > { %5248 = vst [vmem:[#allocation115_spill] sm:$0xff] %v3534_v51  ;;  %v5253_v44 = vsel %vm3540_vm3, 4294967295, %v5252_v44  ;;  %v3550_v49 = vmul.f32 %v1196_v15, %v5259_v2  ;;  %v5262_v51 = vrot.slane %v5249_v59, %v5261_v14  ;;  %v5267_v30 = vrot.slane %v5249_v59, %v5266_v36 }
 0x1df   : > { %5254 = vst [vmem:[#allocation116_spill] sm:$0xff] %v5253_v44  ;;  %5257 = vst [vmem:[#allocation117_spill] sm:$0xff] %v3546_v13  ;;  %v3572_v15 = vadd.f32 %v3523_v9, %v5194_v48  ;;  %2191 = vrcp.f32 %v1418_v32  ;;  %v5272_v34 = vrot.slane %v5249_v59, %v5271_v8  ;;  %v5273_v2 = vmov 0  ;;  %v5276_v48 = vld [vmem:[#allocation12_spill] sm:$0xff]  ;;  %v5281_v13 = vld [vmem:[#allocation13_spill] sm:$0xff] }
 0x1e0   : > { %5260 = vst [vmem:[#allocation118_spill] sm:$0xff] %v3550_v49  ;;  %vm3555_vm4 = vcmp.eq.s32.totalorder %v5262_v51, 1  ;;  %vm3562_vm5 = vcmp.eq.s32.totalorder %v5267_v30, 1  ;;  %v3576_v51 = vadd.f32 %v3523_v9, %v5195_v18  ;;  %v2174_v30 = vpop.eup %2173  ;;  %v5277_v47 = vrot.slane %v5249_v59, %v5276_v48  ;;  %v5383_v44 = vld [vmem:[#allocation108_spill] sm:$0xff] }
 0x1e1   : > { %v5264_v38 = vsel %vm3555_vm4, 4294967295, %v5263_v38  ;;  %v5269_v17 = vsel %vm3562_vm5, 4294967295, %v5268_v17  ;;  %vm3585_vm6 = vcmp.eq.s32.totalorder %v5272_v34, 1  ;;  %v5278_v49 = vmov 0  ;;  %v2176_v18 = vpop.eup %2175 }
 0x1e2   : > { %5265 = vst [vmem:[#allocation119_spill] sm:$0xff] %v5264_v38  ;;  %5270 = vst [vmem:[#allocation62_spill] sm:$0xff] %v5269_v17  ;;  %v5274_v2 = vsel %vm3585_vm6, 4294967295, %v5273_v2  ;;  %vm3592_vm7 = vcmp.eq.s32.totalorder %v5277_v47, 1  ;;  %v3598_v6 = vadd.f32 %v3523_v9, %v5197_v5  ;;  %v3602_v32 = vadd.f32 %v3523_v9, %v5198_v11 }
 0x1e3   : > { %5275 = vst [vmem:[#allocation8_spill] sm:$0xff] %v5274_v2  ;;  %v5279_v49 = vsel %vm3592_vm7, 4294967295, %v5278_v49  ;;  %v3606_v34 = vadd.f32 %v3523_v9, %v5199_v33  ;;  %v5282_v27 = vrot.slane %v5249_v59, %v5281_v13  ;;  %v5283_v47 = vmov 0  ;;  %v5382_v2 = vld [vmem:[#allocation113_spill] sm:$0xff] }
 0x1e4   : > { %5280 = vst [vmem:[#allocation120_spill] sm:$0xff] %v5279_v49  ;;  %v5287_v5 = vrot.slane %v5286_v19, %v5250_v61  ;;  %v5288_v23 = vmov 0  ;;  %v3624_v11 = vadd.f32 %v3523_v9, %v5201_v52  ;;  %v3628_v33 = vadd.f32 %v3523_v9, %v5204_v31 }
 0x1e5   : > { %vm3611_vm8 = vcmp.eq.s32.totalorder %v5282_v27, 1  ;;  %v3632_v27 = vadd.f32 %v3523_v9, %v5207_v43  ;;  %v3636_v25 = vadd.f32 %v3523_v9, %v5210_v56  ;;  %2193 = vrcp.f32 %v1419_v0 }
 0x1e6   : > { %v5284_v47 = vsel %vm3611_vm8, 4294967295, %v5283_v47  ;;  %vm3618_vm9 = vcmp.eq.s32.totalorder %v5287_v5, 1  ;;  %v2178_v5 = vpop.eup %2177  ;;  %v1503_v54 = vmul.f32 %v2170_v7, %v3101_v3  ;;  %v5298_v31 = vrot.slane %v5286_v19, %v5266_v36 }
 0x1e7   : > { %5285 = vst [vmem:[#allocation121_spill] sm:$0xff] %v5284_v47  ;;  %v5289_v23 = vsel %vm3618_vm9, 4294967295, %v5288_v23  ;;  %5291 = vst [vmem:[#allocation10_spill] sm:$0xff] %v3632_v27  ;;  %v5295_v47 = vmov 0  ;;  %v5299_v43 = vmov 0  ;;  %v3655_v56 = vadd.f32 %v3523_v9, %v5213_v55  ;;  %v2180_v0 = vpop.eup %2179 }
 0x1e8   : > { %5290 = vst [vmem:[#allocation9_spill] sm:$0xff] %v5289_v23  ;;  %5292 = vst [vmem:[#allocation11_spill] sm:$0xff] %v3636_v25  ;;  %v5293_v23 = vld [vmem:[#allocation14_spill] sm:$0xff]  ;;  %vm3649_vm11 = vcmp.eq.s32.totalorder %v5298_v31, 1  ;;  %v3659_v3 = vadd.f32 %v3523_v9, %v5218_v4  ;;  %2195 = vrcp.f32 %v1420_v53  ;;  %v1505_v7 = vmul.f32 %v2174_v30, %v3109_v12  ;;  %v5304_v25 = vld [vmem:[#allocation15_spill] sm:$0xff] }
 0x1e9   : > { %v5294_v52 = vrot.slane %v5249_v59, %v5293_v23  ;;  %v5300_v43 = vsel %vm3649_vm11, 4294967295, %v5299_v43  ;;  %5302 = vst [vmem:[#allocation111_spill] sm:$0xff] %v3655_v56  ;;  %v5305_v31 = vrot.slane %v5249_v59, %v5304_v25  ;;  %v5306_v27 = vmov 0 }
 0x1ea   : > { %5301 = vst [vmem:[#allocation13_spill] sm:$0xff] %v5300_v43  ;;  %5303 = vst [vmem:[#allocation14_spill] sm:$0xff] %v3659_v3  ;;  %v5309_v55 = vrot.slane %v5286_v19, %v5261_v14  ;;  %v5310_v56 = vmov 0  ;;  %v5313_v53 = vrot.slane %v5286_v19, %v5271_v8  ;;  %v5317_v12 = vrot.slane %v5286_v19, %v5276_v48 }
 0x1eb   : > { %vm3642_vm10 = vcmp.eq.s32.totalorder %v5294_v52, 1  ;;  %v1504_v52 = vmul.f32 %v2172_v20, %v3105_v21  ;;  %vm3666_vm12 = vcmp.eq.s32.totalorder %v5305_v31, 1  ;;  %v5314_v21 = vmov 0  ;;  %v2182_v20 = vpop.eup %2181 }
 0x1ec   : > { %v5296_v47 = vsel %vm3642_vm10, 4294967295, %v5295_v47  ;;  %v5307_v27 = vsel %vm3666_vm12, 4294967295, %v5306_v27  ;;  %vm3673_vm13 = vcmp.eq.s32.totalorder %v5309_v55, 1  ;;  %vm3680_vm14 = vcmp.eq.s32.totalorder %v5313_v53, 1  ;;  %v5322_v53 = vld [vmem:[#allocation110_spill] sm:$0xff] }
 0x1ed   : > { %5297 = vst [vmem:[#allocation12_spill] sm:$0xff] %v5296_v47  ;;  %5308 = vst [vmem:[#allocation15_spill] sm:$0xff] %v5307_v27  ;;  %v5311_v56 = vsel %vm3673_vm13, 4294967295, %v5310_v56  ;;  %v5315_v21 = vsel %vm3680_vm14, 4294967295, %v5314_v21  ;;  %vm3687_vm15 = vcmp.eq.s32.totalorder %v5317_v12, 1  ;;  %v5318_v59 = vmov 0 }
 0x1ee   : > { %5312 = vst [vmem:[#allocation127_spill] sm:$0xff] %v5311_v56  ;;  %5316 = vst [vmem:[#allocation128_spill] sm:$0xff] %v5315_v21  ;;  %v5319_v59 = vsel %vm3687_vm15, 4294967295, %v5318_v59  ;;  %v3693_v55 = vadd.f32 %v3523_v9, %v5219_v26  ;;  %2197 = vrcp.f32 %v1421_v22  ;;  %v1506_v30 = vmul.f32 %v2176_v18, %v3117_v16  ;;  %v2184_v16 = vpop.eup %2183 }
 0x1ef   : > { %5320 = vst [vmem:[#allocation129_spill] sm:$0xff] %v5319_v59  ;;  %v1507_v31 = vmul.f32 %v2178_v5, %v3121_v28  ;;  %v5323_v4 = vrot.slane %v5322_v53, %v5250_v61  ;;  %v5324_v3 = vmov 0  ;;  %v5327_v12 = vrot.slane %v5286_v19, %v5281_v13 }
 0x1f0   : > { %5321 = vst [vmem:[#allocation130_spill] sm:$0xff] %v3693_v55  ;;  %v5328_v59 = vmov 0  ;;  %v3713_v22 = vadd.f32 %v3523_v9, %v5221_v45  ;;  %2199 = vrcp.f32 %v1422_v39  ;;  %v1508_v28 = vmul.f32 %v2180_v0, %v3125_v60  ;;  %v2186_v39 = vpop.eup %2185 }
 0x1f1   : > { %vm3700_vm0 = vcmp.eq.s32.totalorder %v5323_v4, 1  ;;  %vm3707_vm1 = vcmp.eq.s32.totalorder %v5327_v12, 1  ;;  %v5332_v18 = vrot.slane %v5322_v53, %v5261_v14  ;;  %v5333_v4 = vmov 0  ;;  %v2188_v60 = vpop.eup %2187 }
 0x1f2   : > { %v5325_v3 = vsel %vm3700_vm0, 4294967295, %v5324_v3  ;;  %v5329_v59 = vsel %vm3707_vm1, 4294967295, %v5328_v59  ;;  %5331 = vst [vmem:[#allocation132_spill] sm:$0xff] %v3713_v22  ;;  %v5336_v5 = vrot.slane %v5286_v19, %v5293_v23  ;;  %v5337_v12 = vmov 0  ;;  %v2190_v45 = vpop.eup %2189 }
 0x1f3   : > { %5326 = vst [vmem:[#allocation110_spill] sm:$0xff] %v5325_v3  ;;  %5330 = vst [vmem:[#allocation131_spill] sm:$0xff] %v5329_v59  ;;  %vm3719_vm2 = vcmp.eq.s32.totalorder %v5332_v18, 1  ;;  %v1509_v0 = vmul.f32 %v2182_v20, %v3129_v57  ;;  %vm5340_vm1 = vcmp.eq.s32.totalorder %v3509_v37, 1  ;;  %v5341_v26 = vrot.slane %v5286_v19, %v5304_v25  ;;  %v2192_v35 = vpop.eup %2191 }
 0x1f4   : > { %v5334_v4 = vsel %vm3719_vm2, 4294967295, %v5333_v4  ;;  %vm3726_vm0 = vcmp.eq.s32.totalorder %v5336_v5, 1  ;;  %v1566_v18 = vsel %vm5340_vm1, 0.0, %v1503_v54  ;;  %v5342_v5 = vmov 0  ;;  %v2194_v38 = vpop.eup %2193 }
 0x1f5   : > { %5335 = vst [vmem:[#allocation133_spill] sm:$0xff] %v5334_v4  ;;  %v5338_v12 = vsel %vm3726_vm0, 4294967295, %v5337_v12  ;;  %vm3740_vm2 = vcmp.eq.s32.totalorder %v5341_v26, 1  ;;  %v1510_v55 = vmul.f32 %v2184_v16, %v5214_v62  ;;  %vm5345_vm0 = vmmov %vm5340_vm1  ;;  %v5347_v26 = vrot.slane %v5322_v53, %v5266_v36 }
 0x1f6   : > { %5339 = vst [vmem:[#allocation134_spill] sm:$0xff] %v5338_v12  ;;  %v5343_v5 = vsel %vm3740_vm2, 4294967295, %v5342_v5  ;;  %v1567_v57 = vsel %vm5345_vm0, 0.0, %v1504_v52  ;;  %vm5346_vm1 = vmmov %vm5345_vm0  ;;  %v5348_v19 = vmov 0  ;;  %v1511_v22 = vmul.f32 %v2186_v39, %v5220_v10  ;;  %v5362_v39 = vld [vmem:[#allocation101_spill] sm:$0xff] }
 0x1f7   : > { %5344 = vst [vmem:[#allocation135_spill] sm:$0xff] %v5343_v5  ;;  %v1568_v54 = vsel %vm5346_vm1, 0.0, %v1505_v7  ;;  %vm3756_vm15 = vcmp.eq.s32.totalorder %v5347_v26, 1  ;;  %vm5351_vm2 = vmmov %vm5345_vm0  ;;  %v1570_v52 = vsel %vm5345_vm0, 0.0, %v1507_v31  ;;  %v5352_v7 = vld [vmem:[#allocation112_spill] sm:$0xff]  ;;  %v5354_v26 = vmov 0 }
 0x1f8   : > { %v5349_v19 = vsel %vm3756_vm15, 4294967295, %v5348_v19  ;;  %v1569_v62 = vsel %vm5351_vm2, 0.0, %v1506_v30  ;;  %v5353_v16 = vrot.slane %v5352_v7, %v5250_v61  ;;  %v1512_v20 = vmul.f32 %v2188_v60, %v5223_v1  ;;  %vm5357_vm15 = vmmov %vm5345_vm0 }
 0x1f9   : > { %5350 = vst [vmem:[#allocation136_spill] sm:$0xff] %v5349_v19  ;;  %v1571_v10 = vsel %vm5357_vm15, 0.0, %v1508_v28  ;;  %v5358_v30 = vrot.slane %v5322_v53, %v5271_v8  ;;  %v5359_v31 = vmov 0  ;;  %v1696_v61 = vsel %vm3540_vm3, -1.0, %v1566_v18 }
 0x1fa   : > { %vm3770_vm1 = vcmp.eq.s32.totalorder %v5353_v16, 1  ;;  %v1572_v1 = vsel %vm5345_vm0, 0.0, %v1509_v0  ;;  %v1697_v28 = vsel %vm3555_vm4, -1.0, %v1567_v57  ;;  %v1698_v60 = vsel %vm3562_vm5, -1.0, %v1568_v54  ;;  %vm5371_vm5 = vmmov %vm5345_vm0 }
 0x1fb   : > { %v5355_v26 = vsel %vm3770_vm1, 4294967295, %v5354_v26  ;;  %vm3782_vm2 = vcmp.eq.s32.totalorder %v5358_v30, 1  ;;  %v5363_v30 = vrot.slane %v5352_v7, %v5261_v14  ;;  %v5364_v9 = vmov 0 }
 0x1fc   : > { %5356 = vst [vmem:[#allocation112_spill] sm:$0xff] %v5355_v26  ;;  %v5360_v31 = vsel %vm3782_vm2, 4294967295, %v5359_v31  ;;  %v1513_v16 = vmul.f32 %v2190_v45, %v5224_v63  ;;  %v1573_v0 = vsel %vm5345_vm0, 0.0, %v1510_v55  ;;  %v5367_v57 = vrot.slane %v5322_v53, %v5276_v48  ;;  %v5576_v26 = vld [vmem:[#allocation79_spill] sm:$0xff] }
 0x1fd   : > { %5361 = vst [vmem:[#allocation137_spill] sm:$0xff] %v5360_v31  ;;  %vm3799_vm15 = vcmp.eq.s32.totalorder %v5363_v30, 1  ;;  %v5368_v54 = vmov 0  ;;  %v1699_v14 = vsel %vm3585_vm6, -1.0, %v1569_v62  ;;  %v1700_v30 = vsel %vm3592_vm7, -1.0, %v1570_v52  ;;  %v5402_v52 = vld [vmem:[#allocation109_spill] sm:$0xff] }
 0x1fe   : > { %v5365_v9 = vsel %vm3799_vm15, 4294967295, %v5364_v9  ;;  %vm3811_vm4 = vcmp.eq.s32.totalorder %v5367_v57, 1  ;;  %v1574_v45 = vsel %vm5371_vm5, 0.0, %v1511_v22  ;;  %v5372_v63 = vrot.slane %v5322_v53, %v5281_v13  ;;  %v5578_v31 = vld [vmem:[#allocation81_spill] sm:$0xff] }
 0x1ff   : > { %5366 = vst [vmem:[#allocation101_spill] sm:$0xff] %v5365_v9  ;;  %v5369_v54 = vsel %vm3811_vm4, 4294967295, %v5368_v54  ;;  %v5373_v55 = vmov 0  ;;  %v1701_v18 = vsel %vm3611_vm8, -1.0, %v1571_v10  ;;  %v5377_v62 = vrot.slane %v5352_v7, %v5266_v36 }
 0x200   : > { %5370 = vst [vmem:[#allocation138_spill] sm:$0xff] %v5369_v54  ;;  %vm3824_vm0 = vcmp.eq.s32.totalorder %v5372_v63, 1  ;;  %v5378_v49 = vmov 0  ;;  %v1826_v22 = vsel %vm3618_vm9, %v1696_v61, 0.0  ;;  %v2196_v63 = vpop.eup %2195  ;;  %v1514_v41 = vmul.f32 %v2192_v35, %v5383_v44  ;;  %v5574_v54 = vld [vmem:[#allocation77_spill] sm:$0xff] }
 0x201   : > { %v5374_v55 = vsel %vm3824_vm0, 4294967295, %v5373_v55  ;;  %vm3833_vm6 = vcmp.eq.s32.totalorder %v5377_v62, 1  ;;  %v1575_v57 = vsel %vm5371_vm5, 0.0, %v1512_v20  ;;  %v5384_v10 = vrot.slane %v5322_v53, %v5293_v23  ;;  %v2198_v44 = vpop.eup %2197 }
 0x202   : > { %5375 = vst [vmem:[#allocation139_spill] sm:$0xff] %v5374_v55  ;;  %v5379_v49 = vsel %vm3833_vm6, 4294967295, %v5378_v49  ;;  %v5385_v36 = vmov 0  ;;  %v1702_v62 = vsel %vm3642_vm10, -1.0, %v1572_v1  ;;  %v5388_v61 = vrot.slane %v5352_v7, %v5271_v8  ;;  %v2200_v43 = vpop.eup %2199 }
 0x203   : > { %5380 = vst [vmem:[#allocation140_spill] sm:$0xff] %v5379_v49  ;;  %vm3847_vm8 = vcmp.eq.s32.totalorder %v5384_v10, 1  ;;  %v5389_v17 = vmov 0  ;;  %v1828_v35 = vsel %vm3649_vm11, %v1698_v60, 0.0  ;;  %v5392_v20 = vrot.slane %v5322_v53, %v5304_v25 }
 0x204   : > { %v5386_v36 = vsel %vm3847_vm8, 4294967295, %v5385_v36  ;;  %vm3856_vm9 = vcmp.eq.s32.totalorder %v5388_v61, 1  ;;  %v5393_v10 = vmov 0  ;;  %v1703_v1 = vsel %vm3666_vm12, -1.0, %v1573_v0 }
 0x205   : > { %5387 = vst [vmem:[#allocation113_spill] sm:$0xff] %v5386_v36  ;;  %v5390_v17 = vsel %vm3856_vm9, 4294967295, %v5389_v17  ;;  %vm3865_vm5 = vcmp.eq.s32.totalorder %v5392_v20, 1  ;;  %v5396_v8 = vrot.slane %v5352_v7, %v5276_v48  ;;  %v5397_v61 = vmov 0  ;;  %v5400_v20 = vld [vmem:[#allocation129_spill] sm:$0xff] }
 0x206   : > { %5391 = vst [vmem:[#allocation108_spill] sm:$0xff] %v5390_v17  ;;  %v5394_v10 = vsel %vm3865_vm5, 4294967295, %v5393_v10  ;;  %v1827_v60 = vsel %vm3673_vm13, %v1697_v28, 0.0  ;;  %v1829_v53 = vsel %vm3680_vm14, %v1699_v14, 0.0  ;;  %vm5401_vm11 = vnez %v5400_v20 }
 0x207   : > { %5395 = vst [vmem:[#allocation141_spill] sm:$0xff] %v5394_v10  ;;  %vm3874_vm10 = vcmp.eq.s32.totalorder %v5396_v8, 1  ;;  %v1830_v47 = vsel %vm5401_vm11, %v1700_v30, 0.0  ;;  %v1515_v27 = vmul.f32 %v2194_v38, %v5402_v52  ;;  %vm5403_vm12 = vcmp.eq.s32.totalorder %v3509_v37, 1  ;;  %v5410_v30 = vld [vmem:[#allocation103_spill] sm:$0xff] }
 0x208   : > { %v5398_v61 = vsel %vm3874_vm10, 4294967295, %v5397_v61  ;;  %v1576_v0 = vsel %vm5403_vm12, 0.0, %v1513_v16  ;;  %vm5404_vm7 = vnez %v5325_v3  ;;  %v5405_v8 = vrot.slane %v5352_v7, %v5281_v13 }
 0x209   : > { %5399 = vst [vmem:[#allocation142_spill] sm:$0xff] %v5398_v61  ;;  %v1704_v48 = vsel %vm5404_vm7, -1.0, %v1574_v45  ;;  %v5406_v28 = vmov 0  ;;  %vm5409_vm14 = vnez %v5329_v59  ;;  %v1516_v20 = vmul.f32 %v2196_v63, %v5410_v30 }
 0x20a   : > { %vm3892_vm3 = vcmp.eq.s32.totalorder %v5405_v8, 1  ;;  %v1831_v14 = vsel %vm5409_vm14, %v1701_v18, 0.0  ;;  %vm5411_vm11 = vnez %v5334_v4  ;;  %v5412_v16 = vrot.slane %v5352_v7, %v5293_v23  ;;  %v5417_v8 = vld [vmem:[#allocation104_spill] sm:$0xff] }
 0x20b   : > { %v5407_v28 = vsel %vm3892_vm3, 4294967295, %v5406_v28  ;;  %v1705_v38 = vsel %vm5411_vm11, -1.0, %v1575_v57  ;;  %v5413_v45 = vmov 0  ;;  %vm5416_vm7 = vnez %v5338_v12 }
 0x20c   : > { %5408 = vst [vmem:[#allocation109_spill] sm:$0xff] %v5407_v28  ;;  %vm3904_vm12 = vcmp.eq.s32.totalorder %v5412_v16, 1  ;;  %v1832_v13 = vsel %vm5416_vm7, %v1702_v62, 0.0  ;;  %v1874_v52 = vmax.f32 %v1826_v22, %v1828_v35  ;;  %v1517_v3 = vmul.f32 %v2198_v44, %v5417_v8  ;;  %v5424_v16 = vld [vmem:[#allocation105_spill] sm:$0xff] }
 0x20d   : > { %v5414_v45 = vsel %vm3904_vm12, 4294967295, %v5413_v45  ;;  %vm5418_vm14 = vcmp.eq.s32.totalorder %v3509_v37, 1  ;;  %v5419_v63 = vrot.slane %v5352_v7, %v5304_v25  ;;  %v5420_v57 = vmov 0 }
 0x20e   : > { %5415 = vst [vmem:[#allocation103_spill] sm:$0xff] %v5414_v45  ;;  %v1577_v18 = vsel %vm5418_vm14, 0.0, %v1514_v41  ;;  %vm5423_vm13 = vnez %v5343_v5  ;;  %v1875_v30 = vmax.f32 %v1827_v60, %v1829_v53  ;;  %v1518_v12 = vmul.f32 %v2200_v43, %v5424_v16 }
 0x20f   : > { %vm3916_vm11 = vcmp.eq.s32.totalorder %v5419_v63, 1  ;;  %v1833_v23 = vsel %vm5423_vm13, %v1703_v1, 0.0  ;;  %vm5425_vm7 = vnez %v5349_v19  ;;  %v1876_v62 = vmax.f32 %v1874_v52, %v1830_v47  ;;  %vm5428_vm13 = vmmov %vm5418_vm14  ;;  %v5435_v52 = vld [vmem:[#allocation10_spill] sm:$0xff] }
 0x210   : > { %v5421_v57 = vsel %vm3916_vm11, 4294967295, %v5420_v57  ;;  %v1706_v22 = vsel %vm5425_vm7, -1.0, %v1576_v0  ;;  %v5426_v41 = vsub.f32 %v3568_v50, %v3452_v58  ;;  %v1578_v25 = vsel %vm5418_vm14, 0.0, %v1515_v27  ;;  %vm5430_vm14 = vmmov %vm5428_vm13 }
 0x211   : > { %5422 = vst [vmem:[#allocation104_spill] sm:$0xff] %v5421_v57  ;;  %v1834_v7 = vsel %vm3770_vm1, %v1704_v48, 0.0  ;;  %v1877_v35 = vmax.f32 %v1875_v30, %v1831_v14  ;;  %v5427_v44 = vsub.f32 %v3572_v15, %v3458_v29  ;;  %v1579_v43 = vsel %vm5428_vm13, 0.0, %v1516_v20 }
 0x212   : > { %2201 = vrcp.f32 %v5426_v41  ;;  %v1707_v47 = vsel %vm3782_vm2, -1.0, %v1577_v18  ;;  %v1878_v1 = vmax.f32 %v1876_v62, %v1832_v13  ;;  %v5429_v50 = vsub.f32 %v3576_v51, %v3462_v40  ;;  %v5432_v51 = vld [vmem:[#allocation126_spill] sm:$0xff]  ;;  %v5438_v41 = vld [vmem:[#allocation61_spill] sm:$0xff] }
 0x213   : > { %2203 = vrcp.f32 %v5427_v44  ;;  %v1580_v27 = vsel %vm5430_vm14, 0.0, %v1517_v3  ;;  %v1835_v60 = vsel %vm3799_vm15, %v1705_v38, 0.0  ;;  %v1879_v53 = vmax.f32 %v1877_v35, %v1833_v23 }
 0x214   : > { %2205 = vrcp.f32 %v5429_v50  ;;  %v5431_v15 = vsub.f32 %v3580_v42, %v3468_v24  ;;  %v1581_v20 = vsel %vm5428_vm13, 0.0, %v1518_v12  ;;  %v1708_v0 = vsel %vm3811_vm4, -1.0, %v1578_v25  ;;  %v5434_v42 = vld [vmem:[#allocation54_spill] sm:$0xff]  ;;  %v5439_v25 = vld [vmem:[#allocation11_spill] sm:$0xff] }
 0x215   : > { %v1880_v48 = vmax.f32 %v1878_v1, %v1834_v7  ;;  %v5433_v14 = vsub.f32 %v3598_v6, %v5432_v51  ;;  %v1709_v3 = vsel %vm3824_vm0, -1.0, %v1579_v43  ;;  %v1836_v38 = vsel %vm3833_vm6, %v1706_v22, 0.0  ;;  %v5443_v1 = vld [vmem:[#allocation114_spill] sm:$0xff] }
 0x216   : > { %2207 = vrcp.f32 %v5431_v15  ;;  %v1881_v13 = vmax.f32 %v1879_v53, %v1835_v60  ;;  %v1432_v8 = vsub.f32 %v5435_v52, %v5434_v42  ;;  %v1710_v37 = vsel %vm3847_vm8, -1.0, %v1580_v27  ;;  %v5445_v27 = vld [vmem:[#allocation111_spill] sm:$0xff] }
 0x217   : > { %2209 = vrcp.f32 %v5433_v14  ;;  %v1837_v12 = vsel %vm3856_vm9, %v1707_v47, 0.0  ;;  %v1882_v18 = vmax.f32 %v1880_v48, %v1836_v38  ;;  %v5436_v6 = vsub.f32 %v3602_v32, %v3482_v46  ;;  %v5440_v32 = vld [vmem:[#allocation53_spill] sm:$0xff]  ;;  %v5442_v47 = vld [vmem:[#allocation100_spill] sm:$0xff]  ;;  %v5447_v48 = vld [vmem:[#allocation14_spill] sm:$0xff] }
 0x218   : > { %v1711_v63 = vsel %vm3865_vm5, -1.0, %v1581_v20  ;;  %v1838_v23 = vsel %vm3874_vm10, %v1708_v0, 0.0  ;;  %v1883_v30 = vmax.f32 %v1881_v13, %v1837_v12  ;;  %v5437_v16 = vsub.f32 %v3606_v34, %v5362_v39  ;;  %v5444_v34 = vld [vmem:[#allocation107_spill] sm:$0xff]  ;;  %v5449_v13 = vld [vmem:[#allocation122_spill] sm:$0xff] }
 0x219   : > { %2211 = vrcp.f32 %v5436_v6  ;;  %v1839_v22 = vsel %vm3892_vm3, %v1709_v3, 0.0  ;;  %v1884_v62 = vmax.f32 %v1882_v18, %v1838_v23  ;;  %v1433_v7 = vsub.f32 %v5439_v25, %v5438_v41  ;;  %v5446_v0 = vld [vmem:[#allocation115_spill] sm:$0xff]  ;;  %v5453_v6 = vld [vmem:[#allocation117_spill] sm:$0xff]  ;;  %v5454_v23 = vld [vmem:[#allocation130_spill] sm:$0xff] }
 0x21a   : > { %2213 = vrcp.f32 %v5437_v16  ;;  %v5441_v35 = vsub.f32 %v3624_v11, %v5440_v32  ;;  %v1840_v44 = vsel %vm3904_vm12, %v1710_v37, 0.0  ;;  %v1885_v43 = vmax.f32 %v1883_v30, %v1839_v22  ;;  %v5451_v37 = vld [vmem:[#allocation124_spill] sm:$0xff]  ;;  %v5455_v16 = vld [vmem:[#allocation118_spill] sm:$0xff] }
 0x21b   : > { %v1390_v50 = vadd.f32 %v5443_v1, %v5442_v47  ;;  %v1434_v60 = vsub.f32 %v5445_v27, %v5444_v34  ;;  %v1841_v15 = vsel %vm3916_vm11, %v1711_v63, 0.0  ;;  %v1886_v20 = vmax.f32 %v1884_v62, %v1840_v44  ;;  %v5456_v22 = vld [vmem:[#allocation132_spill] sm:$0xff]  ;;  %v5457_v1 = vld [vmem:[#allocation87_spill] sm:$0xff]  ;;  %v5458_v27 = vld [vmem:[#allocation17_spill] sm:$0xff] }
 0x21c   : > { %2215 = vrcp.f32 %v5441_v35  ;;  %v2202_v53 = vpop.eup %2201  ;;  %v1435_v14 = vsub.f32 %v5447_v48, %v5446_v0  ;;  %v5448_v11 = vsub.f32 %v3628_v33, %v5382_v2  ;;  %v1887_v38 = vmax.f32 %v1885_v43, %v1841_v15  ;;  %v4007_v43 = vpop.permute.xlu0 %1558  ;;  %v5459_v48 = vld [vmem:[#allocation21_spill] sm:$0xff] }
 0x21d   : > { %v2204_v3 = vpop.eup %2203  ;;  %v5450_v52 = vmax.f32 %v5449_v13, 0.0  ;;  %v5452_v12 = vmax.f32 %v5451_v37, 0.0  ;;  %v1436_v30 = vsub.f32 %v5454_v23, %v5453_v6  ;;  %v1437_v62 = vsub.f32 %v5456_v22, %v5455_v16  ;;  %v5461_v13 = vld [vmem:[#allocation23_spill] sm:$0xff]  ;;  %v5463_v23 = vld [vmem:[#allocation29_spill] sm:$0xff]  ;;  %v5466_v22 = vld [vmem:[#allocation24_spill] sm:$0xff] }
 0x21e   : > { %2217 = vrcp.f32 %v5448_v11  ;;  %v2206_v63 = vpop.eup %2205  ;;  %v1888_v33 = vmax.f32 %v1886_v20, %v1887_v38  ;;  %v1519_v11 = vmul.f32 %v2202_v53, %v3452_v58  ;;  %v5460_v20 = vld [vmem:[#allocation22_spill] sm:$0xff]  ;;  %v1520_v38 = vmul.f32 %v2204_v3, %v3458_v29 }
 0x21f   : > { %v4000_v18 = vmul.f32 %v5452_v12, %v5450_v52  ;;  %2219 = vrcp.f32 %v1432_v8  ;;  %vm1564_vm14 = vcmp.eq.s32.totalorder %v4007_v43, 1  ;;  %v5464_v29 = vld [vmem:[#allocation30_spill] sm:$0xff]  ;;  %vm5490_vm3 = vnez %v5311_v56 }
 0x220   : > { %2221 = vrcp.f32 %v1433_v7  ;;  %v2208_v25 = vpop.eup %2207  ;;  %1889 = vmax.xlane.f32.xlu0 %v1888_v33  ;;  %v1521_v7 = vmul.f32 %v2206_v63, %v3462_v40  ;;  %v5462_v40 = vld [vmem:[#allocation25_spill] sm:$0xff]  ;;  %v1583_v63 = vsel %vm1564_vm14, 0.0, %v1520_v38  ;;  %v5471_v38 = vld [vmem:[#allocation116_spill] sm:$0xff]  ;;  %vm5491_vm10 = vnez %v5315_v21 }
 0x221   : > { %v1438_v35 = vsub.f32 %v1390_v50, %v4000_v18  ;;  %2223 = vrcp.f32 %v1434_v60  ;;  %v2210_v44 = vpop.eup %2209  ;;  %vm5472_vm13 = vnez %v5471_v38  ;;  %v5479_v38 = vld [vmem:[#allocation8_spill] sm:$0xff] }
 0x222   : > { %2225 = vrcp.f32 %v1435_v14  ;;  %v1522_v14 = vmul.f32 %v2208_v25, %v3468_v24  ;;  %v1523_v58 = vmul.f32 %v2210_v44, %v5432_v51  ;;  %v5465_v24 = vld [vmem:[#allocation31_spill] sm:$0xff]  ;;  %v1582_v51 = vsel %vm1564_vm14, 0.0, %v1519_v11  ;;  %v5469_v44 = vld [vmem:[#allocation28_spill] sm:$0xff] }
 0x223   : > { %2227 = vrcp.f32 %v1436_v30  ;;  %v2212_v60 = vpop.eup %2211  ;;  %v1584_v33 = vsel %vm1564_vm14, 0.0, %v1521_v7  ;;  %v1712_v8 = vsel %vm5472_vm13, -1.0, %v1582_v51  ;;  %vm5480_vm13 = vnez %v5479_v38  ;;  %v5484_v38 = vld [vmem:[#allocation9_spill] sm:$0xff] }
 0x224   : > { %2229 = vrcp.f32 %v1437_v62  ;;  %v2214_v37 = vpop.eup %2213  ;;  %v1524_v25 = vmul.f32 %v2212_v60, %v3482_v46  ;;  %v1585_v62 = vsel %vm1564_vm14, 0.0, %v1522_v14  ;;  %v1586_v7 = vsel %vm1564_vm14, 0.0, %v1523_v58  ;;  %v5473_v14 = vld [vmem:[#allocation62_spill] sm:$0xff]  ;;  %v5481_v60 = vld [vmem:[#allocation120_spill] sm:$0xff] }
 0x225   : > { %2231 = vrcp.f32 %v1438_v35  ;;  %v5467_v35 = vld [vmem:[#allocation26_spill] sm:$0xff]  ;;  %v1525_v3 = vmul.f32 %v2214_v37, %v5362_v39  ;;  %vm5474_vm11 = vnez %v5473_v14  ;;  %v5477_v37 = vld [vmem:[#allocation119_spill] sm:$0xff]  ;;  %v1715_v51 = vsel %vm5480_vm13, -1.0, %v1585_v62 }
 0x226   : > { %v2216_v12 = vpop.eup %2215  ;;  %v1714_v15 = vsel %vm5474_vm11, -1.0, %v1584_v33  ;;  %v1587_v52 = vsel %vm1564_vm14, 0.0, %v1524_v25  ;;  %vm5478_vm12 = vnez %v5477_v37  ;;  %vm5482_vm11 = vnez %v5481_v60  ;;  %v5486_v37 = vld [vmem:[#allocation13_spill] sm:$0xff] }
 0x227   : > { %v1526_v11 = vmul.f32 %v2216_v12, %v5440_v32  ;;  %v1713_v39 = vsel %vm5478_vm12, -1.0, %v1583_v63  ;;  %v1588_v47 = vsel %vm1564_vm14, 0.0, %v1525_v3  ;;  %v1716_v12 = vsel %vm5482_vm11, -1.0, %v1586_v7  ;;  %v5488_v60 = vld [vmem:[#allocation121_spill] sm:$0xff] }
 0x228   : > { %v2218_v30 = vpop.eup %2217  ;;  %vm5485_vm13 = vnez %v5484_v38  ;;  %vm5487_vm12 = vnez %v5486_v37  ;;  %vm5489_vm11 = vnez %v5488_v60  ;;  %v5492_v37 = vld [vmem:[#allocation12_spill] sm:$0xff]  ;;  %v5494_v38 = vld [vmem:[#allocation129_spill] sm:$0xff] }
 0x229   : > { %v2220_v53 = vpop.eup %2219  ;;  %v1527_v46 = vmul.f32 %v2218_v30, %v5382_v2  ;;  %v5483_v2 = vld [vmem:[#allocation35_spill] sm:$0xff]  ;;  %v1589_v63 = vsel %vm1564_vm14, 0.0, %v1526_v11  ;;  %v1842_v62 = vsel %vm5485_vm13, %v1712_v8, 0.0  ;;  %v1717_v7 = vsel %vm5489_vm11, -1.0, %v1587_v52 }
 0x22a   : > { %v2222_v50 = vpop.eup %2221  ;;  %v1528_v33 = vmul.f32 %v2220_v53, %v5434_v42  ;;  %v1844_v42 = vsel %vm5487_vm12, %v1714_v15, 0.0  ;;  %v1843_v30 = vsel %vm5490_vm3, %v1713_v39, 0.0  ;;  %vm5493_vm12 = vnez %v5492_v37 }
 0x22b   : > { %v2224_v58 = vpop.eup %2223  ;;  %v1529_v25 = vmul.f32 %v2222_v50, %v5438_v41  ;;  %v1845_v41 = vsel %vm5491_vm10, %v1715_v51, 0.0  ;;  %v1590_v8 = vsel %vm1564_vm14, 0.0, %v1527_v46  ;;  %v1718_v15 = vsel %vm5493_vm12, -1.0, %v1588_v47 }
 0x22c   : > { %v2226_v14 = vpop.eup %2225  ;;  %v1530_v3 = vmul.f32 %v2224_v58, %v5444_v34  ;;  %vm5495_vm13 = vnez %v5494_v38  ;;  %v1591_v39 = vsel %vm1564_vm14, 0.0, %v1528_v33  ;;  %v5496_v58 = vld [vmem:[#allocation15_spill] sm:$0xff]  ;;  %v1891_v21 = vmax.f32 %v1842_v62, %v1844_v42 }
 0x22d   : > { %v2228_v32 = vpop.eup %2227  ;;  %v1531_v11 = vmul.f32 %v2226_v14, %v5446_v0  ;;  %v1846_v34 = vsel %vm5495_vm13, %v1716_v12, 0.0  ;;  %vm5497_vm3 = vnez %v5496_v58  ;;  %v1592_v46 = vsel %vm1564_vm14, 0.0, %v1529_v25  ;;  %v5502_v25 = vld [vmem:[#allocation134_spill] sm:$0xff] }
 0x22e   : > { %v2230_v53 = vpop.eup %2229  ;;  %v1532_v52 = vmul.f32 %v2228_v32, %v5453_v6  ;;  %v1719_v51 = vsel %vm5497_vm3, -1.0, %v1589_v63  ;;  %vm5498_vm10 = vnez %v5329_v59  ;;  %v1892_v14 = vmax.f32 %v1843_v30, %v1845_v41  ;;  %v5499_v32 = vld [vmem:[#allocation110_spill] sm:$0xff] }
 0x22f   : > { %v2232_v50 = vpop.eup %2231  ;;  %v1533_v0 = vmul.f32 %v2230_v53, %v5455_v16  ;;  %v1847_v47 = vsel %vm5498_vm10, %v1717_v7, 0.0  ;;  %v1593_v6 = vsel %vm1564_vm14, 0.0, %v1530_v3  ;;  %vm5500_vm13 = vnez %v5499_v32 }
 0x230   : > { %v1534_v12 = vmul.f32 %v2232_v50, %v4000_v18  ;;  %v1720_v33 = vsel %vm5500_vm13, -1.0, %v1590_v8  ;;  %v1893_v58 = vmax.f32 %v1891_v21, %v1846_v34  ;;  %v1594_v63 = vsel %vm1564_vm14, 0.0, %v1531_v11 }
 0x231   : > { %vm5501_vm3 = vnez %v5334_v4  ;;  %vm5503_vm12 = vnez %v5502_v25  ;;  %v1894_v42 = vmax.f32 %v1892_v14, %v1847_v47  ;;  %v1595_v18 = vsel %vm1564_vm14, 0.0, %v1532_v52 }
 0x232   : > { %v1721_v16 = vsel %vm5501_vm3, -1.0, %v1591_v39  ;;  %v1848_v62 = vsel %vm5503_vm12, %v1718_v15, 0.0  ;;  %v1722_v30 = vsel %vm5425_vm7, -1.0, %v1592_v46  ;;  %vm5504_vm10 = vnez %v5343_v5  ;;  %v5579_v5 = vld [vmem:[#allocation82_spill] sm:$0xff] }
 0x233   : > { %v1849_v53 = vsel %vm5504_vm10, %v1719_v51, 0.0  ;;  %v1895_v21 = vmax.f32 %v1893_v58, %v1848_v62  ;;  %v1596_v3 = vsel %vm1564_vm14, 0.0, %v1533_v0  ;;  %v1723_v7 = vsel %vm3782_vm2, -1.0, %v1593_v6  ;;  %v5505_v51 = vld [vmem:[#allocation102_spill] sm:$0xff]  ;;  %v5506_v0 = vld [vmem:[#allocation16_spill] sm:$0xff]  ;;  %v5509_v62 = vld [vmem:[#allocation19_spill] sm:$0xff] }
 0x234   : > { %v1850_v41 = vsel %vm3770_vm1, %v1720_v33, 0.0  ;;  %v1896_v50 = vmax.f32 %v1894_v42, %v1849_v53  ;;  %v1597_v11 = vsel %vm1564_vm14, 0.0, %v1534_v12  ;;  %v1724_v8 = vsel %vm3811_vm4, -1.0, %v1594_v63  ;;  %v5507_v12 = vld [vmem:[#allocation18_spill] sm:$0xff]  ;;  %v5511_v53 = vld [vmem:[#allocation20_spill] sm:$0xff] }
 0x235   : > { %v1851_v15 = vsel %vm3799_vm15, %v1721_v16, 0.0  ;;  %v1897_v34 = vmax.f32 %v1895_v21, %v1850_v41  ;;  %v1725_v52 = vsel %vm3824_vm0, -1.0, %v1595_v18  ;;  %v1852_v39 = vsel %vm3833_vm6, %v1722_v30, 0.0 }
 0x236   : > { %v1898_v58 = vmax.f32 %v1896_v50, %v1851_v15  ;;  %v626_v46 = vmax.f32 %v5506_v0, %v5505_v51  ;;  %v1726_v43 = vsel %vm3847_vm8, -1.0, %v1596_v3  ;;  %v1853_v47 = vsel %vm3856_vm9, %v1723_v7, 0.0  ;;  %v5512_v3 = vld [vmem:[#allocation36_spill] sm:$0xff]  ;;  %v5515_v15 = vld [vmem:[#allocation38_spill] sm:$0xff] }
 0x237   : > { %v1899_v14 = vmax.f32 %v1897_v34, %v1852_v39  ;;  %v627_v6 = vmax.f32 %v5507_v12, %v5505_v51  ;;  %v1727_v33 = vsel %vm3865_vm5, -1.0, %v1597_v11  ;;  %vm5508_vm14 = vnez %v5398_v61  ;;  %v5514_v11 = vld [vmem:[#allocation37_spill] sm:$0xff] }
 0x238   : > { %v1854_v63 = vsel %vm5508_vm14, %v1724_v8, 0.0  ;;  %v1900_v16 = vmax.f32 %v1898_v58, %v1853_v47  ;;  %v628_v42 = vmax.f32 %v5509_v62, %v5505_v51  ;;  %vm5510_vm6 = vnez %v5407_v28  ;;  %v5517_v58 = vld [vmem:[#allocation39_spill] sm:$0xff]  ;;  %v5518_v47 = vld [vmem:[#allocation40_spill] sm:$0xff] }
 0x239   : > { %v1855_v18 = vsel %vm5510_vm6, %v1725_v52, 0.0  ;;  %v1901_v30 = vmax.f32 %v1899_v14, %v1854_v63  ;;  %v629_v21 = vmax.f32 %v5511_v53, %v5505_v51  ;;  %v630_v7 = vmax.f32 %v5512_v3, %v5505_v51  ;;  %v5522_v3 = vld [vmem:[#allocation44_spill] sm:$0xff] }
 0x23a   : > { %vm5513_vm9 = vnez %v5414_v45  ;;  %v1902_v50 = vmax.f32 %v1900_v16, %v1855_v18  ;;  %v631_v8 = vmax.f32 %v5514_v11, %v5505_v51  ;;  %v632_v34 = vmax.f32 %v5515_v15, %v5505_v51  ;;  %v5520_v16 = vld [vmem:[#allocation42_spill] sm:$0xff]  ;;  %v5521_v18 = vld [vmem:[#allocation43_spill] sm:$0xff] }
 0x23b   : > { %v1856_v41 = vsel %vm5513_vm9, %v1726_v43, 0.0  ;;  %vm5516_vm14 = vnez %v5421_v57  ;;  %v633_v0 = vmax.f32 %v5517_v58, %v5505_v51  ;;  %v634_v14 = vmax.f32 %v5518_v47, %v5505_v51  ;;  %v5519_v43 = vld [vmem:[#allocation41_spill] sm:$0xff]  ;;  %v5524_v11 = vld [vmem:[#allocation46_spill] sm:$0xff] }
 0x23c   : > { %v1857_v52 = vsel %vm5516_vm14, %v1727_v33, 0.0  ;;  %v1903_v39 = vmax.f32 %v1901_v30, %v1856_v41  ;;  %v635_v63 = vmax.f32 %v5519_v43, %v5505_v51  ;;  %v636_v62 = vmax.f32 %v5520_v16, %v5505_v51  ;;  %v5523_v30 = vld [vmem:[#allocation45_spill] sm:$0xff] }
 0x23d   : > { %v1904_v12 = vmax.f32 %v1902_v50, %v1857_v52  ;;  %v637_v53 = vmax.f32 %v5521_v18, %v5505_v51  ;;  %v638_v33 = vmax.f32 %v5522_v3, %v5505_v51  ;;  %v639_v41 = vmax.f32 %v5523_v30, %v5505_v51  ;;  %v5525_v50 = vld [vmem:[#allocation47_spill] sm:$0xff] }
 0x23e   : > { %v640_v15 = vmax.f32 %v5524_v11, %v5505_v51  ;;  %v641_v52 = vmax.f32 %v5525_v50, %v5505_v51  ;;  %v5526_v47 = vmin.f32 %v5458_v27, %v5457_v1  ;;  %v5527_v16 = vmin.f32 %v5459_v48, %v5457_v1  ;;  %v5539_v50 = vld [vmem:[#allocation32_spill] sm:$0xff] }
 0x23f   : > { %v1905_v58 = vmax.f32 %v1903_v39, %v1904_v12  ;;  %v5528_v3 = vmin.f32 %v5460_v20, %v5457_v1  ;;  %v5529_v30 = vmin.f32 %v5461_v13, %v5457_v1  ;;  %v5530_v51 = vmin.f32 %v5462_v40, %v5457_v1  ;;  %v5536_v12 = vld [vmem:[#allocation27_spill] sm:$0xff] }
 0x240   : > { %v674_v43 = vsub.f32 %v5526_v47, %v626_v46  ;;  %v675_v18 = vsub.f32 %v5527_v16, %v627_v6  ;;  %v5531_v27 = vmin.f32 %v5463_v23, %v5457_v1  ;;  %v5532_v48 = vmin.f32 %v5464_v29, %v5457_v1  ;;  %v5543_v47 = vld [vmem:[#allocation34_spill] sm:$0xff] }
 0x241   : > { %v676_v57 = vsub.f32 %v5528_v3, %v628_v42  ;;  %v677_v11 = vsub.f32 %v5529_v30, %v629_v21  ;;  %v678_v39 = vsub.f32 %v5530_v51, %v630_v7  ;;  %1906 = vmax.xlane.f32.xlu1 %v1905_v58  ;;  %v5533_v20 = vmin.f32 %v5465_v24, %v5457_v1  ;;  %v5541_v58 = vld [vmem:[#allocation33_spill] sm:$0xff] }
 0x242   : > { %v679_v46 = vsub.f32 %v5531_v27, %v631_v8  ;;  %v680_v6 = vsub.f32 %v5532_v48, %v632_v34  ;;  %v5534_v13 = vmin.f32 %v5466_v22, %v5457_v1  ;;  %v5535_v40 = vmin.f32 %v5467_v35, %v5457_v1 }
 0x243   : > { %v681_v42 = vsub.f32 %v5533_v20, %v633_v0  ;;  %v5537_v23 = vmin.f32 %v5536_v12, %v5457_v1  ;;  %v5538_v29 = vmin.f32 %v5469_v44, %v5457_v1  ;;  %v5540_v24 = vmin.f32 %v5539_v50, %v5457_v1  ;;  %v5555_v50 = vld [vmem:[#allocation68_spill] sm:$0xff] }
 0x244   : > { %v682_v21 = vsub.f32 %v5534_v13, %v634_v14  ;;  %v683_v7 = vsub.f32 %v5535_v40, %v635_v63  ;;  %v5542_v22 = vmin.f32 %v5541_v58, %v5457_v1  ;;  %v5544_v35 = vmin.f32 %v5543_v47, %v5457_v1  ;;  %v5550_v47 = vld [vmem:[#allocation50_spill] sm:$0xff] }
 0x245   : > { %v684_v8 = vsub.f32 %v5537_v23, %v636_v62  ;;  %v685_v34 = vsub.f32 %v5538_v29, %v637_v53  ;;  %v686_v0 = vsub.f32 %v5540_v24, %v638_v33  ;;  %v5545_v16 = vmin.f32 %v5483_v2, %v5457_v1  ;;  %v5547_v24 = vld [vmem:[#allocation106_spill] sm:$0xff]  ;;  %v5553_v29 = vld [vmem:[#allocation55_spill] sm:$0xff] }
 0x246   : > { %v687_v14 = vsub.f32 %v5542_v22, %v639_v41  ;;  %v688_v63 = vsub.f32 %v5544_v35, %v640_v15  ;;  %v4234_v3 = vadd.f32 1.0, %v674_v43  ;;  %v4236_v44 = vadd.f32 1.0, %v675_v18  ;;  %v5549_v22 = vld [vmem:[#allocation49_spill] sm:$0xff]  ;;  %v5554_v23 = vld [vmem:[#allocation123_spill] sm:$0xff] }
 0x247   : > { %v689_v62 = vsub.f32 %v5545_v16, %v641_v52  ;;  %v4238_v53 = vadd.f32 1.0, %v676_v57  ;;  %v4240_v30 = vadd.f32 1.0, %v677_v11  ;;  %v4242_v33 = vadd.f32 1.0, %v678_v39 }
 0x248   : > { %v4244_v51 = vadd.f32 1.0, %v679_v46  ;;  %v4246_v41 = vadd.f32 1.0, %v680_v6  ;;  %v4248_v27 = vadd.f32 1.0, %v681_v42  ;;  %v4250_v15 = vadd.f32 1.0, %v682_v21 }
 0x249   : > { %v4252_v1 = vadd.f32 1.0, %v683_v7  ;;  %v4254_v2 = vadd.f32 1.0, %v684_v8  ;;  %v4256_v52 = vadd.f32 1.0, %v685_v34  ;;  %v4258_v57 = vadd.f32 1.0, %v686_v0  ;;  %v5548_v0 = vld [vmem:[#allocation48_spill] sm:$0xff] }
 0x24a   : > { %v4260_v43 = vadd.f32 1.0, %v687_v14  ;;  %v4262_v18 = vadd.f32 1.0, %v688_v63  ;;  %v4264_v11 = vadd.f32 1.0, %v689_v62  ;;  %v912_v58 = vmin.f32 %v5548_v0, %v5547_v24  ;;  %v5551_v63 = vld [vmem:[#allocation51_spill] sm:$0xff]  ;;  %v5552_v62 = vld [vmem:[#allocation52_spill] sm:$0xff] }
 0x24b   : > { %v913_v14 = vmin.f32 %v5549_v22, %v5547_v24  ;;  %v914_v35 = vmin.f32 %v5550_v47, %v5547_v24  ;;  %v915_v16 = vmin.f32 %v5551_v63, %v5547_v24  ;;  %v916_v8 = vmin.f32 %v5552_v62, %v5547_v24  ;;  %v5556_v0 = vld [vmem:[#allocation56_spill] sm:$0xff]  ;;  %v5557_v22 = vld [vmem:[#allocation57_spill] sm:$0xff]  ;;  %v5558_v47 = vld [vmem:[#allocation58_spill] sm:$0xff] }
 0x24c   : > { %5546 = vst [vmem:[#allocation105_spill] sm:$0xff] %v4264_v11  ;;  %v917_v34 = vmin.f32 %v5553_v29, %v5547_v24  ;;  %v1054_v12 = vmax.f32 %v5555_v50, %v5554_v23  ;;  %v918_v7 = vmin.f32 %v5556_v0, %v5547_v24  ;;  %v919_v40 = vmin.f32 %v5557_v22, %v5547_v24  ;;  %v5559_v63 = vld [vmem:[#allocation69_spill] sm:$0xff]  ;;  %v5560_v62 = vld [vmem:[#allocation59_spill] sm:$0xff]  ;;  %v5561_v29 = vld [vmem:[#allocation60_spill] sm:$0xff] }
 0x24d   : > { %v920_v21 = vmin.f32 %v5558_v47, %v5547_v24  ;;  %v1055_v13 = vmax.f32 %v5559_v63, %v5554_v23  ;;  %v921_v42 = vmin.f32 %v5560_v62, %v5547_v24  ;;  %v922_v20 = vmin.f32 %v5561_v29, %v5547_v24  ;;  %v5562_v50 = vld [vmem:[#allocation63_spill] sm:$0xff]  ;;  %v5563_v0 = vld [vmem:[#allocation70_spill] sm:$0xff]  ;;  %v5564_v22 = vld [vmem:[#allocation64_spill] sm:$0xff] }
 0x24e   : > { %v923_v6 = vmin.f32 %v5562_v50, %v5547_v24  ;;  %v1056_v48 = vmax.f32 %v5563_v0, %v5554_v23  ;;  %v924_v46 = vmin.f32 %v5564_v22, %v5547_v24  ;;  %v5565_v47 = vld [vmem:[#allocation65_spill] sm:$0xff]  ;;  %v5566_v63 = vld [vmem:[#allocation66_spill] sm:$0xff]  ;;  %v5567_v62 = vld [vmem:[#allocation71_spill] sm:$0xff]  ;;  %v1102_v36 = vsub.f32 %v912_v58, %v1054_v12 }
 0x24f   : > { %v925_v39 = vmin.f32 %v5565_v47, %v5547_v24  ;;  %v926_v45 = vmin.f32 %v5566_v63, %v5547_v24  ;;  %v1057_v28 = vmax.f32 %v5567_v62, %v5554_v23  ;;  %v5568_v29 = vld [vmem:[#allocation67_spill] sm:$0xff]  ;;  %v5569_v50 = vld [vmem:[#allocation72_spill] sm:$0xff]  ;;  %v5570_v0 = vld [vmem:[#allocation73_spill] sm:$0xff]  ;;  %v1103_v62 = vsub.f32 %v913_v14, %v1055_v13 }
 0x250   : > { %v927_v61 = vmin.f32 %v5568_v29, %v5547_v24  ;;  %v1058_v10 = vmax.f32 %v5569_v50, %v5554_v23  ;;  %v1059_v17 = vmax.f32 %v5570_v0, %v5554_v23  ;;  %v5571_v22 = vld [vmem:[#allocation74_spill] sm:$0xff]  ;;  %v5572_v47 = vld [vmem:[#allocation75_spill] sm:$0xff]  ;;  %v5573_v63 = vld [vmem:[#allocation76_spill] sm:$0xff]  ;;  %v1063_v24 = vmax.f32 %v5574_v54, %v5554_v23 }
 0x251   : > { %v1060_v49 = vmax.f32 %v5571_v22, %v5554_v23  ;;  %v1061_v55 = vmax.f32 %v5572_v47, %v5554_v23  ;;  %v1062_v9 = vmax.f32 %v5573_v63, %v5554_v23  ;;  %v5575_v29 = vld [vmem:[#allocation78_spill] sm:$0xff]  ;;  %v1065_v0 = vmax.f32 %v5576_v26, %v5554_v23  ;;  %v5577_v58 = vld [vmem:[#allocation80_spill] sm:$0xff]  ;;  %v5580_v14 = vld [vmem:[#allocation83_spill] sm:$0xff] }
 0x252   : > { %v1064_v50 = vmax.f32 %v5575_v29, %v5554_v23  ;;  %v1104_v12 = vsub.f32 %v914_v35, %v1056_v48  ;;  %v1066_v22 = vmax.f32 %v5577_v58, %v5554_v23  ;;  %v1067_v47 = vmax.f32 %v5578_v31, %v5554_v23 }
 0x253   : > { %v1068_v63 = vmax.f32 %v5579_v5, %v5554_v23  ;;  %v1105_v13 = vsub.f32 %v915_v16, %v1057_v28  ;;  %v1069_v54 = vmax.f32 %v5580_v14, %v5554_v23  ;;  %v1106_v19 = vsub.f32 %v916_v8, %v1058_v10 }
 0x254   : > { %v1107_v25 = vsub.f32 %v917_v34, %v1059_v17  ;;  %v1150_v29 = vadd.f32 1.0, %v1102_v36  ;;  %v1108_v4 = vsub.f32 %v918_v7, %v1060_v49  ;;  %v1109_v32 = vsub.f32 %v919_v40, %v1061_v55 }
 0x255   : > { %v1110_v26 = vsub.f32 %v920_v21, %v1062_v9  ;;  %v1151_v48 = vadd.f32 1.0, %v1103_v62  ;;  %v1111_v35 = vsub.f32 %v921_v42, %v1063_v24  ;;  %v1112_v59 = vsub.f32 %v922_v20, %v1064_v50  ;;  %v5581_v21 = vld [vmem:[#allocation84_spill] sm:$0xff]  ;;  %v5582_v42 = vld [vmem:[#allocation125_spill] sm:$0xff] }
 0x256   : > { %v1113_v58 = vsub.f32 %v923_v6, %v1065_v0  ;;  %v1152_v38 = vadd.f32 1.0, %v1104_v12  ;;  %v1114_v37 = vsub.f32 %v924_v46, %v1066_v22  ;;  %v1115_v31 = vsub.f32 %v925_v39, %v1067_v47  ;;  %v5583_v39 = vld [vmem:[#allocation85_spill] sm:$0xff] }
 0x257   : > { %v1116_v56 = vsub.f32 %v926_v45, %v1068_v63  ;;  %v1153_v60 = vadd.f32 1.0, %v1105_v13  ;;  %v1117_v5 = vsub.f32 %v927_v61, %v1069_v54  ;;  %v1154_v28 = vadd.f32 1.0, %v1106_v19 }
 0x258   : > { %v1155_v16 = vadd.f32 1.0, %v1107_v25  ;;  %v1198_v11 = vmax.f32 %v1150_v29, 0.0  ;;  %v1156_v23 = vadd.f32 1.0, %v1108_v4  ;;  %v1157_v10 = vadd.f32 1.0, %v1109_v32  ;;  %v5585_v32 = vld [vmem:[#allocation86_spill] sm:$0xff] }
 0x259   : > { %v1158_v17 = vadd.f32 1.0, %v1110_v26  ;;  %v1199_v36 = vmax.f32 %v1151_v48, 0.0  ;;  %v1159_v49 = vadd.f32 1.0, %v1111_v35  ;;  %v1160_v55 = vadd.f32 1.0, %v1112_v59  ;;  %v5593_v35 = vld [vmem:[#allocation91_spill] sm:$0xff] }
 0x25a   : > { %v1200_v9 = vmax.f32 %v1152_v38, 0.0  ;;  %v1391_v20 = vadd.f32 %v5582_v42, %v5581_v21  ;;  %v1161_v6 = vadd.f32 1.0, %v1113_v58  ;;  %v1162_v40 = vadd.f32 1.0, %v1114_v37 }
 0x25b   : > { %v1201_v46 = vmax.f32 %v1153_v60, 0.0  ;;  %v1392_v45 = vadd.f32 %v5582_v42, %v5583_v39  ;;  %v1163_v61 = vadd.f32 1.0, %v1115_v31  ;;  %v1202_v19 = vmax.f32 %v1154_v28, 0.0  ;;  %v5587_v60 = vld [vmem:[#allocation88_spill] sm:$0xff] }
 0x25c   : > { %v5584_v25 = vmax.f32 %v4234_v3, 0.0  ;;  %v1393_v7 = vadd.f32 %v5582_v42, %v5585_v32  ;;  %v1164_v59 = vadd.f32 1.0, %v1116_v56  ;;  %v4356_v38 = vadd.f32 1.0, %v1117_v5  ;;  %v5589_v3 = vld [vmem:[#allocation89_spill] sm:$0xff]  ;;  %v5595_v28 = vld [vmem:[#allocation92_spill] sm:$0xff] }
 0x25d   : > { %v5586_v8 = vmax.f32 %v4236_v44, 0.0  ;;  %v1394_v37 = vadd.f32 %v5582_v42, %v5587_v60  ;;  %v1203_v62 = vmax.f32 %v1155_v16, 0.0  ;;  %v5588_v24 = vmax.f32 %v4238_v53, 0.0  ;;  %v5592_v53 = vld [vmem:[#allocation90_spill] sm:$0xff] }
 0x25e   : > { %v4352_v4 = vmul.f32 %v1198_v11, %v5584_v25  ;;  %v1395_v11 = vadd.f32 %v5582_v42, %v5589_v3  ;;  %v1204_v56 = vmax.f32 %v1156_v23, 0.0  ;;  %v1205_v12 = vmax.f32 %v1157_v10, 0.0 }
 0x25f   : > { %v4360_v34 = vmul.f32 %v1199_v36, %v5586_v8  ;;  %v4366_v50 = vmul.f32 %v1200_v9, %v5588_v24  ;;  %v5590_v22 = vmax.f32 %v4240_v30, 0.0  ;;  %v1206_v63 = vmax.f32 %v1158_v17, 0.0  ;;  %v5603_v8 = vld [vmem:[#allocation96_spill] sm:$0xff] }
 0x260   : > { %v1439_v0 = vsub.f32 %v1391_v20, %v4352_v4  ;;  %v5591_v13 = vmax.f32 %v4242_v33, 0.0  ;;  %v1396_v54 = vadd.f32 %v5582_v42, %v5592_v53  ;;  %v1207_v26 = vmax.f32 %v1159_v49, 0.0 }
 0x261   : > { %v4373_v44 = vmul.f32 %v1201_v46, %v5590_v22  ;;  %v1440_v47 = vsub.f32 %v1392_v45, %v4360_v34  ;;  %v1441_v29 = vsub.f32 %v1393_v7, %v4366_v50  ;;  %v1208_v48 = vmax.f32 %v1160_v55, 0.0  ;;  %v5599_v46 = vld [vmem:[#allocation94_spill] sm:$0xff] }
 0x262   : > { %v4378_v14 = vmul.f32 %v1202_v19, %v5591_v13  ;;  %v1397_v58 = vadd.f32 %v5582_v42, %v5593_v35  ;;  %v5594_v31 = vmax.f32 %v4244_v51, 0.0  ;;  %v1398_v33 = vadd.f32 %v5582_v42, %v5595_v28  ;;  %v5598_v51 = vld [vmem:[#allocation93_spill] sm:$0xff]  ;;  %v5611_v13 = vld [vmem:[#allocation100_spill] sm:$0xff] }
 0x263   : > { %v1442_v30 = vsub.f32 %v1394_v37, %v4373_v44  ;;  %2233 = vrcp.f32 %v1439_v0  ;;  %v1209_v23 = vmax.f32 %v1161_v6, 0.0  ;;  %v1210_v10 = vmax.f32 %v1162_v40, 0.0 }
 0x264   : > { %v4388_v5 = vmul.f32 %v1203_v62, %v5594_v31  ;;  %v1443_v16 = vsub.f32 %v1395_v11, %v4378_v14  ;;  %v5596_v17 = vmax.f32 %v4246_v41, 0.0  ;;  %2235 = vrcp.f32 %v1440_v47  ;;  %v5605_v62 = vld [vmem:[#allocation97_spill] sm:$0xff] }
 0x265   : > { %v5597_v49 = vmax.f32 %v4248_v27, 0.0  ;;  %v1399_v9 = vadd.f32 %v5582_v42, %v5598_v51  ;;  %2237 = vrcp.f32 %v1441_v29  ;;  %v1211_v20 = vmax.f32 %v1163_v61, 0.0  ;;  %v5601_v27 = vld [vmem:[#allocation95_spill] sm:$0xff] }
 0x266   : > { %v4395_v36 = vmul.f32 %v1204_v56, %v5596_v17  ;;  %v1444_v21 = vsub.f32 %v1396_v54, %v4388_v5  ;;  %v1400_v6 = vadd.f32 %v5582_v42, %v5599_v46  ;;  %2239 = vrcp.f32 %v1442_v30 }
 0x267   : > { %v4399_v55 = vmul.f32 %v1205_v12, %v5597_v49  ;;  %v5600_v41 = vmax.f32 %v4250_v15, 0.0  ;;  %v1401_v45 = vadd.f32 %v5582_v42, %v5601_v27  ;;  %2241 = vrcp.f32 %v1443_v16  ;;  %v5609_v12 = vld [vmem:[#allocation99_spill] sm:$0xff] }
 0x268   : > { %v1445_v40 = vsub.f32 %v1397_v58, %v4395_v36  ;;  %v1212_v25 = vmax.f32 %v1164_v59, 0.0  ;;  %v1213_v32 = vmax.f32 %v4356_v38, 0.0  ;;  %v5602_v61 = vmax.f32 %v4252_v1, 0.0  ;;  %v5607_v1 = vld [vmem:[#allocation98_spill] sm:$0xff]  ;;  %v5613_v58 = vld [vmem:[#allocation105_spill] sm:$0xff] }
 0x269   : > { %v4409_v39 = vmul.f32 %v1206_v63, %v5600_v41  ;;  %v1446_v19 = vsub.f32 %v1398_v33, %v4399_v55  ;;  %v1402_v60 = vadd.f32 %v5582_v42, %v5603_v8  ;;  %v5604_v15 = vmax.f32 %v4254_v2, 0.0 }
 0x26a   : > { %v4417_v7 = vmul.f32 %v1207_v26, %v5602_v61  ;;  %v1403_v24 = vadd.f32 %v5582_v42, %v5605_v62  ;;  %2243 = vrcp.f32 %v1444_v21  ;;  %v5606_v59 = vmax.f32 %v4256_v52, 0.0 }
 0x26b   : > { %v4423_v37 = vmul.f32 %v1208_v48, %v5604_v15  ;;  %v1447_v3 = vsub.f32 %v1399_v9, %v4409_v39  ;;  %v1404_v11 = vadd.f32 %v5582_v42, %v5607_v1  ;;  %2245 = vrcp.f32 %v1445_v40  ;;  %v5619_v15 = vld [vmem:[#allocation119_spill] sm:$0xff] }
 0x26c   : > { %v4430_v38 = vmul.f32 %v1209_v23, %v5606_v59  ;;  %v1448_v0 = vsub.f32 %v1400_v6, %v4417_v7  ;;  %v5608_v2 = vmax.f32 %v4258_v57, 0.0  ;;  %v1405_v22 = vadd.f32 %v5582_v42, %v5609_v12  ;;  %v4461_v23 = vpop.permute.xlu1 %1561 }
 0x26d   : > { %v1449_v47 = vsub.f32 %v1401_v45, %v4423_v37  ;;  %2247 = vrcp.f32 %v1446_v19  ;;  %v5610_v52 = vmax.f32 %v4260_v43, 0.0  ;;  %v1406_v53 = vadd.f32 %v5582_v42, %v5611_v13  ;;  %v2234_v29 = vpop.eup %2233  ;;  %v5615_v19 = vld [vmem:[#allocation116_spill] sm:$0xff] }
 0x26e   : > { %v4437_v56 = vmul.f32 %v1210_v10, %v5608_v2  ;;  %v1450_v54 = vsub.f32 %v1402_v60, %v4430_v38  ;;  %v5612_v57 = vmax.f32 %v4262_v18, 0.0  ;;  %2249 = vrcp.f32 %v1447_v3  ;;  %v2236_v35 = vpop.eup %2235 }
 0x26f   : > { %v4444_v63 = vmul.f32 %v1211_v20, %v5610_v52  ;;  %v5614_v30 = vmax.f32 %v5613_v58, 0.0  ;;  %2251 = vrcp.f32 %v1448_v0  ;;  %v2238_v28 = vpop.eup %2237  ;;  %v1535_v10 = vmul.f32 %v2234_v29, %v4352_v4  ;;  %v5627_v52 = vld [vmem:[#allocation13_spill] sm:$0xff] }
 0x270   : > { %v4451_v26 = vmul.f32 %v1212_v25, %v5612_v57  ;;  %v1451_v48 = vsub.f32 %v1403_v24, %v4437_v56  ;;  %2253 = vrcp.f32 %v1449_v47  ;;  %v2240_v33 = vpop.eup %2239  ;;  %v1537_v17 = vmul.f32 %v2238_v28, %v4366_v50  ;;  %v5630_v57 = vld [vmem:[#allocation127_spill] sm:$0xff]  ;;  %v5634_v28 = vld [vmem:[#allocation12_spill] sm:$0xff] }
 0x271   : > { %v4456_v31 = vmul.f32 %v1213_v32, %v5614_v30  ;;  %v1452_v43 = vsub.f32 %v1404_v11, %v4444_v63  ;;  %2255 = vrcp.f32 %v1450_v54  ;;  %v2242_v16 = vpop.eup %2241  ;;  %v1536_v51 = vmul.f32 %v2236_v35, %v4360_v34  ;;  %v5617_v32 = vld [vmem:[#allocation62_spill] sm:$0xff]  ;;  %v5623_v11 = vld [vmem:[#allocation120_spill] sm:$0xff] }
 0x272   : > { %v1453_v42 = vsub.f32 %v1405_v22, %v4451_v26  ;;  %2257 = vrcp.f32 %v1451_v48  ;;  %v1538_v9 = vmul.f32 %v2240_v33, %v4373_v44  ;;  %v1539_v20 = vmul.f32 %v2242_v16, %v4378_v14  ;;  %v5625_v22 = vld [vmem:[#allocation9_spill] sm:$0xff]  ;;  %v5632_v35 = vld [vmem:[#allocation128_spill] sm:$0xff]  ;;  %v5660_v54 = vld [vmem:[#allocation142_spill] sm:$0xff] }
 0x273   : > { %v1454_v18 = vsub.f32 %v1406_v53, %v4456_v31  ;;  %2259 = vrcp.f32 %v1452_v43  ;;  %vm1565_vm14 = vcmp.eq.s32.totalorder %v4461_v23, 1  ;;  %vm5616_vm9 = vnez %v5615_v19  ;;  %v5636_v33 = vld [vmem:[#allocation129_spill] sm:$0xff]  ;;  %v5656_v23 = vld [vmem:[#allocation108_spill] sm:$0xff] }
 0x274   : > { %v2244_v49 = vpop.eup %2243  ;;  %2261 = vrcp.f32 %v1453_v42  ;;  %v1598_v4 = vsel %vm1565_vm14, 0.0, %v1535_v10  ;;  %v1600_v50 = vsel %vm1565_vm14, 0.0, %v1537_v17  ;;  %v1599_v44 = vsel %vm1565_vm14, 0.0, %v1536_v51  ;;  %v5638_v10 = vld [vmem:[#allocation15_spill] sm:$0xff] }
 0x275   : > { %v2246_v21 = vpop.eup %2245  ;;  %2263 = vrcp.f32 %v1454_v18  ;;  %v1540_v6 = vmul.f32 %v2244_v49, %v4388_v5  ;;  %v1601_v14 = vsel %vm1565_vm14, 0.0, %v1538_v9  ;;  %v1602_v5 = vsel %vm1565_vm14, 0.0, %v1539_v20  ;;  %v5640_v9 = vld [vmem:[#allocation131_spill] sm:$0xff] }
 0x276   : > { %v1541_v34 = vmul.f32 %v2246_v21, %v4395_v36  ;;  %v1728_v25 = vsel %vm5616_vm9, -1.0, %v1598_v4  ;;  %vm5618_vm6 = vnez %v5617_v32  ;;  %vm5620_vm5 = vnez %v5619_v15 }
 0x277   : > { %v2248_v46 = vpop.eup %2247  ;;  %v1730_v61 = vsel %vm5618_vm6, -1.0, %v1600_v50  ;;  %v1603_v60 = vsel %vm1565_vm14, 0.0, %v1540_v6  ;;  %v1729_v62 = vsel %vm5620_vm5, -1.0, %v1599_v44  ;;  %vm5624_vm6 = vnez %v5623_v11 }
 0x278   : > { %v2250_v40 = vpop.eup %2249  ;;  %v1542_v27 = vmul.f32 %v2248_v46, %v4399_v55  ;;  %v5621_v55 = vld [vmem:[#allocation8_spill] sm:$0xff]  ;;  %v1604_v1 = vsel %vm1565_vm14, 0.0, %v1541_v34  ;;  %v1732_v0 = vsel %vm5624_vm6, -1.0, %v1602_v5  ;;  %vm5626_vm9 = vnez %v5625_v22  ;;  %v5654_v22 = vld [vmem:[#allocation113_spill] sm:$0xff] }
 0x279   : > { %v2252_v41 = vpop.eup %2251  ;;  %v1543_v8 = vmul.f32 %v2250_v40, %v4409_v39  ;;  %vm5622_vm8 = vnez %v5621_v55  ;;  %v1858_v47 = vsel %vm5626_vm9, %v1728_v25, 0.0  ;;  %v1733_v29 = vsel %vm5489_vm11, -1.0, %v1603_v60 }
 0x27a   : > { %v2254_v45 = vpop.eup %2253  ;;  %v1731_v24 = vsel %vm5622_vm8, -1.0, %v1601_v14  ;;  %v1544_v59 = vmul.f32 %v2252_v41, %v4417_v7  ;;  %v1605_v12 = vsel %vm1565_vm14, 0.0, %v1542_v27  ;;  %vm5628_vm8 = vnez %v5627_v52 }
 0x27b   : > { %v2256_v36 = vpop.eup %2255  ;;  %v1545_v39 = vmul.f32 %v2254_v45, %v4423_v37  ;;  %v1860_v13 = vsel %vm5628_vm8, %v1730_v61, 0.0  ;;  %vm5631_vm5 = vnez %v5630_v57  ;;  %vm5633_vm6 = vnez %v5632_v35 }
 0x27c   : > { %v2258_v3 = vpop.eup %2257  ;;  %v1546_v7 = vmul.f32 %v2256_v36, %v4430_v38  ;;  %v1859_v48 = vsel %vm5631_vm5, %v1729_v62, 0.0  ;;  %v1861_v37 = vsel %vm5633_vm6, %v1731_v24, 0.0  ;;  %v1606_v43 = vsel %vm1565_vm14, 0.0, %v1543_v8 }
 0x27d   : > { %v2260_v2 = vpop.eup %2259  ;;  %v1547_v30 = vmul.f32 %v2258_v3, %v4437_v56  ;;  %vm5635_vm9 = vnez %v5634_v28  ;;  %vm5637_vm8 = vnez %v5636_v33  ;;  %v1607_v16 = vsel %vm1565_vm14, 0.0, %v1544_v59  ;;  %v5666_v28 = vld [vmem:[#allocation104_spill] sm:$0xff] }
 0x27e   : > { %v2262_v53 = vpop.eup %2261  ;;  %v1734_v42 = vsel %vm5635_vm9, -1.0, %v1604_v1  ;;  %v1862_v38 = vsel %vm5637_vm8, %v1732_v0, 0.0  ;;  %v1548_v18 = vmul.f32 %v2260_v2, %v4444_v63  ;;  %vm5639_vm11 = vnez %v5638_v10  ;;  %v5652_v2 = vld [vmem:[#allocation140_spill] sm:$0xff] }
 0x27f   : > { %v2264_v58 = vpop.eup %2263  ;;  %v1735_v17 = vsel %vm5639_vm11, -1.0, %v1605_v12  ;;  %v1908_v49 = vmax.f32 %v1858_v47, %v1860_v13  ;;  %v1549_v56 = vmul.f32 %v2262_v53, %v4451_v26  ;;  %v1608_v51 = vsel %vm1565_vm14, 0.0, %v1545_v39  ;;  %v5658_v53 = vld [vmem:[#allocation141_spill] sm:$0xff] }
 0x280   : > { %vm5641_vm5 = vnez %v5640_v9  ;;  %v1909_v20 = vmax.f32 %v1859_v48, %v1861_v37  ;;  %v1550_v46 = vmul.f32 %v2264_v58, %v4456_v31  ;;  %v1609_v63 = vsel %vm1565_vm14, 0.0, %v1546_v7  ;;  %v5662_v48 = vld [vmem:[#allocation109_spill] sm:$0xff]  ;;  %v5664_v58 = vld [vmem:[#allocation103_spill] sm:$0xff]  ;;  %v1927_v9 = vld [vmem:[%s2595_s11 + $0x10] sm:$0xff] }
 0x281   : > { %v1863_v21 = vsel %vm5641_vm5, %v1733_v29, 0.0  ;;  %v1736_v4 = vsel %vm5500_vm13, -1.0, %v1606_v43  ;;  %v1910_v50 = vmax.f32 %v1908_v49, %v1862_v38  ;;  %v1610_v40 = vsel %vm1565_vm14, 0.0, %v1547_v30  ;;  %v1926_v49 = vld [vmem:[%s2595_s11 + $0x8] sm:$0xff] }
 0x282   : > { %v1737_v34 = vsel %vm5501_vm3, -1.0, %v1607_v16  ;;  %v1864_v14 = vsel %vm5503_vm12, %v1734_v42, 0.0  ;;  %v1911_v41 = vmax.f32 %v1909_v20, %v1863_v21  ;;  %v1611_v31 = vsel %vm1565_vm14, 0.0, %v1548_v18  ;;  %v1925_v16 = vld [vmem:[%s2595_s11] sm:$0xff] }
 0x283   : > { %v1738_v5 = vsel %vm5425_vm7, -1.0, %v1608_v51  ;;  %v1865_v19 = vsel %vm5504_vm10, %v1735_v17, 0.0  ;;  %v1912_v25 = vmax.f32 %v1910_v50, %v1864_v14  ;;  %v1612_v32 = vsel %vm1565_vm14, 0.0, %v1549_v56 }
 0x284   : > { %v1739_v36 = vsel %vm3782_vm2, -1.0, %v1609_v63  ;;  %v1866_v60 = vsel %vm3770_vm1, %v1736_v4, 0.0  ;;  %v1913_v15 = vmax.f32 %v1911_v41, %v1865_v19  ;;  %v1613_v62 = vsel %vm1565_vm14, 0.0, %v1550_v46 }
 0x285   : > { %v1740_v24 = vsel %vm3811_vm4, -1.0, %v1610_v40  ;;  %v1867_v59 = vsel %vm3799_vm15, %v1737_v34, 0.0  ;;  %v1914_v1 = vmax.f32 %v1912_v25, %v1866_v60  ;;  %v1741_v0 = vsel %vm3824_vm0, -1.0, %v1611_v31 }
 0x286   : > { %vm5653_vm3 = vnez %v5652_v2  ;;  %v1915_v12 = vmax.f32 %v1913_v15, %v1867_v59  ;;  %vm5655_vm7 = vnez %v5654_v22  ;;  %vm5657_vm10 = vnez %v5656_v23 }
 0x287   : > { %v1868_v39 = vsel %vm5653_vm3, %v1738_v5, 0.0  ;;  %v1742_v47 = vsel %vm5655_vm7, -1.0, %v1612_v32  ;;  %v1869_v52 = vsel %vm5657_vm10, %v1739_v36, 0.0  ;;  %vm5659_vm4 = vnez %v5658_v53 }
 0x288   : > { %v1916_v13 = vmax.f32 %v1914_v1, %v1868_v39  ;;  %v1743_v7 = vsel %vm5659_vm4, -1.0, %v1613_v62  ;;  %vm5661_vm1 = vnez %v5660_v54  ;;  %v1917_v57 = vmax.f32 %v1915_v12, %v1869_v52 }
 0x289   : > { %v1870_v29 = vsel %vm5661_vm1, %v1740_v24, 0.0  ;;  %vm5663_vm2 = vnez %v5662_v48  ;;  %vm5665_vm15 = vnez %v5664_v58  ;;  %vm5667_vm0 = vnez %v5666_v28 }
 0x28a   : > { %v1871_v35 = vsel %vm5663_vm2, %v1741_v0, 0.0  ;;  %v1918_v37 = vmax.f32 %v1916_v13, %v1870_v29  ;;  %v1872_v30 = vsel %vm5665_vm15, %v1742_v47, 0.0  ;;  %v1873_v42 = vsel %vm5667_vm0, %v1743_v7, 0.0 }
 0x28b   : > { %v1919_v43 = vmax.f32 %v1917_v57, %v1871_v35  ;;  %vm1931_vm12 = vcmask 7168  }
 0x28c   : > { %v1920_v33 = vmax.f32 %v1918_v37, %v1872_v30 }
 0x28d   : > { %v1921_v38 = vmax.f32 %v1919_v43, %v1873_v42 }
 0x28f   : > { %v1922_v18 = vmax.f32 %v1920_v33, %v1921_v38 }
 0x291   : > { %1923 = vmax.xlane.f32.xlu0 %v1922_v18 }
 0x2ad   : > { %v1890_v10 = vpop.xlane.xlu0 %1889 }
 0x2ae   : > { %v1928_v17 = vmax.f32 %v1925_v16, %v1890_v10 }
 0x2b0   : > { %1932 = vst.msk [vmem:[%s2595_s11] sm:$0xff] %vm1931_vm12, %v1928_v17 }
 0x2ce   : > { %v1907_v56 = vpop.xlane.xlu1 %1906 }
 0x2cf   : > { %v1929_v51 = vmax.f32 %v1926_v49, %v1907_v56 }
 0x2d1   : > { %1933 = vst.msk [vmem:[%s2595_s11 + $0x8] sm:$0xff] %vm1931_vm12, %v1929_v51 }
 0x31e   : > { %v1924_v21 = vpop.xlane.xlu0 %1923 }
 0x31f   : > { %v1930_v20 = vmax.f32 %v1927_v9, %v1924_v21 }
 0x321   : > { %1934 = vst.msk [vmem:[%s2595_s11 + $0x10] sm:$0xff] %vm1931_vm12, %v1930_v20 }
 0x322 PF: > { %s19_s19 = sadd.s32 1, %s2395_s19   ;;  %s5668_s12 = smov %s2371_s13 }
 0x323   : > { %p16_p7 = scmp.ge.s32.totalorder %s19_s19, 6   ;;  %s5669_s13 = smov %s2375_s14 }
 0x324   : > { %s5670_s14 = smov %s2484_s26  ;;  %s5671_s15 = smov %s2387_s17 }
 0x325   : > { %s5672_s16 = smov %s2391_s18  ;;  %s5673_s17 = smov %s5676_s21 }
 0x326   : > { %s5674_s18 = smov %s5680_s22  ;;  %18 = sbr.rel (!%p16_p7) target bundleno = 7 (0x7), region = 99 }
 0x32d   :  { %1956 = vsyncpa [#allocation3], 1 }
 0x32e   :  { %1958 = vsyncpa [#allocation3 + $0x1], 1 }
 0x32f   :  { %1959 = vsyncpa [#allocation5], 1 }
 0x330   :  { %1961 = vsyncpa [#allocation5 + $0x1], 1 }

// kernel: _anchor_target_core.7
= control target key start
LH: loop header
LB: loop body
LE: loop exit
PB: predicated region body
PF: predicated region fallthrough
CT: control target
= control target key end

     0   :  { %s8033_s0 = inlined_call_operand.hbm [shape: f32[1,4096], index: 0, kind: input, shape index: {}]   ;;  %s8034_s1 = inlined_call_operand.hbm [shape: f32[4,4096], index: 1, kind: input, shape index: {}]   ;;  %s8035_s2 = inlined_call_operand.vmem [shape: f32[2,24,5], index: 2, kind: input, shape index: {}]   ;;  %s8036_s3 = inlined_call_operand.vmem [shape: f32[2,4,24], index: 3, kind: input, shape index: {}]   ;;  %s8037_s4 = inlined_call_operand.vmem [shape: f32[2,24,1], index: 4, kind: input, shape index: {}]   ;;  %s8038_s5 = inlined_call_operand.vmem [shape: f32[2,1,4096], index: 5, kind: output, shape index: {0}]   ;;  %s8039_s6 = inlined_call_operand.vmem [shape: f32[2,4,4096], index: 6, kind: output, shape index: {1}]  }
   0x1   :  { %8198 = sst [smem:[#allocation67_spill]] %s8033_s0 }
   0x2   :  { %12 = vsyncpa [#allocation3], 0 }
   0x3   :  { %14 = vsyncpa [#allocation3 + $0x1], 0 }
   0x4   :  { %15 = vsyncpa [#allocation5], 0 }
   0x5   :  { %17 = vsyncpa [#allocation5 + $0x1], 0  ;;  %s5275_s21 = smov 0   ;;  %s5277_s22 = smov 0  }
   0x6   :  { %s5279_s23 = smov 0   ;;  %s5281_s24 = smov 0  }
   0x7   :  { %s5283_s25 = smov 0   ;;  %s5285_s26 = smov 0  }
   0x8   :  { %s5287_s27 = smov 0   ;;  %s5289_s28 = smov 0  }
   0x9 LB: > { %s4599_s29 = sadd.s32 4294967295, %s5225_s28   ;;  %s32_s30 = sadd.s32 1, %s5217_s26  ;;  %s5225_s28 = sphi %s5289_s28, %s23_s28   ;;  %s5221_s27 = sphi %s5287_s27, %s8517_s27   ;;  %s5217_s26 = sphi %s5285_s26, %s8516_s26   ;;  %s5213_s25 = sphi %s5283_s25, %s8515_s25   ;;  %s5209_s24 = sphi %s5281_s24, %s8514_s24   ;;  %s5205_s23 = sphi %s5279_s23, %s8513_s23   ;;  %s5201_s22 = sphi %s5277_s22, %s8512_s22   ;;  %s5197_s21 = sphi %s5275_s21, %s8511_s21  }
   0xa   : > { %p33_p0 = scmp.ge.s32.totalorder %s32_s30, 2  ;;  %s35_s7 = sadd.s32 1, %s5221_s27 }
   0xb   : > { %s42_s8 = sadd.s32 1, %s5205_s23  ;;  %p49_p1 = scmp.ne.s32.totalorder %s5205_s23, %s5201_s22 }
   0xc   : > { %s8519_s30 = smov (%p33_p0, %s32_s30), 0  ;;  %s8521_s7 = smov (!%p33_p0, %s35_s7), %s5221_s27 }
   0xd   : > { %s39_s9 = ssub.s32 %s5217_s26, %s8519_s30  ;;  %p50_p2 = scmp.eq.s32.totalorder %s5225_s28, 0 }
   0xe   : > { %p37_p3 = scmp.ge.s32.totalorder %s8521_s7, 2  ;;  %p40_p4 = scmp.eq.s32.totalorder %s39_s9, 0 }
   0xf   : > { %p5325_p5 = por %p50_p2, %p49_p1  ;;  %p55_p6 = scmp.ne.s32.totalorder %s5201_s22, %s5197_s21 }
  0x10   : > { %s8523_s7 = smov (%p37_p3, %s8521_s7), 0  ;;  %p56_p7 = scmp.eq.s32.totalorder %s4599_s29, 0 }
  0x11   : > { %s5333_s11 = scalar_select %p40_p4, %s5205_s23, %s42_s8  }
  0x12   : > { %p4827_p8 = scmp.lt.s32.totalorder %s5225_s28, 4  ;;  %s5337_s12 = sand.u32 1, %s5205_s23  }
  0x13   : > { %p5339_p9 = por %p56_p7, %p55_p6  ;;  %s4603_s14 = sshll.u32 %s5337_s12, 4 }
  0x14   : > { %s4781_s15 = sshll.u32 %s5217_s26, 8  ;;  %s8201_s0 = sld [smem:[#allocation67_spill]] }
  0x15   : > { %s8200_s13 = scalar_select %p5339_p9, 1, 0 }
  0x16   : > { %s243_s19 = scalar_lea.vmem [#allocation2], %s4603_s14  ;;  %p5352_p10 = pnand %p4827_p8, %p5325_p5 }
  0x17   : > { %s251_s20 = sshll.u32 %s243_s19, 4  ;;  %s240_s29 = scalar_lea.sflag [#allocation3], %s5337_s12  ;;  %s5356_s20 = int_to_ptr.vmem [resolvable:$true] %s251_s20 }
  0x18   : > { %p5097_p0 = pneg %p5352_p10 }
  0x1a   : > { %s5348_s18 = scalar_lea.hbm %s8201_s0, %s4781_s15  ;;  %s5100_s14 = scalar_lea.hbm %s8201_s0, 512 }
  0x1b   : > { %s5095_s8 = scalar_lea.hbm %s5348_s18, 256  ;;  %p5101_p3 = scmp.lt.u32.totalorder %s5348_s18, %s8201_s0 }
  0x1c   : > { %p5096_p13 = scmp.ne.s32.totalorder %s5348_s18, %s5095_s8  ;;  %p5102_p4 = scmp.lt.u32.totalorder %s5100_s14, %s5095_s8 }
  0x1d   : > { %p5104_p6 = scmp.lt.u32.totalorder %s5095_s8, %s5348_s18 }
  0x1e   : > { %p5098_p1 = pnand %p5097_p0, %p5096_p13  ;;  %p5103_p5 = por %p5102_p4, %p5101_p3 }
  0x20   : > { %p5099_p2 = pneg %p5098_p1  ;;  %p5105_p7 = por %p5104_p6, %p5103_p5 }
  0x22   : > { %p5106_p8 = pnand %p5105_p7, %p5099_p2 }
  0x24   : > { %5109 = shalt.err (!%p5106_p8)
}
  0x25   : > { %s5110_s17 = scalar_lea.vmem %s5356_s20, 256  ;;  %s5227_s19 = smov [#allocation2]  }
  0x26   : > { %p5111_p13 = scmp.ne.s32.totalorder %s5356_s20, %s5110_s17  ;;  %s5115_s9 = sshll.u32 %s5227_s19, 4  ;;  %s5116_s9 = int_to_ptr.vmem [resolvable:$false] %s5115_s9 }
  0x27   : > { %s5117_s10 = scalar_lea.vmem %s5116_s9, 512  ;;  %p5118_p12 = scmp.lt.s32.totalorder %s5356_s20, %s5116_s9 }
  0x28   : > { %p5113_p1 = pnand %p5111_p13, %p5097_p0  ;;  %p5119_p3 = scmp.lt.s32.totalorder %s5117_s10, %s5110_s17 }
  0x2a   : > { %p5114_p11 = pneg %p5113_p1  ;;  %p5120_p4 = por %p5119_p3, %p5118_p12 }
  0x2c   : > { %p5121_p5 = pnand %p5120_p4, %p5114_p11 }
  0x2e   : > { %5124 = shalt.err (!%p5121_p5)
}
  0x2f   : > { %4823 = dma.hbm_to_vmem [thread:$0]  (!%p5352_p10), %s5348_s18, 256, %s5356_s20, %s240_s29  }
  0x30   : > { %p8203_p2 = scmp.lt.s32.totalorder %s5225_s28, 5  ;;  %p8204_p6 = scmp.ge.s32.totalorder %s5225_s28, 1 }
  0x31   : > { %s4606_s14 = sshll.u32 %s5337_s12, 6  ;;  %s4782_s15 = sshll.u32 %s5217_s26, 10 }
  0x32   : > { %p5390_p7 = pnand %p8204_p6, %p8203_p2  ;;  %s5399_s19 = scalar_lea.hbm %s8034_s1, %s4782_s15 }
  0x33   : > { %s262_s9 = scalar_lea.vmem [#allocation4], %s4606_s14  ;;  %s259_s18 = scalar_lea.sflag [#allocation5], %s5337_s12 }
  0x34   : > { %s8205_s8 = scalar_select %p5390_p7, 1, 0 }
  0x35   : > { %s270_s10 = sshll.u32 %s262_s9, 4  ;;  %s5125_s20 = scalar_lea.hbm %s5399_s19, 1024  ;;  %s271_s10 = int_to_ptr.vmem [resolvable:$true] %s270_s10 }
  0x36   : > { %p5126_p11 = scmp.ne.s32.totalorder %s5399_s19, %s5125_s20  ;;  %s5130_s16 = scalar_lea.hbm %s8034_s1, 2048 }
  0x37   : > { %p5131_p13 = scmp.lt.u32.totalorder %s5399_s19, %s8034_s1  ;;  %p5132_p1 = scmp.lt.u32.totalorder %s5130_s16, %s5125_s20 }
  0x38   : > { %p5128_p12 = pnand %p5126_p11, %p5097_p0  ;;  %p5134_p4 = scmp.lt.u32.totalorder %s5125_s20, %s5399_s19 }
  0x39   : > { %p5133_p3 = por %p5132_p1, %p5131_p13 }
  0x3a   : > { %p5129_p8 = pneg %p5128_p12 }
  0x3b   : > { %p5135_p5 = por %p5134_p4, %p5133_p3 }
  0x3d   : > { %p5136_p2 = pnand %p5135_p5, %p5129_p8 }
  0x3f   : > { %5139 = shalt.err (!%p5136_p2)
}
  0x40   : > { %s5140_s12 = scalar_lea.vmem %s271_s10, 1024  ;;  %s5228_s14 = smov [#allocation4]  }
  0x41   : > { %p5141_p6 = scmp.ne.s32.totalorder %s271_s10, %s5140_s12  ;;  %s5145_s0 = sshll.u32 %s5228_s14, 4  ;;  %s5146_s0 = int_to_ptr.vmem [resolvable:$false] %s5145_s0 }
  0x42   : > { %s5147_s9 = scalar_lea.vmem %s5146_s0, 2048  ;;  %p5148_p9 = scmp.lt.s32.totalorder %s271_s10, %s5146_s0 }
  0x43   : > { %p5143_p11 = pnand %p5141_p6, %p5097_p0  ;;  %p5149_p7 = scmp.lt.s32.totalorder %s5147_s9, %s5140_s12 }
  0x45   : > { %p5144_p12 = pneg %p5143_p11  ;;  %p5150_p1 = por %p5149_p7, %p5148_p9 }
  0x47   : > { %p5151_p13 = pnand %p5150_p1, %p5144_p12 }
  0x49   : > { %5154 = shalt.err (!%p5151_p13)
}
  0x4a   : > { %4826 = dma.hbm_to_vmem [thread:$0]  (!%p5352_p10), %s5399_s19, 1024, %s271_s10, %s259_s18  }
  0x4b   : > { %p8206_p8 = scmp.ne.s32.totalorder %s8205_s8, 0 }
  0x4d   : > { %302 = sbr.rel (%p8206_p8) target bundleno = 1080 (0x438), region = 40 }
  0x54   : > { %s304_s20 = sand.u32 1, %s5201_s22   ;;  %p8207_p0 = scmp.ne.s32.totalorder %s8200_s13, 0 }
  0x55   : > { %s4610_s29 = sshll.u32 %s304_s20, 4  ;;  %s305_s16 = scalar_lea.sflag [#allocation3], %s304_s20 }
  0x56   : > { %s5424_s15 = scalar_lea.vmem [#allocation2], %s4610_s29 }
  0x57   : > { %5188 = dma.done.wait (%p8207_p0), %s305_s16, 256  }
  0x58   : > { %5190 = vsyncadd (%p8207_p0), %s305_s16, 4294967040  ;;  %s4611_s17 = sshll.u32 %s304_s20, 6  ;;  %s314_s21 = scalar_lea.sflag [#allocation5], %s304_s20 }
  0x59   : > { %s5430_s12 = scalar_lea.vmem [#allocation4], %s4611_s17 }
  0x5a   : > { %5192 = dma.done.wait (%p8207_p0), %s314_s21, 1024  }
  0x5b   : > { %5194 = vsyncadd (%p8207_p0), %s314_s21, 4294966272  ;;  %p379_p9 = scmp.lt.s32.totalorder %s5213_s25, 1  ;;  %s5229_s14 = smov 2   ;;  %v5230_v3 = vmov 2   ;;  %v8041_v13 = vmov 0   ;;  %v5233_v17 = vmov 1   ;;  %v503_v32 = vlaneseq }
  0x5c   : > { %4903 = vset.pattern.permute.xlu1 %v5230_v3  ;;  %4904 = vset.pattern.permute.xlu0 %v5230_v3  ;;  %s5231_s13 = smov 127   ;;  %v5234_v18 = vmov 3   ;;  %v5473_v36 = vld [vmem:[%s5430_s12] ss:$4 sm:$0xff]  ;;  %v5477_v37 = vld [vmem:[%s5430_s12 + $0x1] ss:$4 sm:$0xff] }
  0x5d   : > { %s8525_s25 = smov (!%p379_p9, %s5213_s25), 1  ;;  %8208 = vst [vmem:[#allocation8_spill] sm:$0xff] %v5473_v36  ;;  %8209 = vst [vmem:[#allocation9_spill] sm:$0xff] %v5477_v37  ;;  %v5480_v38 = vld [vmem:[%s5430_s12 + $0x2] ss:$4 sm:$0xff]  ;;  %v5489_v43 = vshrl.u32 %v503_v32, 7 }
  0x5e   : > { %s4815_s8 = smul.u32 24, %s8525_s25  ;;  %8210 = vst [vmem:[#allocation10_spill] sm:$0xff] %v5480_v38  ;;  %v5483_v39 = vld [vmem:[%s5430_s12 + $0x3] ss:$4 sm:$0xff]  ;;  %v452_v41 = vsub.f32 %v5480_v38, %v5473_v36  ;;  %v8043_v50 = vmov 0.0   ;;  %s4613_s29 = sshll.u32 %s8525_s25, 2 }
  0x5f   : > { %8211 = vst [vmem:[#allocation11_spill] sm:$0xff] %v5483_v39  ;;  %v456_v42 = vsub.f32 %v5483_v39, %v5477_v37  ;;  %8212 = vst [vmem:[#allocation12_spill] sm:$0xff] %v5489_v43  ;;  %v5497_v47 = vsub.s32 1, %v5489_v43  ;;  %v5500_v48 = vsub.s32 3, %v5489_v43  ;;  %v5503_v49 = vsub.s32 0, %v5489_v43  ;;  %3048 = vmatprep.mubr.f32.mxu0 %v8043_v50  ;;  %3119 = vmatprep.mubr.f32.mxu1 %v8043_v50  ;;  %s6499_s21 = scalar_lea.vmem %s8036_s3, %s4613_s29  ;;  %s4616_s19 = sshll.u32 %s8525_s25, 5 }
  0x60   : > { %s383_s18 = scalar_lea.vmem %s8035_s2, %s4815_s8  ;;  %s392_s20 = scalar_lea.vmem %s8037_s4, %s4815_s8  ;;  %v5492_v45 = vadd.f32 1.0, %v452_v41  ;;  %v5512_v52 = vsub.s32 2, %v5489_v43  ;;  %v5543_v60 = vsub.s32 5, %v5489_v43 }
  0x61   : > { %v431_v0 = vld [vmem:[%s383_s18] sm:$0xff]  ;;  %v433_v1 = vld [vmem:[%s383_s18 + $0x10] sm:$0xff]  ;;  %v432_v2 = vld [vmem:[%s383_s18 + $0x8] sm:$0xff]  ;;  %v5494_v46 = vadd.f32 1.0, %v456_v42  ;;  %8215 = vst [vmem:[#allocation15_spill] sm:$0xff] %v5497_v47  ;;  %v5520_v54 = vrot.slane %v5480_v38, %v5497_v47  ;;  %v5524_v55 = vrot.slane %v5473_v36, %v5497_v47  ;;  %v5528_v56 = vrot.slane %v5477_v37, %v5497_v47  ;;  %s4615_s8 = sshll.u32 %s5209_s24, 4 }
  0x62   : > { %437 = vrot.lane.b32.xlu0 %v431_v0, %s5229_s14  ;;  %441 = vrot.lane.b32.xlu1 %v433_v1, %s5229_s14  ;;  %v2323_v27 = vld [vmem:[%s392_s20] sm:$0xff]  ;;  %v2324_v31 = vld [vmem:[%s392_s20 + $0x8] sm:$0xff]  ;;  %8213 = vst [vmem:[#allocation13_spill] sm:$0xff] %v5492_v45  ;;  %8216 = vst [vmem:[#allocation16_spill] sm:$0xff] %v5500_v48  ;;  %vm495_vm12 = vcmp.eq.f32.partialorder %v5492_v45, 1.0  ;;  %v5532_v57 = vrot.slane %v5483_v39, %v5497_v47  ;;  %v5536_v58 = vrot.slane %v5480_v38, %v5500_v48  ;;  %p7509_p10 = scmp.lt.s32.totalorder %s4615_s8, 31 }
  0x63   : > { %vm2326_vm7 = vcmp.eq.f32.partialorder %v2323_v27, 0.0  ;;  %vm2327_vm10 = vcmp.eq.f32.partialorder %v2324_v31, 0.0  ;;  %v2325_v35 = vld [vmem:[%s392_s20 + $0x10] sm:$0xff]  ;;  %8214 = vst [vmem:[#allocation14_spill] sm:$0xff] %v5494_v46  ;;  %8217 = vst [vmem:[#allocation17_spill] sm:$0xff] %v5503_v49  ;;  %vm497_vm13 = vcmp.eq.f32.partialorder %v5494_v46, 1.0  ;;  %v5516_v53 = vmul.f32 %v5494_v46, %v5492_v45 }
  0x64   : > { %v2329_v34 = vsel %vm2326_vm7, 1e-05, %v2323_v27  ;;  %v2330_v40 = vsel %vm2327_vm10, 1e-05, %v2324_v31  ;;  %vm2328_vm11 = vcmp.eq.f32.partialorder %v2325_v35, 0.0  ;;  %8219 = vst [vmem:[#allocation19_spill] sm:$0xff] %v5512_v52  ;;  %v5540_v59 = vrot.slane %v5473_v36, %v5500_v48  ;;  %vm499_vm14 = vmand %vm495_vm12, %vm497_vm13 }
  0x65   : > { %v2331_v44 = vsel %vm2328_vm11, 1e-05, %v2325_v35  ;;  %8220 = vst [vmem:[#allocation20_spill] sm:$0xff] %v5516_v53  ;;  %8221 = vst [vmem:[#allocation21_spill] sm:$0xff] %v5543_v60  ;;  %v5547_v61 = vrot.slane %v5483_v39, %v5500_v48  ;;  %v5551_v62 = vrot.slane %v5477_v37, %v5500_v48  ;;  %v5555_v63 = vrot.slane %v5480_v38, %v5503_v49  ;;  %s8527_s8 = smov (!%p7509_p10, %s4615_s8), 31 }
  0x66   : > { %439 = vrot.lane.b32.xlu0 %v432_v2, %s5229_s14  ;;  %v5643_v27 = vrot.slane %v5516_v53, %v5512_v52  ;;  %s7547_s25 = sadd.s32 %s4616_s19, %s8527_s8 }
  0x67   : > { %s7560_s14 = scalar_lea.vmem %s8038_s5, %s7547_s25 }
  0x68   : > { %8230 = vst [vmem:[#allocation30_spill] sm:$0xff] %v5643_v27 }
  0xd4   : > { %v438_v4 = vpop.permute.xlu0 %437  ;;  %v442_v5 = vpop.permute.xlu1 %441 }
  0xd5   : > { %v446_v6 = vsub.f32 %v431_v0, %v438_v4  ;;  %v448_v7 = vsub.f32 %v433_v1, %v442_v5  ;;  %v5574_v4 = vsub.s32 7, %v5489_v43 }
  0xd7   : > { %v449_v8 = vadd.f32 1.0, %v446_v6  ;;  %v5446_v10 = vadd.f32 1.0, %v448_v7  ;;  %8222 = vst [vmem:[#allocation22_spill] sm:$0xff] %v5574_v4  ;;  %v5582_v7 = vrot.slane %v5516_v53, %v5497_v47  ;;  %v5655_v31 = vrot.slane %v5483_v39, %v5574_v4 }
  0xd8   : > { %v440_v9 = vpop.permute.xlu0 %439  ;;  %v5659_v32 = vrot.slane %v5477_v37, %v5574_v4 }
  0xd9   : > { %v447_v11 = vsub.f32 %v432_v2, %v440_v9  ;;  %463 = vrot.lane.b32.xlu1 %v449_v8, %s5231_s13  ;;  %vm477_vm0 = vcmp.eq.f32.partialorder %v449_v8, 1.0  ;;  %vm479_vm2 = vcmp.eq.f32.partialorder %v5446_v10, 1.0  ;;  %8225 = vst [vmem:[#allocation25_spill] sm:$0xff] %v5582_v7  ;;  %v5590_v9 = vrot.slane %v5483_v39, %v5512_v52  ;;  %8231 = vst [vmem:[#allocation31_spill] sm:$0xff] %v5655_v31 }
  0xda   : > { %v480_v14 = vsel %vm477_vm0, 1, %v8041_v13  ;;  %v482_v16 = vsel %vm479_vm2, 1, %v8041_v13  ;;  %8232 = vst [vmem:[#allocation32_spill] sm:$0xff] %v5659_v32 }
  0xdb   : > { %v450_v12 = vadd.f32 1.0, %v447_v11  ;;  %v5597_v11 = vsel %vm499_vm14, 1, %v8041_v13 }
  0xdd   : > { %467 = vrot.lane.b32.xlu1 %v5446_v10, %s5231_s13  ;;  %465 = vrot.lane.b32.xlu0 %v450_v12, %s5231_s13  ;;  %vm478_vm1 = vcmp.eq.f32.partialorder %v450_v12, 1.0 }
  0xde   : > { %v481_v15 = vsel %vm478_vm1, 1, %v8041_v13 }
  0xe1   : > { %483 = vrot.lane.b32.xlu0 %v480_v14, %s5231_s13  ;;  %485 = vrot.lane.b32.xlu1 %v481_v15, %s5231_s13  ;;  %v5605_v14 = vrot.slane %v5480_v38, %v5543_v60  ;;  %v5609_v15 = vrot.slane %v5473_v36, %v5543_v60 }
  0xe5   : > { %487 = vrot.lane.b32.xlu0 %v482_v16, %s5231_s13  ;;  %584 = vperm.xlu1 %4903, %v431_v0   ;;  %s4619_s13 = sshll.u32 %s7547_s25, 2 }
  0xe6   : > { %s7778_s20 = scalar_lea.vmem %s8039_s6, %s4619_s13 }
  0xe9   : > { %4905 = vset.pattern.permute.xlu1 %v8041_v13  ;;  %588 = vperm.xlu0 %4904, %v432_v2  }
  0xea   : > { %726 = vperm.xlu1 %4905, %v431_v0  }
  0xed   : > { %4908 = vset.pattern.permute.xlu0 %v5233_v17 }
  0xee   : > { %730 = vperm.xlu1 %4905, %v432_v2   ;;  %1158 = vperm.xlu0 %4908, %v432_v2  }
  0xf2   : > { %4906 = vset.pattern.permute.xlu1 %v5234_v18  ;;  %4909 = vset.pattern.permute.xlu0 %v5234_v18  ;;  %v5617_v18 = vrot.slane %v5516_v53, %v5503_v49 }
  0xf3   : > { %1016 = vperm.xlu1 %4906, %v432_v2   ;;  %1012 = vperm.xlu0 %4909, %v431_v0   ;;  %v5567_v2 = vrot.slane %v5477_v37, %v5503_v49 }
  0xf4   : > { %8227 = vst [vmem:[#allocation27_spill] sm:$0xff] %v5617_v18 }
  0xf7   : > { %4907 = vset.pattern.permute.xlu1 %v5233_v17  ;;  %1020 = vperm.xlu0 %4909, %v433_v1  }
  0xf8   : > { %1154 = vperm.xlu1 %4907, %v431_v0   ;;  %v5559_v0 = vrot.slane %v5473_v36, %v5503_v49 }
  0xfb   : > { %4914 = vset.pattern.permute.xlu0 %v5230_v3 }
  0xfc   : > { %4910 = vset.pattern.permute.xlu1 %v5230_v3 }
  0xfd   : > { %592 = vperm.xlu1 %4910, %v433_v1  }
 0x101   : > { %4911 = vset.pattern.permute.xlu1 %v8041_v13 }
 0x102   : > { %734 = vperm.xlu1 %4911, %v433_v1  }
 0x106   : > { %4912 = vset.pattern.permute.xlu1 %v5233_v17 }
 0x107   : > { %1162 = vperm.xlu1 %4912, %v433_v1   ;;  %v5563_v1 = vrot.slane %v5483_v39, %v5503_v49 }
 0x10b   : > { %4913 = vset.pattern.permute.xlu1 %v5230_v3  ;;  %v5571_v3 = vrot.slane %v5480_v38, %v5512_v52 }
 0x14b   : > { %v464_v19 = vpop.permute.xlu1 %463 }
 0x14c   : > { %v472_v20 = vmul.f32 %v464_v19, %v449_v8  ;;  %v5586_v8 = vrot.slane %v5473_v36, %v5512_v52  ;;  %v5621_v19 = vrot.slane %v5483_v39, %v5543_v60  ;;  %v5718_v39 = vsub.s32 4, %v5489_v43 }
 0x14e   : > { %1489 = vperm.xlu1 %4913, %v472_v20   ;;  %8237 = vst [vmem:[#allocation37_spill] sm:$0xff] %v5718_v39 }
 0x14f   : > { %v468_v21 = vpop.permute.xlu1 %467  ;;  %v466_v22 = vpop.permute.xlu0 %465 }
 0x150   : > { %v474_v23 = vmul.f32 %v468_v21, %v5446_v10  ;;  %v473_v24 = vmul.f32 %v466_v22, %v450_v12  ;;  %v5594_v10 = vrot.slane %v5477_v37, %v5512_v52  ;;  %v5601_v12 = vrot.slane %v5516_v53, %v5500_v48  ;;  %v8270_v52 = vld [vmem:[#allocation9_spill] sm:$0xff] }
 0x151   : > { %v5629_v22 = vrot.slane %v5477_v37, %v5543_v60 }
 0x152   : > { %1494 = vperm.xlu0 %4914, %v473_v24   ;;  %1499 = vperm.xlu1 %4913, %v474_v23   ;;  %8226 = vst [vmem:[#allocation26_spill] sm:$0xff] %v5601_v12  ;;  %v5633_v23 = vrot.slane %v5480_v38, %v5574_v4 }
 0x153   : > { %v484_v25 = vpop.permute.xlu0 %483  ;;  %v486_v26 = vpop.permute.xlu1 %485 }
 0x154   : > { %vm489_vm3 = vcmp.ne.s32.totalorder %v484_v25, 0  ;;  %vm490_vm4 = vcmp.ne.s32.totalorder %v486_v26, 0  ;;  %8228 = vst [vmem:[#allocation28_spill] sm:$0xff] %v5633_v23 }
 0x155   : > { %vm492_vm5 = vmand %vm477_vm0, %vm489_vm3 }
 0x156   : > { %vm493_vm6 = vmand %vm478_vm1, %vm490_vm4  ;;  %v1694_v28 = vsel %vm492_vm5, 1, %v8041_v13 }
 0x157   : > { %v488_v29 = vpop.permute.xlu0 %487  ;;  %1698 = vperm.xlu1 %4913, %v1694_v28   ;;  %v1695_v30 = vsel %vm493_vm6, 1, %v8041_v13  ;;  %v5647_v28 = vrot.slane %v5473_v36, %v5574_v4 }
 0x158   : > { %vm491_vm8 = vcmp.ne.s32.totalorder %v488_v29, 0  ;;  %1701 = vperm.xlu0 %4914, %v1695_v30  }
 0x159   : > { %vm494_vm9 = vmand %vm479_vm2, %vm491_vm8 }
 0x15a   : > { %v1696_v33 = vsel %vm494_vm9, 1, %v8041_v13 }
 0x15b   : > { %1704 = vperm.xlu1 %4913, %v1696_v33  }
 0x15c   : > { %4915 = vset.pattern.permute.xlu0 %v8041_v13 }
 0x15d   : > { %2334 = vperm.xlu0 %4915, %v2329_v34  }
 0x15f   : > { %4916 = vset.pattern.permute.xlu1 %v8041_v13 }
 0x160   : > { %2339 = vperm.xlu1 %4916, %v2330_v40  }
 0x164   : > { %2344 = vperm.xlu1 %4916, %v2331_v44   ;;  %v5507_v51 = vpop.permute.xlu1 %584 }
 0x165   : > { %8218 = vst [vmem:[#allocation18_spill] sm:$0xff] %v5507_v51  ;;  %v596_v16 = vmin.f32 %v5520_v54, %v5507_v51  ;;  %v598_v20 = vmin.f32 %v5536_v58, %v5507_v51  ;;  %v595_v29 = vmin.f32 %v5555_v63, %v5507_v51  ;;  %v597_v40 = vmin.f32 %v5571_v3, %v5507_v51 }
 0x166   : > { %v600_v41 = vmin.f32 %v5605_v14, %v5507_v51  ;;  %v602_v50 = vmin.f32 %v5633_v23, %v5507_v51 }
 0x168   : > { %v5578_v6 = vpop.permute.xlu0 %588 }
 0x169   : > { %v5576_v5 = vpop.permute.xlu1 %726  ;;  %8224 = vst [vmem:[#allocation24_spill] sm:$0xff] %v5578_v6  ;;  %v612_v42 = vmin.f32 %v5520_v54, %v5578_v6  ;;  %v614_v44 = vmin.f32 %v5536_v58, %v5578_v6  ;;  %v613_v46 = vmin.f32 %v5571_v3, %v5578_v6 }
 0x16a   : > { %8223 = vst [vmem:[#allocation23_spill] sm:$0xff] %v5576_v5  ;;  %v738_v17 = vmax.f32 %v5524_v55, %v5576_v5  ;;  %v740_v21 = vmax.f32 %v5540_v59, %v5576_v5  ;;  %v737_v30 = vmax.f32 %v5559_v0, %v5576_v5  ;;  %v739_v35 = vmax.f32 %v5586_v8, %v5576_v5 }
 0x16b   : > { %v742_v26 = vmax.f32 %v5609_v15, %v5576_v5  ;;  %v744_v45 = vmax.f32 %v5647_v28, %v5576_v5 }
 0x16c   : > { %v786_v34 = vsub.f32 %v596_v16, %v738_v17  ;;  %v788_v13 = vsub.f32 %v598_v20, %v740_v21  ;;  %v611_v17 = vmin.f32 %v5555_v63, %v5578_v6  ;;  %v785_v21 = vsub.f32 %v595_v29, %v737_v30 }
 0x16d   : > { %v5635_v24 = vpop.permute.xlu1 %730  ;;  %v5661_v33 = vpop.permute.xlu0 %1158  ;;  %v787_v37 = vsub.f32 %v597_v40, %v739_v35  ;;  %v5711_v5 = vsub.f32 %v600_v41, %v742_v26  ;;  %v5715_v51 = vsub.f32 %v602_v50, %v744_v45 }
 0x16e   : > { %8229 = vst [vmem:[#allocation29_spill] sm:$0xff] %v5635_v24  ;;  %8233 = vst [vmem:[#allocation33_spill] sm:$0xff] %v5661_v33  ;;  %v754_v16 = vmax.f32 %v5524_v55, %v5635_v24  ;;  %v756_v20 = vmax.f32 %v5540_v59, %v5635_v24  ;;  %v5691_v27 = vadd.f32 1.0, %v786_v34  ;;  %v1182_v12 = vmax.f32 %v5528_v56, %v5661_v33 }
 0x16f   : > { %v5699_v49 = vadd.f32 1.0, %v788_v13  ;;  %v1184_v30 = vmax.f32 %v5551_v62, %v5661_v33  ;;  %v753_v4 = vmax.f32 %v5559_v0, %v5635_v24  ;;  %v5713_v7 = vadd.f32 1.0, %v785_v21  ;;  %8236 = vst [vmem:[#allocation36_spill] sm:$0xff] %v5715_v51 }
 0x170   : > { %v802_v47 = vsub.f32 %v612_v42, %v754_v16  ;;  %v804_v13 = vsub.f32 %v614_v44, %v756_v20  ;;  %v1181_v42 = vmax.f32 %v5567_v2, %v5661_v33  ;;  %v755_v26 = vmax.f32 %v5586_v8, %v5635_v24 }
 0x171   : > { %v5739_v34 = vadd.f32 1.0, %v787_v37  ;;  %v5755_v20 = vadd.s32 16, %v5489_v43 }
 0x172   : > { %v5683_v25 = vpop.permute.xlu1 %1016  ;;  %v5707_v48 = vpop.permute.xlu0 %1012  ;;  %v850_v41 = vadd.f32 1.0, %v802_v47  ;;  %v852_v16 = vadd.f32 1.0, %v804_v13  ;;  %v1183_v13 = vmax.f32 %v5594_v10, %v5661_v33 }
 0x173   : > { %8234 = vst [vmem:[#allocation34_spill] sm:$0xff] %v5683_v25  ;;  %v1040_v18 = vmin.f32 %v5532_v57, %v5683_v25  ;;  %v1042_v29 = vmin.f32 %v5547_v61, %v5683_v25  ;;  %8235 = vst [vmem:[#allocation35_spill] sm:$0xff] %v5707_v48  ;;  %v1024_v35 = vmin.f32 %v5532_v57, %v5707_v48 }
 0x174   : > { %v1026_v44 = vmin.f32 %v5547_v61, %v5707_v48  ;;  %v1039_v21 = vmin.f32 %v5563_v1, %v5683_v25  ;;  %8242 = vst [vmem:[#allocation42_spill] sm:$0xff] %v5755_v20 }
 0x175   : > { %v1230_v60 = vsub.f32 %v1040_v18, %v1182_v12  ;;  %v1232_v40 = vsub.f32 %v1042_v29, %v1184_v30  ;;  %v801_v18 = vsub.f32 %v611_v17, %v753_v4  ;;  %v1023_v29 = vmin.f32 %v5563_v1, %v5707_v48 }
 0x176   : > { %v803_v30 = vsub.f32 %v613_v46, %v755_v26  ;;  %v5748_v4 = vadd.s32 8, %v5489_v43  ;;  %v5752_v37 = vpop.permute.xlu0 %1020  ;;  %v1041_v46 = vmin.f32 %v5590_v9, %v5683_v25  ;;  %v900_v26 = vmax.f32 %v852_v16, 0.0 }
 0x177   : > { %v5720_v53 = vpop.permute.xlu1 %1154  ;;  %v1278_v36 = vadd.f32 1.0, %v1230_v60  ;;  %v1280_v17 = vadd.f32 1.0, %v1232_v40  ;;  %8241 = vst [vmem:[#allocation41_spill] sm:$0xff] %v5752_v37  ;;  %v898_v60 = vmax.f32 %v850_v41, 0.0  ;;  %v849_v32 = vadd.f32 1.0, %v801_v18 }
 0x178   : > { %8238 = vst [vmem:[#allocation38_spill] sm:$0xff] %v5720_v53  ;;  %v1166_v45 = vmax.f32 %v5528_v56, %v5720_v53  ;;  %v1168_v12 = vmax.f32 %v5551_v62, %v5720_v53  ;;  %v1165_v47 = vmax.f32 %v5567_v2, %v5720_v53  ;;  %8240 = vst [vmem:[#allocation40_spill] sm:$0xff] %v5748_v4  ;;  %v851_v4 = vadd.f32 1.0, %v803_v30 }
 0x179   : > { %v883_v40 = vmax.f32 %v5739_v34, 0.0  ;;  %v1056_v51 = vmin.f32 %v5532_v57, %v5752_v37  ;;  %v1058_v41 = vmin.f32 %v5547_v61, %v5752_v37  ;;  %v1328_v20 = vmax.f32 %v1280_v17, 0.0 }
 0x17a   : > { %v1214_v38 = vsub.f32 %v1024_v35, %v1166_v45  ;;  %v1216_v39 = vsub.f32 %v1026_v44, %v1168_v12  ;;  %v1229_v35 = vsub.f32 %v1039_v21, %v1181_v42  ;;  %v1326_v45 = vmax.f32 %v1278_v36, 0.0 }
 0x17b   : > { %v1213_v31 = vsub.f32 %v1023_v29, %v1165_v47  ;;  %v1025_v18 = vmin.f32 %v5590_v9, %v5707_v48  ;;  %v1167_v36 = vmax.f32 %v5594_v10, %v5720_v53  ;;  %v1231_v42 = vsub.f32 %v1041_v46, %v1183_v13 }
 0x17c   : > { %v5745_v50 = vpop.permute.xlu1 %592  ;;  %v1262_v23 = vadd.f32 1.0, %v1214_v38  ;;  %v1264_v12 = vadd.f32 1.0, %v1216_v39  ;;  %v897_v57 = vmax.f32 %v849_v32, 0.0  ;;  %v1277_v21 = vadd.f32 1.0, %v1229_v35 }
 0x17d   : > { %8239 = vst [vmem:[#allocation39_spill] sm:$0xff] %v5745_v50  ;;  %v628_v16 = vmin.f32 %v5520_v54, %v5745_v50  ;;  %v5774_v61 = vmul.f32 %v1326_v45, %v898_v60  ;;  %v1055_v39 = vmin.f32 %v5563_v1, %v5752_v37  ;;  %v1261_v29 = vadd.f32 1.0, %v1213_v31 }
 0x17e   : > { %v899_v47 = vmax.f32 %v851_v4, 0.0  ;;  %v1310_v30 = vmax.f32 %v1262_v23, 0.0  ;;  %v630_v17 = vmin.f32 %v5536_v58, %v5745_v50  ;;  %v5782_v54 = vmul.f32 %v1328_v20, %v900_v26 }
 0x17f   : > { %v1312_v46 = vmax.f32 %v1264_v12, 0.0  ;;  %v1215_v32 = vsub.f32 %v1025_v18, %v1167_v36  ;;  %v1279_v60 = vadd.f32 1.0, %v1231_v42  ;;  %v1325_v31 = vmax.f32 %v1277_v21, 0.0 }
 0x180   : > { %v629_v58 = vmin.f32 %v5571_v3, %v5745_v50  ;;  %v1309_v4 = vmax.f32 %v1261_v29, 0.0  ;;  %v8245_v26 = vmax.f32 %v5691_v27, 0.0  ;;  %v1057_v3 = vmin.f32 %v5590_v9, %v5752_v37 }
 0x181   : > { %v5764_v44 = vpop.permute.xlu1 %734  ;;  %v1327_v36 = vmax.f32 %v1279_v60, 0.0  ;;  %v758_v27 = vmax.f32 %v5609_v15, %v5635_v24  ;;  %v8250_v60 = vmin.f32 %v5605_v14, %v5578_v6 }
 0x182   : > { %8243 = vst [vmem:[#allocation43_spill] sm:$0xff] %v5764_v44  ;;  %v770_v38 = vmax.f32 %v5524_v55, %v5764_v44  ;;  %v772_v13 = vmax.f32 %v5540_v59, %v5764_v44  ;;  %v627_v55 = vmin.f32 %v5555_v63, %v5745_v50  ;;  %v769_v23 = vmax.f32 %v5559_v0, %v5764_v44 }
 0x183   : > { %v5800_v45 = vmul.f32 %v1310_v30, %v8245_v26  ;;  %v771_v0 = vmax.f32 %v5586_v8, %v5764_v44  ;;  %v5236_v30 = vmov 1966171168   ;;  %v776_v34 = vmax.f32 %v5647_v28, %v5764_v44 }
 0x184   : > { %v818_v1 = vsub.f32 %v628_v16, %v770_v38  ;;  %v820_v12 = vsub.f32 %v630_v17, %v772_v13  ;;  %v5810_v16 = vmul.f32 %v1325_v31, %v897_v57 }
 0x185   : > { %v819_v17 = vsub.f32 %v629_v58, %v771_v0  ;;  %v1060_v0 = vmin.f32 %v5621_v19, %v5752_v37 }
 0x186   : > { %v5786_v35 = vpop.permute.xlu1 %1162  ;;  %v866_v42 = vadd.f32 1.0, %v818_v1  ;;  %8247 = vst [vmem:[#allocation45_spill] sm:$0xff] %v5810_v16  ;;  %v868_v9 = vadd.f32 1.0, %v820_v12  ;;  %v806_v1 = vsub.f32 %v8250_v60, %v758_v27  ;;  %v838_v27 = vadd.f32 1.0, %v5711_v5 }
 0x187   : > { %8244 = vst [vmem:[#allocation44_spill] sm:$0xff] %v5786_v35  ;;  %v1198_v59 = vmax.f32 %v5528_v56, %v5786_v35  ;;  %v1200_v20 = vmax.f32 %v5551_v62, %v5786_v35  ;;  %v1197_v63 = vmax.f32 %v5567_v2, %v5786_v35  ;;  %v8246_v56 = vmax.f32 %v5699_v49, 0.0 }
 0x188   : > { %v1263_v62 = vadd.f32 1.0, %v1215_v32  ;;  %v817_v2 = vsub.f32 %v627_v55, %v769_v23  ;;  %v1199_v8 = vmax.f32 %v5594_v10, %v5786_v35  ;;  %v2736_v49 = vunpack.c.l.s4 %v5236_v30 }
 0x189   : > { %v5808_v18 = vmul.f32 %v1312_v46, %v8246_v56  ;;  %v1246_v38 = vsub.f32 %v1056_v51, %v1198_v59  ;;  %v1248_v21 = vsub.f32 %v1058_v41, %v1200_v20  ;;  %v1245_v29 = vsub.f32 %v1055_v39, %v1197_v63 }
 0x18a   : > { %v8248_v46 = vmax.f32 %v5713_v7, 0.0  ;;  %v1311_v55 = vmax.f32 %v1263_v62, 0.0  ;;  %v5822_v32 = vmul.f32 %v1327_v36, %v899_v47  ;;  %v632_v51 = vmin.f32 %v5605_v14, %v5745_v50 }
 0x18b   : > { %v914_v41 = vmax.f32 %v866_v42, 0.0  ;;  %v865_v39 = vadd.f32 1.0, %v817_v2  ;;  %v774_v10 = vmax.f32 %v5609_v15, %v5764_v44  ;;  %v1294_v23 = vadd.f32 1.0, %v1246_v38 }
 0x18c   : > { %v5820_v57 = vmul.f32 %v1309_v4, %v8248_v46  ;;  %8249 = vst [vmem:[#allocation46_spill] sm:$0xff] %v5822_v32  ;;  %v1296_v31 = vadd.f32 1.0, %v1248_v21  ;;  %v1293_v7 = vadd.f32 1.0, %v1245_v29  ;;  %v1247_v58 = vsub.f32 %v1057_v3, %v1199_v8  ;;  %v5975_v32 = vld [vmem:[%s5430_s12 + $0x23] ss:$4 sm:$0xff] }
 0x18d   : > { %v916_v59 = vmax.f32 %v868_v9, 0.0  ;;  %v2737_v20 = vunpack.c.0.s8 %v2736_v49  ;;  %v867_v47 = vadd.f32 1.0, %v819_v17  ;;  %v1028_v63 = vmin.f32 %v5621_v19, %v5707_v48  ;;  %v8253_v49 = vld [vmem:[#allocation28_spill] sm:$0xff] }
 0x18e   : > { %v1044_v4 = vmin.f32 %v5621_v19, %v5683_v25  ;;  %v1170_v15 = vmax.f32 %v5629_v22, %v5720_v53  ;;  %v1186_v14 = vmax.f32 %v5629_v22, %v5661_v33  ;;  %v913_v26 = vmax.f32 %v865_v39, 0.0 }
 0x18f   : > { %v822_v12 = vsub.f32 %v632_v51, %v774_v10  ;;  %v1202_v3 = vmax.f32 %v5629_v22, %v5786_v35  ;;  %v1342_v56 = vmax.f32 %v1294_v23, 0.0  ;;  %v1344_v62 = vmax.f32 %v1296_v31, 0.0 }
 0x190   : > { %v1341_v36 = vmax.f32 %v1293_v7, 0.0  ;;  %v1295_v42 = vadd.f32 1.0, %v1247_v58  ;;  %v5845_v2 = vmul.f32 %v1311_v55, %v883_v40  ;;  %v854_v38 = vadd.f32 1.0, %v806_v1  ;;  %v8256_v1 = vld [vmem:[#allocation36_spill] sm:$0xff] }
 0x191   : > { %v760_v21 = vmax.f32 %v5647_v28, %v5635_v24  ;;  %v5851_v29 = vsub.s32 %v2737_v20, %v5489_v43  ;;  %v915_v19 = vmax.f32 %v867_v47, 0.0  ;;  %v1218_v8 = vsub.f32 %v1028_v63, %v1170_v15  ;;  %v8257_v28 = vld [vmem:[#allocation31_spill] sm:$0xff]  ;;  %v8258_v58 = vld [vmem:[#allocation32_spill] sm:$0xff] }
 0x192   : > { %8251 = vst [vmem:[#allocation47_spill] sm:$0xff] %v5845_v2  ;;  %v1234_v22 = vsub.f32 %v1044_v4, %v1186_v14  ;;  %v870_v9 = vadd.f32 1.0, %v822_v12  ;;  %v1250_v30 = vsub.f32 %v1060_v0, %v1202_v3  ;;  %v634_v17 = vmin.f32 %v8253_v49, %v5745_v50  ;;  %v8261_v12 = vld [vmem:[#allocation10_spill] sm:$0xff]  ;;  %v8262_v3 = vld [vmem:[#allocation8_spill] sm:$0xff] }
 0x193   : > { %8252 = vst [vmem:[#allocation48_spill] sm:$0xff] %v5851_v29  ;;  %v5857_v40 = vmul.f32 %v1342_v56, %v914_v41  ;;  %v5859_v5 = vmul.f32 %v1344_v62, %v916_v59  ;;  %v5861_v46 = vmul.f32 %v1341_v36, %v913_v26  ;;  %v1343_v55 = vmax.f32 %v1295_v42, 0.0  ;;  %v8260_v26 = vld [vmem:[#allocation37_spill] sm:$0xff]  ;;  %v8264_v36 = vld [vmem:[#allocation20_spill] sm:$0xff] }
 0x194   : > { %v886_v51 = vmax.f32 %v838_v27, 0.0  ;;  %v902_v39 = vmax.f32 %v854_v38, 0.0  ;;  %v8255_v10 = vmin.f32 %v8253_v49, %v5578_v6  ;;  %v5867_v23 = vadd.f32 1.0, %v8256_v1  ;;  %v8263_v62 = vld [vmem:[#allocation21_spill] sm:$0xff] }
 0x195   : > { %8254 = vst [vmem:[#allocation28_spill] sm:$0xff] %v5861_v46  ;;  %v1266_v31 = vadd.f32 1.0, %v1218_v8  ;;  %v1282_v7 = vadd.f32 1.0, %v1234_v22  ;;  %v1030_v41 = vmin.f32 %v8257_v28, %v5707_v48  ;;  %v1172_v59 = vmax.f32 %v8258_v58, %v5720_v53 }
 0x196   : > { %v808_v60 = vsub.f32 %v8255_v10, %v760_v21  ;;  %v1298_v20 = vadd.f32 1.0, %v1250_v30  ;;  %v824_v47 = vsub.f32 %v634_v17, %v776_v34  ;;  %v1046_v63 = vmin.f32 %v8257_v28, %v5683_v25  ;;  %v8265_v34 = vld [vmem:[#allocation11_spill] sm:$0xff]  ;;  %v8266_v10 = vld [vmem:[#allocation18_spill] sm:$0xff] }
 0x197   : > { %v1188_v4 = vmax.f32 %v8258_v58, %v5661_v33  ;;  %v5877_v15 = vmul.f32 %v1343_v55, %v915_v19  ;;  %v918_v14 = vmax.f32 %v870_v9, 0.0  ;;  %v522_v0 = vrot.slane %v8261_v12, %v8260_v26 }
 0x198   : > { %v664_v56 = vrot.slane %v8262_v3, %v8260_v26  ;;  %v5885_v42 = vrot.slane %v8264_v36, %v8263_v62  ;;  %v5887_v27 = vadd.f32 1.0, %v808_v60  ;;  %v888_v38 = vmax.f32 %v5867_v23, 0.0  ;;  %v8267_v23 = vld [vmem:[#allocation23_spill] sm:$0xff] }
 0x199   : > { %8259 = vst [vmem:[#allocation36_spill] sm:$0xff] %v5877_v15  ;;  %v1062_v21 = vmin.f32 %v8257_v28, %v5752_v37  ;;  %v1314_v19 = vmax.f32 %v1266_v31, 0.0  ;;  %v1330_v8 = vmax.f32 %v1282_v7, 0.0  ;;  %v1204_v22 = vmax.f32 %v8258_v58, %v5786_v35 }
 0x19a   : > { %v1220_v9 = vsub.f32 %v1030_v41, %v1172_v59  ;;  %v1346_v30 = vmax.f32 %v1298_v20, 0.0  ;;  %v5894_v49 = vadd.f32 1.0, %v824_v47  ;;  %v1236_v17 = vsub.f32 %v1046_v63, %v1188_v4 }
 0x19b   : > { %v950_v55 = vrot.slane %v8265_v34, %v8260_v26  ;;  %v599_v60 = vmin.f32 %v522_v0, %v8266_v10  ;;  %v615_v1 = vmin.f32 %v522_v0, %v5578_v6  ;;  %v741_v13 = vmax.f32 %v664_v56, %v8267_v23 }
 0x19c   : > { %v757_v31 = vmax.f32 %v664_v56, %v5635_v24  ;;  %v631_v41 = vmin.f32 %v522_v0, %v5745_v50  ;;  %v773_v58 = vmax.f32 %v664_v56, %v5764_v44  ;;  %v5907_v59 = vmul.f32 %v1314_v19, %v886_v51 }
 0x19d   : > { %v5909_v20 = vmul.f32 %v1330_v8, %v902_v39  ;;  %v1252_v47 = vsub.f32 %v1062_v21, %v1204_v22  ;;  %v1268_v63 = vadd.f32 1.0, %v1220_v9  ;;  %v1027_v4 = vmin.f32 %v950_v55, %v5707_v48 }
 0x19e   : > { %8268 = vst [vmem:[#allocation31_spill] sm:$0xff] %v5907_v59  ;;  %v1043_v29 = vmin.f32 %v950_v55, %v5683_v25  ;;  %v1092_v15 = vrot.slane %v8270_v52, %v8260_v26  ;;  %v5916_v7 = vsub.s32 6, %v5489_v43  ;;  %v1284_v28 = vadd.f32 1.0, %v1236_v17 }
 0x19f   : > { %8269 = vst [vmem:[#allocation32_spill] sm:$0xff] %v5909_v20  ;;  %v789_v0 = vsub.f32 %v599_v60, %v741_v13  ;;  %v805_v62 = vsub.f32 %v615_v1, %v757_v31  ;;  %v1059_v51 = vmin.f32 %v950_v55, %v5752_v37  ;;  %v821_v56 = vsub.f32 %v631_v41, %v773_v58  ;;  %v8273_v41 = vld [vmem:[#allocation22_spill] sm:$0xff] }
 0x1a0   : > { %8271 = vst [vmem:[#allocation10_spill] sm:$0xff] %v5916_v7  ;;  %v1169_v39 = vmax.f32 %v1092_v15, %v5720_v53  ;;  %v1185_v21 = vmax.f32 %v1092_v15, %v5661_v33  ;;  %v1201_v19 = vmax.f32 %v1092_v15, %v5786_v35  ;;  %v5922_v8 = vmul.f32 %v1346_v30, %v918_v14 }
 0x1a1   : > { %v920_v22 = vmax.f32 %v5894_v49, 0.0  ;;  %v530_v9 = vrot.slane %v8261_v12, %v5916_v7  ;;  %v672_v13 = vrot.slane %v8262_v3, %v5916_v7  ;;  %v1300_v17 = vadd.f32 1.0, %v1252_v47 }
 0x1a2   : > { %8272 = vst [vmem:[#allocation8_spill] sm:$0xff] %v5922_v8  ;;  %v1316_v55 = vmax.f32 %v1268_v63, 0.0  ;;  %v1217_v60 = vsub.f32 %v1027_v4, %v1169_v39  ;;  %v1233_v1 = vsub.f32 %v1043_v29, %v1185_v21  ;;  %v1332_v31 = vmax.f32 %v1284_v28, 0.0  ;;  %v5942_v4 = vld [vmem:[%s5430_s12 + $0x22] ss:$4 sm:$0xff] }
 0x1a3   : > { %v5931_v58 = vrot.slane %v8264_v36, %v8273_v41  ;;  %v1249_v14 = vsub.f32 %v1059_v51, %v1201_v19  ;;  %v837_v30 = vadd.f32 1.0, %v789_v0  ;;  %v853_v49 = vadd.f32 1.0, %v805_v62  ;;  %v8275_v8 = vld [vmem:[#allocation15_spill] sm:$0xff] }
 0x1a4   : > { %v869_v12 = vadd.f32 1.0, %v821_v56  ;;  %v958_v3 = vrot.slane %v8265_v34, %v5916_v7  ;;  %v601_v47 = vmin.f32 %v530_v9, %v8266_v10  ;;  %v617_v63 = vmin.f32 %v530_v9, %v5578_v6 }
 0x1a5   : > { %v743_v29 = vmax.f32 %v672_v13, %v8267_v23  ;;  %v759_v28 = vmax.f32 %v672_v13, %v5635_v24  ;;  %v1348_v39 = vmax.f32 %v1300_v17, 0.0  ;;  %v5944_v21 = vmul.f32 %v1316_v55, %v888_v38 }
 0x1a6   : > { %v1265_v0 = vadd.f32 1.0, %v1217_v60  ;;  %v1281_v62 = vadd.f32 1.0, %v1233_v1  ;;  %v1297_v51 = vadd.f32 1.0, %v1249_v14  ;;  %v633_v56 = vmin.f32 %v530_v9, %v5745_v50  ;;  %v5955_v9 = vld [vmem:[%s5430_s12 + $0x20] ss:$4 sm:$0xff] }
 0x1a7   : > { %8274 = vst [vmem:[#allocation20_spill] sm:$0xff] %v5944_v21  ;;  %v775_v34 = vmax.f32 %v672_v13, %v5764_v44  ;;  %v1100_v19 = vrot.slane %v8270_v52, %v5916_v7  ;;  %v885_v15 = vmax.f32 %v837_v30, 0.0  ;;  %v901_v41 = vmax.f32 %v853_v49, 0.0 }
 0x1a8   : > { %v917_v43 = vmax.f32 %v869_v12, 0.0  ;;  %v542_v20 = vrot.slane %v5942_v4, %v8275_v8  ;;  %v791_v17 = vsub.f32 %v601_v47, %v743_v29  ;;  %v807_v38 = vsub.f32 %v617_v63, %v759_v28 }
 0x1a9   : > { %v1029_v55 = vmin.f32 %v958_v3, %v5707_v48  ;;  %v1045_v60 = vmin.f32 %v958_v3, %v5683_v25  ;;  %v1313_v13 = vmax.f32 %v1265_v0, 0.0  ;;  %v1329_v1 = vmax.f32 %v1281_v62, 0.0  ;;  %v5972_v62 = vld [vmem:[%s5430_s12 + $0x21] ss:$4 sm:$0xff] }
 0x1aa   : > { %v1171_v52 = vmax.f32 %v1100_v19, %v5720_v53  ;;  %v1187_v14 = vmax.f32 %v1100_v19, %v5661_v33  ;;  %v1345_v30 = vmax.f32 %v1297_v51, 0.0  ;;  %v823_v49 = vsub.f32 %v633_v56, %v775_v34 }
 0x1ab   : > { %v1061_v12 = vmin.f32 %v958_v3, %v5752_v37  ;;  %v1203_v47 = vmax.f32 %v1100_v19, %v5786_v35  ;;  %v8276_v63 = vmax.f32 %v5887_v27, 0.0  ;;  %v5965_v28 = vmul.f32 %v1348_v39, %v920_v22 }
 0x1ac   : > { %v5969_v0 = vrot.slane %v8264_v36, %v8260_v26  ;;  %v684_v51 = vrot.slane %v5955_v9, %v8275_v8  ;;  %v839_v3 = vadd.f32 1.0, %v791_v17  ;;  %v1219_v56 = vsub.f32 %v1029_v55, %v1171_v52 }
 0x1ad   : > { %v5963_v29 = vmul.f32 %v1332_v31, %v8276_v63  ;;  %8278 = vst [vmem:[#allocation9_spill] sm:$0xff] %v5965_v28  ;;  %v453_v27 = vsub.f32 %v5942_v4, %v5955_v9  ;;  %v457_v22 = vsub.f32 %v5975_v32, %v5972_v62  ;;  %v5983_v31 = vmul.f32 %v1313_v13, %v885_v15 }
 0x1ae   : > { %v5985_v39 = vmul.f32 %v1329_v1, %v901_v41  ;;  %v5987_v34 = vadd.f32 1.0, %v807_v38  ;;  %v1235_v19 = vsub.f32 %v1045_v60, %v1187_v14  ;;  %v5989_v63 = vmul.f32 %v1345_v30, %v917_v43 }
 0x1af   : > { %8277 = vst [vmem:[#allocation11_spill] sm:$0xff] %v5963_v29  ;;  %8279 = vst [vmem:[#allocation49_spill] sm:$0xff] %v5983_v31  ;;  %v5991_v28 = vadd.f32 1.0, %v823_v49  ;;  %v1251_v29 = vsub.f32 %v1061_v12, %v1203_v47  ;;  %v604_v17 = vmin.f32 %v542_v20, %v8266_v10  ;;  %v620_v55 = vmin.f32 %v542_v20, %v5578_v6 }
 0x1b0   : > { %8280 = vst [vmem:[#allocation50_spill] sm:$0xff] %v5985_v39  ;;  %8281 = vst [vmem:[#allocation51_spill] sm:$0xff] %v5989_v63  ;;  %v746_v52 = vmax.f32 %v684_v51, %v8267_v23  ;;  %v762_v21 = vmax.f32 %v684_v51, %v5635_v24  ;;  %v970_v41 = vrot.slane %v5975_v32, %v8275_v8  ;;  %v1267_v15 = vadd.f32 1.0, %v1219_v56 }
 0x1b1   : > { %v5999_v38 = vadd.f32 1.0, %v453_v27  ;;  %v6001_v60 = vadd.f32 1.0, %v457_v22  ;;  %v1112_v43 = vrot.slane %v5972_v62, %v8275_v8  ;;  %v887_v1 = vmax.f32 %v839_v3, 0.0 }
 0x1b2   : > { %v6007_v14 = vadd.f32 1.0, %v1235_v19  ;;  %v636_v12 = vmin.f32 %v542_v20, %v5745_v50  ;;  %v778_v47 = vmax.f32 %v684_v51, %v5764_v44  ;;  %v794_v56 = vsub.f32 %v604_v17, %v746_v52  ;;  %v8286_v17 = vld [vmem:[#allocation16_spill] sm:$0xff] }
 0x1b3   : > { %8282 = vst [vmem:[#allocation52_spill] sm:$0xff] %v5999_v38  ;;  %8283 = vst [vmem:[#allocation53_spill] sm:$0xff] %v6001_v60  ;;  %v810_v27 = vsub.f32 %v620_v55, %v762_v21  ;;  %v1032_v22 = vmin.f32 %v970_v41, %v5707_v48  ;;  %v1174_v63 = vmax.f32 %v1112_v43, %v5720_v53  ;;  %v6015_v39 = vadd.f32 1.0, %v1251_v29 }
 0x1b4   : > { %v1315_v13 = vmax.f32 %v1267_v15, 0.0  ;;  %v6019_v3 = vrot.slane %v8264_v36, %v5916_v7  ;;  %v6023_v19 = vmul.f32 %v6001_v60, %v5999_v38  ;;  %v1048_v51 = vmin.f32 %v970_v41, %v5683_v25 }
 0x1b5   : > { %v1190_v21 = vmax.f32 %v1112_v43, %v5661_v33  ;;  %v550_v55 = vrot.slane %v5942_v4, %v8286_v17  ;;  %v826_v29 = vsub.f32 %v636_v12, %v778_v47  ;;  %v1064_v52 = vmin.f32 %v970_v41, %v5752_v37 }
 0x1b6   : > { %8284 = vst [vmem:[#allocation54_spill] sm:$0xff] %v6019_v3  ;;  %8285 = vst [vmem:[#allocation55_spill] sm:$0xff] %v6023_v19  ;;  %v1206_v15 = vmax.f32 %v1112_v43, %v5786_v35  ;;  %v692_v36 = vrot.slane %v5955_v9, %v8286_v17  ;;  %v6034_v49 = vadd.f32 1.0, %v794_v56  ;;  %v6036_v30 = vadd.f32 1.0, %v810_v27  ;;  %v8288_v3 = vld [vmem:[#allocation17_spill] sm:$0xff] }
 0x1b7   : > { %v1222_v20 = vsub.f32 %v1032_v22, %v1174_v63  ;;  %v978_v60 = vrot.slane %v5975_v32, %v8286_v17  ;;  %v606_v38 = vmin.f32 %v550_v55, %v8266_v10  ;;  %v622_v26 = vmin.f32 %v550_v55, %v5578_v6 }
 0x1b8   : > { %v748_v12 = vmax.f32 %v692_v36, %v8267_v23  ;;  %v764_v41 = vmax.f32 %v692_v36, %v5635_v24  ;;  %v1347_v43 = vmax.f32 %v6015_v39, 0.0  ;;  %v6045_v47 = vmul.f32 %v1315_v13, %v887_v1 }
 0x1b9   : > { %v1238_v56 = vsub.f32 %v1048_v51, %v1190_v21  ;;  %v1120_v27 = vrot.slane %v5972_v62, %v8286_v17  ;;  %v874_v63 = vadd.f32 1.0, %v826_v29  ;;  %v1254_v22 = vsub.f32 %v1064_v52, %v1206_v15 }
 0x1ba   : > { %8287 = vst [vmem:[#allocation56_spill] sm:$0xff] %v6045_v47  ;;  %v638_v31 = vmin.f32 %v550_v55, %v5745_v50  ;;  %v780_v59 = vmax.f32 %v692_v36, %v5764_v44  ;;  %v890_v46 = vmax.f32 %v6034_v49, 0.0  ;;  %v906_v2 = vmax.f32 %v6036_v30, 0.0 }
 0x1bb   : > { %v796_v16 = vsub.f32 %v606_v38, %v748_v12  ;;  %v538_v39 = vrot.slane %v5942_v4, %v8288_v3  ;;  %v1270_v13 = vadd.f32 1.0, %v1222_v20  ;;  %v812_v1 = vsub.f32 %v622_v26, %v764_v41 }
 0x1bc   : > { %v1034_v51 = vmin.f32 %v978_v60, %v5707_v48  ;;  %v1050_v21 = vmin.f32 %v978_v60, %v5683_v25  ;;  %v1286_v29 = vadd.f32 1.0, %v1238_v56  ;;  %v1066_v52 = vmin.f32 %v978_v60, %v5752_v37  ;;  %v8330_v25 = vld [vmem:[#allocation36_spill] sm:$0xff] }
 0x1bd   : > { %v1176_v55 = vmax.f32 %v1120_v27, %v5720_v53  ;;  %v1192_v15 = vmax.f32 %v1120_v27, %v5661_v33  ;;  %v922_v49 = vmax.f32 %v874_v63, 0.0  ;;  %v1302_v36 = vadd.f32 1.0, %v1254_v22 }
 0x1be   : > { %v828_v30 = vsub.f32 %v638_v31, %v780_v59  ;;  %v1208_v38 = vmax.f32 %v1120_v27, %v5786_v35  ;;  %v844_v12 = vadd.f32 1.0, %v796_v16  ;;  %v860_v4 = vadd.f32 1.0, %v812_v1 }
 0x1bf   : > { %v1224_v20 = vsub.f32 %v1034_v51, %v1176_v55  ;;  %v1240_v26 = vsub.f32 %v1050_v21, %v1192_v15  ;;  %v603_v47 = vmin.f32 %v538_v39, %v8266_v10  ;;  %v619_v56 = vmin.f32 %v538_v39, %v5578_v6  ;;  %v8324_v10 = vld [vmem:[#allocation31_spill] sm:$0xff] }
 0x1c0   : > { %v1256_v41 = vsub.f32 %v1066_v52, %v1208_v38  ;;  %v680_v60 = vrot.slane %v5955_v9, %v8288_v3  ;;  %v1318_v53 = vmax.f32 %v1270_v13, 0.0  ;;  %v1334_v37 = vmax.f32 %v1286_v29, 0.0 }
 0x1c1   : > { %v1272_v33 = vadd.f32 1.0, %v1224_v20  ;;  %v1288_v63 = vadd.f32 1.0, %v1240_v26  ;;  %v876_v22 = vadd.f32 1.0, %v828_v30  ;;  %v1350_v27 = vmax.f32 %v1302_v36, 0.0 }
 0x1c2   : > { %v1304_v59 = vadd.f32 1.0, %v1256_v41  ;;  %v745_v31 = vmax.f32 %v680_v60, %v8267_v23  ;;  %v761_v16 = vmax.f32 %v680_v60, %v5635_v24  ;;  %v892_v1 = vmax.f32 %v844_v12, 0.0  ;;  %v8320_v23 = vld [vmem:[#allocation28_spill] sm:$0xff] }
 0x1c3   : > { %v908_v51 = vmax.f32 %v860_v4, 0.0  ;;  %v6069_v21 = vrot.slane %v5975_v32, %v8288_v3  ;;  %v1320_v52 = vmax.f32 %v1272_v33, 0.0  ;;  %v1336_v55 = vmax.f32 %v1288_v63, 0.0 }
 0x1c4   : > { %v793_v9 = vsub.f32 %v603_v47, %v745_v31  ;;  %v809_v13 = vsub.f32 %v619_v56, %v761_v16  ;;  %v8290_v29 = vmax.f32 %v5987_v34, 0.0  ;;  %v8291_v15 = vmax.f32 %v6007_v14, 0.0 }
 0x1c5   : > { %8289 = vst [vmem:[#allocation57_spill] sm:$0xff] %v6069_v21  ;;  %v8292_v38 = vmax.f32 %v5991_v28, 0.0  ;;  %v6085_v32 = vrot.slane %v6023_v19, %v8275_v8  ;;  %v924_v33 = vmax.f32 %v876_v22, 0.0  ;;  %v1352_v47 = vmax.f32 %v1304_v59, 0.0 }
 0x1c6   : > { %v6075_v30 = vmul.f32 %v8291_v15, %v8290_v29  ;;  %v635_v12 = vmin.f32 %v538_v39, %v5745_v50  ;;  %v777_v34 = vmax.f32 %v680_v60, %v5764_v44  ;;  %v6089_v14 = vmul.f32 %v1318_v53, %v890_v46  ;;  %v8300_v60 = vld [vmem:[#allocation25_spill] sm:$0xff]  ;;  %v8302_v46 = vld [vmem:[#allocation27_spill] sm:$0xff]  ;;  %v8308_v29 = vld [vmem:[#allocation30_spill] sm:$0xff] }
 0x1c7   : > { %v6079_v20 = vmul.f32 %v1347_v43, %v8292_v38  ;;  %v6091_v4 = vmul.f32 %v1334_v37, %v906_v2  ;;  %v6093_v28 = vmul.f32 %v1350_v27, %v922_v49  ;;  %v6095_v43 = vadd.f32 1.0, %v793_v9  ;;  %v8301_v37 = vld [vmem:[#allocation26_spill] sm:$0xff]  ;;  %v8319_v44 = vld [vmem:[#allocation47_spill] sm:$0xff] }
 0x1c8   : > { %8293 = vst [vmem:[#allocation58_spill] sm:$0xff] %v6089_v14  ;;  %v6099_v41 = vmul.f32 %v1320_v52, %v892_v1  ;;  %v6101_v56 = vmul.f32 %v1336_v55, %v908_v51  ;;  %v6103_v63 = vadd.f32 1.0, %v809_v13  ;;  %v6115_v22 = vrot.slane %v6023_v19, %v8286_v17 }
 0x1c9   : > { %8294 = vst [vmem:[#allocation59_spill] sm:$0xff] %v6091_v4  ;;  %8295 = vst [vmem:[#allocation60_spill] sm:$0xff] %v6093_v28  ;;  %v6117_v59 = vmul.f32 %v1352_v47, %v924_v33  ;;  %v6119_v31 = vsub.f32 %v635_v12, %v777_v34  ;;  %v6125_v27 = vrot.slane %v5972_v62, %v8288_v3 }
 0x1ca   : > { %8296 = vst [vmem:[#allocation61_spill] sm:$0xff] %v6095_v43  ;;  %8297 = vst [vmem:[#allocation62_spill] sm:$0xff] %v6099_v41 }
 0x1cb   : > { %8298 = vst [vmem:[#allocation63_spill] sm:$0xff] %v6101_v56  ;;  %8299 = vst [vmem:[#allocation64_spill] sm:$0xff] %v6103_v63 }
 0x1cc   : > { %8303 = vst [vmem:[#allocation25_spill] sm:$0xff] %v6115_v22  ;;  %8304 = vst [vmem:[#allocation26_spill] sm:$0xff] %v6117_v59 }
 0x1cd   : > { %v6097_v26 = vpop.permute.xlu1 %1489  ;;  %8305 = vst [vmem:[#allocation27_spill] sm:$0xff] %v6119_v31  ;;  %8306 = vst [vmem:[#allocation65_spill] sm:$0xff] %v6125_v27  ;;  %v8335_v27 = vld [vmem:[#allocation11_spill] sm:$0xff] }
 0x1ce   : > { %v1503_v53 = vadd.f32 %v6097_v26, %v8300_v60  ;;  %v1505_v2 = vadd.f32 %v6097_v26, %v8301_v37  ;;  %v1502_v49 = vadd.f32 %v6097_v26, %v8302_v46  ;;  %v1504_v15 = vadd.f32 %v6097_v26, %v8308_v29 }
 0x1cf   : > { %v6139_v38 = vadd.f32 %v6097_v26, %v5885_v42  ;;  %v6143_v62 = vadd.f32 %v6097_v26, %v5931_v58 }
 0x1d0   : > { %v1551_v1 = vsub.f32 %v1503_v53, %v5800_v45  ;;  %v1553_v51 = vsub.f32 %v1505_v2, %v5808_v18  ;;  %v1550_v52 = vsub.f32 %v1502_v49, %v5820_v57  ;;  %v1552_v24 = vsub.f32 %v1504_v15, %v8319_v44  ;;  %v8325_v15 = vld [vmem:[#allocation20_spill] sm:$0xff] }
 0x1d1   : > { %v6131_v9 = vpop.permute.xlu0 %1494  ;;  %v6133_v13 = vpop.permute.xlu1 %1499 }
 0x1d2   : > { %8307 = vst [vmem:[#allocation66_spill] sm:$0xff] %v6133_v13  ;;  %v1519_v47 = vadd.f32 %v6131_v9, %v8300_v60  ;;  %v1535_v12 = vadd.f32 %v6133_v13, %v8300_v60  ;;  %4917 = vrcp.f32 %v1551_v1  ;;  %v1521_v34 = vadd.f32 %v6131_v9, %v8301_v37 }
 0x1d3   : > { %v1537_v53 = vadd.f32 %v6133_v13, %v8301_v37  ;;  %4919 = vrcp.f32 %v1553_v51  ;;  %v1518_v2 = vadd.f32 %v6131_v9, %v8302_v46  ;;  %v1534_v49 = vadd.f32 %v6133_v13, %v8302_v46 }
 0x1d4   : > { %v1567_v33 = vsub.f32 %v1519_v47, %v5774_v61  ;;  %v1583_v55 = vsub.f32 %v1535_v12, %v5857_v40  ;;  %v1569_v60 = vsub.f32 %v1521_v34, %v5782_v54  ;;  %4921 = vrcp.f32 %v1550_v52  ;;  %v8313_v47 = vld [vmem:[#allocation54_spill] sm:$0xff] }
 0x1d5   : > { %v8309_v1 = vrot.slane %v5597_v11, %v8275_v8  ;;  %v1585_v37 = vsub.f32 %v1537_v53, %v5859_v5  ;;  %v1520_v51 = vadd.f32 %v6131_v9, %v8308_v29  ;;  %v6173_v46 = vadd.f32 %v6097_v26, %v5969_v0  ;;  %v8318_v53 = vld [vmem:[#allocation45_spill] sm:$0xff] }
 0x1d6   : > { %v6177_v12 = vadd.f32 %v6097_v26, %v8313_v47  ;;  %v6179_v52 = vpop.permute.xlu1 %1698  ;;  %4923 = vrcp.f32 %v1567_v33  ;;  %v8315_v34 = vrot.slane %v5597_v11, %v8286_v17  ;;  %v1566_v39 = vsub.f32 %v1518_v2, %v8318_v53 }
 0x1d7   : > { %vm6164_vm15 = vcmp.eq.s32.totalorder %v8309_v1, 1  ;;  %8312 = vst [vmem:[#allocation30_spill] sm:$0xff] %v6173_v46  ;;  %v1536_v36 = vadd.f32 %v6133_v13, %v8308_v29  ;;  %4925 = vrcp.f32 %v1583_v55  ;;  %v1582_v50 = vsub.f32 %v1534_v49, %v8320_v23  ;;  %v6204_v63 = vpop.permute.xlu0 %1701  ;;  %v8334_v49 = vld [vmem:[#allocation8_spill] sm:$0xff] }
 0x1d8   : > { %8314 = vst [vmem:[#allocation54_spill] sm:$0xff] %v6177_v12  ;;  %vm6184_vm0 = vcmp.eq.s32.totalorder %v8315_v34, 1  ;;  %v8321_v33 = vrot.slane %v5597_v11, %v8288_v3  ;;  %v1523_v34 = vadd.f32 %v6131_v9, %v5885_v42  ;;  %v1555_v2 = vsub.f32 %v6139_v38, %v8324_v10 }
 0x1d9   : > { %4927 = vrcp.f32 %v1569_v60  ;;  %v6208_v55 = vadd.f32 %v6133_v13, %v5885_v42  ;;  %v6212_v29 = vadd.f32 %v6131_v9, %v5931_v58  ;;  %vm1706_vm2 = vcmp.eq.s32.totalorder %v6179_v52, 1 }
 0x1da   : > { %vm6196_vm1 = vcmp.eq.s32.totalorder %v8321_v33, 1  ;;  %4929 = vrcp.f32 %v1585_v37  ;;  %v8326_v33 = vld [vmem:[#allocation46_spill] sm:$0xff]  ;;  %v6222_v42 = vpop.permute.xlu1 %1704  ;;  %v1584_v48 = vsub.f32 %v1536_v36, %v8330_v25  ;;  %v6227_v35 = vadd.f32 %v6133_v13, %v5931_v58  ;;  %v8332_v37 = vld [vmem:[#allocation32_spill] sm:$0xff] }
 0x1db   : > { %v1568_v43 = vsub.f32 %v1520_v51, %v8326_v33  ;;  %8329 = vst [vmem:[#allocation45_spill] sm:$0xff] %v6222_v42  ;;  %4931 = vrcp.f32 %v1566_v39  ;;  %vm1707_vm3 = vcmp.eq.s32.totalorder %v6204_v63, 1  ;;  %v1571_v51 = vsub.f32 %v1523_v34, %v8332_v37 }
 0x1dc   : > { %8331 = vst [vmem:[#allocation47_spill] sm:$0xff] %v6227_v35  ;;  %4933 = vrcp.f32 %v1582_v50  ;;  %v6233_v38 = vadd.f32 %v6131_v9, %v5969_v0  ;;  %v4918_v60 = vpop.eup %4917  ;;  %v6241_v58 = vadd.f32 %v6133_v13, %v5969_v0  ;;  %vm1708_vm4 = vcmp.eq.s32.totalorder %v6222_v42, 1  ;;  %v6249_v31 = vpop.permute.xlu0 %2334  ;;  %v8463_v42 = vld [vmem:[#allocation55_spill] sm:$0xff] }
 0x1dd   : > { %4935 = vrcp.f32 %v1552_v24  ;;  %v4920_v21 = vpop.eup %4919  ;;  %v1647_v50 = vmul.f32 %v4918_v60, %v5800_v45  ;;  %v6247_v34 = vadd.f32 %v6131_v9, %v8313_v47  ;;  %8337 = vst [vmem:[#allocation20_spill] sm:$0xff] %v6249_v31  ;;  %v6256_v17 = vadd.f32 %v6133_v13, %v8313_v47 }
 0x1de   : > { %8333 = vst [vmem:[#allocation28_spill] sm:$0xff] %v6233_v38  ;;  %8336 = vst [vmem:[#allocation31_spill] sm:$0xff] %v6241_v58  ;;  %4937 = vrcp.f32 %v1568_v43  ;;  %v4922_v24 = vpop.eup %4921  ;;  %v1649_v39 = vmul.f32 %v4920_v21, %v5808_v18 }
 0x1df   : > { %4939 = vrcp.f32 %v1584_v48  ;;  %v6258_v59 = vpop.permute.xlu1 %2339  ;;  %v1710_v45 = vsel %vm1706_vm2, 0.0, %v1647_v50  ;;  %v1646_v43 = vmul.f32 %v4922_v24, %v5820_v57 }
 0x1e0   : > { %8339 = vst [vmem:[#allocation46_spill] sm:$0xff] %v6258_v59  ;;  %4941 = vrcp.f32 %v1555_v2  ;;  %v4924_v18 = vpop.eup %4923  ;;  %v6267_v48 = vsel %vm6164_vm15, -1.0, %v1710_v45  ;;  %v1712_v21 = vsel %vm1706_vm2, 0.0, %v1649_v39 }
 0x1e1   : > { %4943 = vrcp.f32 %v1571_v51  ;;  %v4926_v41 = vpop.eup %4925  ;;  %v1663_v50 = vmul.f32 %v4924_v18, %v5774_v61  ;;  %vm2348_vm5 = vcmp.eq.f32.partialorder %v6267_v48, %v6249_v31  ;;  %v6278_v57 = vsel %vm6184_vm0, -1.0, %v1712_v21 }
 0x1e2   : > { %v1709_v2 = vsel %vm1706_vm2, 0.0, %v1646_v43  ;;  %v1679_v39 = vmul.f32 %v4926_v41, %v5857_v40  ;;  %v8342_v51 = vmov 0.0   ;;  %vm2350_vm6 = vcmp.eq.f32.partialorder %v6278_v57, %v6249_v31 }
 0x1e3   : > { %v4928_v24 = vpop.eup %4927  ;;  %v4628_v45 = vsel %vm2348_vm5, 1.0, %v8342_v51  ;;  %v6288_v61 = vsel %vm6196_vm1, -1.0, %v1709_v2  ;;  %v6290_v0 = vpop.permute.xlu1 %2344  ;;  %v1726_v21 = vsel %vm1707_vm3, 0.0, %v1663_v50  ;;  %v4630_v56 = vsel %vm2350_vm6, 1.0, %v8342_v51 }
 0x1e4   : > { %v4930_v18 = vpop.eup %4929  ;;  %8343 = vst [vmem:[#allocation36_spill] sm:$0xff] %v6290_v0  ;;  %v1665_v43 = vmul.f32 %v4928_v24, %v5782_v54  ;;  %vm2347_vm7 = vcmp.eq.f32.partialorder %v6288_v61, %v6249_v31  ;;  %v1742_v41 = vsel %vm1708_vm4, 0.0, %v1679_v39  ;;  %v6302_v2 = vsel %vm6164_vm15, -1.0, %v1726_v21 }
 0x1e5   : > { %v4932_v40 = vpop.eup %4931  ;;  %v1681_v8 = vmul.f32 %v4930_v18, %v5859_v5  ;;  %v4627_v22 = vsel %vm2347_vm7, 1.0, %v8342_v51  ;;  %v6308_v54 = vsel %vm6164_vm15, -1.0, %v1742_v41  ;;  %v1895_v24 = vmax.f32 %v6267_v48, %v6302_v2 }
 0x1e6   : > { %v4934_v50 = vpop.eup %4933  ;;  %vm2364_vm8 = vcmp.eq.f32.partialorder %v6302_v2, %v6258_v59  ;;  %v1728_v39 = vsel %vm1707_vm3, 0.0, %v1665_v43  ;;  %vm2380_vm9 = vcmp.eq.f32.partialorder %v6308_v54, %v6290_v0 }
 0x1e7   : > { %v4936_v21 = vpop.eup %4935  ;;  %v4644_v5 = vsel %vm2364_vm8, 1.0, %v8342_v51  ;;  %v1744_v16 = vsel %vm1708_vm4, 0.0, %v1681_v8  ;;  %v6323_v18 = vsel %vm6184_vm0, -1.0, %v1728_v39  ;;  %v1896_v28 = vmax.f32 %v1895_v24, %v6308_v54 }
 0x1e8   : > { %v4938_v41 = vpop.eup %4937  ;;  %v4660_v4 = vsel %vm2380_vm9, 1.0, %v8342_v51  ;;  %v2499_v7 = vadd.f32 %v4644_v5, %v4628_v45  ;;  %v6329_v43 = vsel %vm6184_vm0, -1.0, %v1744_v16  ;;  %v1911_v12 = vmax.f32 %v6278_v57, %v6323_v18 }
 0x1e9   : > { %v4940_v3 = vpop.eup %4939  ;;  %vm2366_vm10 = vcmp.eq.f32.partialorder %v6323_v18, %v6258_v59  ;;  %vm2382_vm11 = vcmp.eq.f32.partialorder %v6329_v43, %v6290_v0  ;;  %v1662_v8 = vmul.f32 %v4932_v40, %v8318_v53  ;;  %v1897_v39 = vrot.slane %v1896_v28, 4 }
 0x1ea   : > { %v6338_v24 = vpop.eup %4941  ;;  %v2500_v45 = vadd.f32 %v4660_v4, %v2499_v7  ;;  %v4646_v1 = vsel %vm2366_vm10, 1.0, %v8342_v51  ;;  %v4662_v5 = vsel %vm2382_vm11, 1.0, %v8342_v51  ;;  %v1912_v47 = vmax.f32 %v1911_v12, %v6329_v43 }
 0x1eb   : > { %v6342_v16 = vpop.eup %4943  ;;  %v2515_v58 = vadd.f32 %v4646_v1, %v4630_v56  ;;  %v1678_v60 = vmul.f32 %v4934_v50, %v8320_v23  ;;  %v1725_v38 = vsel %vm1707_vm3, 0.0, %v1662_v8  ;;  %v1898_v19 = vmax.f32 %v1896_v28, %v1897_v39 }
 0x1ec   : > { %v2501_v53 = vrot.slane %v2500_v45, 4  ;;  %v6350_v40 = vsel %vm6196_vm1, -1.0, %v1725_v38  ;;  %v1648_v7 = vmul.f32 %v4936_v21, %v8319_v44  ;;  %v1913_v4 = vrot.slane %v1912_v47, 4 }
 0x1ed   : > { %v2516_v46 = vadd.f32 %v4662_v5, %v2515_v58  ;;  %v1741_v14 = vsel %vm1708_vm4, 0.0, %v1678_v60  ;;  %v1887_v56 = vmax.f32 %v6288_v61, %v6350_v40  ;;  %v1899_v23 = vrot.slane %v1898_v19, 2 }
 0x1ee   : > { %v2502_v12 = vadd.f32 %v2501_v53, %v2500_v45  ;;  %v6359_v28 = vsel %vm6196_vm1, -1.0, %v1741_v14  ;;  %vm2363_vm12 = vcmp.eq.f32.partialorder %v6350_v40, %v6258_v59  ;;  %v1914_v38 = vmax.f32 %v1912_v47, %v1913_v4 }
 0x1ef   : > { %v2517_v50 = vrot.slane %v2516_v46, 4  ;;  %v1888_v44 = vmax.f32 %v1887_v56, %v6359_v28  ;;  %vm2379_vm13 = vcmp.eq.f32.partialorder %v6359_v28, %v6290_v0  ;;  %v1900_v58 = vmax.f32 %v1898_v19, %v1899_v23 }
 0x1f0   : > { %v2503_v60 = vrot.slane %v2502_v12, 2  ;;  %v4643_v21 = vsel %vm2363_vm12, 1.0, %v8342_v51  ;;  %v4659_v8 = vsel %vm2379_vm13, 1.0, %v8342_v51  ;;  %v1915_v39 = vrot.slane %v1914_v38, 2 }
 0x1f1   : > { %v2518_v6 = vadd.f32 %v2517_v50, %v2516_v46  ;;  %v1889_v14 = vrot.slane %v1888_v44, 4  ;;  %v2491_v45 = vadd.f32 %v4643_v21, %v4627_v22  ;;  %v1901_v1 = vrot.slane %v1900_v58, 1 }
 0x1f2   : > { %v2504_v5 = vadd.f32 %v2503_v60, %v2502_v12  ;;  %v1664_v47 = vmul.f32 %v4938_v41, %v8326_v33  ;;  %v1680_v53 = vmul.f32 %v4940_v3, %v8330_v25  ;;  %v1916_v4 = vmax.f32 %v1914_v38, %v1915_v39  ;;  %v8344_v3 = vld [vmem:[#allocation12_spill] sm:$0xff] }
 0x1f3   : > { %v2519_v56 = vrot.slane %v2518_v6, 2  ;;  %v1890_v13 = vmax.f32 %v1888_v44, %v1889_v14  ;;  %v2492_v36 = vadd.f32 %v4659_v8, %v2491_v45  ;;  %v1902_v19 = vmax.f32 %v1900_v58, %v1901_v1  ;;  %v8345_v38 = vld [vmem:[#allocation40_spill] sm:$0xff]  ;;  %v8346_v44 = vld [vmem:[#allocation42_spill] sm:$0xff] }
 0x1f4   : > { %v2505_v23 = vrot.slane %v2504_v5, 1  ;;  %v6372_v35 = vsel %vm1706_vm2, 0.0, %v1648_v7  ;;  %v6376_v46 = vsel %vm1707_vm3, 0.0, %v1664_v47  ;;  %v1917_v22 = vrot.slane %v1916_v4, 1 }
 0x1f5   : > { %v2520_v12 = vadd.f32 %v2519_v56, %v2518_v6  ;;  %v1891_v50 = vrot.slane %v1890_v13, 2  ;;  %v2493_v33 = vrot.slane %v2492_v36, 4  ;;  %vm2020_vm14 = vcmp.eq.f32.partialorder %v6267_v48, %v1902_v19 }
 0x1f6   : > { %vm2036_vm15 = vcmp.eq.f32.partialorder %v6302_v2, %v1902_v19  ;;  %vm2052_vm0 = vcmp.eq.f32.partialorder %v6308_v54, %v1902_v19  ;;  %v2506_v25 = vadd.f32 %v2505_v23, %v2504_v5  ;;  %v2068_v41 = vsel %vm2020_vm14, %v8344_v3, 24 }
 0x1f7   : > { %v2084_v7 = vsel %vm2036_vm15, %v8345_v38, 24  ;;  %v2100_v58 = vsel %vm2052_vm0, %v8346_v44, 24  ;;  %vm2620_vm1 = vcmp.lt.f32.partialorder %v1902_v19, 0.3  ;;  %v8164_v60 = vmov -1.0  }
 0x1f8   : > { %vm2128_vm5 = vcmp.lt.s32.totalorder %v2068_v41, %v2084_v7  ;;  %v2636_v21 = vsel %vm2620_vm1, 0.0, %v8164_v60  ;;  %vm2652_vm6 = vcmp.gt.f32.partialorder %v2506_v25, 0.0  ;;  %vm2684_vm7 = vcmp.ge.f32.partialorder %v1902_v19, 0.7 }
 0x1f9   : > { %v2129_v8 = vsel %vm2128_vm5, %v2068_v41, %v2084_v7  ;;  %v2668_v48 = vsel %vm2652_vm6, 1.0, %v2636_v21  ;;  %v1918_v39 = vmax.f32 %v1916_v4, %v1917_v22  ;;  %v2521_v2 = vrot.slane %v2520_v12, 1 }
 0x1fa   : > { %vm2130_vm8 = vcmp.lt.s32.totalorder %v2129_v8, %v2100_v58  ;;  %v6385_v54 = vsel %vm2684_vm7, 1.0, %v2668_v48  ;;  %v1892_v6 = vmax.f32 %v1890_v13, %v1891_v50  ;;  %v2494_v14 = vadd.f32 %v2493_v33, %v2492_v36 }
 0x1fb   : > { %v2131_v45 = vsel %vm2130_vm8, %v2129_v8, %v2100_v58  ;;  %vm2022_vm9 = vcmp.eq.f32.partialorder %v6278_v57, %v1918_v39  ;;  %vm2038_vm10 = vcmp.eq.f32.partialorder %v6323_v18, %v1918_v39  ;;  %vm2054_vm11 = vcmp.eq.f32.partialorder %v6329_v43, %v1918_v39  ;;  %v8347_v18 = vld [vmem:[#allocation19_spill] sm:$0xff] }
 0x1fc   : > { %v2132_v1 = vrot.slane %v2131_v45, 4  ;;  %v2070_v5 = vsel %vm2022_vm9, %v8344_v3, 24  ;;  %v2086_v47 = vsel %vm2038_vm10, %v8345_v38, 24  ;;  %v2102_v4 = vsel %vm2054_vm11, %v8346_v44, 24 }
 0x1fd   : > { %vm2154_vm12 = vcmp.lt.s32.totalorder %v2070_v5, %v2086_v47  ;;  %v2522_v56 = vadd.f32 %v2521_v2, %v2520_v12  ;;  %vm2622_vm13 = vcmp.lt.f32.partialorder %v1918_v39, 0.3  ;;  %vm2686_vm14 = vcmp.ge.f32.partialorder %v1918_v39, 0.7 }
 0x1fe   : > { %vm2133_vm15 = vcmp.lt.s32.totalorder %v2131_v45, %v2132_v1  ;;  %v2155_v13 = vsel %vm2154_vm12, %v2070_v5, %v2086_v47  ;;  %v2638_v36 = vsel %vm2622_vm13, 0.0, %v8164_v60  ;;  %v1893_v57 = vrot.slane %v1892_v6, 1 }
 0x1ff   : > { %v8348_v19 = vrot.slane %v5597_v11, %v8347_v18  ;;  %v2134_v23 = vsel %vm2133_vm15, %v2131_v45, %v2132_v1  ;;  %vm2156_vm1 = vcmp.lt.s32.totalorder %v2155_v13, %v2102_v4  ;;  %vm2654_vm5 = vcmp.gt.f32.partialorder %v2522_v56, 0.0 }
 0x200   : > { %v2495_v22 = vrot.slane %v2494_v14, 2  ;;  %v2135_v50 = vrot.slane %v2134_v23, 2  ;;  %v2157_v12 = vsel %vm2156_vm1, %v2155_v13, %v2102_v4  ;;  %v2670_v33 = vsel %vm2654_vm5, 1.0, %v2638_v36 }
 0x201   : > { %vm6397_vm0 = vcmp.eq.s32.totalorder %v8348_v19, 1  ;;  %v1894_v25 = vmax.f32 %v1892_v6, %v1893_v57  ;;  %v2158_v41 = vrot.slane %v2157_v12, 4  ;;  %v6401_v7 = vsel %vm2686_vm14, 1.0, %v2670_v33 }
 0x202   : > { %v2496_v58 = vadd.f32 %v2495_v22, %v2494_v14  ;;  %v1743_v21 = vsel %vm1708_vm4, 0.0, %v1680_v53  ;;  %vm2136_vm6 = vcmp.lt.s32.totalorder %v2134_v23, %v2135_v50  ;;  %v6421_v13 = vsel %vm6397_vm0, -1.0, %v6372_v35  ;;  %v8351_v35 = vld [vmem:[#allocation21_spill] sm:$0xff] }
 0x203   : > { %vm2019_vm7 = vcmp.eq.f32.partialorder %v6288_v61, %v1894_v25  ;;  %vm2035_vm8 = vcmp.eq.f32.partialorder %v6350_v40, %v1894_v25  ;;  %vm2051_vm9 = vcmp.eq.f32.partialorder %v6359_v28, %v1894_v25  ;;  %v2137_v8 = vsel %vm2136_vm6, %v2134_v23, %v2135_v50 }
 0x204   : > { %vm2159_vm10 = vcmp.lt.s32.totalorder %v2157_v12, %v2158_v41  ;;  %v2067_v48 = vsel %vm2019_vm7, %v8344_v3, 24  ;;  %v2083_v39 = vsel %vm2035_vm8, %v8345_v38, 24  ;;  %v2138_v2 = vrot.slane %v2137_v8, 1 }
 0x205   : > { %v2160_v6 = vsel %vm2159_vm10, %v2157_v12, %v2158_v41  ;;  %v2099_v14 = vsel %vm2051_vm9, %v8346_v44, 24  ;;  %vm2115_vm11 = vcmp.lt.s32.totalorder %v2067_v48, %v2083_v39  ;;  %v2497_v1 = vrot.slane %v2496_v58, 1 }
 0x206   : > { %v2161_v45 = vrot.slane %v2160_v6, 2  ;;  %v2116_v53 = vsel %vm2115_vm11, %v2067_v48, %v2083_v39  ;;  %vm2619_vm12 = vcmp.lt.f32.partialorder %v1894_v25, 0.3  ;;  %vm2139_vm13 = vcmp.lt.s32.totalorder %v2137_v8, %v2138_v2 }
 0x207   : > { %vm2117_vm14 = vcmp.lt.s32.totalorder %v2116_v53, %v2099_v14  ;;  %v2635_v61 = vsel %vm2619_vm12, 0.0, %v8164_v60  ;;  %vm2683_vm15 = vcmp.ge.f32.partialorder %v1894_v25, 0.7  ;;  %v6412_v40 = vsel %vm2139_vm13, %v2137_v8, %v2138_v2 }
 0x208   : > { %vm2162_vm1 = vcmp.lt.s32.totalorder %v2160_v6, %v2161_v45  ;;  %v2118_v28 = vsel %vm2117_vm14, %v2116_v53, %v2099_v14  ;;  %v2498_v5 = vadd.f32 %v2497_v1, %v2496_v58  ;;  %vm2836_vm5 = vcmp.eq.s32.totalorder %v8344_v3, %v6412_v40 }
 0x209   : > { %vm2852_vm6 = vcmp.eq.s32.totalorder %v8345_v38, %v6412_v40  ;;  %v2163_v47 = vsel %vm2162_vm1, %v2160_v6, %v2161_v45  ;;  %v2119_v4 = vrot.slane %v2118_v28, 4  ;;  %v6426_v36 = vsel %vm6397_vm0, -1.0, %v6376_v46 }
 0x20a   : > { %vm4783_vm7 = vmpackc.low %vm2852_vm6, %vm2836_vm5  ;;  %v2164_v56 = vrot.slane %v2163_v47, 1  ;;  %vm2651_vm8 = vcmp.gt.f32.partialorder %v2498_v5, 0.0  ;;  %v8162_v57 = vmov 1.0|1.0   ;;  %v6431_v23 = vsel %vm6397_vm0, -1.0, %v1743_v21 }
 0x20b   : > { %4784 = vmatprep.subr.msk.bf16.mxu0 %vm4783_vm7, %v8162_v57  ;;  %vm2120_vm9 = vcmp.lt.s32.totalorder %v2118_v28, %v2119_v4  ;;  %v2667_v19 = vsel %vm2651_vm8, 1.0, %v2635_v61  ;;  %v1903_v22 = vmax.f32 %v6421_v13, %v6426_v36  ;;  %v8352_v50 = vrot.slane %v5597_v11, %v8351_v35 }
 0x20c   : > { %vm2165_vm11 = vcmp.lt.s32.totalorder %v2163_v47, %v2164_v56  ;;  %v2121_v46 = vsel %vm2120_vm9, %v2118_v28, %v2119_v4  ;;  %v2699_v33 = vsel %vm2683_vm15, 1.0, %v2667_v19  ;;  %vm2349_vm12 = vcmp.eq.f32.partialorder %v6421_v13, %v6249_v31 }
 0x20d   : > { %vm6438_vm10 = vcmp.eq.s32.totalorder %v8352_v50, 1  ;;  %v6445_v43 = vsel %vm2165_vm11, %v2163_v47, %v2164_v56  ;;  %v2122_v41 = vrot.slane %v2121_v46, 2  ;;  %v2731_v58 = vcombine.low %v2699_v33, %v6385_v54 }
 0x20e   : > { %v1904_v21 = vmax.f32 %v1903_v22, %v6431_v23  ;;  %vm2838_vm0 = vcmp.eq.s32.totalorder %v8344_v3, %v6445_v43  ;;  %vm2854_vm13 = vcmp.eq.s32.totalorder %v8345_v38, %v6445_v43  ;;  %vm2365_vm14 = vcmp.eq.f32.partialorder %v6426_v36, %v6258_v59 }
 0x20f   : > { %vm4787_vm15 = vmpackc.low %vm2854_vm13, %vm2838_vm0  ;;  %vm2123_vm1 = vcmp.lt.s32.totalorder %v2121_v46, %v2122_v41  ;;  %vm2381_vm5 = vcmp.eq.f32.partialorder %v6431_v23, %v6290_v0  ;;  %v4629_v39 = vsel %vm2349_vm12, 1.0, %v8342_v51  ;;  %v4645_v2 = vsel %vm2365_vm14, 1.0, %v8342_v51 }
 0x210   : > { %v1905_v8 = vrot.slane %v1904_v21, 4  ;;  %4788 = vmatprep.subr.msk.bf16.mxu1 %vm4787_vm15, %v8162_v57  ;;  %v2124_v48 = vsel %vm2123_vm1, %v2121_v46, %v2122_v41  ;;  %v6469_v6 = vadd.f32 %v6097_v26, %v6085_v32  ;;  %v2507_v53 = vadd.f32 %v4645_v2, %v4629_v39  ;;  %v8359_v46 = vld [vmem:[#allocation9_spill] sm:$0xff]  ;;  %v8361_v41 = vld [vmem:[#allocation66_spill] sm:$0xff]  ;;  %v8362_v39 = vld [vmem:[#allocation48_spill] sm:$0xff] }
 0x211   : > { %v2125_v14 = vrot.slane %v2124_v48, 1  ;;  %vm8168_vm6 = vcmask 195584   ;;  %v6473_v1 = vadd.f32 %v6131_v9, %v6085_v32  ;;  %v4661_v61 = vsel %vm2381_vm5, 1.0, %v8342_v51 }
 0x212   : > { %v1906_v45 = vmax.f32 %v1904_v21, %v1905_v8  ;;  %v8355_v28 = vsub.f32 %v6208_v55, %v8334_v49  ;;  %v1651_v5 = vmul.f32 %v6338_v24, %v8324_v10  ;;  %v1667_v47 = vmul.f32 %v6342_v16, %v8332_v37  ;;  %v8358_v16 = vld [vmem:[#allocation47_spill] sm:$0xff] }
 0x213   : > { %vm2126_vm7 = vcmp.lt.s32.totalorder %v2124_v48, %v2125_v14  ;;  %v2508_v56 = vadd.f32 %v4661_v61, %v2507_v53  ;;  %v8356_v19 = vsub.f32 %v6143_v62, %v8325_v15  ;;  %v8357_v10 = vsub.f32 %v6212_v29, %v8335_v27 }
 0x214   : > { %4945 = vrcp.f32 %v8355_v28  ;;  %v1907_v4 = vrot.slane %v1906_v45, 2  ;;  %v2127_v22 = vsel %vm2126_vm7, %v2124_v48, %v2125_v14  ;;  %v1714_v50 = vsel %vm1706_vm2, 0.0, %v1651_v5 }
 0x215   : > { %4947 = vrcp.f32 %v8356_v19  ;;  %v1730_v55 = vsel %vm1707_vm3, 0.0, %v1667_v47  ;;  %vm2835_vm8 = vcmp.eq.s32.totalorder %v8344_v3, %v2127_v22  ;;  %vm2851_vm9 = vcmp.eq.s32.totalorder %v8345_v38, %v2127_v22  ;;  %v8365_v47 = vld [vmem:[#allocation30_spill] sm:$0xff] }
 0x216   : > { %4949 = vrcp.f32 %v8357_v10  ;;  %v1908_v37 = vmax.f32 %v1906_v45, %v1907_v4  ;;  %v2509_v24 = vrot.slane %v2508_v56, 4  ;;  %vm4785_vm11 = vmpackc.low %vm2851_vm9, %vm2835_vm8  ;;  %v6503_v62 = vsel %vm6438_vm10, -1.0, %v1714_v50  ;;  %v8364_v45 = vld [vmem:[#allocation58_spill] sm:$0xff] }
 0x217   : > { %v6507_v29 = vsel %vm6438_vm10, -1.0, %v1730_v55  ;;  %v8360_v33 = vsub.f32 %v8358_v16, %v8359_v46  ;;  %v6514_v21 = vadd.f32 %v8361_v41, %v6085_v32  ;;  %4786 = vmatpush1.bf16.msk.msra.mxu0 %vm4785_vm11, %v8162_v57  ;;  %vm2868_vm12 = vcmp.eq.s32.totalorder %v8346_v44, %v6412_v40  ;;  %v6531_v40 = vld [vmem:[%s6499_s21] sm:$0xf]  ;;  %v8368_v50 = vld [vmem:[#allocation22_spill] sm:$0xff] }
 0x218   : > { %v1909_v8 = vrot.slane %v1908_v37, 1  ;;  %v2510_v48 = vadd.f32 %v2509_v24, %v2508_v56  ;;  %vm2352_vm0 = vcmp.eq.f32.partialorder %v6503_v62, %v6249_v31  ;;  %v6522_v2 = vrot.slane %v2731_v58, %v8362_v39  ;;  %v8366_v58 = vld [vmem:[#allocation49_spill] sm:$0xff]  ;;  %v8373_v24 = vld [vmem:[#allocation50_spill] sm:$0xff] }
 0x219   : > { %4951 = vrcp.f32 %v8360_v33  ;;  %v8160_v14 = vmov 1.0   ;;  %vm2368_vm13 = vcmp.eq.f32.partialorder %v6507_v29, %v6258_v59  ;;  %v4632_v32 = vsel %vm2352_vm0, 1.0, %v8342_v51 }
 0x21a   : > { %8363 = vst [vmem:[#allocation32_spill] sm:$0xff] %v6522_v2  ;;  %4727 = vmatprep.subr.msk.mxu0 %vm2868_vm12, %v8160_v14  ;;  %v1910_v61 = vmax.f32 %v1908_v37, %v1909_v8  ;;  %v2511_v28 = vrot.slane %v2510_v48, 2  ;;  %v4648_v5 = vsel %vm2368_vm13, 1.0, %v8342_v51  ;;  %v8367_v4 = vsub.f32 %v8365_v47, %v8366_v58  ;;  %v8372_v37 = vld [vmem:[#allocation28_spill] sm:$0xff]  ;;  %v8376_v47 = vld [vmem:[#allocation51_spill] sm:$0xff] }
 0x21b   : > { %vm2867_vm14 = vcmp.eq.s32.totalorder %v8346_v44, %v2127_v22  ;;  %v1927_v56 = vmax.f32 %v6503_v62, %v6507_v29  ;;  %v2531_v19 = vadd.f32 %v4648_v5, %v4632_v32  ;;  %v8369_v55 = vrot.slane %v5597_v11, %v8368_v50  ;;  %v8375_v5 = vld [vmem:[#allocation31_spill] sm:$0xff] }
 0x21c   : > { %4953 = vrcp.f32 %v8367_v4  ;;  %v8374_v16 = vsub.f32 %v8372_v37, %v8373_v24  ;;  %vm2021_vm1 = vcmp.eq.f32.partialorder %v6421_v13, %v1910_v61  ;;  %vm2037_vm5 = vcmp.eq.f32.partialorder %v6426_v36, %v1910_v61  ;;  %4728 = vmatpush1.msk.msra.mxu0 %vm2867_vm14, %v8160_v14  ;;  %v8379_v14 = vld [vmem:[#allocation56_spill] sm:$0xff] }
 0x21d   : > { %vm6543_vm15 = vcmp.eq.s32.totalorder %v8369_v55, 1  ;;  %vm2053_vm7 = vcmp.eq.f32.partialorder %v6431_v23, %v1910_v61  ;;  %v2512_v22 = vadd.f32 %v2511_v28, %v2510_v48  ;;  %v2069_v8 = vsel %vm2021_vm1, %v8344_v3, 24  ;;  %4729 = vmatmul.mubr.msk.f32.vlgmr.msra.gmra.mrb[0].mxu0 %vm8168_vm6, %v6531_v40 }
 0x21e   : > { %4955 = vrcp.f32 %v8374_v16  ;;  %v4946_v33 = vpop.eup %4945  ;;  %v2085_v32 = vsel %vm2037_vm5, %v8345_v38, 24  ;;  %vm2621_vm8 = vcmp.lt.f32.partialorder %v1910_v61, 0.3  ;;  %v8377_v4 = vsub.f32 %v8375_v5, %v8376_v47  ;;  %3190 = vmatprep.mubr.f32.mxu0 %v8342_v51 }
 0x21f   : > { %v4948_v13 = vpop.eup %4947  ;;  %v2101_v36 = vsel %vm2053_vm7, %v8346_v44, 24  ;;  %vm2141_vm9 = vcmp.lt.s32.totalorder %v2069_v8, %v2085_v32  ;;  %v2513_v23 = vrot.slane %v2512_v22, 1  ;;  %v2637_v48 = vsel %vm2621_vm8, 0.0, %v8164_v60 }
 0x220   : > { %4957 = vrcp.f32 %v8377_v4  ;;  %v4950_v28 = vpop.eup %4949  ;;  %v2142_v55 = vsel %vm2141_vm9, %v2069_v8, %v2085_v32  ;;  %vm2685_vm11 = vcmp.ge.f32.partialorder %v1910_v61, 0.7  ;;  %v1683_v37 = vmul.f32 %v4946_v33, %v8334_v49  ;;  %v8378_v4 = vld [vmem:[#allocation54_spill] sm:$0xff] }
 0x221   : > { %v1653_v16 = vmul.f32 %v4948_v13, %v8325_v15  ;;  %vm2143_vm12 = vcmp.lt.s32.totalorder %v2142_v55, %v2101_v36  ;;  %v2514_v53 = vadd.f32 %v2513_v23, %v2512_v22  ;;  %v1669_v5 = vmul.f32 %v4950_v28, %v8335_v27 }
 0x222   : > { %v8380_v57 = vsub.f32 %v8378_v4, %v8379_v14  ;;  %v2144_v25 = vsel %vm2143_vm12, %v2142_v55, %v2101_v36  ;;  %v1746_v60 = vsel %vm1708_vm4, 0.0, %v1683_v37  ;;  %v8381_v49 = vsub.f32 %v6247_v34, %v6075_v30 }
 0x223   : > { %v4952_v54 = vpop.eup %4951  ;;  %v1716_v8 = vsel %vm1706_vm2, 0.0, %v1653_v16  ;;  %v2145_v15 = vrot.slane %v2144_v25, 4  ;;  %vm2653_vm0 = vcmp.gt.f32.partialorder %v2514_v53, 0.0  ;;  %v6579_v27 = vsel %vm6438_vm10, -1.0, %v1746_v60 }
 0x224   : > { %4959 = vrcp.f32 %v8380_v57  ;;  %v1685_v57 = vmul.f32 %v4952_v54, %v8359_v46  ;;  %v2669_v22 = vsel %vm2653_vm0, 1.0, %v2637_v48  ;;  %v1928_v33 = vmax.f32 %v1927_v56, %v6579_v27 }
 0x225   : > { %4961 = vrcp.f32 %v8381_v49  ;;  %vm2384_vm13 = vcmp.eq.f32.partialorder %v6579_v27, %v6290_v0  ;;  %v1732_v32 = vsel %vm1707_vm3, 0.0, %v1669_v5  ;;  %vm2146_vm14 = vcmp.lt.s32.totalorder %v2144_v25, %v2145_v15 }
 0x226   : > { %v4954_v13 = vpop.eup %4953  ;;  %v2701_v34 = vsel %vm2685_vm11, 1.0, %v2669_v22  ;;  %v4664_v53 = vsel %vm2384_vm13, 1.0, %v8342_v51  ;;  %v1748_v60 = vsel %vm1708_vm4, 0.0, %v1685_v57  ;;  %v2147_v54 = vsel %vm2146_vm14, %v2144_v25, %v2145_v15  ;;  %v8383_v22 = vld [vmem:[#allocation37_spill] sm:$0xff] }
 0x227   : > { %v2732_v46 = vcombine.low %v2701_v34, %v6401_v7  ;;  %v1929_v56 = vrot.slane %v1928_v33, 4  ;;  %v2532_v36 = vadd.f32 %v4664_v53, %v2531_v19  ;;  %v2148_v23 = vrot.slane %v2147_v54, 2 }
 0x228   : > { %v4956_v12 = vpop.eup %4955  ;;  %v6594_v48 = vsel %vm6543_vm15, -1.0, %v1716_v8  ;;  %v6598_v61 = vsel %vm6543_vm15, -1.0, %v1732_v32  ;;  %v6602_v28 = vsel %vm6543_vm15, -1.0, %v1748_v60  ;;  %vm2870_vm1 = vcmp.eq.s32.totalorder %v8346_v44, %v6445_v43 }
 0x229   : > { %v6605_v25 = vrot.slane %v2732_v46, %v8362_v39  ;;  %v1930_v7 = vmax.f32 %v1928_v33, %v1929_v56  ;;  %v2533_v37 = vrot.slane %v2532_v36, 4  ;;  %v1943_v19 = vmax.f32 %v6594_v48, %v6598_v61 }
 0x22a   : > { %v4958_v55 = vpop.eup %4957  ;;  %vm2149_vm10 = vcmp.lt.s32.totalorder %v2147_v54, %v2148_v23  ;;  %vm2354_vm5 = vcmp.eq.f32.partialorder %v6594_v48, %v6249_v31  ;;  %vm2370_vm15 = vcmp.eq.f32.partialorder %v6598_v61, %v6258_v59  ;;  %vm2386_vm7 = vcmp.eq.f32.partialorder %v6602_v28, %v6290_v0 }
 0x22b   : > { %8382 = vst [vmem:[#allocation8_spill] sm:$0xff] %v6605_v25  ;;  %v2150_v10 = vsel %vm2149_vm10, %v2147_v54, %v2148_v23  ;;  %v1931_v5 = vrot.slane %v1930_v7, 2  ;;  %v2534_v4 = vadd.f32 %v2533_v37, %v2532_v36  ;;  %v1944_v15 = vmax.f32 %v1943_v19, %v6602_v28 }
 0x22c   : > { %v2151_v49 = vrot.slane %v2150_v10, 1  ;;  %v4650_v57 = vsel %vm2370_vm15, 1.0, %v8342_v51  ;;  %v8384_v33 = vrot.slane %v5597_v11, %v8383_v22  ;;  %v8387_v34 = vsub.f32 %v6256_v17, %v6079_v20 }
 0x22d   : > { %v1932_v60 = vmax.f32 %v1930_v7, %v1931_v5  ;;  %v2535_v54 = vrot.slane %v2534_v4, 2  ;;  %v4634_v46 = vsel %vm2354_vm5, 1.0, %v8342_v51  ;;  %v4666_v56 = vsel %vm2386_vm7, 1.0, %v8342_v51 }
 0x22e   : > { %v4960_v8 = vpop.eup %4959  ;;  %vm6624_vm8 = vcmp.eq.s32.totalorder %v8384_v33, 1  ;;  %4963 = vrcp.f32 %v8387_v34  ;;  %vm2152_vm9 = vcmp.lt.s32.totalorder %v2150_v10, %v2151_v49  ;;  %v1945_v36 = vrot.slane %v1944_v15, 4 }
 0x22f   : > { %v6631_v53 = vpop.eup %4961  ;;  %v2547_v23 = vadd.f32 %v4650_v57, %v4634_v46  ;;  %v1650_v37 = vmul.f32 %v4954_v13, %v8366_v58  ;;  %v2153_v19 = vsel %vm2152_vm9, %v2150_v10, %v2151_v49  ;;  %v1933_v33 = vrot.slane %v1932_v60, 1 }
 0x230   : > { %v2536_v17 = vadd.f32 %v2535_v54, %v2534_v4  ;;  %v1666_v34 = vmul.f32 %v4956_v12, %v8373_v24  ;;  %vm2837_vm11 = vcmp.eq.s32.totalorder %v8344_v3, %v2153_v19  ;;  %vm2853_vm12 = vcmp.eq.s32.totalorder %v8345_v38, %v2153_v19 }
 0x231   : > { %vm2869_vm0 = vcmp.eq.s32.totalorder %v8346_v44, %v2153_v19  ;;  %v1946_v7 = vmax.f32 %v1944_v15, %v1945_v36  ;;  %vm4789_vm13 = vmpackc.low %vm2853_vm12, %vm2837_vm11  ;;  %v1934_v5 = vmax.f32 %v1932_v60, %v1933_v33  ;;  %v2548_v25 = vadd.f32 %v4666_v56, %v2547_v23 }
 0x232   : > { %v2537_v16 = vrot.slane %v2536_v17, 1  ;;  %v1682_v57 = vmul.f32 %v4958_v55, %v8376_v47  ;;  %v8388_v46 = vmov 1.0|1.0   ;;  %v1713_v13 = vsel %vm1706_vm2, 0.0, %v1650_v37 }
 0x233   : > { %4790 = vmatpush1.bf16.msk.msra.mxu1 %vm4789_vm13, %v8388_v46  ;;  %v1947_v58 = vrot.slane %v1946_v7, 2  ;;  %v1729_v24 = vsel %vm1707_vm3, 0.0, %v1666_v34  ;;  %v6650_v12 = vmul.f32 %v4960_v8, %v8379_v14  ;;  %v8389_v10 = vmov 1.0  }
 0x234   : > { %4734 = vmatprep.subr.msk.mxu1 %vm2870_vm1, %v8389_v10  ;;  %vm2024_vm14 = vcmp.eq.f32.partialorder %v6503_v62, %v1934_v5  ;;  %vm2040_vm10 = vcmp.eq.f32.partialorder %v6507_v29, %v1934_v5  ;;  %vm2056_vm5 = vcmp.eq.f32.partialorder %v6579_v27, %v1934_v5  ;;  %v2538_v47 = vadd.f32 %v2537_v16, %v2536_v17 }
 0x235   : > { %v2072_v55 = vsel %vm2024_vm14, %v8344_v3, 24  ;;  %v2088_v4 = vsel %vm2040_vm10, %v8345_v38, 24  ;;  %v2104_v49 = vsel %vm2056_vm5, %v8346_v44, 24  ;;  %vm2624_vm15 = vcmp.lt.f32.partialorder %v1934_v5, 0.3 }
 0x236   : > { %vm2180_vm7 = vcmp.lt.s32.totalorder %v2072_v55, %v2088_v4  ;;  %v8390_v14 = vmov -1.0   ;;  %vm2656_vm9 = vcmp.gt.f32.partialorder %v2538_v47, 0.0  ;;  %vm2688_vm11 = vcmp.ge.f32.partialorder %v1934_v5, 0.7 }
 0x237   : > { %v2640_v8 = vsel %vm2624_vm15, 0.0, %v8390_v14  ;;  %4735 = vmatpush1.msk.msra.mxu1 %vm2869_vm0, %v8389_v10  ;;  %v2181_v62 = vsel %vm2180_vm7, %v2072_v55, %v2088_v4  ;;  %v1948_v27 = vmax.f32 %v1946_v7, %v1947_v58  ;;  %v2549_v16 = vrot.slane %v2548_v25, 4  ;;  %v8391_v58 = vld [vmem:[#allocation10_spill] sm:$0xff] }
 0x238   : > { %v4964_v43 = vpop.eup %4963  ;;  %v2672_v29 = vsel %vm2656_vm9, 1.0, %v2640_v8  ;;  %4736 = vmatmul.mubr.msk.f32.vlgmr.msra.gmra.mrb[0].mxu1 %vm8168_vm6, %v6531_v40  ;;  %vm2182_vm1 = vcmp.lt.s32.totalorder %v2181_v62, %v2104_v49  ;;  %v1745_v60 = vsel %vm1708_vm4, 0.0, %v1682_v57  ;;  %v6674_v54 = vsel %vm6624_vm8, -1.0, %v1713_v13  ;;  %v8395_v8 = vld [vmem:[#allocation52_spill] sm:$0xff] }
 0x239   : > { %v6668_v15 = vsel %vm2688_vm11, 1.0, %v2672_v29  ;;  %v2183_v56 = vsel %vm2182_vm1, %v2181_v62, %v2104_v49  ;;  %v1949_v36 = vrot.slane %v1948_v27, 1  ;;  %v2550_v23 = vadd.f32 %v2549_v16, %v2548_v25  ;;  %3261 = vmatprep.mubr.f32.mxu1 %v8342_v51 }
 0x23a   : > { %v6678_v37 = vsel %vm6624_vm8, -1.0, %v1729_v24  ;;  %v2184_v19 = vrot.slane %v2183_v56, 4  ;;  %v6683_v33 = vsel %vm6624_vm8, -1.0, %v1745_v60  ;;  %vm2351_vm12 = vcmp.eq.f32.partialorder %v6674_v54, %v6249_v31 }
 0x23b   : > { %v1919_v17 = vmax.f32 %v6674_v54, %v6678_v37  ;;  %v1950_v34 = vmax.f32 %v1948_v27, %v1949_v36  ;;  %v2551_v7 = vrot.slane %v2550_v23, 2  ;;  %vm2367_vm0 = vcmp.eq.f32.partialorder %v6678_v37, %v6258_v59 }
 0x23c   : > { %vm2383_vm13 = vcmp.eq.f32.partialorder %v6683_v33, %v6290_v0  ;;  %vm2185_vm14 = vcmp.lt.s32.totalorder %v2183_v56, %v2184_v19  ;;  %v4631_v32 = vsel %vm2351_vm12, 1.0, %v8342_v51  ;;  %v4647_v5 = vsel %vm2367_vm0, 1.0, %v8342_v51 }
 0x23d   : > { %v1920_v25 = vmax.f32 %v1919_v17, %v6683_v33  ;;  %v2186_v57 = vsel %vm2185_vm14, %v2183_v56, %v2184_v19  ;;  %vm2026_vm8 = vcmp.eq.f32.partialorder %v6594_v48, %v1950_v34  ;;  %vm2042_vm10 = vcmp.eq.f32.partialorder %v6598_v61, %v1950_v34  ;;  %v8396_v48 = vld [vmem:[#allocation53_spill] sm:$0xff] }
 0x23e   : > { %vm2058_vm5 = vcmp.eq.f32.partialorder %v6602_v28, %v1950_v34  ;;  %v8392_v13 = vrot.slane %v5597_v11, %v8391_v58  ;;  %v2187_v47 = vrot.slane %v2186_v57, 2  ;;  %v2074_v55 = vsel %vm2026_vm8, %v8344_v3, 24 }
 0x23f   : > { %v2090_v4 = vsel %vm2042_vm10, %v8345_v38, 24  ;;  %v2106_v49 = vsel %vm2058_vm5, %v8346_v44, 24  ;;  %vm496_vm7 = vcmp.eq.f32.partialorder %v8395_v8, 1.0  ;;  %vm498_vm9 = vcmp.eq.f32.partialorder %v8396_v48, 1.0 }
 0x240   : > { %vm6702_vm15 = vcmp.eq.s32.totalorder %v8392_v13, 1  ;;  %vm2206_vm11 = vcmp.lt.s32.totalorder %v2074_v55, %v2090_v4  ;;  %v2552_v61 = vadd.f32 %v2551_v7, %v2550_v23  ;;  %vm2626_vm1 = vcmp.lt.f32.partialorder %v1950_v34, 0.3 }
 0x241   : > { %vm2690_vm12 = vcmp.ge.f32.partialorder %v1950_v34, 0.7  ;;  %vm2188_vm0 = vcmp.lt.s32.totalorder %v2186_v57, %v2187_v47  ;;  %v2207_v11 = vsel %vm2206_vm11, %v2074_v55, %v2090_v4  ;;  %v2642_v28 = vsel %vm2626_vm1, 0.0, %v8390_v14 }
 0x242   : > { %v1921_v62 = vrot.slane %v1920_v25, 4  ;;  %v2189_v29 = vsel %vm2188_vm0, %v2186_v57, %v2187_v47  ;;  %vm2208_vm14 = vcmp.lt.s32.totalorder %v2207_v11, %v2106_v49  ;;  %v2553_v27 = vrot.slane %v2552_v61, 1  ;;  %vm500_vm0 = vmand %vm496_vm7, %vm498_vm9 }
 0x243   : > { %v4663_v16 = vsel %vm2383_vm13, 1.0, %v8342_v51  ;;  %v2190_v60 = vrot.slane %v2189_v29, 1  ;;  %v2209_v56 = vsel %vm2208_vm14, %v2207_v11, %v2106_v49  ;;  %v2523_v19 = vadd.f32 %v4647_v5, %v4631_v32  ;;  %v8397_v11 = vld [vmem:[#allocation59_spill] sm:$0xff] }
 0x244   : > { %v1922_v36 = vmax.f32 %v1920_v25, %v1921_v62  ;;  %v2210_v23 = vrot.slane %v2209_v56, 4  ;;  %v2554_v17 = vadd.f32 %v2553_v27, %v2552_v61  ;;  %v1668_v7 = vmul.f32 %v6631_v53, %v6075_v30 }
 0x245   : > { %v1684_v13 = vmul.f32 %v4964_v43, %v6079_v20  ;;  %vm2191_vm8 = vcmp.lt.s32.totalorder %v2189_v29, %v2190_v60  ;;  %v2524_v47 = vadd.f32 %v4663_v16, %v2523_v19  ;;  %v1715_v55 = vsel %vm1706_vm2, 0.0, %v6650_v12 }
 0x246   : > { %v1923_v57 = vrot.slane %v1922_v36, 2  ;;  %v6722_v4 = vsel %vm2191_vm8, %v2189_v29, %v2190_v60  ;;  %vm2211_vm13 = vcmp.lt.s32.totalorder %v2209_v56, %v2210_v23  ;;  %vm2658_vm10 = vcmp.gt.f32.partialorder %v2554_v17, 0.0 }
 0x247   : > { %v1731_v25 = vsel %vm1707_vm3, 0.0, %v1668_v7  ;;  %vm2840_vm5 = vcmp.eq.s32.totalorder %v8344_v3, %v6722_v4  ;;  %vm2856_vm11 = vcmp.eq.s32.totalorder %v8345_v38, %v6722_v4  ;;  %v2212_v30 = vsel %vm2211_vm13, %v2209_v56, %v2210_v23 }
 0x248   : > { %v2674_v20 = vsel %vm2658_vm10, 1.0, %v2642_v28  ;;  %vm4791_vm1 = vmpackc.low %vm2856_vm11, %vm2840_vm5  ;;  %v2213_v53 = vrot.slane %v2212_v30, 2  ;;  %v1924_v12 = vmax.f32 %v1922_v36, %v1923_v57  ;;  %v2525_v32 = vrot.slane %v2524_v47, 4 }
 0x249   : > { %v6731_v43 = vsel %vm2690_vm12, 1.0, %v2674_v20  ;;  %4792 = vmatprep.subr.msk.bf16.mxu0 %vm4791_vm1, %v8388_v46  ;;  %v1747_v5 = vsel %vm1708_vm4, 0.0, %v1684_v13  ;;  %v6738_v49 = vsel %vm6702_vm15, -1.0, %v1715_v55  ;;  %v6742_v61 = vsel %vm6702_vm15, -1.0, %v1731_v25 }
 0x24a   : > { %v1575_v34 = vsub.f32 %v6473_v1, %v8397_v11  ;;  %vm2214_vm12 = vcmp.lt.s32.totalorder %v2212_v30, %v2213_v53  ;;  %v1925_v28 = vrot.slane %v1924_v12, 1  ;;  %v2526_v62 = vadd.f32 %v2525_v32, %v2524_v47  ;;  %v8398_v1 = vld [vmem:[#allocation60_spill] sm:$0xff] }
 0x24b   : > { %v6748_v29 = vsel %vm6702_vm15, -1.0, %v1747_v5  ;;  %v2215_v27 = vsel %vm2214_vm12, %v2212_v30, %v2213_v53  ;;  %v1935_v16 = vmax.f32 %v6738_v49, %v6742_v61  ;;  %vm2353_vm14 = vcmp.eq.f32.partialorder %v6738_v49, %v6249_v31 }
 0x24c   : > { %v1591_v60 = vsub.f32 %v6514_v21, %v8398_v1  ;;  %v2216_v56 = vrot.slane %v2215_v27, 1  ;;  %v1926_v36 = vmax.f32 %v1924_v12, %v1925_v28  ;;  %v2527_v24 = vrot.slane %v2526_v62, 2 }
 0x24d   : > { %vm2369_vm15 = vcmp.eq.f32.partialorder %v6742_v61, %v6258_v59  ;;  %v1936_v19 = vmax.f32 %v1935_v16, %v6748_v29  ;;  %vm2385_vm7 = vcmp.eq.f32.partialorder %v6748_v29, %v6290_v0  ;;  %v4633_v23 = vsel %vm2353_vm14, 1.0, %v8342_v51 }
 0x24e   : > { %v8399_v17 = vmov 0   ;;  %vm2217_vm9 = vcmp.lt.s32.totalorder %v2215_v27, %v2216_v56  ;;  %vm2023_vm8 = vcmp.eq.f32.partialorder %v6674_v54, %v1926_v36  ;;  %vm2039_vm13 = vcmp.eq.f32.partialorder %v6678_v37, %v1926_v36 }
 0x24f   : > { %v6767_v7 = vsel %vm500_vm0, 1, %v8399_v17  ;;  %vm2055_vm10 = vcmp.eq.f32.partialorder %v6683_v33, %v1926_v36  ;;  %v6772_v21 = vsel %vm2217_vm9, %v2215_v27, %v2216_v56  ;;  %v2071_v13 = vsel %vm2023_vm8, %v8344_v3, 24  ;;  %v8401_v56 = vld [vmem:[#allocation25_spill] sm:$0xff] }
 0x250   : > { %v2087_v57 = vsel %vm2039_vm13, %v8345_v38, 24  ;;  %v4649_v47 = vsel %vm2369_vm15, 1.0, %v8342_v51  ;;  %vm2842_vm5 = vcmp.eq.s32.totalorder %v8344_v3, %v6772_v21  ;;  %vm2858_vm11 = vcmp.eq.s32.totalorder %v8345_v38, %v6772_v21  ;;  %v8425_v17 = vld [vmem:[#allocation17_spill] sm:$0xff] }
 0x251   : > { %vm2167_vm1 = vcmp.lt.s32.totalorder %v2071_v13, %v2087_v57  ;;  %v2528_v54 = vadd.f32 %v2527_v24, %v2526_v62  ;;  %vm4795_vm12 = vmpackc.low %vm2858_vm11, %vm2842_vm5  ;;  %v2103_v37 = vsel %vm2055_vm10, %v8346_v44, 24  ;;  %vm2623_vm0 = vcmp.lt.f32.partialorder %v1926_v36, 0.3 }
 0x252   : > { %v2168_v33 = vsel %vm2167_vm1, %v2071_v13, %v2087_v57  ;;  %v1937_v55 = vrot.slane %v1936_v19, 4  ;;  %4796 = vmatprep.subr.msk.bf16.mxu1 %vm4795_vm12, %v8388_v46  ;;  %v4665_v30 = vsel %vm2385_vm7, 1.0, %v8342_v51  ;;  %v2539_v20 = vadd.f32 %v4649_v47, %v4633_v23 }
 0x253   : > { %vm2169_vm14 = vcmp.lt.s32.totalorder %v2168_v33, %v2103_v37  ;;  %v2529_v25 = vrot.slane %v2528_v54, 1  ;;  %v2639_v12 = vsel %vm2623_vm0, 0.0, %v8390_v14  ;;  %v8400_v5 = vsub.f32 %v6469_v6, %v8364_v45 }
 0x254   : > { %v2170_v53 = vsel %vm2169_vm14, %v2168_v33, %v2103_v37  ;;  %v1938_v32 = vmax.f32 %v1936_v19, %v1937_v55  ;;  %v2540_v27 = vadd.f32 %v4665_v30, %v2539_v20  ;;  %v1513_v24 = vadd.f32 %v6097_v26, %v8401_v56  ;;  %v8402_v19 = vld [vmem:[#allocation15_spill] sm:$0xff]  ;;  %v8403_v30 = vld [vmem:[#allocation62_spill] sm:$0xff] }
 0x255   : > { %4965 = vrcp.f32 %v8400_v5  ;;  %v2171_v28 = vrot.slane %v2170_v53, 4  ;;  %v2530_v62 = vadd.f32 %v2529_v25, %v2528_v54  ;;  %v1529_v23 = vadd.f32 %v6131_v9, %v8401_v56  ;;  %v8404_v5 = vld [vmem:[#allocation63_spill] sm:$0xff] }
 0x256   : > { %4967 = vrcp.f32 %v1575_v34  ;;  %v1939_v16 = vrot.slane %v1938_v32, 2  ;;  %v2541_v13 = vrot.slane %v2540_v27, 4  ;;  %v1798_v57 = vrot.slane %v6767_v7, %v8402_v19 }
 0x257   : > { %4969 = vrcp.f32 %v1591_v60  ;;  %vm2172_vm15 = vcmp.lt.s32.totalorder %v2170_v53, %v2171_v28  ;;  %vm2655_vm7 = vcmp.gt.f32.partialorder %v2530_v62, 0.0  ;;  %vm2687_vm9 = vcmp.ge.f32.partialorder %v1926_v36, 0.7 }
 0x258   : > { %v2173_v6 = vsel %vm2172_vm15, %v2170_v53, %v2171_v28  ;;  %v2671_v47 = vsel %vm2655_vm7, 1.0, %v2639_v12  ;;  %v1940_v54 = vmax.f32 %v1938_v32, %v1939_v16  ;;  %v2542_v33 = vadd.f32 %v2541_v13, %v2540_v27  ;;  %v8407_v53 = vld [vmem:[#allocation26_spill] sm:$0xff] }
 0x259   : > { %v2174_v37 = vrot.slane %v2173_v6, 2  ;;  %v2703_v34 = vsel %vm2687_vm9, 1.0, %v2671_v47  ;;  %v1545_v60 = vadd.f32 %v8361_v41, %v8401_v56  ;;  %v1561_v20 = vsub.f32 %v1513_v24, %v8403_v30 }
 0x25a   : > { %v2733_v55 = vcombine.low %v2703_v34, %v6668_v15  ;;  %v1941_v25 = vrot.slane %v1940_v54, 1  ;;  %v1577_v62 = vsub.f32 %v1529_v23, %v8404_v5  ;;  %v2543_v48 = vrot.slane %v2542_v33, 2  ;;  %v8408_v15 = vld [vmem:[#allocation16_spill] sm:$0xff] }
 0x25b   : > { %vm2175_vm8 = vcmp.lt.s32.totalorder %v2173_v6, %v2174_v37  ;;  %vm2872_vm13 = vcmp.eq.s32.totalorder %v8346_v44, %v6722_v4  ;;  %vm6804_vm10 = vcmp.eq.s32.totalorder %v1798_v57, 1  ;;  %v1593_v12 = vsub.f32 %v1545_v60, %v8407_v53 }
 0x25c   : > { %v2176_v32 = vsel %vm2175_vm8, %v2173_v6, %v2174_v37  ;;  %v1942_v28 = vmax.f32 %v1940_v54, %v1941_v25  ;;  %4971 = vrcp.f32 %v1561_v20  ;;  %v1806_v27 = vrot.slane %v6767_v7, %v8408_v15 }
 0x25d   : > { %v2177_v16 = vrot.slane %v2176_v32, 1  ;;  %v6812_v56 = vrot.slane %v2733_v55, %v8362_v39  ;;  %v2544_v24 = vadd.f32 %v2543_v48, %v2542_v33  ;;  %4973 = vrcp.f32 %v1577_v62  ;;  %v8412_v62 = vld [vmem:[#allocation27_spill] sm:$0xff] }
 0x25e   : > { %vm2025_vm5 = vcmp.eq.f32.partialorder %v6738_v49, %v1942_v28  ;;  %vm2041_vm11 = vcmp.eq.f32.partialorder %v6742_v61, %v1942_v28  ;;  %vm2057_vm1 = vcmp.eq.f32.partialorder %v6748_v29, %v1942_v28  ;;  %vm2625_vm12 = vcmp.lt.f32.partialorder %v1942_v28, 0.3 }
 0x25f   : > { %8409 = vst [vmem:[#allocation11_spill] sm:$0xff] %v6812_v56  ;;  %v4966_v23 = vpop.eup %4965  ;;  %vm2178_vm0 = vcmp.lt.s32.totalorder %v2176_v32, %v2177_v16  ;;  %v2073_v57 = vsel %vm2025_vm5, %v8344_v3, 24  ;;  %v2089_v6 = vsel %vm2041_vm11, %v8345_v38, 24  ;;  %v2105_v47 = vsel %vm2057_vm1, %v8346_v44, 24 }
 0x260   : > { %v4968_v13 = vpop.eup %4967  ;;  %v2179_v37 = vsel %vm2178_vm0, %v2176_v32, %v2177_v16  ;;  %vm2193_vm14 = vcmp.lt.s32.totalorder %v2073_v57, %v2089_v6  ;;  %v2545_v48 = vrot.slane %v2544_v24, 1  ;;  %v2641_v34 = vsel %vm2625_vm12, 0.0, %v8390_v14 }
 0x261   : > { %v4970_v54 = vpop.eup %4969  ;;  %vm2839_vm15 = vcmp.eq.s32.totalorder %v8344_v3, %v2179_v37  ;;  %vm2855_vm7 = vcmp.eq.s32.totalorder %v8345_v38, %v2179_v37  ;;  %v2194_v49 = vsel %vm2193_vm14, %v2073_v57, %v2089_v6  ;;  %vm2689_vm9 = vcmp.ge.f32.partialorder %v1942_v28, 0.7 }
 0x262   : > { %vm4793_vm8 = vmpackc.low %vm2855_vm7, %vm2839_vm15  ;;  %vm2195_vm6 = vcmp.lt.s32.totalorder %v2194_v49, %v2105_v47  ;;  %v2546_v61 = vadd.f32 %v2545_v48, %v2544_v24  ;;  %vm2871_vm5 = vcmp.eq.s32.totalorder %v8346_v44, %v2179_v37  ;;  %v1655_v29 = vmul.f32 %v4966_v23, %v8364_v45 }
 0x263   : > { %vm6825_vm11 = vcmp.eq.s32.totalorder %v1806_v27, 1  ;;  %4794 = vmatpush1.bf16.msk.msra.mxu0 %vm4793_vm8, %v8388_v46  ;;  %v2196_v60 = vsel %vm2195_vm6, %v2194_v49, %v2105_v47  ;;  %v1671_v55 = vmul.f32 %v4968_v13, %v8397_v11  ;;  %v1687_v25 = vmul.f32 %v4970_v54, %v8398_v1 }
 0x264   : > { %4975 = vrcp.f32 %v1593_v12  ;;  %v2197_v20 = vrot.slane %v2196_v60, 4  ;;  %vm2657_vm1 = vcmp.gt.f32.partialorder %v2546_v61, 0.0  ;;  %4741 = vmatprep.subr.msk.mxu0 %vm2872_vm13, %v8389_v10  ;;  %v1718_v45 = vsel %vm1706_vm2, 0.0, %v1655_v29 }
 0x265   : > { %v6839_v32 = vadd.f32 1.0, %v8412_v62  ;;  %v2673_v27 = vsel %vm2657_vm1, 1.0, %v2641_v34  ;;  %v1734_v11 = vsel %vm1707_vm3, 0.0, %v1671_v55  ;;  %v1750_v1 = vsel %vm1708_vm4, 0.0, %v1687_v25 }
 0x266   : > { %v6847_v12 = vsel %vm6804_vm10, -1.0, %v1718_v45  ;;  %v4972_v16 = vpop.eup %4971  ;;  %vm2198_vm6 = vcmp.lt.s32.totalorder %v2196_v60, %v2197_v20  ;;  %v2705_v4 = vsel %vm2689_vm9, 1.0, %v2673_v27  ;;  %v6852_v24 = vsel %vm6804_vm10, -1.0, %v1734_v11 }
 0x267   : > { %v6856_v23 = vsel %vm6804_vm10, -1.0, %v1750_v1  ;;  %v4974_v13 = vpop.eup %4973  ;;  %v2199_v57 = vsel %vm2198_vm6, %v2196_v60, %v2197_v20  ;;  %v2734_v6 = vcombine.low %v2705_v4, %v6731_v43  ;;  %4742 = vmatpush1.msk.msra.mxu0 %vm2871_vm5, %v8389_v10  ;;  %v1959_v28 = vmax.f32 %v6847_v12, %v6852_v24  ;;  %v8416_v4 = vld [vmem:[#allocation57_spill] sm:$0xff] }
 0x268   : > { %vm2356_vm13 = vcmp.eq.f32.partialorder %v6847_v12, %v6249_v31  ;;  %v2200_v47 = vrot.slane %v2199_v57, 2  ;;  %vm8413_vm12 = vcmask 195584   ;;  %vm2372_vm10 = vcmp.eq.f32.partialorder %v6852_v24, %v6258_v59 }
 0x269   : > { %4743 = vmatmul.mubr.msk.f32.vlgmr.msra.gmra.mrb[2].mxu0 %vm8413_vm12, %v6531_v40  ;;  %vm2388_vm0 = vcmp.eq.f32.partialorder %v6856_v23, %v6290_v0  ;;  %v4636_v43 = vsel %vm2356_vm13, 1.0, %v8342_v51  ;;  %v6874_v36 = vrot.slane %v2734_v6, %v8362_v39  ;;  %v1960_v54 = vmax.f32 %v1959_v28, %v6856_v23 }
 0x26a   : > { %v4652_v37 = vsel %vm2372_vm10, 1.0, %v8342_v51  ;;  %v4668_v48 = vsel %vm2388_vm0, 1.0, %v8342_v51  ;;  %3332 = vmatprep.mubr.f32.mxu0 %v8342_v51  ;;  %vm2201_vm14 = vcmp.lt.s32.totalorder %v2199_v57, %v2200_v47  ;;  %vm2874_vm15 = vcmp.eq.s32.totalorder %v8346_v44, %v6772_v21 }
 0x26b   : > { %8414 = vst [vmem:[#allocation12_spill] sm:$0xff] %v6874_v36  ;;  %v2563_v34 = vadd.f32 %v4652_v37, %v4636_v43  ;;  %v1657_v49 = vmul.f32 %v4972_v16, %v8403_v30  ;;  %v1673_v61 = vmul.f32 %v4974_v13, %v8404_v5  ;;  %v2202_v29 = vsel %vm2201_vm14, %v2199_v57, %v2200_v47  ;;  %v8415_v16 = vld [vmem:[#allocation41_spill] sm:$0xff] }
 0x26c   : > { %v1961_v55 = vrot.slane %v1960_v54, 4  ;;  %v2203_v20 = vrot.slane %v2202_v29, 1  ;;  %v1063_v13 = vmin.f32 %v8416_v4, %v8415_v16 }
 0x26d   : > { %v2564_v45 = vadd.f32 %v4668_v48, %v2563_v34  ;;  %v1720_v62 = vsel %vm1706_vm2, 0.0, %v1657_v49  ;;  %v1736_v27 = vsel %vm1707_vm3, 0.0, %v1673_v61 }
 0x26e   : > { %v4976_v11 = vpop.eup %4975  ;;  %v1962_v1 = vmax.f32 %v1960_v54, %v1961_v55  ;;  %v6893_v30 = vsel %vm6825_vm11, -1.0, %v1720_v62  ;;  %v6897_v5 = vsel %vm6825_vm11, -1.0, %v1736_v27  ;;  %vm2204_vm7 = vcmp.lt.s32.totalorder %v2202_v29, %v2203_v20  ;;  %v8417_v55 = vld [vmem:[#allocation38_spill] sm:$0xff] }
 0x26f   : > { %v2565_v57 = vrot.slane %v2564_v45, 4  ;;  %v1689_v6 = vmul.f32 %v4976_v11, %v8407_v53  ;;  %v1975_v28 = vmax.f32 %v6893_v30, %v6897_v5  ;;  %v2205_v47 = vsel %vm2204_vm7, %v2202_v29, %v2203_v20  ;;  %v8418_v20 = vld [vmem:[#allocation65_spill] sm:$0xff] }
 0x270   : > { %v1963_v43 = vrot.slane %v1962_v1, 2  ;;  %vm2358_vm9 = vcmp.eq.f32.partialorder %v6893_v30, %v6249_v31  ;;  %vm2374_vm8 = vcmp.eq.f32.partialorder %v6897_v5, %v6258_v59  ;;  %vm2841_vm5 = vcmp.eq.s32.totalorder %v8344_v3, %v2205_v47  ;;  %v8419_v11 = vld [vmem:[#allocation33_spill] sm:$0xff] }
 0x271   : > { %vm2857_vm1 = vcmp.eq.s32.totalorder %v8345_v38, %v2205_v47  ;;  %vm2873_vm6 = vcmp.eq.s32.totalorder %v8346_v44, %v2205_v47  ;;  %v2566_v54 = vadd.f32 %v2565_v57, %v2564_v45  ;;  %v1752_v37 = vsel %vm1708_vm4, 0.0, %v1689_v6  ;;  %v8420_v6 = vld [vmem:[#allocation44_spill] sm:$0xff] }
 0x272   : > { %vm4797_vm13 = vmpackc.low %vm2857_vm1, %vm2841_vm5  ;;  %v1964_v53 = vmax.f32 %v1962_v1, %v1963_v43  ;;  %v4638_v48 = vsel %vm2358_vm9, 1.0, %v8342_v51  ;;  %v4654_v34 = vsel %vm2374_vm8, 1.0, %v8342_v51  ;;  %v6918_v61 = vsel %vm6825_vm11, -1.0, %v1752_v37  ;;  %v8421_v37 = vld [vmem:[#allocation35_spill] sm:$0xff] }
 0x273   : > { %4798 = vmatpush1.bf16.msk.msra.mxu1 %vm4797_vm13, %v8388_v46  ;;  %v2567_v49 = vrot.slane %v2566_v54, 2  ;;  %v2579_v29 = vadd.f32 %v4654_v34, %v4638_v48  ;;  %v1173_v45 = vmax.f32 %v8418_v20, %v8417_v55  ;;  %v1976_v27 = vmax.f32 %v1975_v28, %v6918_v61  ;;  %v8423_v28 = vld [vmem:[#allocation34_spill] sm:$0xff] }
 0x274   : > { %4748 = vmatprep.subr.msk.mxu1 %vm2874_vm15, %v8389_v10  ;;  %v1965_v62 = vrot.slane %v1964_v53, 1  ;;  %vm2390_vm12 = vcmp.eq.f32.partialorder %v6918_v61, %v6290_v0  ;;  %v1189_v33 = vmax.f32 %v8418_v20, %v8419_v11  ;;  %v1205_v43 = vmax.f32 %v8418_v20, %v8420_v6  ;;  %v8426_v20 = vld [vmem:[#allocation55_spill] sm:$0xff] }
 0x275   : > { %v2568_v1 = vadd.f32 %v2567_v49, %v2566_v54  ;;  %v4670_v57 = vsel %vm2390_vm12, 1.0, %v8342_v51  ;;  %v8422_v48 = vmin.f32 %v8416_v4, %v8421_v37  ;;  %v1977_v60 = vrot.slane %v1976_v27, 4 }
 0x276   : > { %v1966_v34 = vmax.f32 %v1964_v53, %v1965_v62  ;;  %v2580_v25 = vadd.f32 %v4670_v57, %v2579_v29  ;;  %v8424_v8 = vmin.f32 %v8416_v4, %v8423_v28  ;;  %v1253_v49 = vsub.f32 %v1063_v13, %v1205_v43 }
 0x277   : > { %v1221_v21 = vsub.f32 %v8422_v48, %v1173_v45  ;;  %4749 = vmatpush1.msk.msra.mxu1 %vm2873_vm6, %v8389_v10  ;;  %v2569_v54 = vrot.slane %v2568_v1, 1  ;;  %v1442_v36 = vrot.slane %v8426_v20, %v8425_v17  ;;  %vm8427_vm11 = vcmask 195584  }
 0x278   : > { %v1237_v15 = vsub.f32 %v8424_v8, %v1189_v33  ;;  %4750 = vmatmul.mubr.msk.f32.vlgmr.msra.gmra.mrb[2].mxu1 %vm8427_vm11, %v6531_v40  ;;  %vm2028_vm10 = vcmp.eq.f32.partialorder %v6847_v12, %v1966_v34  ;;  %vm2044_vm0 = vcmp.eq.f32.partialorder %v6852_v24, %v1966_v34  ;;  %vm2060_vm14 = vcmp.eq.f32.partialorder %v6856_v23, %v1966_v34 }
 0x279   : > { %v1269_v19 = vadd.f32 1.0, %v1221_v21  ;;  %vm2628_vm15 = vcmp.lt.f32.partialorder %v1966_v34, 0.3  ;;  %v2076_v8 = vsel %vm2028_vm10, %v8344_v3, 24  ;;  %v2092_v4 = vsel %vm2044_vm0, %v8345_v38, 24  ;;  %3403 = vmatprep.mubr.f32.mxu1 %v8342_v51 }
 0x27a   : > { %v2108_v13 = vsel %vm2060_vm14, %v8346_v44, 24  ;;  %v2570_v47 = vadd.f32 %v2569_v54, %v2568_v1  ;;  %vm2232_vm7 = vcmp.lt.s32.totalorder %v2076_v8, %v2092_v4  ;;  %v2644_v53 = vsel %vm2628_vm15, 0.0, %v8390_v14 }
 0x27b   : > { %vm2692_vm9 = vcmp.ge.f32.partialorder %v1966_v34, 0.7  ;;  %v1978_v40 = vmax.f32 %v1976_v27, %v1977_v60  ;;  %v2233_v12 = vsel %vm2232_vm7, %v2076_v8, %v2092_v4  ;;  %v2581_v24 = vrot.slane %v2580_v25, 4  ;;  %v8428_v34 = vld [vmem:[#allocation61_spill] sm:$0xff]  ;;  %v8430_v4 = vld [vmem:[#allocation64_spill] sm:$0xff] }
 0x27c   : > { %vm2660_vm8 = vcmp.gt.f32.partialorder %v2570_v47, 0.0  ;;  %v1285_v29 = vadd.f32 1.0, %v1237_v15  ;;  %vm2234_vm5 = vcmp.lt.s32.totalorder %v2233_v12, %v2108_v13  ;;  %v1301_v62 = vadd.f32 1.0, %v1253_v49 }
 0x27d   : > { %v2676_v23 = vsel %vm2660_vm8, 1.0, %v2644_v53  ;;  %v1979_v45 = vrot.slane %v1978_v40, 2  ;;  %v2235_v33 = vsel %vm2234_vm5, %v2233_v12, %v2108_v13  ;;  %v2582_v43 = vadd.f32 %v2581_v24, %v2580_v25 }
 0x27e   : > { %v6955_v57 = vsel %vm2692_vm9, 1.0, %v2676_v23  ;;  %v1317_v1 = vmax.f32 %v1269_v19, 0.0  ;;  %v2236_v48 = vrot.slane %v2235_v33, 4  ;;  %v1333_v54 = vmax.f32 %v1285_v29, 0.0 }
 0x27f   : > { %v1980_v21 = vmax.f32 %v1978_v40, %v1979_v45  ;;  %v1349_v56 = vmax.f32 %v1301_v62, 0.0  ;;  %v2583_v2 = vrot.slane %v2582_v43, 2  ;;  %v8429_v60 = vmax.f32 %v8428_v34, 0.0 }
 0x280   : > { %v1510_v15 = vadd.f32 %v6097_v26, %v1442_v36  ;;  %v1526_v8 = vadd.f32 %v6131_v9, %v1442_v36  ;;  %vm2237_vm1 = vcmp.lt.s32.totalorder %v2235_v33, %v2236_v48  ;;  %v8431_v13 = vmax.f32 %v8430_v4, 0.0 }
 0x281   : > { %v6959_v27 = vmul.f32 %v1317_v1, %v8429_v60  ;;  %v1981_v49 = vrot.slane %v1980_v21, 1  ;;  %v8432_v19 = vmax.f32 %v6839_v32, 0.0  ;;  %v2238_v53 = vsel %vm2237_vm1, %v2235_v33, %v2236_v48  ;;  %v6983_v33 = vld [vmem:[%s5430_s12 + $0x22] ss:$4 sm:$0xff] }
 0x282   : > { %v6965_v47 = vmul.f32 %v1333_v54, %v8431_v13  ;;  %v2584_v40 = vadd.f32 %v2583_v2, %v2582_v43  ;;  %v1542_v12 = vadd.f32 %v8361_v41, %v1442_v36  ;;  %v2239_v29 = vrot.slane %v2238_v53, 2  ;;  %v8436_v13 = vld [vmem:[#allocation24_spill] sm:$0xff] }
 0x283   : > { %v6969_v25 = vmul.f32 %v1349_v56, %v8432_v19  ;;  %v1558_v24 = vsub.f32 %v1510_v15, %v6959_v27  ;;  %v1982_v23 = vmax.f32 %v1980_v21, %v1981_v49  ;;  %v1794_v32 = vrot.slane %v6767_v7, %v8425_v17  ;;  %v8435_v49 = vld [vmem:[#allocation18_spill] sm:$0xff] }
 0x284   : > { %v1574_v45 = vsub.f32 %v1526_v8, %v6965_v47  ;;  %v2585_v62 = vrot.slane %v2584_v40, 1  ;;  %vm2240_vm6 = vcmp.lt.s32.totalorder %v2238_v53, %v2239_v29  ;;  %v546_v43 = vrot.slane %v6983_v33, %v8347_v18 }
 0x285   : > { %v1590_v1 = vsub.f32 %v1542_v12, %v6969_v25  ;;  %4977 = vrcp.f32 %v1558_v24  ;;  %vm2030_vm13 = vcmp.eq.f32.partialorder %v6893_v30, %v1982_v23  ;;  %vm2046_vm12 = vcmp.eq.f32.partialorder %v6897_v5, %v1982_v23  ;;  %v7001_v12 = vld [vmem:[%s5430_s12 + $0x20] ss:$4 sm:$0xff] }
 0x286   : > { %vm2062_vm11 = vcmp.eq.f32.partialorder %v6918_v61, %v1982_v23  ;;  %v2241_v2 = vsel %vm2240_vm6, %v2238_v53, %v2239_v29  ;;  %v2078_v56 = vsel %vm2030_vm13, %v8344_v3, 24  ;;  %v2094_v36 = vsel %vm2046_vm12, %v8345_v38, 24  ;;  %v8437_v53 = vld [vmem:[#allocation39_spill] sm:$0xff] }
 0x287   : > { %v2242_v48 = vrot.slane %v2241_v2, 1  ;;  %vm2258_vm10 = vcmp.lt.s32.totalorder %v2078_v56, %v2094_v36  ;;  %v2586_v21 = vadd.f32 %v2585_v62, %v2584_v40  ;;  %vm2630_vm0 = vcmp.lt.f32.partialorder %v1982_v23, 0.3  ;;  %v7016_v62 = vld [vmem:[%s5430_s12 + $0x21] ss:$4 sm:$0xff] }
 0x288   : > { %v2110_v30 = vsel %vm2062_vm11, %v8346_v44, 24  ;;  %v2259_v54 = vsel %vm2258_vm10, %v2078_v56, %v2094_v36  ;;  %v2646_v5 = vsel %vm2630_vm0, 0.0, %v8390_v14  ;;  %4979 = vrcp.f32 %v1574_v45  ;;  %v8440_v36 = vld [vmem:[#allocation23_spill] sm:$0xff] }
 0x289   : > { %vm2243_vm14 = vcmp.lt.s32.totalorder %v2241_v2, %v2242_v48  ;;  %vm2260_vm15 = vcmp.lt.s32.totalorder %v2259_v54, %v2110_v30  ;;  %vm2662_vm7 = vcmp.gt.f32.partialorder %v2586_v21, 0.0  ;;  %4981 = vrcp.f32 %v1590_v1 }
 0x28a   : > { %v6989_v61 = vsel %vm2243_vm14, %v2241_v2, %v2242_v48  ;;  %v2261_v34 = vsel %vm2260_vm15, %v2259_v54, %v2110_v30  ;;  %v2678_v60 = vsel %vm2662_vm7, 1.0, %v2646_v5  ;;  %vm2694_vm9 = vcmp.ge.f32.partialorder %v1982_v23, 0.7  ;;  %v7011_v23 = vld [vmem:[%s5430_s12 + $0x23] ss:$4 sm:$0xff] }
 0x28b   : > { %8433 = vst [vmem:[#allocation40_spill] sm:$0xff] %v6989_v61  ;;  %vm2844_vm8 = vcmp.eq.s32.totalorder %v8344_v3, %v6989_v61  ;;  %vm2860_vm5 = vcmp.eq.s32.totalorder %v8345_v38, %v6989_v61  ;;  %v2262_v15 = vrot.slane %v2261_v34, 4  ;;  %v6995_v8 = vsel %vm2694_vm9, 1.0, %v2678_v60  ;;  %v8441_v48 = vld [vmem:[#allocation29_spill] sm:$0xff] }
 0x28c   : > { %8434 = vst [vmem:[#allocation42_spill] sm:$0xff] %v6995_v8  ;;  %vm4799_vm1 = vmpackc.low %vm2860_vm5, %vm2844_vm8  ;;  %v605_v4 = vmin.f32 %v546_v43, %v8435_v49  ;;  %v621_v19 = vmin.f32 %v546_v43, %v8436_v13  ;;  %v637_v40 = vmin.f32 %v546_v43, %v8437_v53  ;;  %v688_v24 = vrot.slane %v7001_v12, %v8347_v18 }
 0x28d   : > { %4800 = vmatprep.subr.msk.bf16.mxu0 %vm4799_vm1, %v8388_v46  ;;  %vm2263_vm6 = vcmp.lt.s32.totalorder %v2261_v34, %v2262_v15  ;;  %vm7006_vm13 = vcmp.eq.s32.totalorder %v1794_v32, 1  ;;  %v974_v45 = vrot.slane %v7011_v23, %v8347_v18  ;;  %v1116_v1 = vrot.slane %v7016_v62, %v8347_v18  ;;  %v8442_v32 = vld [vmem:[#allocation43_spill] sm:$0xff] }
 0x28e   : > { %v2264_v56 = vsel %vm2263_vm6, %v2261_v34, %v2262_v15  ;;  %v747_v43 = vmax.f32 %v688_v24, %v8440_v36  ;;  %v763_v21 = vmax.f32 %v688_v24, %v8441_v48  ;;  %v779_v30 = vmax.f32 %v688_v24, %v8442_v32 }
 0x28f   : > { %v4978_v2 = vpop.eup %4977  ;;  %v2265_v54 = vrot.slane %v2264_v56, 2  ;;  %v1033_v60 = vmin.f32 %v974_v45, %v8421_v37  ;;  %v1450_v17 = vrot.slane %v8426_v20, %v8347_v18  ;;  %v1049_v39 = vmin.f32 %v974_v45, %v8423_v28 }
 0x290   : > { %v1654_v5 = vmul.f32 %v4978_v2, %v6959_v27  ;;  %v795_v58 = vsub.f32 %v605_v4, %v747_v43  ;;  %v811_v22 = vsub.f32 %v621_v19, %v763_v21  ;;  %v827_v8 = vsub.f32 %v637_v40, %v779_v30 }
 0x291   : > { %vm2266_vm12 = vcmp.lt.s32.totalorder %v2264_v56, %v2265_v54  ;;  %v1065_v15 = vmin.f32 %v974_v45, %v8415_v16  ;;  %v1175_v24 = vmax.f32 %v1116_v1, %v8417_v55  ;;  %v1191_v21 = vmax.f32 %v1116_v1, %v8419_v11 }
 0x292   : > { %v1717_v34 = vsel %vm1706_vm2, 0.0, %v1654_v5  ;;  %v4980_v10 = vpop.eup %4979  ;;  %v2267_v27 = vsel %vm2266_vm12, %v2264_v56, %v2265_v54  ;;  %v843_v50 = vadd.f32 1.0, %v795_v58  ;;  %v859_v4 = vadd.f32 1.0, %v811_v22 }
 0x293   : > { %v7034_v2 = vsel %vm7006_vm13, -1.0, %v1717_v34  ;;  %v4982_v19 = vpop.eup %4981  ;;  %v2268_v40 = vrot.slane %v2267_v27, 1  ;;  %v1670_v43 = vmul.f32 %v4980_v10, %v6965_v47  ;;  %v875_v56 = vadd.f32 1.0, %v827_v8 }
 0x294   : > { %vm2355_vm11 = vcmp.eq.f32.partialorder %v7034_v2, %v6249_v31  ;;  %v1686_v45 = vmul.f32 %v4982_v19, %v6969_v25  ;;  %v891_v54 = vmax.f32 %v843_v50, 0.0  ;;  %v907_v22 = vmax.f32 %v859_v4, 0.0 }
 0x295   : > { %v4635_v30 = vsel %vm2355_vm11, 1.0, %v8342_v51  ;;  %vm2269_vm10 = vcmp.lt.s32.totalorder %v2267_v27, %v2268_v40  ;;  %v1733_v58 = vsel %vm1707_vm3, 0.0, %v1670_v43  ;;  %v1207_v5 = vmax.f32 %v1116_v1, %v8420_v6 }
 0x296   : > { %v7045_v34 = vsel %vm2269_vm10, %v2267_v27, %v2268_v40  ;;  %v1749_v10 = vsel %vm1708_vm4, 0.0, %v1686_v45  ;;  %v7051_v47 = vsel %vm7006_vm13, -1.0, %v1733_v58  ;;  %v1223_v25 = vsub.f32 %v1033_v60, %v1175_v24 }
 0x297   : > { %8443 = vst [vmem:[#allocation47_spill] sm:$0xff] %v7045_v34  ;;  %vm2846_vm0 = vcmp.eq.s32.totalorder %v8344_v3, %v7045_v34  ;;  %vm2862_vm14 = vcmp.eq.s32.totalorder %v8345_v38, %v7045_v34  ;;  %v7059_v50 = vsel %vm7006_vm13, -1.0, %v1749_v10  ;;  %v1951_v8 = vmax.f32 %v7034_v2, %v7051_v47 }
 0x298   : > { %vm4803_vm15 = vmpackc.low %vm2862_vm14, %vm2846_vm0  ;;  %vm2371_vm7 = vcmp.eq.f32.partialorder %v7051_v47, %v6258_v59  ;;  %vm2387_vm9 = vcmp.eq.f32.partialorder %v7059_v50, %v6290_v0  ;;  %v1239_v1 = vsub.f32 %v1049_v39, %v1191_v21  ;;  %v1255_v60 = vsub.f32 %v1065_v15, %v1207_v5 }
 0x299   : > { %4804 = vmatprep.subr.msk.bf16.mxu1 %vm4803_vm15, %v8388_v46  ;;  %v1952_v24 = vmax.f32 %v1951_v8, %v7059_v50  ;;  %v4651_v29 = vsel %vm2371_vm7, 1.0, %v8342_v51  ;;  %v923_v27 = vmax.f32 %v875_v56, 0.0  ;;  %v1271_v4 = vadd.f32 1.0, %v1223_v25 }
 0x29a   : > { %v4667_v19 = vsel %vm2387_vm9, 1.0, %v8342_v51  ;;  %v2555_v40 = vadd.f32 %v4651_v29, %v4635_v30  ;;  %v1287_v43 = vadd.f32 1.0, %v1239_v1  ;;  %v1303_v45 = vadd.f32 1.0, %v1255_v60 }
 0x29b   : > { %v1953_v58 = vrot.slane %v1952_v24, 4  ;;  %v1319_v10 = vmax.f32 %v1271_v4, 0.0  ;;  %v1512_v34 = vadd.f32 %v6097_v26, %v1450_v17  ;;  %v1528_v39 = vadd.f32 %v6131_v9, %v1450_v17 }
 0x29c   : > { %v2556_v15 = vadd.f32 %v4667_v19, %v2555_v40  ;;  %v1335_v21 = vmax.f32 %v1287_v43, 0.0  ;;  %v1351_v5 = vmax.f32 %v1303_v45, 0.0  ;;  %v1544_v8 = vadd.f32 %v8361_v41, %v1450_v17 }
 0x29d   : > { %v1954_v46 = vmax.f32 %v1952_v24, %v1953_v58  ;;  %v1367_v61 = vmul.f32 %v1319_v10, %v891_v54  ;;  %v1802_v30 = vrot.slane %v6767_v7, %v8347_v18  ;;  %v558_v29 = vrot.slane %v6983_v33, %v8351_v35 }
 0x29e   : > { %v2557_v56 = vrot.slane %v2556_v15, 4  ;;  %v7074_v25 = vmul.f32 %v1335_v21, %v907_v22  ;;  %v7076_v51 = vmul.f32 %v1351_v5, %v923_v27  ;;  %v700_v4 = vrot.slane %v7001_v12, %v8351_v35 }
 0x29f   : > { %v1955_v1 = vrot.slane %v1954_v46, 2  ;;  %v1560_v60 = vsub.f32 %v1512_v34, %v1367_v61  ;;  %v7088_v22 = vrot.slane %v7011_v23, %v8351_v35  ;;  %v608_v27 = vmin.f32 %v558_v29, %v8435_v49 }
 0x2a0   : > { %v2558_v19 = vadd.f32 %v2557_v56, %v2556_v15  ;;  %v1576_v17 = vsub.f32 %v1528_v39, %v7074_v25  ;;  %v1592_v54 = vsub.f32 %v1544_v8, %v7076_v51  ;;  %v624_v34 = vmin.f32 %v558_v29, %v8436_v13 }
 0x2a1   : > { %v1956_v24 = vmax.f32 %v1954_v46, %v1955_v1  ;;  %4983 = vrcp.f32 %v1560_v60  ;;  %v640_v43 = vmin.f32 %v558_v29, %v8437_v53  ;;  %v750_v45 = vmax.f32 %v700_v4, %v8440_v36 }
 0x2a2   : > { %v2559_v40 = vrot.slane %v2558_v19, 2  ;;  %4985 = vrcp.f32 %v1576_v17  ;;  %v766_v10 = vmax.f32 %v700_v4, %v8441_v48  ;;  %v782_v39 = vmax.f32 %v700_v4, %v8442_v32 }
 0x2a3   : > { %v1957_v58 = vrot.slane %v1956_v24, 1  ;;  %4987 = vrcp.f32 %v1592_v54  ;;  %vm7096_vm8 = vcmp.eq.s32.totalorder %v1802_v30, 1  ;;  %v798_v21 = vsub.f32 %v608_v27, %v750_v45 }
 0x2a4   : > { %v2560_v15 = vadd.f32 %v2559_v40, %v2558_v19  ;;  %v1036_v5 = vmin.f32 %v7088_v22, %v8421_v37  ;;  %v814_v56 = vsub.f32 %v624_v34, %v766_v10  ;;  %v830_v1 = vsub.f32 %v640_v43, %v782_v39 }
 0x2a5   : > { %v1958_v8 = vmax.f32 %v1956_v24, %v1957_v58  ;;  %v1052_v60 = vmin.f32 %v7088_v22, %v8423_v28  ;;  %v7104_v17 = vadd.f32 1.0, %v798_v21  ;;  %v1068_v4 = vmin.f32 %v7088_v22, %v8415_v16 }
 0x2a6   : > { %v2561_v29 = vrot.slane %v2560_v15, 1  ;;  %v1128_v30 = vrot.slane %v7016_v62, %v8351_v35  ;;  %v7117_v27 = vrot.slane %v8426_v20, %v8351_v35 }
 0x2a7   : > { %vm2027_vm5 = vcmp.eq.f32.partialorder %v7034_v2, %v1958_v8  ;;  %vm2043_vm1 = vcmp.eq.f32.partialorder %v7051_v47, %v1958_v8  ;;  %vm2059_vm6 = vcmp.eq.f32.partialorder %v7059_v50, %v1958_v8  ;;  %vm2627_vm13 = vcmp.lt.f32.partialorder %v1958_v8, 0.3 }
 0x2a8   : > { %v2075_v19 = vsel %vm2027_vm5, %v8344_v3, 24  ;;  %v2091_v54 = vsel %vm2043_vm1, %v8345_v38, 24  ;;  %v2562_v24 = vadd.f32 %v2561_v29, %v2560_v15  ;;  %v2107_v22 = vsel %vm2059_vm6, %v8346_v44, 24 }
 0x2a9   : > { %vm2219_vm12 = vcmp.lt.s32.totalorder %v2075_v19, %v2091_v54  ;;  %v2643_v34 = vsel %vm2627_vm13, 0.0, %v8390_v14  ;;  %v7121_v2 = vadd.f32 1.0, %v814_v56  ;;  %vm2691_vm10 = vcmp.ge.f32.partialorder %v1958_v8, 0.7 }
 0x2aa   : > { %v2220_v47 = vsel %vm2219_vm12, %v2075_v19, %v2091_v54  ;;  %vm2659_vm11 = vcmp.gt.f32.partialorder %v2562_v24, 0.0  ;;  %v7123_v50 = vadd.f32 1.0, %v830_v1  ;;  %v894_v45 = vmax.f32 %v7104_v17, 0.0 }
 0x2ab   : > { %v4984_v40 = vpop.eup %4983  ;;  %vm2221_vm0 = vcmp.lt.s32.totalorder %v2220_v47, %v2107_v22  ;;  %v2675_v43 = vsel %vm2659_vm11, 1.0, %v2643_v34  ;;  %v1178_v58 = vmax.f32 %v1128_v30, %v8417_v55  ;;  %v910_v56 = vmax.f32 %v7121_v2, 0.0 }
 0x2ac   : > { %v4986_v10 = vpop.eup %4985  ;;  %v2222_v39 = vsel %vm2221_vm0, %v2220_v47, %v2107_v22  ;;  %v7127_v15 = vsel %vm2691_vm10, 1.0, %v2675_v43  ;;  %v1656_v21 = vmul.f32 %v4984_v40, %v1367_v61  ;;  %v926_v54 = vmax.f32 %v7123_v50, 0.0 }
 0x2ad   : > { %v4988_v29 = vpop.eup %4987  ;;  %v2223_v19 = vrot.slane %v2222_v39, 4  ;;  %v1672_v1 = vmul.f32 %v4986_v10, %v7074_v25  ;;  %v1194_v22 = vmax.f32 %v1128_v30, %v8419_v11  ;;  %v1210_v61 = vmax.f32 %v1128_v30, %v8420_v6 }
 0x2ae   : > { %v1688_v17 = vmul.f32 %v4988_v29, %v7076_v51  ;;  %v1719_v24 = vsel %vm1706_vm2, 0.0, %v1656_v21  ;;  %v1226_v25 = vsub.f32 %v1036_v5, %v1178_v58  ;;  %v8446_v5 = vmov 0.0  }
 0x2af   : > { %vm2224_vm14 = vcmp.lt.s32.totalorder %v2222_v39, %v2223_v19  ;;  %v1735_v34 = vsel %vm1707_vm3, 0.0, %v1672_v1  ;;  %v7143_v2 = vsel %vm7096_vm8, -1.0, %v1719_v24  ;;  %v1258_v1 = vsub.f32 %v1068_v4, %v1210_v61 }
 0x2b0   : > { %v2225_v47 = vsel %vm2224_vm14, %v2222_v39, %v2223_v19  ;;  %v1751_v51 = vsel %vm1708_vm4, 0.0, %v1688_v17  ;;  %v7149_v50 = vsel %vm7096_vm8, -1.0, %v1735_v34  ;;  %vm2357_vm15 = vcmp.eq.f32.partialorder %v7143_v2, %v6249_v31 }
 0x2b1   : > { %v2226_v30 = vrot.slane %v2225_v47, 2  ;;  %v7155_v40 = vsel %vm7096_vm8, -1.0, %v1751_v51  ;;  %v1967_v43 = vmax.f32 %v7143_v2, %v7149_v50  ;;  %vm2373_vm7 = vcmp.eq.f32.partialorder %v7149_v50, %v6258_v59 }
 0x2b2   : > { %vm2389_vm9 = vcmp.eq.f32.partialorder %v7155_v40, %v6290_v0  ;;  %v4637_v58 = vsel %vm2357_vm15, 1.0, %v8446_v5  ;;  %v4653_v10 = vsel %vm2373_vm7, 1.0, %v8446_v5  ;;  %v1242_v39 = vsub.f32 %v1052_v60, %v1194_v22 }
 0x2b3   : > { %vm2227_vm5 = vcmp.lt.s32.totalorder %v2225_v47, %v2226_v30  ;;  %v1968_v21 = vmax.f32 %v1967_v43, %v7155_v40  ;;  %v4669_v46 = vsel %vm2389_vm9, 1.0, %v8446_v5  ;;  %v2571_v29 = vadd.f32 %v4653_v10, %v4637_v58 }
 0x2b4   : > { %v2228_v19 = vsel %vm2227_vm5, %v2225_v47, %v2226_v30  ;;  %v1274_v17 = vadd.f32 1.0, %v1226_v25  ;;  %v1290_v24 = vadd.f32 1.0, %v1242_v39  ;;  %v1515_v18 = vadd.f32 %v6097_v26, %v7117_v27  ;;  %v8447_v39 = vld [vmem:[#allocation40_spill] sm:$0xff] }
 0x2b5   : > { %v2229_v34 = vrot.slane %v2228_v19, 1  ;;  %v1969_v51 = vrot.slane %v1968_v21, 4  ;;  %v2572_v8 = vadd.f32 %v4669_v46, %v2571_v29  ;;  %v1306_v20 = vadd.f32 1.0, %v1258_v1  ;;  %v8449_v46 = vld [vmem:[#allocation22_spill] sm:$0xff] }
 0x2b6   : > { %v1322_v6 = vmax.f32 %v1274_v17, 0.0  ;;  %v1338_v11 = vmax.f32 %v1290_v24, 0.0  ;;  %v1531_v60 = vadd.f32 %v6131_v9, %v7117_v27  ;;  %v1547_v4 = vadd.f32 %v8361_v41, %v7117_v27  ;;  %v8451_v24 = vld [vmem:[#allocation48_spill] sm:$0xff] }
 0x2b7   : > { %vm2230_vm8 = vcmp.lt.s32.totalorder %v2228_v19, %v2229_v34  ;;  %v1970_v22 = vmax.f32 %v1968_v21, %v1969_v51  ;;  %v2573_v43 = vrot.slane %v2572_v8, 4  ;;  %v1354_v25 = vmax.f32 %v1306_v20, 0.0 }
 0x2b8   : > { %v2231_v61 = vsel %vm2230_vm8, %v2228_v19, %v2229_v34  ;;  %v7173_v47 = vmul.f32 %v1322_v6, %v894_v45  ;;  %v7175_v30 = vmul.f32 %v1338_v11, %v910_v56  ;;  %vm2876_vm12 = vcmp.eq.s32.totalorder %v8346_v44, %v8447_v39 }
 0x2b9   : > { %vm2843_vm1 = vcmp.eq.s32.totalorder %v8344_v3, %v2231_v61  ;;  %vm2859_vm6 = vcmp.eq.s32.totalorder %v8345_v38, %v2231_v61  ;;  %v1971_v58 = vrot.slane %v1970_v22, 2  ;;  %v2574_v10 = vadd.f32 %v2573_v43, %v2572_v8 }
 0x2ba   : > { %vm4801_vm13 = vmpackc.low %vm2859_vm6, %vm2843_vm1  ;;  %v7181_v21 = vmul.f32 %v1354_v25, %v926_v54  ;;  %v1563_v27 = vsub.f32 %v1515_v18, %v7173_v47  ;;  %v1579_v20 = vsub.f32 %v1531_v60, %v7175_v30  ;;  %v8448_v6 = vmov 1.0|1.0  }
 0x2bb   : > { %4802 = vmatpush1.bf16.msk.msra.mxu0 %vm4801_vm13, %v8448_v6  ;;  %v1972_v11 = vmax.f32 %v1970_v22, %v1971_v58  ;;  %v2575_v45 = vrot.slane %v2574_v10, 2  ;;  %v1814_v56 = vrot.slane %v6767_v7, %v8351_v35  ;;  %v566_v8 = vrot.slane %v6983_v33, %v8449_v46 }
 0x2bc   : > { %v8450_v29 = vmov 1.0   ;;  %v1595_v19 = vsub.f32 %v1547_v4, %v7181_v21  ;;  %4989 = vrcp.f32 %v1563_v27  ;;  %v708_v18 = vrot.slane %v7001_v12, %v8449_v46  ;;  %v8460_v4 = vld [vmem:[#allocation33_spill] sm:$0xff] }
 0x2bd   : > { %4755 = vmatprep.subr.msk.mxu0 %vm2876_vm12, %v8450_v29  ;;  %v7196_v54 = vrot.slane %v7011_v23, %v8449_v46  ;;  %v1973_v1 = vrot.slane %v1972_v11, 1  ;;  %v2576_v17 = vadd.f32 %v2575_v45, %v2574_v10  ;;  %4991 = vrcp.f32 %v1579_v20 }
 0x2be   : > { %v8452_v34 = vcombine.low %v7127_v15, %v6955_v57  ;;  %vm2875_vm11 = vcmp.eq.s32.totalorder %v8346_v44, %v2231_v61  ;;  %4993 = vrcp.f32 %v1595_v19  ;;  %v610_v60 = vmin.f32 %v566_v8, %v8435_v49  ;;  %v7214_v57 = vld [vmem:[%s6499_s21] sm:$0xf] }
 0x2bf   : > { %v1974_v22 = vmax.f32 %v1972_v11, %v1973_v1  ;;  %v2577_v43 = vrot.slane %v2576_v17, 1  ;;  %4756 = vmatpush1.msk.msra.mxu0 %vm2875_vm11, %v8450_v29  ;;  %vm7207_vm10 = vcmp.eq.s32.totalorder %v1814_v56, 1  ;;  %v626_v25 = vmin.f32 %v566_v8, %v8436_v13 }
 0x2c0   : > { %v7202_v51 = vrot.slane %v8452_v34, %v8451_v24  ;;  %v642_v58 = vmin.f32 %v566_v8, %v8437_v53  ;;  %vm8456_vm0 = vcmask 195584   ;;  %v752_v15 = vmax.f32 %v708_v18, %v8440_v36 }
 0x2c1   : > { %4757 = vmatmul.mubr.msk.f32.vlgmr.msra.gmra.mrb[4].mxu0 %vm8456_vm0, %v7214_v57  ;;  %v768_v61 = vmax.f32 %v708_v18, %v8441_v48  ;;  %v784_v10 = vmax.f32 %v708_v18, %v8442_v32  ;;  %vm2029_vm14 = vcmp.eq.f32.partialorder %v7143_v2, %v1974_v22  ;;  %vm2045_vm15 = vcmp.eq.f32.partialorder %v7149_v50, %v1974_v22 }
 0x2c2   : > { %8453 = vst [vmem:[#allocation9_spill] sm:$0xff] %v7202_v51  ;;  %vm2061_vm7 = vcmp.eq.f32.partialorder %v7155_v40, %v1974_v22  ;;  %v2578_v27 = vadd.f32 %v2577_v43, %v2576_v17  ;;  %3474 = vmatprep.mubr.f32.mxu0 %v8446_v5  ;;  %v2077_v20 = vsel %vm2029_vm14, %v8344_v3, 24  ;;  %v2093_v11 = vsel %vm2045_vm15, %v8345_v38, 24  ;;  %v8457_v43 = vld [vmem:[#allocation42_spill] sm:$0xff] }
 0x2c3   : > { %v2109_v45 = vsel %vm2061_vm7, %v8346_v44, 24  ;;  %vm2629_vm9 = vcmp.lt.f32.partialorder %v1974_v22, 0.3  ;;  %vm2245_vm5 = vcmp.lt.s32.totalorder %v2077_v20, %v2093_v11  ;;  %vm2693_vm1 = vcmp.ge.f32.partialorder %v1974_v22, 0.7 }
 0x2c4   : > { %v2645_v56 = vsel %vm2629_vm9, 0.0, %v8390_v14  ;;  %vm2661_vm8 = vcmp.gt.f32.partialorder %v2578_v27, 0.0  ;;  %v2246_v2 = vsel %vm2245_vm5, %v2077_v20, %v2093_v11  ;;  %v800_v50 = vsub.f32 %v610_v60, %v752_v15 }
 0x2c5   : > { %v2677_v8 = vsel %vm2661_vm8, 1.0, %v2645_v56  ;;  %v816_v19 = vsub.f32 %v626_v25, %v768_v61  ;;  %vm2247_vm6 = vcmp.lt.s32.totalorder %v2246_v2, %v2109_v45  ;;  %v832_v18 = vsub.f32 %v642_v58, %v784_v10 }
 0x2c6   : > { %v2709_v40 = vsel %vm2693_vm1, 1.0, %v2677_v8  ;;  %v1136_v1 = vrot.slane %v7016_v62, %v8449_v46  ;;  %v4990_v17 = vpop.eup %4989  ;;  %v2248_v34 = vsel %vm2247_vm6, %v2246_v2, %v2109_v45  ;;  %v7234_v35 = vadd.f32 1.0, %v800_v50 }
 0x2c7   : > { %v2781_v39 = vcombine.low %v2709_v40, %v8457_v43  ;;  %v1054_v27 = vmin.f32 %v7196_v54, %v8423_v28  ;;  %v4992_v22 = vpop.eup %4991  ;;  %v2249_v20 = vrot.slane %v2248_v34, 4  ;;  %v1659_v60 = vmul.f32 %v4990_v17, %v7173_v47 }
 0x2c8   : > { %v7239_v25 = vadd.f32 1.0, %v816_v19  ;;  %v1070_v58 = vmin.f32 %v7196_v54, %v8415_v16  ;;  %v4994_v15 = vpop.eup %4993  ;;  %v1675_v10 = vmul.f32 %v4992_v22, %v7175_v30  ;;  %v7247_v11 = vadd.f32 1.0, %v832_v18 }
 0x2c9   : > { %v7244_v61 = vrot.slane %v2781_v39, %v8451_v24  ;;  %v1180_v45 = vmax.f32 %v1136_v1, %v8417_v55  ;;  %vm2250_vm13 = vcmp.lt.s32.totalorder %v2248_v34, %v2249_v20  ;;  %v1691_v56 = vmul.f32 %v4994_v15, %v7181_v21 }
 0x2ca   : > { %v1722_v47 = vsel %vm1706_vm2, 0.0, %v1659_v60  ;;  %v896_v2 = vmax.f32 %v7234_v35, 0.0  ;;  %v2251_v8 = vsel %vm2250_vm13, %v2248_v34, %v2249_v20  ;;  %v1738_v39 = vsel %vm1707_vm3, 0.0, %v1675_v10  ;;  %v8459_v34 = vld [vmem:[#allocation47_spill] sm:$0xff] }
 0x2cb   : > { %8458 = vst [vmem:[#allocation66_spill] sm:$0xff] %v7244_v61  ;;  %v7260_v30 = vsel %vm7207_vm10, -1.0, %v1722_v47  ;;  %v2252_v19 = vrot.slane %v2251_v8, 2  ;;  %v1754_v21 = vsel %vm1708_vm4, 0.0, %v1691_v56  ;;  %v7266_v40 = vsel %vm7207_vm10, -1.0, %v1738_v39  ;;  %v8461_v47 = vld [vmem:[#allocation44_spill] sm:$0xff] }
 0x2cc   : > { %vm2360_vm12 = vcmp.eq.f32.partialorder %v7260_v30, %v6249_v31  ;;  %v7272_v35 = vsel %vm7207_vm10, -1.0, %v1754_v21  ;;  %v1991_v18 = vmax.f32 %v7260_v30, %v7266_v40  ;;  %vm2376_vm11 = vcmp.eq.f32.partialorder %v7266_v40, %v6258_v59 }
 0x2cd   : > { %v4640_v17 = vsel %vm2360_vm12, 1.0, %v8446_v5  ;;  %vm2253_vm0 = vcmp.lt.s32.totalorder %v2251_v8, %v2252_v19  ;;  %vm2878_vm14 = vcmp.eq.s32.totalorder %v8346_v44, %v8459_v34  ;;  %vm2392_vm15 = vcmp.eq.f32.partialorder %v7272_v35, %v6290_v0 }
 0x2ce   : > { %v4656_v43 = vsel %vm2376_vm11, 1.0, %v8446_v5  ;;  %v1196_v22 = vmax.f32 %v1136_v1, %v8460_v4  ;;  %v2254_v20 = vsel %vm2253_vm0, %v2251_v8, %v2252_v19  ;;  %v1992_v60 = vmax.f32 %v1991_v18, %v7272_v35 }
 0x2cf   : > { %v4672_v15 = vsel %vm2392_vm15, 1.0, %v8446_v5  ;;  %v2595_v10 = vadd.f32 %v4656_v43, %v4640_v17  ;;  %v2255_v56 = vrot.slane %v2254_v20, 1  ;;  %v1212_v39 = vmax.f32 %v1136_v1, %v8461_v47 }
 0x2d0   : > { %v8462_v21 = vmin.f32 %v7196_v54, %v8421_v37  ;;  %v1244_v61 = vsub.f32 %v1054_v27, %v1196_v22  ;;  %v1993_v51 = vrot.slane %v1992_v60, 4  ;;  %v912_v0 = vmax.f32 %v7239_v25, 0.0 }
 0x2d1   : > { %v2596_v24 = vadd.f32 %v4672_v15, %v2595_v10  ;;  %v1470_v8 = vrot.slane %v8463_v42, %v8449_v46  ;;  %vm2256_vm10 = vcmp.lt.s32.totalorder %v2254_v20, %v2255_v56  ;;  %v1260_v19 = vsub.f32 %v1070_v58, %v1212_v39 }
 0x2d2   : > { %v1228_v50 = vsub.f32 %v8462_v21, %v1180_v45  ;;  %v1292_v59 = vadd.f32 1.0, %v1244_v61  ;;  %v2257_v17 = vsel %vm2256_vm10, %v2254_v20, %v2255_v56  ;;  %v1994_v43 = vmax.f32 %v1992_v60, %v1993_v51  ;;  %v8464_v60 = vld [vmem:[#allocation37_spill] sm:$0xff] }
 0x2d3   : > { %v2597_v31 = vrot.slane %v2596_v24, 4  ;;  %v928_v1 = vmax.f32 %v7247_v11, 0.0  ;;  %vm2845_vm7 = vcmp.eq.s32.totalorder %v8344_v3, %v2257_v17  ;;  %vm2861_vm9 = vcmp.eq.s32.totalorder %v8345_v38, %v2257_v17 }
 0x2d4   : > { %v1276_v18 = vadd.f32 1.0, %v1228_v50  ;;  %v1308_v54 = vadd.f32 1.0, %v1260_v19  ;;  %v1517_v27 = vadd.f32 %v6097_v26, %v1470_v8  ;;  %vm4805_vm5 = vmpackc.low %vm2861_vm9, %vm2845_vm7  ;;  %v1995_v25 = vrot.slane %v1994_v43, 2 }
 0x2d5   : > { %v2598_v45 = vadd.f32 %v2597_v31, %v2596_v24  ;;  %v1340_v15 = vmax.f32 %v1292_v59, 0.0  ;;  %4806 = vmatpush1.bf16.msk.msra.mxu1 %vm4805_vm5, %v8448_v6  ;;  %v1533_v51 = vadd.f32 %v6131_v9, %v1470_v8  ;;  %v1549_v61 = vadd.f32 %v8361_v41, %v1470_v8 }
 0x2d6   : > { %v1324_v22 = vmax.f32 %v1276_v18, 0.0  ;;  %v1356_v58 = vmax.f32 %v1308_v54, 0.0  ;;  %v1822_v11 = vrot.slane %v6767_v7, %v8449_v46  ;;  %4762 = vmatprep.subr.msk.mxu1 %vm2878_vm14, %v8450_v29  ;;  %v1996_v50 = vmax.f32 %v1994_v43, %v1995_v25 }
 0x2d7   : > { %v2599_v20 = vrot.slane %v2598_v45, 2  ;;  %v7309_v59 = vmul.f32 %v1340_v15, %v912_v0  ;;  %vm2877_vm8 = vcmp.eq.s32.totalorder %v8346_v44, %v2257_v17  ;;  %v554_v10 = vrot.slane %v6983_v33, %v8464_v60 }
 0x2d8   : > { %v7307_v31 = vmul.f32 %v1324_v22, %v896_v2  ;;  %v7312_v24 = vmul.f32 %v1356_v58, %v928_v1  ;;  %v696_v56 = vrot.slane %v7001_v12, %v8464_v60  ;;  %v1997_v39 = vrot.slane %v1996_v50, 1 }
 0x2d9   : > { %v2600_v21 = vadd.f32 %v2599_v20, %v2598_v45  ;;  %v1581_v8 = vsub.f32 %v1533_v51, %v7309_v59  ;;  %4763 = vmatpush1.msk.msra.mxu1 %vm2877_vm8, %v8450_v29  ;;  %v607_v2 = vmin.f32 %v554_v10, %v8435_v49  ;;  %v623_v19 = vmin.f32 %v554_v10, %v8436_v13 }
 0x2da   : > { %v1565_v34 = vsub.f32 %v1517_v27, %v7307_v31  ;;  %v1597_v0 = vsub.f32 %v1549_v61, %v7312_v24  ;;  %v982_v18 = vrot.slane %v7011_v23, %v8464_v60  ;;  %vm8465_vm1 = vcmask 195584  }
 0x2db   : > { %4764 = vmatmul.mubr.msk.f32.vlgmr.msra.gmra.mrb[4].mxu1 %vm8465_vm1, %v7214_v57  ;;  %v1998_v17 = vmax.f32 %v1996_v50, %v1997_v39  ;;  %v2601_v43 = vrot.slane %v2600_v21, 1  ;;  %v639_v1 = vmin.f32 %v554_v10, %v8437_v53  ;;  %v749_v54 = vmax.f32 %v696_v56, %v8440_v36 }
 0x2dc   : > { %4995 = vrcp.f32 %v1565_v34  ;;  %v765_v27 = vmax.f32 %v696_v56, %v8441_v48  ;;  %v781_v25 = vmax.f32 %v696_v56, %v8442_v32  ;;  %3545 = vmatprep.mubr.f32.mxu1 %v8446_v5  ;;  %vm7339_vm0 = vcmp.eq.s32.totalorder %v1822_v11, 1 }
 0x2dd   : > { %4997 = vrcp.f32 %v1581_v8  ;;  %vm2032_vm6 = vcmp.eq.f32.partialorder %v7260_v30, %v1998_v17  ;;  %vm2048_vm13 = vcmp.eq.f32.partialorder %v7266_v40, %v1998_v17  ;;  %vm2064_vm12 = vcmp.eq.f32.partialorder %v7272_v35, %v1998_v17 }
 0x2de   : > { %v2602_v45 = vadd.f32 %v2601_v43, %v2600_v21  ;;  %v2080_v22 = vsel %vm2032_vm6, %v8344_v3, 24  ;;  %v2096_v15 = vsel %vm2048_vm13, %v8345_v38, 24  ;;  %v2112_v58 = vsel %vm2064_vm12, %v8346_v44, 24 }
 0x2df   : > { %vm2632_vm11 = vcmp.lt.f32.partialorder %v1998_v17, 0.3  ;;  %vm2284_vm14 = vcmp.lt.s32.totalorder %v2080_v22, %v2096_v15  ;;  %vm2696_vm10 = vcmp.ge.f32.partialorder %v1998_v17, 0.7  ;;  %4999 = vrcp.f32 %v1597_v0 }
 0x2e0   : > { %v2648_v61 = vsel %vm2632_vm11, 0.0, %v8390_v14  ;;  %vm2664_vm15 = vcmp.gt.f32.partialorder %v2602_v45, 0.0  ;;  %v2285_v30 = vsel %vm2284_vm14, %v2080_v22, %v2096_v15  ;;  %v797_v35 = vsub.f32 %v607_v2, %v749_v54 }
 0x2e1   : > { %v2680_v40 = vsel %vm2664_vm15, 1.0, %v2648_v61  ;;  %vm2286_vm7 = vcmp.lt.s32.totalorder %v2285_v30, %v2112_v58  ;;  %v813_v20 = vsub.f32 %v623_v19, %v765_v27  ;;  %v829_v10 = vsub.f32 %v639_v1, %v781_v25  ;;  %v8468_v19 = vld [vmem:[#allocation10_spill] sm:$0xff] }
 0x2e2   : > { %v7344_v50 = vsel %vm2696_vm10, 1.0, %v2680_v40  ;;  %v2287_v56 = vsel %vm2286_vm7, %v2285_v30, %v2112_v58  ;;  %v845_v39 = vadd.f32 1.0, %v797_v35  ;;  %v1035_v11 = vmin.f32 %v982_v18, %v8421_v37 }
 0x2e3   : > { %v1051_v21 = vmin.f32 %v982_v18, %v8423_v28  ;;  %v2288_v34 = vrot.slane %v2287_v56, 4  ;;  %v861_v8 = vadd.f32 1.0, %v813_v20  ;;  %v877_v43 = vadd.f32 1.0, %v829_v10 }
 0x2e4   : > { %v1124_v17 = vrot.slane %v7016_v62, %v8464_v60  ;;  %v893_v45 = vmax.f32 %v845_v39, 0.0  ;;  %v1067_v0 = vmin.f32 %v982_v18, %v8415_v16  ;;  %v1458_v2 = vrot.slane %v8463_v42, %v8464_v60 }
 0x2e5   : > { %v7355_v1 = vrot.slane %v6983_v33, %v8468_v19  ;;  %vm2289_vm9 = vcmp.lt.s32.totalorder %v2287_v56, %v2288_v34  ;;  %v909_v27 = vmax.f32 %v861_v8, 0.0  ;;  %v925_v25 = vmax.f32 %v877_v43, 0.0 }
 0x2e6   : > { %v4996_v54 = vpop.eup %4995  ;;  %v1177_v22 = vmax.f32 %v1124_v17, %v8417_v55  ;;  %v2290_v58 = vsel %vm2289_vm9, %v2287_v56, %v2288_v34  ;;  %v1193_v30 = vmax.f32 %v1124_v17, %v8460_v4  ;;  %v1209_v18 = vmax.f32 %v1124_v17, %v8461_v47 }
 0x2e7   : > { %v4998_v15 = vpop.eup %4997  ;;  %v1661_v61 = vmul.f32 %v4996_v54, %v7307_v31  ;;  %v2291_v40 = vrot.slane %v2290_v58, 2  ;;  %v1514_v33 = vadd.f32 %v6097_v26, %v1458_v2  ;;  %v1530_v43 = vadd.f32 %v6131_v9, %v1458_v2  ;;  %v8469_v54 = vld [vmem:[#allocation20_spill] sm:$0xff] }
 0x2e8   : > { %v1677_v35 = vmul.f32 %v4998_v15, %v7309_v59  ;;  %v1225_v20 = vsub.f32 %v1035_v11, %v1177_v22  ;;  %v1241_v39 = vsub.f32 %v1051_v21, %v1193_v30  ;;  %v1257_v8 = vsub.f32 %v1067_v0, %v1209_v18 }
 0x2e9   : > { %v1724_v10 = vsel %vm1706_vm2, 0.0, %v1661_v61  ;;  %vm2292_vm5 = vcmp.lt.s32.totalorder %v2290_v58, %v2291_v40  ;;  %v5000_v59 = vpop.eup %4999  ;;  %v8470_v61 = vld [vmem:[#allocation46_spill] sm:$0xff] }
 0x2ea   : > { %v1740_v31 = vsel %vm1707_vm3, 0.0, %v1677_v35  ;;  %v7370_v56 = vsel %vm7339_vm0, -1.0, %v1724_v10  ;;  %v1273_v34 = vadd.f32 1.0, %v1225_v20  ;;  %v2293_v11 = vsel %vm2292_vm5, %v2290_v58, %v2291_v40 }
 0x2eb   : > { %v7374_v17 = vsel %vm7339_vm0, -1.0, %v1740_v31  ;;  %vm2362_vm8 = vcmp.eq.f32.partialorder %v7370_v56, %v8469_v54  ;;  %v1289_v21 = vadd.f32 1.0, %v1241_v39  ;;  %v2294_v0 = vrot.slane %v2293_v11, 1 }
 0x2ec   : > { %v1693_v22 = vmul.f32 %v5000_v59, %v7312_v24  ;;  %v2007_v15 = vmax.f32 %v7370_v56, %v7374_v17  ;;  %vm2378_vm1 = vcmp.eq.f32.partialorder %v7374_v17, %v8470_v61  ;;  %v4642_v30 = vsel %vm2362_vm8, 1.0, %v8446_v5 }
 0x2ed   : > { %v4658_v58 = vsel %vm2378_vm1, 1.0, %v8446_v5  ;;  %v1305_v18 = vadd.f32 1.0, %v1257_v8  ;;  %v1321_v40 = vmax.f32 %v1273_v34, 0.0  ;;  %vm2295_vm6 = vcmp.lt.s32.totalorder %v2293_v11, %v2294_v0  ;;  %v8472_v34 = vld [vmem:[#allocation36_spill] sm:$0xff] }
 0x2ee   : > { %v1756_v20 = vsel %vm1708_vm4, 0.0, %v1693_v22  ;;  %v2611_v10 = vadd.f32 %v4658_v58, %v4642_v30  ;;  %v1337_v39 = vmax.f32 %v1289_v21, 0.0  ;;  %v7387_v31 = vsel %vm2295_vm6, %v2293_v11, %v2294_v0 }
 0x2ef   : > { %v7391_v24 = vsel %vm7339_vm0, -1.0, %v1756_v20  ;;  %v1353_v59 = vmax.f32 %v1305_v18, 0.0  ;;  %v7393_v46 = vmul.f32 %v1321_v40, %v893_v45  ;;  %vm2848_vm13 = vcmp.eq.s32.totalorder %v8344_v3, %v7387_v31 }
 0x2f0   : > { %vm2864_vm12 = vcmp.eq.s32.totalorder %v8345_v38, %v7387_v31  ;;  %v2008_v8 = vmax.f32 %v2007_v15, %v7391_v24  ;;  %vm2394_vm11 = vcmp.eq.f32.partialorder %v7391_v24, %v8472_v34  ;;  %v7403_v51 = vmul.f32 %v1337_v39, %v909_v27 }
 0x2f1   : > { %vm4807_vm14 = vmpackc.low %vm2864_vm12, %vm2848_vm13  ;;  %v4674_v11 = vsel %vm2394_vm11, 1.0, %v8446_v5  ;;  %v7405_v21 = vmul.f32 %v1353_v59, %v925_v25  ;;  %v1546_v45 = vadd.f32 %v8361_v41, %v1458_v2  ;;  %v1562_v30 = vsub.f32 %v1514_v33, %v7393_v46 }
 0x2f2   : > { %4808 = vmatprep.subr.msk.bf16.mxu0 %vm4807_vm14, %v8448_v6  ;;  %v2009_v0 = vrot.slane %v2008_v8, 4  ;;  %v2612_v22 = vadd.f32 %v4674_v11, %v2611_v10  ;;  %v1810_v15 = vrot.slane %v6767_v7, %v8464_v60  ;;  %v1578_v58 = vsub.f32 %v1530_v43, %v7403_v51 }
 0x2f3   : > { %v1594_v18 = vsub.f32 %v1546_v45, %v7405_v21  ;;  %v609_v27 = vmin.f32 %v7355_v1, %v8435_v49  ;;  %v625_v25 = vmin.f32 %v7355_v1, %v8436_v13  ;;  %5001 = vrcp.f32 %v1562_v30 }
 0x2f4   : > { %v2010_v2 = vmax.f32 %v2008_v8, %v2009_v0  ;;  %v2613_v40 = vrot.slane %v2612_v22, 4  ;;  %v641_v20 = vmin.f32 %v7355_v1, %v8437_v53  ;;  %5003 = vrcp.f32 %v1578_v58 }
 0x2f5   : > { %v704_v33 = vrot.slane %v7001_v12, %v8468_v19  ;;  %v990_v43 = vrot.slane %v7011_v23, %v8468_v19  ;;  %v1132_v10 = vrot.slane %v7016_v62, %v8468_v19  ;;  %5005 = vrcp.f32 %v1594_v18 }
 0x2f6   : > { %v2011_v49 = vrot.slane %v2010_v2, 2  ;;  %v2614_v39 = vadd.f32 %v2613_v40, %v2612_v22  ;;  %v7428_v13 = vrot.slane %v8463_v42, %v8468_v19  ;;  %vm7436_vm0 = vcmp.eq.s32.totalorder %v1810_v15, 1 }
 0x2f7   : > { %v751_v59 = vmax.f32 %v704_v33, %v8440_v36  ;;  %v767_v53 = vmax.f32 %v704_v33, %v8441_v48  ;;  %v783_v1 = vmax.f32 %v704_v33, %v8442_v32  ;;  %v1037_v12 = vmin.f32 %v990_v43, %v8421_v37  ;;  %v7441_v48 = vpop.f32.mrb[0].mxu0 }
 0x2f8   : > { %v2012_v8 = vmax.f32 %v2010_v2, %v2011_v49  ;;  %v2615_v23 = vrot.slane %v2614_v39, 2  ;;  %v1053_v11 = vmin.f32 %v990_v43, %v8423_v28  ;;  %v1069_v62 = vmin.f32 %v990_v43, %v8415_v16  ;;  %v7445_v28 = vpop.f32.mrb[1].mxu0 }
 0x2f9   : > { %v799_v42 = vsub.f32 %v609_v27, %v751_v59  ;;  %v815_v0 = vsub.f32 %v625_v25, %v767_v53  ;;  %v831_v22 = vsub.f32 %v641_v20, %v783_v1  ;;  %v1179_v36 = vmax.f32 %v1132_v10, %v8417_v55 }
 0x2fa   : > { %v2013_v32 = vrot.slane %v2012_v8, 1  ;;  %v2616_v30 = vadd.f32 %v2615_v23, %v2614_v39  ;;  %v1195_v37 = vmax.f32 %v1132_v10, %v8460_v4  ;;  %v1211_v58 = vmax.f32 %v1132_v10, %v8461_v47 }
 0x2fb   : > { %v7447_v16 = vadd.f32 1.0, %v799_v42  ;;  %v7449_v15 = vadd.f32 1.0, %v815_v0  ;;  %v7451_v18 = vadd.f32 1.0, %v831_v22  ;;  %v1227_v27 = vsub.f32 %v1037_v12, %v1179_v36 }
 0x2fc   : > { %v2014_v25 = vmax.f32 %v2012_v8, %v2013_v32  ;;  %v2617_v2 = vrot.slane %v2616_v30, 1  ;;  %v1243_v55 = vsub.f32 %v1053_v11, %v1195_v37  ;;  %v1259_v40 = vsub.f32 %v1069_v62, %v1211_v58 }
 0x2fd   : > { %v895_v20 = vmax.f32 %v7447_v16, 0.0  ;;  %v911_v33 = vmax.f32 %v7449_v15, 0.0  ;;  %v927_v4 = vmax.f32 %v7451_v18, 0.0  ;;  %v1275_v47 = vadd.f32 1.0, %v1227_v27  ;;  %v5002_v43 = vpop.eup %5001 }
 0x2fe   : > { %vm2034_vm15 = vcmp.eq.f32.partialorder %v7370_v56, %v2014_v25  ;;  %vm2050_vm10 = vcmp.eq.f32.partialorder %v7374_v17, %v2014_v25  ;;  %vm2066_vm7 = vcmp.eq.f32.partialorder %v7391_v24, %v2014_v25  ;;  %v2618_v10 = vadd.f32 %v2617_v2, %v2616_v30  ;;  %v5004_v49 = vpop.eup %5003 }
 0x2ff   : > { %v2082_v39 = vsel %vm2034_vm15, %v8344_v3, 24  ;;  %v2098_v59 = vsel %vm2050_vm10, %v8345_v38, 24  ;;  %v2114_v53 = vsel %vm2066_vm7, %v8346_v44, 24  ;;  %vm2634_vm9 = vcmp.lt.f32.partialorder %v2014_v25, 0.3  ;;  %v5006_v1 = vpop.eup %5005 }
 0x300   : > { %vm2310_vm5 = vcmp.lt.s32.totalorder %v2082_v39, %v2098_v59  ;;  %v2650_v12 = vsel %vm2634_vm9, 0.0, %v8390_v14  ;;  %vm2666_vm8 = vcmp.gt.f32.partialorder %v2618_v10, 0.0  ;;  %vm2698_vm1 = vcmp.ge.f32.partialorder %v2014_v25, 0.7 }
 0x301   : > { %v2311_v56 = vsel %vm2310_vm5, %v2082_v39, %v2098_v59  ;;  %v2682_v8 = vsel %vm2666_vm8, 1.0, %v2650_v12  ;;  %v1658_v17 = vmul.f32 %v5002_v43, %v7393_v46  ;;  %v1674_v24 = vmul.f32 %v5004_v49, %v7403_v51 }
 0x302   : > { %vm2312_vm6 = vcmp.lt.s32.totalorder %v2311_v56, %v2114_v53  ;;  %v7465_v23 = vsel %vm2698_vm1, 1.0, %v2682_v8  ;;  %v1690_v11 = vmul.f32 %v5006_v1, %v7405_v21  ;;  %v1291_v62 = vadd.f32 1.0, %v1243_v55 }
 0x303   : > { %v2313_v42 = vsel %vm2312_vm6, %v2311_v56, %v2114_v53  ;;  %v1721_v0 = vsel %vm1706_vm2, 0.0, %v1658_v17  ;;  %v1737_v22 = vsel %vm1707_vm3, 0.0, %v1674_v24  ;;  %v1307_v36 = vadd.f32 1.0, %v1259_v40  ;;  %v8476_v24 = vld [vmem:[#allocation48_spill] sm:$0xff] }
 0x304   : > { %v2314_v32 = vrot.slane %v2313_v42, 4  ;;  %v1753_v46 = vsel %vm1708_vm4, 0.0, %v1690_v11  ;;  %v7476_v51 = vsel %vm7436_vm0, -1.0, %v1721_v0  ;;  %v7480_v21 = vsel %vm7436_vm0, -1.0, %v1737_v22  ;;  %v8477_v11 = vld [vmem:[#allocation32_spill] sm:$0xff] }
 0x305   : > { %v7484_v30 = vsel %vm7436_vm0, -1.0, %v1753_v46  ;;  %v1983_v37 = vmax.f32 %v7476_v51, %v7480_v21  ;;  %vm2359_vm13 = vcmp.eq.f32.partialorder %v7476_v51, %v8469_v54  ;;  %vm2375_vm12 = vcmp.eq.f32.partialorder %v7480_v21, %v8470_v61  ;;  %v7532_v46 = vld [vmem:[%s5424_s15] sm:$0xff] }
 0x306   : > { %vm2315_vm11 = vcmp.lt.s32.totalorder %v2313_v42, %v2314_v32  ;;  %vm2391_vm14 = vcmp.eq.f32.partialorder %v7484_v30, %v8472_v34  ;;  %v4639_v58 = vsel %vm2359_vm13, 1.0, %v8446_v5  ;;  %v4655_v16 = vsel %vm2375_vm12, 1.0, %v8446_v5 }
 0x307   : > { %v2316_v45 = vsel %vm2315_vm11, %v2313_v42, %v2314_v32  ;;  %v1984_v15 = vmax.f32 %v1983_v37, %v7484_v30  ;;  %v4671_v18 = vsel %vm2391_vm14, 1.0, %v8446_v5  ;;  %v2587_v27 = vadd.f32 %v4655_v16, %v4639_v58  ;;  %v8480_v37 = vld [vmem:[#allocation11_spill] sm:$0xff]  ;;  %v8481_v58 = vld [vmem:[#allocation12_spill] sm:$0xff] }
 0x308   : > { %v2317_v25 = vrot.slane %v2316_v45, 2  ;;  %v1323_v2 = vmax.f32 %v1275_v47, 0.0  ;;  %v1339_v55 = vmax.f32 %v1291_v62, 0.0  ;;  %v1355_v40 = vmax.f32 %v1307_v36, 0.0  ;;  %v8478_v62 = vld [vmem:[#allocation8_spill] sm:$0xff] }
 0x309   : > { %v1985_v43 = vrot.slane %v1984_v15, 4  ;;  %v2588_v10 = vadd.f32 %v4671_v18, %v2587_v27  ;;  %v1516_v49 = vadd.f32 %v6097_v26, %v7428_v13  ;;  %v1532_v39 = vadd.f32 %v6131_v9, %v7428_v13  ;;  %v8483_v27 = vld [vmem:[#allocation13_spill] sm:$0xff] }
 0x30a   : > { %vm2318_vm0 = vcmp.lt.s32.totalorder %v2316_v45, %v2317_v25  ;;  %v7503_v59 = vmul.f32 %v1323_v2, %v895_v20  ;;  %v7505_v53 = vmul.f32 %v1339_v55, %v911_v33  ;;  %v7507_v1 = vmul.f32 %v1355_v40, %v927_v4 }
 0x30b   : > { %v2319_v47 = vsel %vm2318_vm0, %v2316_v45, %v2317_v25  ;;  %v1986_v12 = vmax.f32 %v1984_v15, %v1985_v43  ;;  %v2589_v56 = vrot.slane %v2588_v10, 4  ;;  %v1548_v26 = vadd.f32 %v8361_v41, %v7428_v13  ;;  %v7539_v18 = vpop.f32.mrb[0].mxu1 }
 0x30c   : > { %v2320_v9 = vrot.slane %v2319_v47, 1  ;;  %v1564_v20 = vsub.f32 %v1516_v49, %v7503_v59  ;;  %v1580_v33 = vsub.f32 %v1532_v39, %v7505_v53  ;;  %v8479_v42 = vcombine.low %v8477_v11, %v8478_v62  ;;  %v7545_v2 = vpop.f32.mrb[1].mxu1  ;;  %v8484_v49 = vld [vmem:[#allocation14_spill] sm:$0xff] }
 0x30d   : > { %v1987_v8 = vrot.slane %v1986_v12, 2  ;;  %v2590_v4 = vadd.f32 %v2589_v56, %v2588_v10  ;;  %v1596_v17 = vsub.f32 %v1548_v26, %v7507_v1  ;;  %v8482_v16 = vcombine.low %v8480_v37, %v8481_v58 }
 0x30e   : > { %v2771_v0 = vrot.slane %v8479_v42, %v8476_v24  ;;  %vm2321_vm15 = vcmp.lt.s32.totalorder %v2319_v47, %v2320_v9  ;;  %5007 = vrcp.f32 %v1564_v20  ;;  %v3568_v15 = vrot.slane %v7441_v48, 6 }
 0x30f   : > { %v7524_v41 = vsel %vm2321_vm15, %v2319_v47, %v2320_v9  ;;  %v1988_v13 = vmax.f32 %v1986_v12, %v1987_v8  ;;  %v2591_v22 = vrot.slane %v2590_v4, 2  ;;  %5009 = vrcp.f32 %v1580_v33 }
 0x310   : > { %vm2850_vm10 = vcmp.eq.s32.totalorder %v8344_v3, %v7524_v41  ;;  %vm2866_vm7 = vcmp.eq.s32.totalorder %v8345_v38, %v7524_v41  ;;  %5011 = vrcp.f32 %v1596_v17  ;;  %v2778_v45 = vrot.slane %v8482_v16, %v8476_v24 }
 0x311   : > { %vm4811_vm9 = vmpackc.low %vm2866_vm7, %vm2850_vm10  ;;  %v1989_v36 = vrot.slane %v1988_v13, 1  ;;  %v2592_v32 = vadd.f32 %v2591_v22, %v2590_v4  ;;  %5013 = vrcp.f32 %v8483_v27  ;;  %v1818_v25 = vrot.slane %v6767_v7, %v8468_v19  ;;  %v5091_v22 = vld [vmem:[%s5430_s12 + $0x1] ss:$4 sm:$0xff] }
 0x312   : > { %4812 = vmatprep.subr.msk.bf16.mxu1 %vm4811_vm9, %v8448_v6  ;;  %v2779_v43 = vcombine.low %v2771_v0, %v2778_v45  ;;  %v3712_v10 = vmul.f32 0.5, %v8483_v27  ;;  %5015 = vrcp.f32 %v8484_v49  ;;  %vm414_vm5 = vcmp.gt.f32.partialorder %v7532_v46, 0.5 }
 0x313   : > { %v1990_v55 = vmax.f32 %v1988_v13, %v1989_v36  ;;  %v2593_v40 = vrot.slane %v2592_v32, 1  ;;  %v3600_v39 = vsub.f32 %v7441_v48, %v3568_v15  ;;  %v3716_v56 = vmul.f32 0.5, %v8484_v49 }
 0x314   : > { %vm7565_vm11 = vcmp.eq.s32.totalorder %v1818_v25, 1  ;;  %v2831_v33 = vsel %vm414_vm5, %v2779_v43, -1.0 }
 0x315   : > { %vm2031_vm8 = vcmp.eq.f32.partialorder %v7476_v51, %v1990_v55  ;;  %vm2047_vm1 = vcmp.eq.f32.partialorder %v7480_v21, %v1990_v55  ;;  %vm2063_vm6 = vcmp.eq.f32.partialorder %v7484_v30, %v1990_v55  ;;  %v2594_v7 = vadd.f32 %v2593_v40, %v2592_v32  ;;  %v5090_v21 = vld [vmem:[%s5430_s12] ss:$4 sm:$0xff]  ;;  %2833 = vst [vmem:[%s7560_s14] sm:$0xff] %v2831_v33 }
 0x316   : > { %v2079_v47 = vsel %vm2031_vm8, %v8344_v3, 24  ;;  %v2095_v12 = vsel %vm2047_vm1, %v8345_v38, 24  ;;  %vm2631_vm13 = vcmp.lt.f32.partialorder %v1990_v55, 0.3  ;;  %v7570_v30 = vadd.f32 %v5090_v21, %v3712_v10 }
 0x317   : > { %vm2271_vm12 = vcmp.lt.s32.totalorder %v2079_v47, %v2095_v12  ;;  %v2111_v9 = vsel %vm2063_vm6, %v8346_v44, 24  ;;  %v3616_v8 = vadd.f32 1.0, %v3600_v39  ;;  %v2647_v17 = vsel %vm2631_vm13, 0.0, %v8390_v14 }
 0x318   : > { %v5008_v26 = vpop.eup %5007  ;;  %v2272_v20 = vsel %vm2271_vm12, %v2079_v47, %v2095_v12  ;;  %vm2663_vm0 = vcmp.gt.f32.partialorder %v2594_v7, 0.0  ;;  %v7580_v36 = vadd.f32 %v5091_v22, %v3716_v56  ;;  %vm2695_vm15 = vcmp.ge.f32.partialorder %v1990_v55, 0.7  ;;  %v8487_v7 = vld [vmem:[#allocation17_spill] sm:$0xff] }
 0x319   : > { %v5010_v4 = vpop.eup %5009  ;;  %vm2273_vm14 = vcmp.lt.s32.totalorder %v2272_v20, %v2111_v9  ;;  %v1660_v11 = vmul.f32 %v5008_v26, %v7503_v59  ;;  %v3632_v13 = vmul.f32 0.5, %v3616_v8  ;;  %v2679_v45 = vsel %vm2663_vm0, 1.0, %v2647_v17 }
 0x31a   : > { %v5012_v62 = vpop.eup %5011  ;;  %v2274_v42 = vsel %vm2273_vm14, %v2272_v20, %v2111_v9  ;;  %v1676_v0 = vmul.f32 %v5010_v4, %v7505_v53  ;;  %v2711_v10 = vsel %vm2695_vm15, 1.0, %v2679_v45  ;;  %v3925_v9 = vrot.slane %v7580_v36, %v8487_v7 }
 0x31b   : > { %v2275_v32 = vrot.slane %v2274_v42, 4  ;;  %v1692_v37 = vmul.f32 %v5012_v62, %v7507_v1  ;;  %v1723_v58 = vsel %vm1706_vm2, 0.0, %v1660_v11  ;;  %v7585_v16 = vpop.eup %5013  ;;  %v3664_v15 = vrot.slane %v3632_v13, 2 }
 0x31c   : > { %v1739_v59 = vsel %vm1707_vm3, 0.0, %v1676_v0  ;;  %v7591_v53 = vsel %vm7565_vm11, -1.0, %v1723_v58  ;;  %v7601_v52 = vpop.eup %5015  ;;  %v3827_v47 = vrot.slane %v7585_v16, %v8487_v7  ;;  %v2782_v20 = vcombine.low %v2711_v10, %v7344_v50 }
 0x31d   : > { %vm2276_vm10 = vcmp.lt.s32.totalorder %v2274_v42, %v2275_v32  ;;  %v1755_v27 = vsel %vm1708_vm4, 0.0, %v1692_v37  ;;  %v7597_v1 = vsel %vm7565_vm11, -1.0, %v1739_v59  ;;  %vm2361_vm2 = vcmp.eq.f32.partialorder %v7591_v53, %v8469_v54 }
 0x31e   : > { %v2277_v63 = vsel %vm2276_vm10, %v2274_v42, %v2275_v32  ;;  %v7605_v25 = vsel %vm7565_vm11, -1.0, %v1755_v27  ;;  %v1999_v40 = vmax.f32 %v7591_v53, %v7597_v1  ;;  %vm2377_vm3 = vcmp.eq.f32.partialorder %v7597_v1, %v8470_v61 }
 0x31f   : > { %v2278_v35 = vrot.slane %v2277_v63, 2  ;;  %vm2393_vm4 = vcmp.eq.f32.partialorder %v7605_v25, %v8472_v34  ;;  %v4641_v43 = vsel %vm2361_vm2, 1.0, %v8446_v5  ;;  %v4657_v54 = vsel %vm2377_vm3, 1.0, %v8446_v5 }
 0x320   : > { %v2000_v49 = vmax.f32 %v1999_v40, %v7605_v25  ;;  %v2603_v39 = vadd.f32 %v4657_v54, %v4641_v43  ;;  %v4673_v12 = vsel %vm2393_vm4, 1.0, %v8446_v5  ;;  %v3696_v61 = vadd.f32 %v3664_v15, %v7441_v48 }
 0x321   : > { %vm2279_vm7 = vcmp.lt.s32.totalorder %v2277_v63, %v2278_v35  ;;  %v3729_v34 = vrot.slane %v7570_v30, %v8487_v7  ;;  %v4023_v55 = vrot.slane %v7601_v52, %v8487_v7  ;;  %v4116_v48 = vmul.f32 %v3827_v47, %v3616_v8 }
 0x322   : > { %v2280_v56 = vsel %vm2279_vm7, %v2277_v63, %v2278_v35  ;;  %v2001_v51 = vrot.slane %v2000_v49, 4  ;;  %v2604_v21 = vadd.f32 %v4673_v12, %v2603_v39  ;;  %v3570_v17 = vrot.slane %v7539_v18, 6 }
 0x323   : > { %v2281_v26 = vrot.slane %v2280_v56, 1  ;;  %v3806_v5 = vsub.f32 %v3696_v61, %v3729_v34  ;;  %v4164_v0 = vmul.f32 %v4023_v55, %v3616_v8  ;;  %vm2880_vm6 = vcmp.eq.s32.totalorder %v8346_v44, %v7387_v31  ;;  %v8489_v31 = vld [vmem:[#allocation19_spill] sm:$0xff] }
 0x324   : > { %v2002_v33 = vmax.f32 %v2000_v49, %v2001_v51  ;;  %v2605_v4 = vrot.slane %v2604_v21, 4  ;;  %v4002_v13 = vsub.f32 %v3696_v61, %v3925_v9  ;;  %v8488_v32 = vmov 0   ;;  %v8490_v61 = vld [vmem:[#allocation15_spill] sm:$0xff] }
 0x325   : > { %vm2282_vm9 = vcmp.lt.s32.totalorder %v2280_v56, %v2281_v26  ;;  %v7636_v37 = vsel %vm414_vm5, 1, %v8488_v32  ;;  %v3602_v58 = vsub.f32 %v7539_v18, %v3570_v17  ;;  %v7640_v8 = vrot.slane %v2782_v20, %v8476_v24 }
 0x326   : > { %v2283_v11 = vsel %vm2282_vm9, %v2280_v56, %v2281_v26  ;;  %v2003_v62 = vrot.slane %v2002_v33, 2  ;;  %v2606_v42 = vadd.f32 %v2605_v4, %v2604_v21  ;;  %v3904_v45 = vmul.f32 %v3827_v47, %v3806_v5 }
 0x327   : > { %vm2847_vm8 = vcmp.eq.s32.totalorder %v8344_v3, %v2283_v11  ;;  %vm2863_vm1 = vcmp.eq.s32.totalorder %v8345_v38, %v2283_v11  ;;  %5017 = vlog2.f32 %v4116_v48  ;;  %vm4212_vm12 = vcmask 1040384  }
 0x328   : > { %vm4809_vm13 = vmpackc.low %vm2863_vm1, %vm2847_vm8  ;;  %v2004_v50 = vmax.f32 %v2002_v33, %v2003_v62  ;;  %v2607_v22 = vrot.slane %v2606_v42, 2  ;;  %v7645_v59 = vrot.slane %v7585_v16, %v8489_v31  ;;  %5019 = vlog2.f32 %v4164_v0 }
 0x329   : > { %4810 = vmatpush1.bf16.msk.msra.mxu0 %vm4809_vm13, %v8448_v6  ;;  %v3618_v46 = vadd.f32 1.0, %v3602_v58  ;;  %v4100_v63 = vmul.f32 %v4023_v55, %v4002_v13  ;;  %v4268_v40 = vrot.slane %v7636_v37, %v8487_v7  ;;  %v3737_v35 = vrot.slane %v7570_v30, %v8489_v31 }
 0x32a   : > { %v2005_v15 = vrot.slane %v2004_v50, 1  ;;  %v2608_v27 = vadd.f32 %v2607_v22, %v2606_v42  ;;  %4769 = vmatprep.subr.msk.mxu0 %vm2880_vm6, %v8450_v29  ;;  %v7654_v43 = vrot.slane %v7601_v52, %v8489_v31  ;;  %vm2879_vm5 = vcmp.eq.s32.totalorder %v8346_v44, %v2283_v11 }
 0x32b   : > { %v3569_v49 = vrot.slane %v7445_v28, 6  ;;  %v3634_v39 = vmul.f32 0.5, %v3618_v46  ;;  %v3933_v47 = vrot.slane %v7580_v36, %v8489_v31  ;;  %v4118_v12 = vmul.f32 %v7645_v59, %v3618_v46 }
 0x32c   : > { %v2006_v54 = vmax.f32 %v2004_v50, %v2005_v15  ;;  %v2609_v10 = vrot.slane %v2608_v27, 1  ;;  %v7664_v34 = vrot.slane %v7585_v16, %v8490_v61  ;;  %vm8491_vm15 = vcmask 195584  }
 0x32d   : > { %4770 = vmatpush1.msk.msra.mxu0 %vm2879_vm5, %v8450_v29  ;;  %v4166_v55 = vmul.f32 %v7654_v43, %v3618_v46  ;;  %vm4229_vm7 = vcmask 1041408   ;;  %v3666_v20 = vrot.slane %v3634_v39, 2  ;;  %5021 = vlog2.f32 %v4118_v12 }
 0x32e   : > { %vm2033_vm11 = vcmp.eq.f32.partialorder %v7591_v53, %v2006_v54  ;;  %vm2049_vm14 = vcmp.eq.f32.partialorder %v7597_v1, %v2006_v54  ;;  %vm2065_vm0 = vcmp.eq.f32.partialorder %v7605_v25, %v2006_v54  ;;  %v2610_v56 = vadd.f32 %v2609_v10, %v2608_v27  ;;  %4771 = vmatmul.mubr.msk.f32.vlgmr.msra.gmra.mrb[6].mxu0 %vm8491_vm15, %v7214_v57 }
 0x32f   : > { %v2081_v51 = vsel %vm2033_vm11, %v8344_v3, 24  ;;  %v2097_v21 = vsel %vm2049_vm14, %v8345_v38, 24  ;;  %vm2633_vm10 = vcmp.lt.f32.partialorder %v2006_v54, 0.3  ;;  %v3601_v53 = vsub.f32 %v7445_v28, %v3569_v49 }
 0x330   : > { %vm2297_vm2 = vcmp.lt.s32.totalorder %v2081_v51, %v2097_v21  ;;  %v2649_v26 = vsel %vm2633_vm10, 0.0, %v8390_v14  ;;  %vm2665_vm3 = vcmp.gt.f32.partialorder %v2610_v56, 0.0  ;;  %v2113_v1 = vsel %vm2065_vm0, %v8346_v44, 24 }
 0x331   : > { %v2298_v25 = vsel %vm2297_vm2, %v2081_v51, %v2097_v21  ;;  %v2681_v9 = vsel %vm2665_vm3, 1.0, %v2649_v26  ;;  %vm2697_vm4 = vcmp.ge.f32.partialorder %v2006_v54, 0.7  ;;  %v5018_v33 = vpop.eup %5017  ;;  %5023 = vlog2.f32 %v4166_v55 }
 0x332   : > { %vm2299_vm9 = vcmp.lt.s32.totalorder %v2298_v25, %v2113_v1  ;;  %v2713_v57 = vsel %vm2697_vm4, 1.0, %v2681_v9  ;;  %v4027_v14 = vrot.slane %v7601_v52, %v8490_v61  ;;  %v5020_v48 = vpop.eup %5019  ;;  %v4213_v11 = vsel %vm4212_vm12, %v3904_v45, %v4100_v63 }
 0x333   : > { %v2300_v4 = vsel %vm2299_vm9, %v2298_v25, %v2113_v1  ;;  %v2783_v5 = vcombine.low %v2713_v57, %v7465_v23  ;;  %v3698_v62 = vadd.f32 %v3666_v20, %v7539_v18  ;;  %v3617_v42 = vadd.f32 1.0, %v3601_v53 }
 0x334   : > { %v2301_v17 = vrot.slane %v2300_v4, 4  ;;  %v4276_v13 = vrot.slane %v7636_v37, %v8489_v31  ;;  %v3733_v23 = vrot.slane %v7570_v30, %v8490_v61  ;;  %v3571_v50 = vrot.slane %v7545_v2, 6 }
 0x335   : > { %v7683_v0 = vrot.slane %v2783_v5, %v8476_v24  ;;  %v3808_v22 = vsub.f32 %v3698_v62, %v3737_v35  ;;  %v4004_v58 = vsub.f32 %v3698_v62, %v3933_v47  ;;  %v3633_v15 = vmul.f32 0.5, %v3617_v42  ;;  %v8492_v47 = vld [vmem:[#allocation16_spill] sm:$0xff] }
 0x336   : > { %vm2302_vm8 = vcmp.lt.s32.totalorder %v2300_v4, %v2301_v17  ;;  %vm4246_vm1 = vcmask 1042432   ;;  %v4117_v45 = vmul.f32 %v7664_v34, %v3617_v42  ;;  %v4165_v46 = vmul.f32 %v4027_v14, %v3617_v42 }
 0x337   : > { %v2303_v27 = vsel %vm2302_vm8, %v2300_v4, %v2301_v17  ;;  %v2813_v18 = vcombine.low %v7640_v8, %v7683_v0  ;;  %v4133_v54 = vmul.f32 0.6931472, %v5018_v33  ;;  %v3665_v10 = vrot.slane %v3633_v15, 2  ;;  %v5022_v53 = vpop.eup %5021 }
 0x338   : > { %v2304_v63 = vrot.slane %v2303_v27, 2  ;;  %v3929_v49 = vrot.slane %v7580_v36, %v8490_v61  ;;  %v3906_v39 = vmul.f32 %v7645_v59, %v3808_v22  ;;  %5025 = vlog2.f32 %v4117_v45 }
 0x339   : > { %v3603_v35 = vsub.f32 %v7545_v2, %v3571_v50  ;;  %v7699_v12 = vrot.slane %v7585_v16, %v8492_v47  ;;  %vm2882_vm13 = vcmp.eq.s32.totalorder %v8346_v44, %v7524_v41  ;;  %v4102_v56 = vmul.f32 %v7654_v43, %v4004_v58 }
 0x33a   : > { %vm2305_vm6 = vcmp.lt.s32.totalorder %v2303_v27, %v2304_v63  ;;  %v3697_v51 = vadd.f32 %v3665_v10, %v7445_v28  ;;  %5027 = vlog2.f32 %v4165_v46  ;;  %v4181_v55 = vmul.f32 0.6931472, %v5020_v48 }
 0x33b   : > { %v2306_v21 = vsel %vm2305_vm6, %v2303_v27, %v2304_v63  ;;  %v3619_v26 = vadd.f32 1.0, %v3603_v35  ;;  %v4035_v59 = vrot.slane %v7601_v52, %v8492_v47  ;;  %v4230_v25 = vsel %vm4229_vm7, %v4213_v11, %v4133_v54  ;;  %v5024_v20 = vpop.eup %5023 }
 0x33c   : > { %v2307_v1 = vrot.slane %v2306_v21, 1  ;;  %v3807_v9 = vsub.f32 %v3697_v51, %v3733_v23  ;;  %v4003_v57 = vsub.f32 %v3697_v51, %v3929_v49  ;;  %v4137_v33 = vmul.f32 0.6931472, %v5022_v53  ;;  %v7714_v23 = vpop.f32.mrb[2].mxu0 }
 0x33d   : > { %v3635_v4 = vmul.f32 0.5, %v3619_v26  ;;  %v4119_v43 = vmul.f32 %v7699_v12, %v3619_v26  ;;  %v4167_v5 = vmul.f32 %v4035_v59, %v3619_v26  ;;  %v4215_v28 = vsel %vm4212_vm12, %v3906_v39, %v4102_v56  ;;  %v7721_v58 = vpop.f32.mrb[3].mxu0 }
 0x33e   : > { %vm2308_vm5 = vcmp.lt.s32.totalorder %v2306_v21, %v2307_v1  ;;  %v3741_v48 = vrot.slane %v7570_v30, %v8492_v47  ;;  %v3937_v17 = vrot.slane %v7580_v36, %v8492_v47  ;;  %v4185_v42 = vmul.f32 0.6931472, %v5024_v20 }
 0x33f   : > { %v2309_v62 = vsel %vm2308_vm5, %v2306_v21, %v2307_v1  ;;  %v3667_v11 = vrot.slane %v3635_v4, 2  ;;  %5029 = vlog2.f32 %v4119_v43  ;;  %v4232_v50 = vsel %vm4229_vm7, %v4215_v28, %v4137_v33 }
 0x340   : > { %vm2849_vm11 = vcmp.eq.s32.totalorder %v8344_v3, %v2309_v62  ;;  %vm2865_vm14 = vcmp.eq.s32.totalorder %v8345_v38, %v2309_v62  ;;  %v4272_v22 = vrot.slane %v7636_v37, %v8490_v61  ;;  %v3905_v15 = vmul.f32 %v7664_v34, %v3807_v9 }
 0x341   : > { %vm4813_vm0 = vmpackc.low %vm2865_vm14, %vm2849_vm11  ;;  %v4101_v27 = vmul.f32 %v4027_v14, %v4003_v57  ;;  %v3699_v45 = vadd.f32 %v3667_v11, %v7545_v2  ;;  %5031 = vlog2.f32 %v4167_v5  ;;  %v4247_v3 = vsel %vm4246_vm1, %v4230_v25, %v4181_v55 }
 0x342   : > { %4814 = vmatpush1.bf16.msk.msra.mxu1 %vm4813_vm0, %v8448_v6  ;;  %vm7730_vm15 = vcmp.eq.s32.totalorder %v4268_v40, 1  ;;  %vm7734_vm10 = vcmp.eq.s32.totalorder %v4276_v13, 1  ;;  %v3572_v34 = vrot.slane %v7714_v23, 6  ;;  %v5026_v2 = vpop.eup %5025  ;;  %v7744_v6 = vsel %vm4246_vm1, %v4232_v50, %v4185_v42  ;;  %v8502_v50 = vld [vmem:[#allocation21_spill] sm:$0xff] }
 0x343   : > { %4776 = vmatprep.subr.msk.mxu1 %vm2882_vm13, %v8450_v29  ;;  %v3809_v14 = vsub.f32 %v3699_v45, %v3741_v48  ;;  %v4005_v40 = vsub.f32 %v3699_v45, %v3937_v17  ;;  %v4280_v63 = vrot.slane %v7636_v37, %v8492_v47  ;;  %v4135_v54 = vmul.f32 0.6931472, %v5026_v2 }
 0x344   : > { %v5028_v13 = vpop.eup %5027  ;;  %v3604_v10 = vsub.f32 %v7714_v23, %v3572_v34  ;;  %v3843_v49 = vrot.slane %v7585_v16, %v8464_v60  ;;  %v4039_v41 = vrot.slane %v7601_v52, %v8464_v60  ;;  %vm2881_vm2 = vcmp.eq.s32.totalorder %v8346_v44, %v2309_v62  ;;  %v5092_v44 = vld [vmem:[%s6499_s21] sm:$0xf] }
 0x345   : > { %v4183_v39 = vmul.f32 0.6931472, %v5028_v13  ;;  %v4214_v35 = vsel %vm4212_vm12, %v3905_v15, %v4101_v27  ;;  %vm7756_vm3 = vcmp.eq.s32.totalorder %v4272_v22, 1  ;;  %v4345_v51 = vsel %vm7730_vm15, %v4247_v3, 0.0 }
 0x346   : > { %4777 = vmatpush1.msk.msra.mxu1 %vm2881_vm2, %v8450_v29  ;;  %v4347_v21 = vsel %vm7734_vm10, %v7744_v6, 0.0  ;;  %v4231_v55 = vsel %vm4229_vm7, %v4214_v35, %v4135_v54  ;;  %v3620_v26 = vadd.f32 1.0, %v3604_v10  ;;  %vm8499_vm4 = vcmask 195584  }
 0x347   : > { %4778 = vmatmul.mubr.msk.f32.vlgmr.msra.gmra.mrb[6].mxu1 %vm8499_vm4, %v5092_v44  ;;  %v4248_v53 = vsel %vm4246_vm1, %v4231_v55, %v4183_v39  ;;  %v3907_v1 = vmul.f32 %v7699_v12, %v3809_v14  ;;  %v4103_v25 = vmul.f32 %v4035_v59, %v4005_v40  ;;  %vm7771_vm9 = vcmp.eq.s32.totalorder %v4280_v63, 1 }
 0x348   : > { %v4346_v9 = vsel %vm7756_vm3, %v4248_v53, 0.0  ;;  %v3636_v57 = vmul.f32 0.5, %v3620_v26  ;;  %v4120_v20 = vmul.f32 %v3843_v49, %v3620_v26  ;;  %v4168_v33 = vmul.f32 %v4039_v41, %v3620_v26 }
 0x349   : > { %v5030_v4 = vpop.eup %5029  ;;  %v4377_v43 = vcombine.low %v4345_v51, %v4346_v9  ;;  %v3745_v12 = vrot.slane %v7570_v30, %v8464_v60  ;;  %v3941_v59 = vrot.slane %v7580_v36, %v8464_v60  ;;  %v3573_v5 = vrot.slane %v7721_v58, 6 }
 0x34a   : > { %v4139_v28 = vmul.f32 0.6931472, %v5030_v4  ;;  %v3668_v48 = vrot.slane %v3636_v57, 2  ;;  %5033 = vlog2.f32 %v4120_v20  ;;  %v4284_v17 = vrot.slane %v7636_v37, %v8464_v60  ;;  %v8503_v57 = vld [vmem:[#allocation22_spill] sm:$0xff] }
 0x34b   : > { %v5032_v62 = vpop.eup %5031  ;;  %4393 = vst [vmem:[%s7778_s20] sm:$0xff] %v4377_v43  ;;  %v4216_v42 = vsel %vm4212_vm12, %v3907_v1, %v4103_v25  ;;  %5035 = vlog2.f32 %v4168_v33  ;;  %v3605_v11 = vsub.f32 %v7721_v58, %v3573_v5  ;;  %v3847_v22 = vrot.slane %v7585_v16, %v8502_v50  ;;  %v7814_v25 = vld [vmem:[%s5424_s15 + $0x8] sm:$0xff] }
 0x34c   : > { %v4187_v15 = vmul.f32 0.6931472, %v5032_v62  ;;  %v4233_v27 = vsel %vm4229_vm7, %v4216_v42, %v4139_v28  ;;  %v3700_v45 = vadd.f32 %v3668_v48, %v7714_v23  ;;  %v4043_v3 = vrot.slane %v7601_v52, %v8502_v50  ;;  %v3263_v23 = vpop.f32.mrb[2].mxu1 }
 0x34d   : > { %v3753_v38 = vrot.slane %v7570_v30, %v8468_v19  ;;  %v7802_v46 = vrot.slane %v7585_v16, %v8468_v19  ;;  %v3949_v34 = vrot.slane %v7580_v36, %v8468_v19  ;;  %v3621_v2 = vadd.f32 1.0, %v3605_v11  ;;  %v3265_v35 = vpop.f32.mrb[3].mxu1 }
 0x34e   : > { %v4250_v6 = vsel %vm4246_vm1, %v4233_v27, %v4187_v15  ;;  %v3810_v14 = vsub.f32 %v3700_v45, %v3745_v12  ;;  %v4006_v40 = vsub.f32 %v3700_v45, %v3941_v59  ;;  %v7809_v63 = vrot.slane %v7601_v52, %v8468_v19  ;;  %v8506_v59 = vld [vmem:[#allocation9_spill] sm:$0xff] }
 0x34f   : > { %v4348_v13 = vsel %vm7771_vm9, %v4250_v6, 0.0  ;;  %v3574_v54 = vrot.slane %v3263_v23, 6  ;;  %v3637_v10 = vmul.f32 0.5, %v3621_v2  ;;  %v4121_v39 = vmul.f32 %v3847_v22, %v3621_v2 }
 0x350   : > { %v4378_v56 = vcombine.low %v4347_v21, %v4348_v13  ;;  %v3908_v51 = vmul.f32 %v3843_v49, %v3810_v14  ;;  %v4104_v55 = vmul.f32 %v4039_v41, %v4006_v40  ;;  %v4169_v26 = vmul.f32 %v4043_v3, %v3621_v2 }
 0x351   : > { %v3606_v44 = vsub.f32 %v3263_v23, %v3574_v54  ;;  %v3669_v53 = vrot.slane %v3637_v10, 2  ;;  %5037 = vlog2.f32 %v4121_v39  ;;  %v3575_v1 = vrot.slane %v3265_v35, 6 }
 0x352   : > { %4394 = vst [vmem:[%s7778_s20 + $0x8] sm:$0xff] %v4378_v56  ;;  %v3749_v9 = vrot.slane %v7570_v30, %v8502_v50  ;;  %v3945_v29 = vrot.slane %v7580_v36, %v8502_v50  ;;  %5039 = vlog2.f32 %v4169_v26  ;;  %v7823_v21 = vrot.slane %v7585_v16, %v8503_v57  ;;  %v8507_v16 = vld [vmem:[#allocation66_spill] sm:$0xff] }
 0x353   : > { %v4217_v49 = vsel %vm4212_vm12, %v3908_v51, %v4104_v55  ;;  %vm7826_vm8 = vcmp.eq.s32.totalorder %v4284_v17, 1  ;;  %v3622_v20 = vadd.f32 1.0, %v3606_v44  ;;  %v3701_v33 = vadd.f32 %v3669_v53, %v7721_v58 }
 0x354   : > { %v3607_v4 = vsub.f32 %v3265_v35, %v3575_v1  ;;  %v5034_v43 = vpop.eup %5033  ;;  %v4051_v12 = vrot.slane %v7601_v52, %v8503_v57  ;;  %vm415_vm6 = vcmp.gt.f32.partialorder %v7814_v25, 0.5  ;;  %v8508_v5 = vcombine.low %v8506_v59, %v8507_v16 }
 0x355   : > { %v2827_v48 = vrot.slane %v2813_v18, %v8476_v24  ;;  %v5036_v17 = vpop.eup %5035  ;;  %v4141_v62 = vmul.f32 0.6931472, %v5034_v43  ;;  %v3638_v58 = vmul.f32 0.5, %v3622_v20  ;;  %v4122_v42 = vmul.f32 %v7802_v46, %v3622_v20 }
 0x356   : > { %v2820_v28 = vrot.slane %v8508_v5, %v8476_v24  ;;  %v4170_v11 = vmul.f32 %v7809_v63, %v3622_v20  ;;  %v4189_v52 = vmul.f32 0.6931472, %v5036_v17  ;;  %v3811_v15 = vsub.f32 %v3701_v33, %v3749_v9 }
 0x357   : > { %v4007_v27 = vsub.f32 %v3701_v33, %v3945_v29  ;;  %v3623_v45 = vadd.f32 1.0, %v3607_v4  ;;  %v4234_v2 = vsel %vm4229_vm7, %v4217_v49, %v4141_v62  ;;  %v3670_v6 = vrot.slane %v3638_v58, 2 }
 0x358   : > { %5041 = vlog2.f32 %v4122_v42  ;;  %v2828_v14 = vcombine.low %v2820_v28, %v2827_v48  ;;  %v3909_v40 = vmul.f32 %v3847_v22, %v3811_v15  ;;  %v4288_v24 = vrot.slane %v7636_v37, %v8502_v50 }
 0x359   : > { %5043 = vlog2.f32 %v4170_v11  ;;  %v3757_v8 = vrot.slane %v7570_v30, %v8503_v57  ;;  %v3702_v0 = vadd.f32 %v3670_v6, %v3263_v23  ;;  %v4105_v18 = vmul.f32 %v4043_v3, %v4007_v27 }
 0x35a   : > { %v3639_v13 = vmul.f32 0.5, %v3623_v45  ;;  %v4123_v54 = vmul.f32 %v7823_v21, %v3623_v45  ;;  %v4251_v10 = vsel %vm4246_vm1, %v4234_v2, %v4189_v52  ;;  %v3953_v39 = vrot.slane %v7580_v36, %v8503_v57  ;;  %v8510_v2 = vld [vmem:[#allocation53_spill] sm:$0xff] }
 0x35b   : > { %v4171_v56 = vmul.f32 %v4051_v12, %v3623_v45  ;;  %v2832_v22 = vsel %vm415_vm6, %v2828_v14, -1.0  ;;  %v5038_v51 = vpop.eup %5037  ;;  %v3812_v55 = vsub.f32 %v3702_v0, %v3753_v38  ;;  %v4008_v3 = vsub.f32 %v3702_v0, %v3949_v34 }
 0x35c   : > { %v3671_v23 = vrot.slane %v3639_v13, 2  ;;  %5045 = vlog2.f32 %v4123_v54  ;;  %2834 = vst [vmem:[%s7560_s14 + $0x8] sm:$0xff] %v2832_v22  ;;  %v5040_v26 = vpop.eup %5039  ;;  %v4143_v44 = vmul.f32 0.6931472, %v5038_v51  ;;  %v4218_v1 = vsel %vm4212_vm12, %v3909_v40, %v4105_v18 }
 0x35d   : > { %5047 = vlog2.f32 %v4171_v56  ;;  %v4191_v53 = vmul.f32 0.6931472, %v5040_v26  ;;  %vm4334_vm13 = vcmp.eq.s32.totalorder %v4288_v24, 1  ;;  %v4349_v29 = vsel %vm7826_vm8, %v4251_v10, 0.0  ;;  %v5094_v26 = vld [vmem:[%s5430_s12 + $0x21] ss:$4 sm:$0xff] }
 0x35e   : > { %v3703_v9 = vadd.f32 %v3671_v23, %v3265_v35  ;;  %v3910_v30 = vmul.f32 %v7802_v46, %v3812_v55  ;;  %v4235_v36 = vsel %vm4229_vm7, %v4218_v1, %v4143_v44  ;;  %v4106_v38 = vmul.f32 %v7809_v63, %v4008_v3  ;;  %v5093_v3 = vld [vmem:[%s5430_s12 + $0x20] ss:$4 sm:$0xff] }
 0x35f   : > { %v4252_v34 = vsel %vm4246_vm1, %v4235_v36, %v4191_v53  ;;  %v4292_v43 = vrot.slane %v7636_v37, %v8468_v19  ;;  %v4296_v16 = vrot.slane %v7636_v37, %v8503_v57  ;;  %v3717_v0 = vmul.f32 0.5, %v8510_v2 }
 0x360   : > { %v3813_v49 = vsub.f32 %v3703_v9, %v3757_v8  ;;  %v4009_v20 = vsub.f32 %v3703_v9, %v3953_v39  ;;  %v4350_v33 = vsel %vm4334_vm13, %v4252_v34, 0.0  ;;  %v4219_v5 = vsel %vm4212_vm12, %v3910_v30, %v4106_v38 }
 0x361   : > { %v4379_v35 = vcombine.low %v4349_v29, %v4350_v33  ;;  %vm4335_vm5 = vcmp.eq.s32.totalorder %v4292_v43, 1  ;;  %vm4336_vm11 = vcmp.eq.s32.totalorder %v4296_v16, 1  ;;  %v7902_v44 = vadd.f32 %v5094_v26, %v3717_v0 }
 0x362   : > { %v5042_v4 = vpop.eup %5041  ;;  %v3911_v63 = vmul.f32 %v7823_v21, %v3813_v49  ;;  %v4107_v28 = vmul.f32 %v4051_v12, %v4009_v20  ;;  %v8509_v12 = vld [vmem:[#allocation52_spill] sm:$0xff] }
 0x363   : > { %v5044_v59 = vpop.eup %5043  ;;  %v4145_v41 = vmul.f32 0.6931472, %v5042_v4  ;;  %4395 = vst [vmem:[%s7778_s20 + $0x10] sm:$0xff] %v4379_v35  ;;  %5049 = vrcp.f32 %v8509_v12  ;;  %v3713_v8 = vmul.f32 0.5, %v8509_v12  ;;  %v3957_v20 = vrot.slane %v7902_v44, %v8487_v7 }
 0x364   : > { %v4193_v46 = vmul.f32 0.6931472, %v5044_v59  ;;  %v4220_v52 = vsel %vm4212_vm12, %v3911_v63, %v4107_v28  ;;  %5051 = vrcp.f32 %v8510_v2  ;;  %v3961_v35 = vrot.slane %v7902_v44, %v8490_v61 }
 0x365   : > { %v4236_v48 = vsel %vm4229_vm7, %v4219_v5, %v4145_v41  ;;  %v7899_v23 = vadd.f32 %v5093_v3, %v3713_v8 }
 0x366   : > { %v5046_v17 = vpop.eup %5045  ;;  %v4253_v62 = vsel %vm4246_vm1, %v4236_v48, %v4193_v46  ;;  %v7915_v46 = vsel %vm415_vm6, 1, %v8488_v32 }
 0x367   : > { %v5048_v58 = vpop.eup %5047  ;;  %v4147_v42 = vmul.f32 0.6931472, %v5046_v17  ;;  %v4351_v37 = vsel %vm4335_vm5, %v4253_v62, 0.0  ;;  %v3761_v49 = vrot.slane %v7899_v23, %v8487_v7  ;;  %v3765_v43 = vrot.slane %v7899_v23, %v8490_v61 }
 0x368   : > { %v4195_v11 = vmul.f32 0.6931472, %v5048_v58  ;;  %v4300_v17 = vrot.slane %v7915_v46, %v8487_v7 }
 0x369   : > { %v4237_v15 = vsel %vm4229_vm7, %v4220_v52, %v4147_v42 }
 0x36a   : > { %v4254_v27 = vsel %vm4246_vm1, %v4237_v15, %v4195_v11  ;;  %v4304_v11 = vrot.slane %v7915_v46, %v8490_v61  ;;  %vm4337_vm14 = vcmp.eq.s32.totalorder %v4300_v17, 1  ;;  %v4308_v17 = vrot.slane %v7915_v46, %v8489_v31 }
 0x36b   : > { %v4352_v21 = vsel %vm4336_vm11, %v4254_v27, 0.0 }
 0x36c   : > { %v4380_v45 = vcombine.low %v4351_v37, %v4352_v21  ;;  %vm4338_vm0 = vcmp.eq.s32.totalorder %v4304_v11, 1  ;;  %v4312_v11 = vrot.slane %v7915_v46, %v8492_v47  ;;  %vm4339_vm15 = vcmp.eq.s32.totalorder %v4308_v17, 1 }
 0x36d   : > { %v7884_v6 = vpop.eup %5049 }
 0x36e   : > { %4396 = vst [vmem:[%s7778_s20 + $0x18] sm:$0xff] %v4380_v45  ;;  %v7886_v14 = vpop.eup %5051  ;;  %v3859_v10 = vrot.slane %v7884_v6, %v8487_v7  ;;  %v3863_v22 = vrot.slane %v7884_v6, %v8490_v61  ;;  %vm4340_vm10 = vcmp.eq.s32.totalorder %v4312_v11, 1 }
 0x36f   : > { %v4055_v39 = vrot.slane %v7886_v14, %v8487_v7  ;;  %v4059_v51 = vrot.slane %v7886_v14, %v8490_v61  ;;  %v4067_v3 = vrot.slane %v7886_v14, %v8492_v47 }
 0x394   : > { %v3334_v40 = vpop.f32.mrb[4].mxu0 }
 0x395   : > { %v3576_v24 = vrot.slane %v3334_v40, 6  ;;  %v3336_v18 = vpop.f32.mrb[5].mxu0 }
 0x396   : > { %v3577_v13 = vrot.slane %v3336_v18, 6 }
 0x397   : > { %v3608_v54 = vsub.f32 %v3334_v40, %v3576_v24 }
 0x398   : > { %v3609_v56 = vsub.f32 %v3336_v18, %v3577_v13 }
 0x399   : > { %v3624_v55 = vadd.f32 1.0, %v3608_v54 }
 0x39a   : > { %v3625_v53 = vadd.f32 1.0, %v3609_v56  ;;  %v3867_v56 = vrot.slane %v7884_v6, %v8489_v31 }
 0x39b   : > { %v3640_v1 = vmul.f32 0.5, %v3624_v55  ;;  %v4124_v9 = vmul.f32 %v3859_v10, %v3624_v55  ;;  %v4172_v29 = vmul.f32 %v4055_v39, %v3624_v55  ;;  %v3871_v55 = vrot.slane %v7884_v6, %v8492_v47 }
 0x39c   : > { %v3641_v30 = vmul.f32 0.5, %v3625_v53  ;;  %v4125_v36 = vmul.f32 %v3863_v22, %v3625_v53  ;;  %v4173_v38 = vmul.f32 %v4059_v51, %v3625_v53 }
 0x39d   : > { %v3672_v34 = vrot.slane %v3640_v1, 2  ;;  %5053 = vlog2.f32 %v4124_v9 }
 0x39e   : > { %5055 = vlog2.f32 %v4172_v29  ;;  %v3673_v33 = vrot.slane %v3641_v30, 2 }
 0x39f   : > { %v3704_v4 = vadd.f32 %v3672_v34, %v3334_v40  ;;  %5057 = vlog2.f32 %v4125_v36 }
 0x3a0   : > { %v3705_v59 = vadd.f32 %v3673_v33, %v3336_v18  ;;  %5059 = vlog2.f32 %v4173_v38 }
 0x3a1   : > { %v3814_v41 = vsub.f32 %v3704_v4, %v3761_v49  ;;  %v4010_v16 = vsub.f32 %v3704_v4, %v3957_v20  ;;  %v3769_v49 = vrot.slane %v7899_v23, %v8489_v31  ;;  %v3965_v20 = vrot.slane %v7902_v44, %v8489_v31 }
 0x3a2   : > { %v3815_v5 = vsub.f32 %v3705_v59, %v3765_v43  ;;  %v4011_v63 = vsub.f32 %v3705_v59, %v3961_v35  ;;  %v3773_v43 = vrot.slane %v7899_v23, %v8492_v47  ;;  %v3969_v35 = vrot.slane %v7902_v44, %v8492_v47 }
 0x3a3   : > { %v3912_v28 = vmul.f32 %v3859_v10, %v3814_v41  ;;  %v4108_v48 = vmul.f32 %v4055_v39, %v4010_v16 }
 0x3a4   : > { %v3913_v58 = vmul.f32 %v3863_v22, %v3815_v5  ;;  %v4109_v42 = vmul.f32 %v4059_v51, %v4011_v63  ;;  %v4063_v22 = vrot.slane %v7886_v14, %v8489_v31 }
 0x3a5   : > { %v4221_v32 = vsel %vm4212_vm12, %v3912_v28, %v4108_v48 }
 0x3a6   : > { %v4222_v2 = vsel %vm4212_vm12, %v3913_v58, %v4109_v42 }
 0x3a7   : > { %v5054_v62 = vpop.eup %5053 }
 0x3a8   : > { %v5056_v52 = vpop.eup %5055  ;;  %v4149_v37 = vmul.f32 0.6931472, %v5054_v62 }
 0x3a9   : > { %v5058_v15 = vpop.eup %5057  ;;  %v4197_v27 = vmul.f32 0.6931472, %v5056_v52 }
 0x3aa   : > { %v5060_v25 = vpop.eup %5059  ;;  %v4238_v21 = vsel %vm4229_vm7, %v4221_v32, %v4149_v37  ;;  %v4151_v45 = vmul.f32 0.6931472, %v5058_v15 }
 0x3ab   : > { %v4255_v12 = vsel %vm4246_vm1, %v4238_v21, %v4197_v27  ;;  %v4199_v7 = vmul.f32 0.6931472, %v5060_v25 }
 0x3ac   : > { %v4353_v40 = vsel %vm4337_vm14, %v4255_v12, 0.0  ;;  %v4239_v61 = vsel %vm4229_vm7, %v4222_v2, %v4151_v45 }
 0x3ad   : > { %v4256_v24 = vsel %vm4246_vm1, %v4239_v61, %v4199_v7 }
 0x3ae   : > { %v3405_v8 = vpop.f32.mrb[4].mxu1  ;;  %v4354_v0 = vsel %vm4338_vm0, %v4256_v24, 0.0 }
 0x3af   : > { %v3578_v18 = vrot.slane %v3405_v8, 6  ;;  %v4381_v13 = vcombine.low %v4353_v40, %v4354_v0  ;;  %v3407_v54 = vpop.f32.mrb[5].mxu1 }
 0x3b0   : > { %v3579_v10 = vrot.slane %v3407_v54, 6 }
 0x3b1   : > { %v3610_v39 = vsub.f32 %v3405_v8, %v3578_v18  ;;  %4397 = vst [vmem:[%s7778_s20 + $0x20] sm:$0xff] %v4381_v13 }
 0x3b2   : > { %v3611_v51 = vsub.f32 %v3407_v54, %v3579_v10  ;;  %v3875_v10 = vrot.slane %v7884_v6, %v8464_v60 }
 0x3b3   : > { %v3626_v26 = vadd.f32 1.0, %v3610_v39  ;;  %v4071_v39 = vrot.slane %v7886_v14, %v8464_v60 }
 0x3b4   : > { %v3627_v53 = vadd.f32 1.0, %v3611_v51  ;;  %v4075_v51 = vrot.slane %v7886_v14, %v8502_v50 }
 0x3b5   : > { %v3642_v1 = vmul.f32 0.5, %v3626_v26  ;;  %v4126_v9 = vmul.f32 %v3867_v56, %v3626_v26  ;;  %v4174_v29 = vmul.f32 %v4063_v22, %v3626_v26 }
 0x3b6   : > { %v3643_v30 = vmul.f32 0.5, %v3627_v53  ;;  %v4127_v36 = vmul.f32 %v3871_v55, %v3627_v53  ;;  %v4175_v38 = vmul.f32 %v4067_v3, %v3627_v53 }
 0x3b7   : > { %v3674_v34 = vrot.slane %v3642_v1, 2  ;;  %5061 = vlog2.f32 %v4126_v9 }
 0x3b8   : > { %5063 = vlog2.f32 %v4174_v29  ;;  %v3675_v33 = vrot.slane %v3643_v30, 2 }
 0x3b9   : > { %v3706_v4 = vadd.f32 %v3674_v34, %v3405_v8  ;;  %5065 = vlog2.f32 %v4127_v36  ;;  %v3973_v34 = vrot.slane %v7902_v44, %v8464_v60 }
 0x3ba   : > { %v3707_v59 = vadd.f32 %v3675_v33, %v3407_v54  ;;  %5067 = vlog2.f32 %v4175_v38  ;;  %v3777_v38 = vrot.slane %v7899_v23, %v8464_v60  ;;  %v3781_v33 = vrot.slane %v7899_v23, %v8502_v50 }
 0x3bb   : > { %v3816_v41 = vsub.f32 %v3706_v4, %v3769_v49  ;;  %v4012_v16 = vsub.f32 %v3706_v4, %v3965_v20  ;;  %v3977_v4 = vrot.slane %v7902_v44, %v8502_v50 }
 0x3bc   : > { %v3817_v5 = vsub.f32 %v3707_v59, %v3773_v43  ;;  %v4013_v63 = vsub.f32 %v3707_v59, %v3969_v35 }
 0x3bd   : > { %v3914_v28 = vmul.f32 %v3867_v56, %v3816_v41  ;;  %v4110_v48 = vmul.f32 %v4063_v22, %v4012_v16  ;;  %v3879_v22 = vrot.slane %v7884_v6, %v8502_v50 }
 0x3be   : > { %v3915_v58 = vmul.f32 %v3871_v55, %v3817_v5  ;;  %v4111_v42 = vmul.f32 %v4067_v3, %v4013_v63 }
 0x3bf   : > { %v4223_v32 = vsel %vm4212_vm12, %v3914_v28, %v4110_v48  ;;  %v4316_v28 = vrot.slane %v7915_v46, %v8464_v60 }
 0x3c0   : > { %v4224_v7 = vsel %vm4212_vm12, %v3915_v58, %v4111_v42  ;;  %v4320_v58 = vrot.slane %v7915_v46, %v8502_v50 }
 0x3c1   : > { %v5062_v62 = vpop.eup %5061  ;;  %vm4341_vm2 = vcmp.eq.s32.totalorder %v4316_v28, 1 }
 0x3c2   : > { %v5064_v52 = vpop.eup %5063  ;;  %v4153_v37 = vmul.f32 0.6931472, %v5062_v62  ;;  %vm4342_vm3 = vcmp.eq.s32.totalorder %v4320_v58, 1 }
 0x3c3   : > { %v5066_v15 = vpop.eup %5065  ;;  %v4201_v27 = vmul.f32 0.6931472, %v5064_v52 }
 0x3c4   : > { %v5068_v25 = vpop.eup %5067  ;;  %v4240_v21 = vsel %vm4229_vm7, %v4223_v32, %v4153_v37  ;;  %v4155_v45 = vmul.f32 0.6931472, %v5066_v15 }
 0x3c5   : > { %v4257_v31 = vsel %vm4246_vm1, %v4240_v21, %v4201_v27  ;;  %v4203_v12 = vmul.f32 0.6931472, %v5068_v25 }
 0x3c6   : > { %v4355_v2 = vsel %vm4339_vm15, %v4257_v31, 0.0  ;;  %v4241_v47 = vsel %vm4229_vm7, %v4224_v7, %v4155_v45 }
 0x3c7   : > { %v4258_v40 = vsel %vm4246_vm1, %v4241_v47, %v4203_v12 }
 0x3c8   : > { %v4356_v61 = vsel %vm4340_vm10, %v4258_v40, 0.0 }
 0x3c9   : > { %v4382_v24 = vcombine.low %v4355_v2, %v4356_v61 }
 0x3cb   : > { %4398 = vst [vmem:[%s7778_s20 + $0x28] sm:$0xff] %v4382_v24 }
 0x401   : > { %v3476_v8 = vpop.f32.mrb[6].mxu0 }
 0x402   : > { %v3580_v0 = vrot.slane %v3476_v8, 6  ;;  %v3478_v18 = vpop.f32.mrb[7].mxu0 }
 0x403   : > { %v3581_v13 = vrot.slane %v3478_v18, 6 }
 0x404   : > { %v3612_v54 = vsub.f32 %v3476_v8, %v3580_v0  ;;  %v3883_v0 = vrot.slane %v7884_v6, %v8468_v19 }
 0x405   : > { %v3613_v56 = vsub.f32 %v3478_v18, %v3581_v13 }
 0x406   : > { %v3628_v55 = vadd.f32 1.0, %v3612_v54  ;;  %v3887_v54 = vrot.slane %v7884_v6, %v8503_v57 }
 0x407   : > { %v3629_v3 = vadd.f32 1.0, %v3613_v56 }
 0x408   : > { %v3644_v26 = vmul.f32 0.5, %v3628_v55  ;;  %v4128_v53 = vmul.f32 %v3875_v10, %v3628_v55  ;;  %v4176_v1 = vmul.f32 %v4071_v39, %v3628_v55 }
 0x409   : > { %v3645_v9 = vmul.f32 0.5, %v3629_v3  ;;  %v4129_v29 = vmul.f32 %v3879_v22, %v3629_v3  ;;  %v4177_v30 = vmul.f32 %v4075_v51, %v3629_v3 }
 0x40a   : > { %v3676_v36 = vrot.slane %v3644_v26, 2  ;;  %5069 = vlog2.f32 %v4128_v53 }
 0x40b   : > { %5071 = vlog2.f32 %v4176_v1  ;;  %v3677_v49 = vrot.slane %v3645_v9, 2  ;;  %v3785_v9 = vrot.slane %v7899_v23, %v8468_v19 }
 0x40c   : > { %v3708_v20 = vadd.f32 %v3676_v36, %v3476_v8  ;;  %5073 = vlog2.f32 %v4129_v29  ;;  %v3981_v29 = vrot.slane %v7902_v44, %v8468_v19  ;;  %v3985_v36 = vrot.slane %v7902_v44, %v8503_v57 }
 0x40d   : > { %v3709_v43 = vadd.f32 %v3677_v49, %v3478_v18  ;;  %5075 = vlog2.f32 %v4177_v30  ;;  %v4079_v18 = vrot.slane %v7886_v14, %v8468_v19 }
 0x40e   : > { %v3818_v35 = vsub.f32 %v3708_v20, %v3777_v38  ;;  %v4014_v59 = vsub.f32 %v3708_v20, %v3973_v34 }
 0x40f   : > { %v3819_v41 = vsub.f32 %v3709_v43, %v3781_v33  ;;  %v4015_v16 = vsub.f32 %v3709_v43, %v3977_v4 }
 0x410   : > { %v3916_v5 = vmul.f32 %v3875_v10, %v3818_v35  ;;  %v4112_v63 = vmul.f32 %v4071_v39, %v4014_v59  ;;  %v4083_v10 = vrot.slane %v7886_v14, %v8503_v57  ;;  %v3789_v14 = vrot.slane %v7899_v23, %v8503_v57 }
 0x411   : > { %v3917_v17 = vmul.f32 %v3879_v22, %v3819_v41  ;;  %v4113_v62 = vmul.f32 %v4075_v51, %v4015_v16  ;;  %v4324_v35 = vrot.slane %v7915_v46, %v8468_v19  ;;  %v4328_v23 = vrot.slane %v7915_v46, %v8503_v57 }
 0x412   : > { %v4225_v15 = vsel %vm4212_vm12, %v3916_v5, %v4112_v63 }
 0x413   : > { %v4226_v45 = vsel %vm4212_vm12, %v3917_v17, %v4113_v62  ;;  %vm4343_vm4 = vcmp.eq.s32.totalorder %v4324_v35, 1  ;;  %vm4344_vm9 = vcmp.eq.s32.totalorder %v4328_v23, 1 }
 0x414   : > { %v5070_v48 = vpop.eup %5069 }
 0x415   : > { %v5072_v42 = vpop.eup %5071  ;;  %v4157_v11 = vmul.f32 0.6931472, %v5070_v48 }
 0x416   : > { %v5074_v52 = vpop.eup %5073  ;;  %v4205_v37 = vmul.f32 0.6931472, %v5072_v42 }
 0x417   : > { %v5076_v27 = vpop.eup %5075  ;;  %v4242_v32 = vsel %vm4229_vm7, %v4225_v15, %v4157_v11  ;;  %v4159_v25 = vmul.f32 0.6931472, %v5074_v52 }
 0x418   : > { %v4259_v21 = vsel %vm4246_vm1, %v4242_v32, %v4205_v37  ;;  %v4207_v60 = vmul.f32 0.6931472, %v5076_v27 }
 0x419   : > { %v4357_v31 = vsel %vm4341_vm2, %v4259_v21, 0.0  ;;  %v4243_v50 = vsel %vm4229_vm7, %v4226_v45, %v4159_v25 }
 0x41a   : > { %v3547_v12 = vpop.f32.mrb[6].mxu1  ;;  %v4260_v7 = vsel %vm4246_vm1, %v4243_v50, %v4207_v60 }
 0x41b   : > { %v3582_v2 = vrot.slane %v3547_v12, 6  ;;  %v4358_v47 = vsel %vm4342_vm3, %v4260_v7, 0.0  ;;  %v3549_v40 = vpop.f32.mrb[7].mxu1 }
 0x41c   : > { %v4383_v61 = vcombine.low %v4357_v31, %v4358_v47  ;;  %v3583_v24 = vrot.slane %v3549_v40, 6 }
 0x41d   : > { %v3614_v8 = vsub.f32 %v3547_v12, %v3582_v2 }
 0x41e   : > { %4399 = vst [vmem:[%s7778_s20 + $0x30] sm:$0xff] %v4383_v61  ;;  %v3615_v13 = vsub.f32 %v3549_v40, %v3583_v24 }
 0x41f   : > { %v3630_v39 = vadd.f32 1.0, %v3614_v8 }
 0x420   : > { %v3631_v56 = vadd.f32 1.0, %v3615_v13 }
 0x421   : > { %v3646_v22 = vmul.f32 0.5, %v3630_v39  ;;  %v4130_v51 = vmul.f32 %v3883_v0, %v3630_v39  ;;  %v4178_v55 = vmul.f32 %v4079_v18, %v3630_v39 }
 0x422   : > { %v3647_v3 = vmul.f32 0.5, %v3631_v56  ;;  %v4131_v26 = vmul.f32 %v3887_v54, %v3631_v56  ;;  %v4179_v53 = vmul.f32 %v4083_v10, %v3631_v56 }
 0x423   : > { %v3678_v1 = vrot.slane %v3646_v22, 2  ;;  %5077 = vlog2.f32 %v4130_v51 }
 0x424   : > { %5079 = vlog2.f32 %v4178_v55  ;;  %v3679_v6 = vrot.slane %v3647_v3, 2 }
 0x425   : > { %v3710_v30 = vadd.f32 %v3678_v1, %v3547_v12  ;;  %5081 = vlog2.f32 %v4131_v26 }
 0x426   : > { %v3711_v38 = vadd.f32 %v3679_v6, %v3549_v40  ;;  %5083 = vlog2.f32 %v4179_v53 }
 0x427   : > { %v3820_v34 = vsub.f32 %v3710_v30, %v3785_v9  ;;  %v4016_v49 = vsub.f32 %v3710_v30, %v3981_v29 }
 0x428   : > { %v3821_v20 = vsub.f32 %v3711_v38, %v3789_v14  ;;  %v4017_v33 = vsub.f32 %v3711_v38, %v3985_v36 }
 0x429   : > { %v3918_v4 = vmul.f32 %v3883_v0, %v3820_v34  ;;  %v4114_v43 = vmul.f32 %v4079_v18, %v4016_v49 }
 0x42a   : > { %v3919_v41 = vmul.f32 %v3887_v54, %v3821_v20  ;;  %v4115_v16 = vmul.f32 %v4083_v10, %v4017_v33 }
 0x42b   : > { %v4227_v48 = vsel %vm4212_vm12, %v3918_v4, %v4114_v43 }
 0x42c   : > { %v4228_v11 = vsel %vm4212_vm12, %v3919_v41, %v4115_v16 }
 0x42d   : > { %v5078_v59 = vpop.eup %5077 }
 0x42e   : > { %v5080_v5 = vpop.eup %5079  ;;  %v4161_v44 = vmul.f32 0.6931472, %v5078_v59 }
 0x42f   : > { %v5082_v63 = vpop.eup %5081  ;;  %v4209_v28 = vmul.f32 0.6931472, %v5080_v5 }
 0x430   : > { %v5084_v17 = vpop.eup %5083  ;;  %v4244_v62 = vsel %vm4229_vm7, %v4227_v48, %v4161_v44  ;;  %v4163_v58 = vmul.f32 0.6931472, %v5082_v63 }
 0x431   : > { %v4261_v19 = vsel %vm4246_vm1, %v4244_v62, %v4209_v28  ;;  %v4211_v42 = vmul.f32 0.6931472, %v5084_v17 }
 0x432   : > { %v4359_v52 = vsel %vm4343_vm4, %v4261_v19, 0.0  ;;  %v4245_v57 = vsel %vm4229_vm7, %v4228_v11, %v4163_v58 }
 0x433   : > { %v4262_v46 = vsel %vm4246_vm1, %v4245_v57, %v4211_v42 }
 0x434   : > { %v4360_v37 = vsel %vm4344_vm9, %v4262_v46, 0.0 }
 0x435   : > { %v4384_v15 = vcombine.low %v4359_v52, %v4360_v37 }
 0x437   : > { %4400 = vst [vmem:[%s7778_s20 + $0x38] sm:$0xff] %v4384_v15 }
 0x438 PF: > { %s23_s28 = sadd.s32 1, %s5225_s28   ;;  %s8511_s21 = smov %s5201_s22 }
 0x439   : > { %p20_p7 = scmp.ge.s32.totalorder %s23_s28, 6   ;;  %s8512_s22 = smov %s5205_s23 }
 0x43a   : > { %s8513_s23 = smov %s5333_s11  ;;  %s8514_s24 = smov %s5217_s26 }
 0x43b   : > { %s8515_s25 = smov %s5221_s27  ;;  %s8516_s26 = smov %s8519_s30 }
 0x43c   : > { %s8517_s27 = smov %s8523_s7  ;;  %22 = sbr.rel (!%p20_p7) target bundleno = 9 (0x9), region = 121 }
 0x443   :  { %4454 = vsyncpa [#allocation3], 1 }
 0x444   :  { %4456 = vsyncpa [#allocation3 + $0x1], 1 }
 0x445   :  { %4457 = vsyncpa [#allocation5], 1 }
 0x446   :  { %4459 = vsyncpa [#allocation5 + $0x1], 1 }

</bundles_post_ra>
